<compile_context>
chip_gen: v7x
topology: tpu7x:2x2x1
jax: 0.10.0
libtpu: 0.0.40
codegen_flags: <defaults>
</compile_context>

<pallas_src>
import functools
import numpy as np

import jax
import jax.numpy as jnp
from jax.experimental import pallas as pl
from jax.experimental.pallas import tpu as pltpu


# ----------------------------- kernel helpers -----------------------------

def _mxu(a, b, contract):
    """MXU matmul (bf16 inputs, no-op cast if already bf16) with f32 accumulation."""
    return jax.lax.dot_general(
        a.astype(jnp.bfloat16), b.astype(jnp.bfloat16),
        dimension_numbers=(contract, ((), ())),
        preferred_element_type=jnp.float32)


def _layernorm(x, gamma, beta, eps=1e-5):
    # mean and E[x^2] in one pass (single lane-reduction chain).
    mu = jnp.mean(x, axis=-1, keepdims=True)
    ms = jnp.mean(x * x, axis=-1, keepdims=True)
    var = ms - mu * mu
    return (x - mu) * jax.lax.rsqrt(var + eps) * gamma + beta


def _mha(x_q, x_kv, layer, nb, sq, skv, num_heads,
         wqkv_ref, wo_ref, bqkv_ref, bo, bias=None):
    """Multi-head attention over nb batch elements packed along rows.

    x_q: (nb*sq, C) bf16, x_kv: (nb*skv, C) bf16.
    Weights are pre-split per head ((C, Dh) and (Dh, C) ref slices) so no
    activation-lane slicing is needed; the softmax scale is already folded into
    Wq/bq; head outputs accumulate straight through Wo rows (no concat).
    Dropout is identity at inference.
    """
    base = 3 * layer
    qs, ks, vs = [], [], []
    for h in range(num_heads):                      # static unroll, num_heads small
        qs.append((_mxu(x_q, wqkv_ref[base + 0, h], ((1,), (0,)))
                   + bqkv_ref[base + 0, h]).astype(jnp.bfloat16))
        ks.append((_mxu(x_kv, wqkv_ref[base + 1, h], ((1,), (0,)))
                   + bqkv_ref[base + 1, h]).astype(jnp.bfloat16))
        vs.append((_mxu(x_kv, wqkv_ref[base + 2, h], ((1,), (0,)))
                   + bqkv_ref[base + 2, h]).astype(jnp.bfloat16))

    outs = []
    for n in range(nb):                             # static unroll, nb small
        o_n = None
        for h in range(num_heads):
            q_n = qs[h][n * sq:(n + 1) * sq]        # sublane-aligned row slices
            k_n = ks[h][n * skv:(n + 1) * skv]
            v_n = vs[h][n * skv:(n + 1) * skv]
            s = _mxu(q_n, k_n, ((1,), (1,)))        # (sq, skv) f32
            if bias is not None:
                s = s + bias[n]
            s = s - jnp.max(s, axis=-1, keepdims=True)
            p = jnp.exp(s)
            p = p * pl.reciprocal(jnp.sum(p, axis=-1, keepdims=True), approx=True)
            ctx = _mxu(p, v_n, ((1,), (0,)))        # (sq, Dh)
            c = _mxu(ctx, wo_ref[layer, h], ((1,), (0,)))   # (sq, C)
            o_n = c if o_n is None else o_n + c
        outs.append(o_n + bo)
    return outs[0] if nb == 1 else jnp.concatenate(outs, axis=0)


def _decoder_kernel(num_heads, nb, s_tok, n_agents, emit_mask,
                    x_ref, agent_ref, maskf_ref,
                    wqkv_ref, wo_ref, bqkv_ref, vec_ref, r_ref,
                    out_ref, *mask_ref):
    C = x_ref.shape[1]

    # --- fused bilinear downsample + NCHW -> tokens: (nb*S, C) ---
    # TODO(synk): replace the kron'd (S, HW) resample matrices with separable
    # row/col matmuls for large BEV grids (VMEM limit on v7x); at these shapes
    # the kron keeps every product a plain 2-D MXU matmul.
    D = r_ref[0]                                    # (S, HW) bf16 downsample matrix
    toks = [_mxu(D, x_ref[n], ((1,), (1,))) for n in range(nb)]     # each (S, C) f32
    x_tok = toks[0] if nb == 1 else jnp.concatenate(toks, axis=0)   # (nb*S, C) f32
    x_tok_bf = x_tok.astype(jnp.bfloat16)

    # --- self attention + AddNorm1 (dropout identity at inference) ---
    out1 = _mha(x_tok_bf, x_tok_bf, 0, nb, s_tok, s_tok, num_heads,
                wqkv_ref, wo_ref, bqkv_ref, vec_ref[0, 0])
    out2 = _layernorm(x_tok + out1, vec_ref[0, 1], vec_ref[0, 2])
    out2_bf = out2.astype(jnp.bfloat16)

    # --- learned attention mask: out2 @ mask_features^T, batched over nb ---
    # padded agents were zeroed in mask_features, so masked_fill(..., 0.0) holds.
    out2_3 = out2_bf.reshape(nb, s_tok, C)
    maskf = maskf_ref[...]                          # (nb, A, C) bf16
    mask_sa = jax.lax.dot_general(                  # (nb, S, A) f32
        out2_3, maskf,
        dimension_numbers=(((2,), (2,)), ((0,), (0,))),
        preferred_element_type=jnp.float32)

    # --- cross attention (mask as additive logit bias) + AddNorm2 ---
    # TODO(synk): MultiHeadedAttention source not provided; attention_mask is
    # assumed to be an additive bias on every head's pre-softmax logits.
    agent = agent_ref[...].reshape(nb * n_agents, C)                # bf16
    out3 = _mha(out2_bf, agent, 1, nb, s_tok, n_agents, num_heads,
                wqkv_ref, wo_ref, bqkv_ref, vec_ref[1, 0], bias=mask_sa)
    out4 = _layernorm(out2 + out3, vec_ref[1, 1], vec_ref[1, 2])
    out4_bf = out4.astype(jnp.bfloat16)

    # --- tokens -> NCHW + bilinear upsample x2 + residual add ---
    U_T = r_ref[1]                                  # (S, HW) bf16 upsample matrix^T
    for n in range(nb):
        up = _mxu(out4_bf[n * s_tok:(n + 1) * s_tok], U_T, ((0,), (0,)))  # (C, HW)
        out_ref[n] = up + x_ref[n]

    if emit_mask:
        # Emit (nb, A, S): lane-dense and only a free reshape away from
        # (N, A, Hs, Ws) in the wrapper.
        mask_ref[0][...] = jax.lax.dot_general(
            maskf, out2_3,
            dimension_numbers=(((2,), (2,)), ((0,), (0,))),
            preferred_element_type=jnp.float32)


# --------------------------- JAX glue / wrapper ----------------------------

def _bilinear_matrix(out_size, in_size):
    """1-D interp matrix matching PyTorch bilinear resize, align_corners=False."""
    scale = in_size / out_size
    M = np.zeros((out_size, in_size), dtype=np.float32)
    for i in range(out_size):
        src = max((i + 0.5) * scale - 0.5, 0.0)
        x0 = min(int(np.floor(src)), in_size - 1)
        lam = src - x0
        x1 = min(x0 + 1, in_size - 1)
        M[i, x0] += 1.0 - lam
        M[i, x1] += lam
    return M


def _pick_batch_block(batch, channels, target_rows=256):
    """Largest per-step batch block Nb s.t. Nb | N, Nb*C <= target_rows, and the
    grid keeps >= 2 steps when N >= 2 (so v7x can shard across both TCs).
    For v5e a target_rows of 128 is enough (128x128 MXU, single vst slot)."""
    best = 1
    for nb in range(1, batch + 1):
        if batch % nb:
            continue
        if nb * channels > max(target_rows, channels):
            continue
        if batch >= 2 and batch // nb < 2:
            continue
        best = nb
    return best


@functools.partial(jax.jit,
                   static_argnames=("num_heads", "op_attn_scale", "return_attn_mask"))
def occformer_decoder_layer(dense_features, agent_features, mask_features, params,
                            num_heads, op_attn_scale=2, return_attn_mask=False,
                            pad_mask=None):
    N, C, H, W = dense_features.shape
    Hs, Ws = H // op_attn_scale, W // op_attn_scale
    S, HW = Hs * Ws, H * W
    A = agent_features.shape[1]
    Dh = C // num_heads
    scale = 1.0 / float(np.sqrt(Dh))

    # Channel-major flatten is a free reshape of NCHW (no transpose / HBM pass).
    # Kept f32 so the final residual add stays full precision.
    x_flat = dense_features.reshape(N, C, HW)

    # Fold the agent padding mask into mask_features (== masked_fill(mask, 0.0));
    # matmul-only inputs are pre-cast to bf16 so no per-step casts remain.
    if pad_mask is not None:
        mask_features = mask_features * pad_mask.astype(mask_features.dtype)[:, :, None]
    maskf_bf = mask_features.astype(jnp.bfloat16)
    agent_bf = agent_features.astype(jnp.bfloat16)

    # --- pack weights: per-head split, softmax scale folded into Wq/bq, bf16 ---
    Wp, Bp = params['W'], params['B']                       # (2,4,C,C), (2,6,C)
    wq = Wp[:, 0] * scale
    wqkv = jnp.stack([wq, Wp[:, 1], Wp[:, 2]], axis=1)      # (2, 3, C, C)
    wqkv = wqkv.reshape(2, 3, C, num_heads, Dh).transpose(0, 1, 3, 2, 4)
    wqkv = wqkv.reshape(2 * 3, num_heads, C, Dh).astype(jnp.bfloat16)   # (6,H,C,Dh)
    wo = Wp[:, 3].reshape(2, num_heads, Dh, C).astype(jnp.bfloat16)     # (2,H,Dh,C)
    bq = Bp[:, 0] * scale
    bqkv = jnp.stack([bq, Bp[:, 1], Bp[:, 2]], axis=1).reshape(2 * 3, num_heads, Dh)
    vecs = Bp[:, 3:6]                                       # (2, 3, C): bo, gamma, beta

    # Bilinear down/up-sample as kron'd matrices (jit-folded constants; the
    # scale-2 interpolation weights are exactly representable in bf16).
    D_mat = np.kron(_bilinear_matrix(Hs, H), _bilinear_matrix(Ws, W))   # (S, HW)
    U_T = np.kron(_bilinear_matrix(H, Hs), _bilinear_matrix(W, Ws)).T   # (S, HW)
    resample = jnp.asarray(np.stack([D_mat, U_T]), dtype=jnp.bfloat16)

    # Batch block per grid step: fills the MXU M dim and amortizes step overhead
    # while keeping >= 2 grid steps for v7x's two TensorCores.
    Nb = _pick_batch_block(N, C)
    grid = (N // Nb,)

    out_shapes = [jax.ShapeDtypeStruct((N, C, HW), jnp.float32)]
    out_specs = [pl.BlockSpec((Nb, C, HW), lambda b: (b, 0, 0))]
    if return_attn_mask:
        out_shapes.append(jax.ShapeDtypeStruct((N, A, S), jnp.float32))
        out_specs.append(pl.BlockSpec((Nb, A, S), lambda b: (b, 0, 0)))

    kernel = functools.partial(_decoder_kernel, num_heads, Nb, S, A,
                               return_attn_mask)
    outs = pl.pallas_call(
        kernel,
        out_shape=tuple(out_shapes),
        grid_spec=pltpu.PrefetchScalarGridSpec(
            num_scalar_prefetch=0,
            grid=grid,
            in_specs=[
                pl.BlockSpec((Nb, C, HW), lambda b: (b, 0, 0)),      # dense feats f32
                pl.BlockSpec((Nb, A, C), lambda b: (b, 0, 0)),       # agent feats bf16
                pl.BlockSpec((Nb, A, C), lambda b: (b, 0, 0)),       # mask feats bf16
                pl.BlockSpec((6, num_heads, C, Dh), lambda b: (0, 0, 0, 0)),  # Wq/Wk/Wv
                pl.BlockSpec((2, num_heads, Dh, C), lambda b: (0, 0, 0, 0)),  # Wo
                pl.BlockSpec((6, num_heads, Dh), lambda b: (0, 0, 0)),        # bq/bk/bv
                pl.BlockSpec((2, 3, C), lambda b: (0, 0, 0)),                 # bo, LN g/b
                pl.BlockSpec((2, S, HW), lambda b: (0, 0, 0)),                # resample
            ],
            out_specs=tuple(out_specs)),
        compiler_params=pltpu.CompilerParams(
            dimension_semantics=("parallel",)),
    )(x_flat, agent_bf, maskf_bf, wqkv, wo, bqkv, vecs, resample)

    out5 = outs[0].reshape(N, C, H, W)
    attn_mask = outs[1].reshape(N, A, Hs, Ws) if return_attn_mask else None
    return out5, attn_mask


def init_params(key, embed_dim):
    k0, k1, k2, k3 = jax.random.split(key, 4)
    W1 = jax.random.normal(k0, (4, embed_dim, embed_dim), jnp.float32) * 0.05
    b1 = jax.random.normal(k1, (4, embed_dim), jnp.float32) * 0.01
    W2 = jax.random.normal(k2, (4, embed_dim, embed_dim), jnp.float32) * 0.05
    b2 = jax.random.normal(k3, (4, embed_dim), jnp.float32) * 0.01
    ln = jnp.stack([jnp.ones((embed_dim,), jnp.float32),      # gamma
                    jnp.zeros((embed_dim,), jnp.float32)])    # beta
    # Natural layouts; the wrapper folds the softmax scale, splits heads and
    # casts to bf16 at pack time:
    #   W: (2, 4, C, C) = [layer][Wq, Wk, Wv, Wo]
    #   B: (2, 6, C)    = [layer][bq, bk, bv, bo, ln_gamma, ln_beta]
    W = jnp.stack([W1, W2])
    B = jnp.stack([jnp.concatenate([b1, ln], axis=0),
                   jnp.concatenate([b2, ln], axis=0)])
    return dict(W=W, B=B)


# ----------------------------------- main ----------------------------------

if __name__ == "__main__":
    key = jax.random.PRNGKey(0)
    kd, ka, km, kp = jax.random.split(key, 4)

    N, C, H, W = 4, 32, 16, 16          # (batch, embed_dim, H_bev/s, W_bev/s)
    num_heads = 4
    num_agents = 8
    op_attn_scale = 2

    dense_features = jax.random.normal(kd, (N, C, H, W), jnp.float32)
    agent_features = jax.random.normal(ka, (N, num_agents, C), jnp.float32)
    mask_features = jax.random.normal(km, (N, num_agents, C), jnp.float32)
    params = init_params(kp, C)

    out5, attn_mask = occformer_decoder_layer(
        dense_features, agent_features, mask_features, params,
        num_heads=num_heads, op_attn_scale=op_attn_scale,
        return_attn_mask=True, pad_mask=None)

    jax.block_until_ready(out5)
    jax.block_until_ready(attn_mask)
    assert out5.shape == (N, C, H, W)
    assert attn_mask.shape == (N, num_agents, H // op_attn_scale, W // op_attn_scale)
    assert bool(jnp.isfinite(out5).all())
    assert bool(jnp.isfinite(attn_mask).all())
    print("KERNEL_OK")
</pallas_src>

<mosaic_0001>
module attributes {stable_mosaic.version = 11 : i64} {
  func.func @_decoder_kernel(%arg0: i32, %arg1: memref<2x32x256xf32, #tpu.memory_space<vmem>>, %arg2: memref<2x8x32xbf16, #tpu.memory_space<vmem>>, %arg3: memref<2x8x32xbf16, #tpu.memory_space<vmem>>, %arg4: memref<6x4x32x8xbf16, #tpu.memory_space<vmem>>, %arg5: memref<2x4x8x32xbf16, #tpu.memory_space<vmem>>, %arg6: memref<6x4x8xf32, #tpu.memory_space<vmem>>, %arg7: memref<2x3x32xf32, #tpu.memory_space<vmem>>, %arg8: memref<2x64x256xbf16, #tpu.memory_space<vmem>>, %arg9: memref<2x32x256xf32, #tpu.memory_space<vmem>>, %arg10: memref<2x8x64xf32, #tpu.memory_space<vmem>>) attributes {dimension_semantics = [#tpu.dimension_semantics<parallel>], iteration_bounds = array<i64: 2>, scalar_prefetch = 0 : i64, scratch_operands = 0 : i64, tpu.core_type = #tpu.core_type<tc>, window_params = [{transform_indices = @transform_0, window_bounds = array<i64: 2, 32, 256>}, {transform_indices = @transform_1, window_bounds = array<i64: 2, 8, 32>}, {transform_indices = @transform_2, window_bounds = array<i64: 2, 8, 32>}, {pipeline_mode = #tpu.pipeline_mode<synchronous>, transform_indices = @transform_3, window_bounds = array<i64: 6, 4, 32, 8>}, {pipeline_mode = #tpu.pipeline_mode<synchronous>, transform_indices = @transform_4, window_bounds = array<i64: 2, 4, 8, 32>}, {pipeline_mode = #tpu.pipeline_mode<synchronous>, transform_indices = @transform_5, window_bounds = array<i64: 6, 4, 8>}, {pipeline_mode = #tpu.pipeline_mode<synchronous>, transform_indices = @transform_6, window_bounds = array<i64: 2, 3, 32>}, {pipeline_mode = #tpu.pipeline_mode<synchronous>, transform_indices = @transform_7, window_bounds = array<i64: 2, 64, 256>}, {transform_indices = @transform_8, window_bounds = array<i64: 2, 32, 256>}, {transform_indices = @transform_9, window_bounds = array<i64: 2, 8, 64>}]} {
    %c0 = arith.constant 0 : index
    %c0_0 = arith.constant 0 : index
    %c0_1 = arith.constant 0 : index
    %0 = vector.load %arg8[%c0, %c0_0, %c0_1] : memref<2x64x256xbf16, #tpu.memory_space<vmem>>, vector<1x64x256xbf16>
    %1 = vector.shape_cast %0 : vector<1x64x256xbf16> to vector<64x256xbf16>
    %c0_2 = arith.constant 0 : index
    %c0_3 = arith.constant 0 : index
    %c0_4 = arith.constant 0 : index
    %2 = vector.load %arg1[%c0_2, %c0_3, %c0_4] : memref<2x32x256xf32, #tpu.memory_space<vmem>>, vector<1x32x256xf32>
    %3 = vector.shape_cast %2 : vector<1x32x256xf32> to vector<32x256xf32>
    %4 = arith.truncf %3 : vector<32x256xf32> to vector<32x256xbf16>
    %cst = arith.constant dense<0.000000e+00> : vector<64x32xf32>
    %5 = tpu.matmul %1, %4, %cst {dimension_numbers = #tpu.dot_dimension_numbers<[1], [1], [0], [0], [0, 0, 1, 0], [], []>} : vector<64x256xbf16>, vector<32x256xbf16>, vector<64x32xf32> -> vector<64x32xf32>
    %c1 = arith.constant 1 : index
    %c0_5 = arith.constant 0 : index
    %c0_6 = arith.constant 0 : index
    %6 = vector.load %arg1[%c1, %c0_5, %c0_6] : memref<2x32x256xf32, #tpu.memory_space<vmem>>, vector<1x32x256xf32>
    %7 = vector.shape_cast %6 : vector<1x32x256xf32> to vector<32x256xf32>
    %8 = arith.truncf %7 : vector<32x256xf32> to vector<32x256xbf16>
    %cst_7 = arith.constant dense<0.000000e+00> : vector<64x32xf32>
    %9 = tpu.matmul %1, %8, %cst_7 {dimension_numbers = #tpu.dot_dimension_numbers<[1], [1], [0], [0], [0, 0, 1, 0], [], []>} : vector<64x256xbf16>, vector<32x256xbf16>, vector<64x32xf32> -> vector<64x32xf32>
    %10 = tpu.concatenate %5, %9 in 0 : vector<64x32xf32>, vector<64x32xf32> -> vector<128x32xf32>
    %11 = arith.truncf %10 : vector<128x32xf32> to vector<128x32xbf16>
    %c0_8 = arith.constant 0 : index
    %c0_9 = arith.constant 0 : index
    %c0_10 = arith.constant 0 : index
    %12 = vector.load %arg7[%c0_8, %c0_9, %c0_10] : memref<2x3x32xf32, #tpu.memory_space<vmem>>, vector<1x1x32xf32>
    %13 = vector.shape_cast %12 : vector<1x1x32xf32> to vector<32xf32>
    %c0_11 = arith.constant 0 : index
    %c0_12 = arith.constant 0 : index
    %c0_13 = arith.constant 0 : index
    %c0_14 = arith.constant 0 : index
    %14 = vector.load %arg4[%c0_11, %c0_12, %c0_13, %c0_14] : memref<6x4x32x8xbf16, #tpu.memory_space<vmem>>, vector<1x1x32x8xbf16>
    %15 = vector.shape_cast %14 : vector<1x1x32x8xbf16> to vector<32x8xbf16>
    %cst_15 = arith.constant dense<0.000000e+00> : vector<128x8xf32>
    %16 = tpu.matmul %11, %15, %cst_15 {dimension_numbers = #tpu.dot_dimension_numbers<[1], [0], [0], [1], [0, 0, 1, 1], [], []>} : vector<128x32xbf16>, vector<32x8xbf16>, vector<128x8xf32> -> vector<128x8xf32>
    %c0_16 = arith.constant 0 : index
    %c0_17 = arith.constant 0 : index
    %c0_18 = arith.constant 0 : index
    %17 = vector.load %arg6[%c0_16, %c0_17, %c0_18] : memref<6x4x8xf32, #tpu.memory_space<vmem>>, vector<1x1x8xf32>
    %18 = vector.shape_cast %17 : vector<1x1x8xf32> to vector<8xf32>
    %19 = vector.shape_cast %18 : vector<8xf32> to vector<1x8xf32>
    %20 = vector.broadcast %19 : vector<1x8xf32> to vector<128x8xf32>
    %21 = arith.addf %16, %20 : vector<128x8xf32>
    %22 = arith.truncf %21 : vector<128x8xf32> to vector<128x8xbf16>
    %c1_19 = arith.constant 1 : index
    %c0_20 = arith.constant 0 : index
    %c0_21 = arith.constant 0 : index
    %c0_22 = arith.constant 0 : index
    %23 = vector.load %arg4[%c1_19, %c0_20, %c0_21, %c0_22] : memref<6x4x32x8xbf16, #tpu.memory_space<vmem>>, vector<1x1x32x8xbf16>
    %24 = vector.shape_cast %23 : vector<1x1x32x8xbf16> to vector<32x8xbf16>
    %cst_23 = arith.constant dense<0.000000e+00> : vector<128x8xf32>
    %25 = tpu.matmul %11, %24, %cst_23 {dimension_numbers = #tpu.dot_dimension_numbers<[1], [0], [0], [1], [0, 0, 1, 1], [], []>} : vector<128x32xbf16>, vector<32x8xbf16>, vector<128x8xf32> -> vector<128x8xf32>
    %c1_24 = arith.constant 1 : index
    %c0_25 = arith.constant 0 : index
    %c0_26 = arith.constant 0 : index
    %26 = vector.load %arg6[%c1_24, %c0_25, %c0_26] : memref<6x4x8xf32, #tpu.memory_space<vmem>>, vector<1x1x8xf32>
    %27 = vector.shape_cast %26 : vector<1x1x8xf32> to vector<8xf32>
    %28 = vector.shape_cast %27 : vector<8xf32> to vector<1x8xf32>
    %29 = vector.broadcast %28 : vector<1x8xf32> to vector<128x8xf32>
    %30 = arith.addf %25, %29 : vector<128x8xf32>
    %31 = arith.truncf %30 : vector<128x8xf32> to vector<128x8xbf16>
    %c2 = arith.constant 2 : index
    %c0_27 = arith.constant 0 : index
    %c0_28 = arith.constant 0 : index
    %c0_29 = arith.constant 0 : index
    %32 = vector.load %arg4[%c2, %c0_27, %c0_28, %c0_29] : memref<6x4x32x8xbf16, #tpu.memory_space<vmem>>, vector<1x1x32x8xbf16>
    %33 = vector.shape_cast %32 : vector<1x1x32x8xbf16> to vector<32x8xbf16>
    %cst_30 = arith.constant dense<0.000000e+00> : vector<128x8xf32>
    %34 = tpu.matmul %11, %33, %cst_30 {dimension_numbers = #tpu.dot_dimension_numbers<[1], [0], [0], [1], [0, 0, 1, 1], [], []>} : vector<128x32xbf16>, vector<32x8xbf16>, vector<128x8xf32> -> vector<128x8xf32>
    %c2_31 = arith.constant 2 : index
    %c0_32 = arith.constant 0 : index
    %c0_33 = arith.constant 0 : index
    %35 = vector.load %arg6[%c2_31, %c0_32, %c0_33] : memref<6x4x8xf32, #tpu.memory_space<vmem>>, vector<1x1x8xf32>
    %36 = vector.shape_cast %35 : vector<1x1x8xf32> to vector<8xf32>
    %37 = vector.shape_cast %36 : vector<8xf32> to vector<1x8xf32>
    %38 = vector.broadcast %37 : vector<1x8xf32> to vector<128x8xf32>
    %39 = arith.addf %34, %38 : vector<128x8xf32>
    %40 = arith.truncf %39 : vector<128x8xf32> to vector<128x8xbf16>
    %c0_34 = arith.constant 0 : index
    %c1_35 = arith.constant 1 : index
    %c0_36 = arith.constant 0 : index
    %c0_37 = arith.constant 0 : index
    %41 = vector.load %arg4[%c0_34, %c1_35, %c0_36, %c0_37] : memref<6x4x32x8xbf16, #tpu.memory_space<vmem>>, vector<1x1x32x8xbf16>
    %42 = vector.shape_cast %41 : vector<1x1x32x8xbf16> to vector<32x8xbf16>
    %cst_38 = arith.constant dense<0.000000e+00> : vector<128x8xf32>
    %43 = tpu.matmul %11, %42, %cst_38 {dimension_numbers = #tpu.dot_dimension_numbers<[1], [0], [0], [1], [0, 0, 1, 1], [], []>} : vector<128x32xbf16>, vector<32x8xbf16>, vector<128x8xf32> -> vector<128x8xf32>
    %c0_39 = arith.constant 0 : index
    %c1_40 = arith.constant 1 : index
    %c0_41 = arith.constant 0 : index
    %44 = vector.load %arg6[%c0_39, %c1_40, %c0_41] : memref<6x4x8xf32, #tpu.memory_space<vmem>>, vector<1x1x8xf32>
    %45 = vector.shape_cast %44 : vector<1x1x8xf32> to vector<8xf32>
    %46 = vector.shape_cast %45 : vector<8xf32> to vector<1x8xf32>
    %47 = vector.broadcast %46 : vector<1x8xf32> to vector<128x8xf32>
    %48 = arith.addf %43, %47 : vector<128x8xf32>
    %49 = arith.truncf %48 : vector<128x8xf32> to vector<128x8xbf16>
    %c1_42 = arith.constant 1 : index
    %c1_43 = arith.constant 1 : index
    %c0_44 = arith.constant 0 : index
    %c0_45 = arith.constant 0 : index
    %50 = vector.load %arg4[%c1_42, %c1_43, %c0_44, %c0_45] : memref<6x4x32x8xbf16, #tpu.memory_space<vmem>>, vector<1x1x32x8xbf16>
    %51 = vector.shape_cast %50 : vector<1x1x32x8xbf16> to vector<32x8xbf16>
    %cst_46 = arith.constant dense<0.000000e+00> : vector<128x8xf32>
    %52 = tpu.matmul %11, %51, %cst_46 {dimension_numbers = #tpu.dot_dimension_numbers<[1], [0], [0], [1], [0, 0, 1, 1], [], []>} : vector<128x32xbf16>, vector<32x8xbf16>, vector<128x8xf32> -> vector<128x8xf32>
    %c1_47 = arith.constant 1 : index
    %c1_48 = arith.constant 1 : index
    %c0_49 = arith.constant 0 : index
    %53 = vector.load %arg6[%c1_47, %c1_48, %c0_49] : memref<6x4x8xf32, #tpu.memory_space<vmem>>, vector<1x1x8xf32>
    %54 = vector.shape_cast %53 : vector<1x1x8xf32> to vector<8xf32>
    %55 = vector.shape_cast %54 : vector<8xf32> to vector<1x8xf32>
    %56 = vector.broadcast %55 : vector<1x8xf32> to vector<128x8xf32>
    %57 = arith.addf %52, %56 : vector<128x8xf32>
    %58 = arith.truncf %57 : vector<128x8xf32> to vector<128x8xbf16>
    %c2_50 = arith.constant 2 : index
    %c1_51 = arith.constant 1 : index
    %c0_52 = arith.constant 0 : index
    %c0_53 = arith.constant 0 : index
    %59 = vector.load %arg4[%c2_50, %c1_51, %c0_52, %c0_53] : memref<6x4x32x8xbf16, #tpu.memory_space<vmem>>, vector<1x1x32x8xbf16>
    %60 = vector.shape_cast %59 : vector<1x1x32x8xbf16> to vector<32x8xbf16>
    %cst_54 = arith.constant dense<0.000000e+00> : vector<128x8xf32>
    %61 = tpu.matmul %11, %60, %cst_54 {dimension_numbers = #tpu.dot_dimension_numbers<[1], [0], [0], [1], [0, 0, 1, 1], [], []>} : vector<128x32xbf16>, vector<32x8xbf16>, vector<128x8xf32> -> vector<128x8xf32>
    %c2_55 = arith.constant 2 : index
    %c1_56 = arith.constant 1 : index
    %c0_57 = arith.constant 0 : index
    %62 = vector.load %arg6[%c2_55, %c1_56, %c0_57] : memref<6x4x8xf32, #tpu.memory_space<vmem>>, vector<1x1x8xf32>
    %63 = vector.shape_cast %62 : vector<1x1x8xf32> to vector<8xf32>
    %64 = vector.shape_cast %63 : vector<8xf32> to vector<1x8xf32>
    %65 = vector.broadcast %64 : vector<1x8xf32> to vector<128x8xf32>
    %66 = arith.addf %61, %65 : vector<128x8xf32>
    %67 = arith.truncf %66 : vector<128x8xf32> to vector<128x8xbf16>
    %c0_58 = arith.constant 0 : index
    %c2_59 = arith.constant 2 : index
    %c0_60 = arith.constant 0 : index
    %c0_61 = arith.constant 0 : index
    %68 = vector.load %arg4[%c0_58, %c2_59, %c0_60, %c0_61] : memref<6x4x32x8xbf16, #tpu.memory_space<vmem>>, vector<1x1x32x8xbf16>
    %69 = vector.shape_cast %68 : vector<1x1x32x8xbf16> to vector<32x8xbf16>
    %cst_62 = arith.constant dense<0.000000e+00> : vector<128x8xf32>
    %70 = tpu.matmul %11, %69, %cst_62 {dimension_numbers = #tpu.dot_dimension_numbers<[1], [0], [0], [1], [0, 0, 1, 1], [], []>} : vector<128x32xbf16>, vector<32x8xbf16>, vector<128x8xf32> -> vector<128x8xf32>
    %c0_63 = arith.constant 0 : index
    %c2_64 = arith.constant 2 : index
    %c0_65 = arith.constant 0 : index
    %71 = vector.load %arg6[%c0_63, %c2_64, %c0_65] : memref<6x4x8xf32, #tpu.memory_space<vmem>>, vector<1x1x8xf32>
    %72 = vector.shape_cast %71 : vector<1x1x8xf32> to vector<8xf32>
    %73 = vector.shape_cast %72 : vector<8xf32> to vector<1x8xf32>
    %74 = vector.broadcast %73 : vector<1x8xf32> to vector<128x8xf32>
    %75 = arith.addf %70, %74 : vector<128x8xf32>
    %76 = arith.truncf %75 : vector<128x8xf32> to vector<128x8xbf16>
    %c1_66 = arith.constant 1 : index
    %c2_67 = arith.constant 2 : index
    %c0_68 = arith.constant 0 : index
    %c0_69 = arith.constant 0 : index
    %77 = vector.load %arg4[%c1_66, %c2_67, %c0_68, %c0_69] : memref<6x4x32x8xbf16, #tpu.memory_space<vmem>>, vector<1x1x32x8xbf16>
    %78 = vector.shape_cast %77 : vector<1x1x32x8xbf16> to vector<32x8xbf16>
    %cst_70 = arith.constant dense<0.000000e+00> : vector<128x8xf32>
    %79 = tpu.matmul %11, %78, %cst_70 {dimension_numbers = #tpu.dot_dimension_numbers<[1], [0], [0], [1], [0, 0, 1, 1], [], []>} : vector<128x32xbf16>, vector<32x8xbf16>, vector<128x8xf32> -> vector<128x8xf32>
    %c1_71 = arith.constant 1 : index
    %c2_72 = arith.constant 2 : index
    %c0_73 = arith.constant 0 : index
    %80 = vector.load %arg6[%c1_71, %c2_72, %c0_73] : memref<6x4x8xf32, #tpu.memory_space<vmem>>, vector<1x1x8xf32>
    %81 = vector.shape_cast %80 : vector<1x1x8xf32> to vector<8xf32>
    %82 = vector.shape_cast %81 : vector<8xf32> to vector<1x8xf32>
    %83 = vector.broadcast %82 : vector<1x8xf32> to vector<128x8xf32>
    %84 = arith.addf %79, %83 : vector<128x8xf32>
    %85 = arith.truncf %84 : vector<128x8xf32> to vector<128x8xbf16>
    %c2_74 = arith.constant 2 : index
    %c2_75 = arith.constant 2 : index
    %c0_76 = arith.constant 0 : index
    %c0_77 = arith.constant 0 : index
    %86 = vector.load %arg4[%c2_74, %c2_75, %c0_76, %c0_77] : memref<6x4x32x8xbf16, #tpu.memory_space<vmem>>, vector<1x1x32x8xbf16>
    %87 = vector.shape_cast %86 : vector<1x1x32x8xbf16> to vector<32x8xbf16>
    %cst_78 = arith.constant dense<0.000000e+00> : vector<128x8xf32>
    %88 = tpu.matmul %11, %87, %cst_78 {dimension_numbers = #tpu.dot_dimension_numbers<[1], [0], [0], [1], [0, 0, 1, 1], [], []>} : vector<128x32xbf16>, vector<32x8xbf16>, vector<128x8xf32> -> vector<128x8xf32>
    %c2_79 = arith.constant 2 : index
    %c2_80 = arith.constant 2 : index
    %c0_81 = arith.constant 0 : index
    %89 = vector.load %arg6[%c2_79, %c2_80, %c0_81] : memref<6x4x8xf32, #tpu.memory_space<vmem>>, vector<1x1x8xf32>
    %90 = vector.shape_cast %89 : vector<1x1x8xf32> to vector<8xf32>
    %91 = vector.shape_cast %90 : vector<8xf32> to vector<1x8xf32>
    %92 = vector.broadcast %91 : vector<1x8xf32> to vector<128x8xf32>
    %93 = arith.addf %88, %92 : vector<128x8xf32>
    %94 = arith.truncf %93 : vector<128x8xf32> to vector<128x8xbf16>
    %c0_82 = arith.constant 0 : index
    %c3 = arith.constant 3 : index
    %c0_83 = arith.constant 0 : index
    %c0_84 = arith.constant 0 : index
    %95 = vector.load %arg4[%c0_82, %c3, %c0_83, %c0_84] : memref<6x4x32x8xbf16, #tpu.memory_space<vmem>>, vector<1x1x32x8xbf16>
    %96 = vector.shape_cast %95 : vector<1x1x32x8xbf16> to vector<32x8xbf16>
    %cst_85 = arith.constant dense<0.000000e+00> : vector<128x8xf32>
    %97 = tpu.matmul %11, %96, %cst_85 {dimension_numbers = #tpu.dot_dimension_numbers<[1], [0], [0], [1], [0, 0, 1, 1], [], []>} : vector<128x32xbf16>, vector<32x8xbf16>, vector<128x8xf32> -> vector<128x8xf32>
    %c0_86 = arith.constant 0 : index
    %c3_87 = arith.constant 3 : index
    %c0_88 = arith.constant 0 : index
    %98 = vector.load %arg6[%c0_86, %c3_87, %c0_88] : memref<6x4x8xf32, #tpu.memory_space<vmem>>, vector<1x1x8xf32>
    %99 = vector.shape_cast %98 : vector<1x1x8xf32> to vector<8xf32>
    %100 = vector.shape_cast %99 : vector<8xf32> to vector<1x8xf32>
    %101 = vector.broadcast %100 : vector<1x8xf32> to vector<128x8xf32>
    %102 = arith.addf %97, %101 : vector<128x8xf32>
    %103 = arith.truncf %102 : vector<128x8xf32> to vector<128x8xbf16>
    %c1_89 = arith.constant 1 : index
    %c3_90 = arith.constant 3 : index
    %c0_91 = arith.constant 0 : index
    %c0_92 = arith.constant 0 : index
    %104 = vector.load %arg4[%c1_89, %c3_90, %c0_91, %c0_92] : memref<6x4x32x8xbf16, #tpu.memory_space<vmem>>, vector<1x1x32x8xbf16>
    %105 = vector.shape_cast %104 : vector<1x1x32x8xbf16> to vector<32x8xbf16>
    %cst_93 = arith.constant dense<0.000000e+00> : vector<128x8xf32>
    %106 = tpu.matmul %11, %105, %cst_93 {dimension_numbers = #tpu.dot_dimension_numbers<[1], [0], [0], [1], [0, 0, 1, 1], [], []>} : vector<128x32xbf16>, vector<32x8xbf16>, vector<128x8xf32> -> vector<128x8xf32>
    %c1_94 = arith.constant 1 : index
    %c3_95 = arith.constant 3 : index
    %c0_96 = arith.constant 0 : index
    %107 = vector.load %arg6[%c1_94, %c3_95, %c0_96] : memref<6x4x8xf32, #tpu.memory_space<vmem>>, vector<1x1x8xf32>
    %108 = vector.shape_cast %107 : vector<1x1x8xf32> to vector<8xf32>
    %109 = vector.shape_cast %108 : vector<8xf32> to vector<1x8xf32>
    %110 = vector.broadcast %109 : vector<1x8xf32> to vector<128x8xf32>
    %111 = arith.addf %106, %110 : vector<128x8xf32>
    %112 = arith.truncf %111 : vector<128x8xf32> to vector<128x8xbf16>
    %c2_97 = arith.constant 2 : index
    %c3_98 = arith.constant 3 : index
    %c0_99 = arith.constant 0 : index
    %c0_100 = arith.constant 0 : index
    %113 = vector.load %arg4[%c2_97, %c3_98, %c0_99, %c0_100] : memref<6x4x32x8xbf16, #tpu.memory_space<vmem>>, vector<1x1x32x8xbf16>
    %114 = vector.shape_cast %113 : vector<1x1x32x8xbf16> to vector<32x8xbf16>
    %cst_101 = arith.constant dense<0.000000e+00> : vector<128x8xf32>
    %115 = tpu.matmul %11, %114, %cst_101 {dimension_numbers = #tpu.dot_dimension_numbers<[1], [0], [0], [1], [0, 0, 1, 1], [], []>} : vector<128x32xbf16>, vector<32x8xbf16>, vector<128x8xf32> -> vector<128x8xf32>
    %c2_102 = arith.constant 2 : index
    %c3_103 = arith.constant 3 : index
    %c0_104 = arith.constant 0 : index
    %116 = vector.load %arg6[%c2_102, %c3_103, %c0_104] : memref<6x4x8xf32, #tpu.memory_space<vmem>>, vector<1x1x8xf32>
    %117 = vector.shape_cast %116 : vector<1x1x8xf32> to vector<8xf32>
    %118 = vector.shape_cast %117 : vector<8xf32> to vector<1x8xf32>
    %119 = vector.broadcast %118 : vector<1x8xf32> to vector<128x8xf32>
    %120 = arith.addf %115, %119 : vector<128x8xf32>
    %121 = arith.truncf %120 : vector<128x8xf32> to vector<128x8xbf16>
    %122 = vector.extract_strided_slice %22 {offsets = [0, 0], sizes = [64, 8], strides = [1, 1]} : vector<128x8xbf16> to vector<64x8xbf16>
    %123 = vector.extract_strided_slice %31 {offsets = [0, 0], sizes = [64, 8], strides = [1, 1]} : vector<128x8xbf16> to vector<64x8xbf16>
    %124 = vector.extract_strided_slice %40 {offsets = [0, 0], sizes = [64, 8], strides = [1, 1]} : vector<128x8xbf16> to vector<64x8xbf16>
    %cst_105 = arith.constant dense<0.000000e+00> : vector<64x64xf32>
    %125 = tpu.matmul %122, %123, %cst_105 {dimension_numbers = #tpu.dot_dimension_numbers<[1], [1], [0], [0], [0, 0, 1, 0], [], []>} : vector<64x8xbf16>, vector<64x8xbf16>, vector<64x64xf32> -> vector<64x64xf32>
    %cst_106 = arith.constant dense<0xFF800000> : vector<64xf32>
    %126 = vector.multi_reduction <maximumf>, %125, %cst_106 [1] : vector<64x64xf32> to vector<64xf32>
    %127 = vector.shape_cast %126 : vector<64xf32> to vector<64x1xf32>
    %128 = vector.broadcast %127 : vector<64x1xf32> to vector<64x64xf32>
    %129 = arith.subf %125, %128 : vector<64x64xf32>
    %130 = math.exp %129 : vector<64x64xf32>
    %cst_107 = arith.constant dense<0.000000e+00> : vector<64xf32>
    %131 = vector.multi_reduction <add>, %130, %cst_107 [1] : vector<64x64xf32> to vector<64xf32>
    %132 = vector.shape_cast %131 : vector<64xf32> to vector<64x1xf32>
    %133 = tpu.reciprocal %132 {approx = true} : vector<64x1xf32> -> vector<64x1xf32>
    %134 = vector.broadcast %133 : vector<64x1xf32> to vector<64x64xf32>
    %135 = arith.mulf %130, %134 : vector<64x64xf32>
    %136 = arith.truncf %135 : vector<64x64xf32> to vector<64x64xbf16>
    %cst_108 = arith.constant dense<0.000000e+00> : vector<64x8xf32>
    %137 = tpu.matmul %136, %124, %cst_108 {dimension_numbers = #tpu.dot_dimension_numbers<[1], [0], [0], [1], [0, 0, 1, 1], [], []>} : vector<64x64xbf16>, vector<64x8xbf16>, vector<64x8xf32> -> vector<64x8xf32>
    %c0_109 = arith.constant 0 : index
    %c0_110 = arith.constant 0 : index
    %c0_111 = arith.constant 0 : index
    %c0_112 = arith.constant 0 : index
    %138 = vector.load %arg5[%c0_109, %c0_110, %c0_111, %c0_112] : memref<2x4x8x32xbf16, #tpu.memory_space<vmem>>, vector<1x1x8x32xbf16>
    %139 = vector.shape_cast %138 : vector<1x1x8x32xbf16> to vector<8x32xbf16>
    %140 = arith.truncf %137 : vector<64x8xf32> to vector<64x8xbf16>
    %cst_113 = arith.constant dense<0.000000e+00> : vector<64x32xf32>
    %141 = tpu.matmul %140, %139, %cst_113 {dimension_numbers = #tpu.dot_dimension_numbers<[1], [0], [0], [1], [0, 0, 1, 1], [], []>} : vector<64x8xbf16>, vector<8x32xbf16>, vector<64x32xf32> -> vector<64x32xf32>
    %142 = vector.extract_strided_slice %49 {offsets = [0, 0], sizes = [64, 8], strides = [1, 1]} : vector<128x8xbf16> to vector<64x8xbf16>
    %143 = vector.extract_strided_slice %58 {offsets = [0, 0], sizes = [64, 8], strides = [1, 1]} : vector<128x8xbf16> to vector<64x8xbf16>
    %144 = vector.extract_strided_slice %67 {offsets = [0, 0], sizes = [64, 8], strides = [1, 1]} : vector<128x8xbf16> to vector<64x8xbf16>
    %cst_114 = arith.constant dense<0.000000e+00> : vector<64x64xf32>
    %145 = tpu.matmul %142, %143, %cst_114 {dimension_numbers = #tpu.dot_dimension_numbers<[1], [1], [0], [0], [0, 0, 1, 0], [], []>} : vector<64x8xbf16>, vector<64x8xbf16>, vector<64x64xf32> -> vector<64x64xf32>
    %cst_115 = arith.constant dense<0xFF800000> : vector<64xf32>
    %146 = vector.multi_reduction <maximumf>, %145, %cst_115 [1] : vector<64x64xf32> to vector<64xf32>
    %147 = vector.shape_cast %146 : vector<64xf32> to vector<64x1xf32>
    %148 = vector.broadcast %147 : vector<64x1xf32> to vector<64x64xf32>
    %149 = arith.subf %145, %148 : vector<64x64xf32>
    %150 = math.exp %149 : vector<64x64xf32>
    %cst_116 = arith.constant dense<0.000000e+00> : vector<64xf32>
    %151 = vector.multi_reduction <add>, %150, %cst_116 [1] : vector<64x64xf32> to vector<64xf32>
    %152 = vector.shape_cast %151 : vector<64xf32> to vector<64x1xf32>
    %153 = tpu.reciprocal %152 {approx = true} : vector<64x1xf32> -> vector<64x1xf32>
    %154 = vector.broadcast %153 : vector<64x1xf32> to vector<64x64xf32>
    %155 = arith.mulf %150, %154 : vector<64x64xf32>
    %156 = arith.truncf %155 : vector<64x64xf32> to vector<64x64xbf16>
    %cst_117 = arith.constant dense<0.000000e+00> : vector<64x8xf32>
    %157 = tpu.matmul %156, %144, %cst_117 {dimension_numbers = #tpu.dot_dimension_numbers<[1], [0], [0], [1], [0, 0, 1, 1], [], []>} : vector<64x64xbf16>, vector<64x8xbf16>, vector<64x8xf32> -> vector<64x8xf32>
    %c0_118 = arith.constant 0 : index
    %c1_119 = arith.constant 1 : index
    %c0_120 = arith.constant 0 : index
    %c0_121 = arith.constant 0 : index
    %158 = vector.load %arg5[%c0_118, %c1_119, %c0_120, %c0_121] : memref<2x4x8x32xbf16, #tpu.memory_space<vmem>>, vector<1x1x8x32xbf16>
    %159 = vector.shape_cast %158 : vector<1x1x8x32xbf16> to vector<8x32xbf16>
    %160 = arith.truncf %157 : vector<64x8xf32> to vector<64x8xbf16>
    %cst_122 = arith.constant dense<0.000000e+00> : vector<64x32xf32>
    %161 = tpu.matmul %160, %159, %cst_122 {dimension_numbers = #tpu.dot_dimension_numbers<[1], [0], [0], [1], [0, 0, 1, 1], [], []>} : vector<64x8xbf16>, vector<8x32xbf16>, vector<64x32xf32> -> vector<64x32xf32>
    %162 = arith.addf %141, %161 : vector<64x32xf32>
    %163 = vector.extract_strided_slice %76 {offsets = [0, 0], sizes = [64, 8], strides = [1, 1]} : vector<128x8xbf16> to vector<64x8xbf16>
    %164 = vector.extract_strided_slice %85 {offsets = [0, 0], sizes = [64, 8], strides = [1, 1]} : vector<128x8xbf16> to vector<64x8xbf16>
    %165 = vector.extract_strided_slice %94 {offsets = [0, 0], sizes = [64, 8], strides = [1, 1]} : vector<128x8xbf16> to vector<64x8xbf16>
    %cst_123 = arith.constant dense<0.000000e+00> : vector<64x64xf32>
    %166 = tpu.matmul %163, %164, %cst_123 {dimension_numbers = #tpu.dot_dimension_numbers<[1], [1], [0], [0], [0, 0, 1, 0], [], []>} : vector<64x8xbf16>, vector<64x8xbf16>, vector<64x64xf32> -> vector<64x64xf32>
    %cst_124 = arith.constant dense<0xFF800000> : vector<64xf32>
    %167 = vector.multi_reduction <maximumf>, %166, %cst_124 [1] : vector<64x64xf32> to vector<64xf32>
    %168 = vector.shape_cast %167 : vector<64xf32> to vector<64x1xf32>
    %169 = vector.broadcast %168 : vector<64x1xf32> to vector<64x64xf32>
    %170 = arith.subf %166, %169 : vector<64x64xf32>
    %171 = math.exp %170 : vector<64x64xf32>
    %cst_125 = arith.constant dense<0.000000e+00> : vector<64xf32>
    %172 = vector.multi_reduction <add>, %171, %cst_125 [1] : vector<64x64xf32> to vector<64xf32>
    %173 = vector.shape_cast %172 : vector<64xf32> to vector<64x1xf32>
    %174 = tpu.reciprocal %173 {approx = true} : vector<64x1xf32> -> vector<64x1xf32>
    %175 = vector.broadcast %174 : vector<64x1xf32> to vector<64x64xf32>
    %176 = arith.mulf %171, %175 : vector<64x64xf32>
    %177 = arith.truncf %176 : vector<64x64xf32> to vector<64x64xbf16>
    %cst_126 = arith.constant dense<0.000000e+00> : vector<64x8xf32>
    %178 = tpu.matmul %177, %165, %cst_126 {dimension_numbers = #tpu.dot_dimension_numbers<[1], [0], [0], [1], [0, 0, 1, 1], [], []>} : vector<64x64xbf16>, vector<64x8xbf16>, vector<64x8xf32> -> vector<64x8xf32>
    %c0_127 = arith.constant 0 : index
    %c2_128 = arith.constant 2 : index
    %c0_129 = arith.constant 0 : index
    %c0_130 = arith.constant 0 : index
    %179 = vector.load %arg5[%c0_127, %c2_128, %c0_129, %c0_130] : memref<2x4x8x32xbf16, #tpu.memory_space<vmem>>, vector<1x1x8x32xbf16>
    %180 = vector.shape_cast %179 : vector<1x1x8x32xbf16> to vector<8x32xbf16>
    %181 = arith.truncf %178 : vector<64x8xf32> to vector<64x8xbf16>
    %cst_131 = arith.constant dense<0.000000e+00> : vector<64x32xf32>
    %182 = tpu.matmul %181, %180, %cst_131 {dimension_numbers = #tpu.dot_dimension_numbers<[1], [0], [0], [1], [0, 0, 1, 1], [], []>} : vector<64x8xbf16>, vector<8x32xbf16>, vector<64x32xf32> -> vector<64x32xf32>
    %183 = arith.addf %162, %182 : vector<64x32xf32>
    %184 = vector.extract_strided_slice %103 {offsets = [0, 0], sizes = [64, 8], strides = [1, 1]} : vector<128x8xbf16> to vector<64x8xbf16>
    %185 = vector.extract_strided_slice %112 {offsets = [0, 0], sizes = [64, 8], strides = [1, 1]} : vector<128x8xbf16> to vector<64x8xbf16>
    %186 = vector.extract_strided_slice %121 {offsets = [0, 0], sizes = [64, 8], strides = [1, 1]} : vector<128x8xbf16> to vector<64x8xbf16>
    %cst_132 = arith.constant dense<0.000000e+00> : vector<64x64xf32>
    %187 = tpu.matmul %184, %185, %cst_132 {dimension_numbers = #tpu.dot_dimension_numbers<[1], [1], [0], [0], [0, 0, 1, 0], [], []>} : vector<64x8xbf16>, vector<64x8xbf16>, vector<64x64xf32> -> vector<64x64xf32>
    %cst_133 = arith.constant dense<0xFF800000> : vector<64xf32>
    %188 = vector.multi_reduction <maximumf>, %187, %cst_133 [1] : vector<64x64xf32> to vector<64xf32>
    %189 = vector.shape_cast %188 : vector<64xf32> to vector<64x1xf32>
    %190 = vector.broadcast %189 : vector<64x1xf32> to vector<64x64xf32>
    %191 = arith.subf %187, %190 : vector<64x64xf32>
    %192 = math.exp %191 : vector<64x64xf32>
    %cst_134 = arith.constant dense<0.000000e+00> : vector<64xf32>
    %193 = vector.multi_reduction <add>, %192, %cst_134 [1] : vector<64x64xf32> to vector<64xf32>
    %194 = vector.shape_cast %193 : vector<64xf32> to vector<64x1xf32>
    %195 = tpu.reciprocal %194 {approx = true} : vector<64x1xf32> -> vector<64x1xf32>
    %196 = vector.broadcast %195 : vector<64x1xf32> to vector<64x64xf32>
    %197 = arith.mulf %192, %196 : vector<64x64xf32>
    %198 = arith.truncf %197 : vector<64x64xf32> to vector<64x64xbf16>
    %cst_135 = arith.constant dense<0.000000e+00> : vector<64x8xf32>
    %199 = tpu.matmul %198, %186, %cst_135 {dimension_numbers = #tpu.dot_dimension_numbers<[1], [0], [0], [1], [0, 0, 1, 1], [], []>} : vector<64x64xbf16>, vector<64x8xbf16>, vector<64x8xf32> -> vector<64x8xf32>
    %c0_136 = arith.constant 0 : index
    %c3_137 = arith.constant 3 : index
    %c0_138 = arith.constant 0 : index
    %c0_139 = arith.constant 0 : index
    %200 = vector.load %arg5[%c0_136, %c3_137, %c0_138, %c0_139] : memref<2x4x8x32xbf16, #tpu.memory_space<vmem>>, vector<1x1x8x32xbf16>
    %201 = vector.shape_cast %200 : vector<1x1x8x32xbf16> to vector<8x32xbf16>
    %202 = arith.truncf %199 : vector<64x8xf32> to vector<64x8xbf16>
    %cst_140 = arith.constant dense<0.000000e+00> : vector<64x32xf32>
    %203 = tpu.matmul %202, %201, %cst_140 {dimension_numbers = #tpu.dot_dimension_numbers<[1], [0], [0], [1], [0, 0, 1, 1], [], []>} : vector<64x8xbf16>, vector<8x32xbf16>, vector<64x32xf32> -> vector<64x32xf32>
    %204 = arith.addf %183, %203 : vector<64x32xf32>
    %205 = vector.shape_cast %13 : vector<32xf32> to vector<1x32xf32>
    %206 = vector.broadcast %205 : vector<1x32xf32> to vector<64x32xf32>
    %207 = arith.addf %204, %206 : vector<64x32xf32>
    %208 = vector.extract_strided_slice %22 {offsets = [64, 0], sizes = [64, 8], strides = [1, 1]} : vector<128x8xbf16> to vector<64x8xbf16>
    %209 = vector.extract_strided_slice %31 {offsets = [64, 0], sizes = [64, 8], strides = [1, 1]} : vector<128x8xbf16> to vector<64x8xbf16>
    %210 = vector.extract_strided_slice %40 {offsets = [64, 0], sizes = [64, 8], strides = [1, 1]} : vector<128x8xbf16> to vector<64x8xbf16>
    %cst_141 = arith.constant dense<0.000000e+00> : vector<64x64xf32>
    %211 = tpu.matmul %208, %209, %cst_141 {dimension_numbers = #tpu.dot_dimension_numbers<[1], [1], [0], [0], [0, 0, 1, 0], [], []>} : vector<64x8xbf16>, vector<64x8xbf16>, vector<64x64xf32> -> vector<64x64xf32>
    %cst_142 = arith.constant dense<0xFF800000> : vector<64xf32>
    %212 = vector.multi_reduction <maximumf>, %211, %cst_142 [1] : vector<64x64xf32> to vector<64xf32>
    %213 = vector.shape_cast %212 : vector<64xf32> to vector<64x1xf32>
    %214 = vector.broadcast %213 : vector<64x1xf32> to vector<64x64xf32>
    %215 = arith.subf %211, %214 : vector<64x64xf32>
    %216 = math.exp %215 : vector<64x64xf32>
    %cst_143 = arith.constant dense<0.000000e+00> : vector<64xf32>
    %217 = vector.multi_reduction <add>, %216, %cst_143 [1] : vector<64x64xf32> to vector<64xf32>
    %218 = vector.shape_cast %217 : vector<64xf32> to vector<64x1xf32>
    %219 = tpu.reciprocal %218 {approx = true} : vector<64x1xf32> -> vector<64x1xf32>
    %220 = vector.broadcast %219 : vector<64x1xf32> to vector<64x64xf32>
    %221 = arith.mulf %216, %220 : vector<64x64xf32>
    %222 = arith.truncf %221 : vector<64x64xf32> to vector<64x64xbf16>
    %cst_144 = arith.constant dense<0.000000e+00> : vector<64x8xf32>
    %223 = tpu.matmul %222, %210, %cst_144 {dimension_numbers = #tpu.dot_dimension_numbers<[1], [0], [0], [1], [0, 0, 1, 1], [], []>} : vector<64x64xbf16>, vector<64x8xbf16>, vector<64x8xf32> -> vector<64x8xf32>
    %c0_145 = arith.constant 0 : index
    %c0_146 = arith.constant 0 : index
    %c0_147 = arith.constant 0 : index
    %c0_148 = arith.constant 0 : index
    %224 = vector.load %arg5[%c0_145, %c0_146, %c0_147, %c0_148] : memref<2x4x8x32xbf16, #tpu.memory_space<vmem>>, vector<1x1x8x32xbf16>
    %225 = vector.shape_cast %224 : vector<1x1x8x32xbf16> to vector<8x32xbf16>
    %226 = arith.truncf %223 : vector<64x8xf32> to vector<64x8xbf16>
    %cst_149 = arith.constant dense<0.000000e+00> : vector<64x32xf32>
    %227 = tpu.matmul %226, %225, %cst_149 {dimension_numbers = #tpu.dot_dimension_numbers<[1], [0], [0], [1], [0, 0, 1, 1], [], []>} : vector<64x8xbf16>, vector<8x32xbf16>, vector<64x32xf32> -> vector<64x32xf32>
    %228 = vector.extract_strided_slice %49 {offsets = [64, 0], sizes = [64, 8], strides = [1, 1]} : vector<128x8xbf16> to vector<64x8xbf16>
    %229 = vector.extract_strided_slice %58 {offsets = [64, 0], sizes = [64, 8], strides = [1, 1]} : vector<128x8xbf16> to vector<64x8xbf16>
    %230 = vector.extract_strided_slice %67 {offsets = [64, 0], sizes = [64, 8], strides = [1, 1]} : vector<128x8xbf16> to vector<64x8xbf16>
    %cst_150 = arith.constant dense<0.000000e+00> : vector<64x64xf32>
    %231 = tpu.matmul %228, %229, %cst_150 {dimension_numbers = #tpu.dot_dimension_numbers<[1], [1], [0], [0], [0, 0, 1, 0], [], []>} : vector<64x8xbf16>, vector<64x8xbf16>, vector<64x64xf32> -> vector<64x64xf32>
    %cst_151 = arith.constant dense<0xFF800000> : vector<64xf32>
    %232 = vector.multi_reduction <maximumf>, %231, %cst_151 [1] : vector<64x64xf32> to vector<64xf32>
    %233 = vector.shape_cast %232 : vector<64xf32> to vector<64x1xf32>
    %234 = vector.broadcast %233 : vector<64x1xf32> to vector<64x64xf32>
    %235 = arith.subf %231, %234 : vector<64x64xf32>
    %236 = math.exp %235 : vector<64x64xf32>
    %cst_152 = arith.constant dense<0.000000e+00> : vector<64xf32>
    %237 = vector.multi_reduction <add>, %236, %cst_152 [1] : vector<64x64xf32> to vector<64xf32>
    %238 = vector.shape_cast %237 : vector<64xf32> to vector<64x1xf32>
    %239 = tpu.reciprocal %238 {approx = true} : vector<64x1xf32> -> vector<64x1xf32>
    %240 = vector.broadcast %239 : vector<64x1xf32> to vector<64x64xf32>
    %241 = arith.mulf %236, %240 : vector<64x64xf32>
    %242 = arith.truncf %241 : vector<64x64xf32> to vector<64x64xbf16>
    %cst_153 = arith.constant dense<0.000000e+00> : vector<64x8xf32>
    %243 = tpu.matmul %242, %230, %cst_153 {dimension_numbers = #tpu.dot_dimension_numbers<[1], [0], [0], [1], [0, 0, 1, 1], [], []>} : vector<64x64xbf16>, vector<64x8xbf16>, vector<64x8xf32> -> vector<64x8xf32>
    %c0_154 = arith.constant 0 : index
    %c1_155 = arith.constant 1 : index
    %c0_156 = arith.constant 0 : index
    %c0_157 = arith.constant 0 : index
    %244 = vector.load %arg5[%c0_154, %c1_155, %c0_156, %c0_157] : memref<2x4x8x32xbf16, #tpu.memory_space<vmem>>, vector<1x1x8x32xbf16>
    %245 = vector.shape_cast %244 : vector<1x1x8x32xbf16> to vector<8x32xbf16>
    %246 = arith.truncf %243 : vector<64x8xf32> to vector<64x8xbf16>
    %cst_158 = arith.constant dense<0.000000e+00> : vector<64x32xf32>
    %247 = tpu.matmul %246, %245, %cst_158 {dimension_numbers = #tpu.dot_dimension_numbers<[1], [0], [0], [1], [0, 0, 1, 1], [], []>} : vector<64x8xbf16>, vector<8x32xbf16>, vector<64x32xf32> -> vector<64x32xf32>
    %248 = arith.addf %227, %247 : vector<64x32xf32>
    %249 = vector.extract_strided_slice %76 {offsets = [64, 0], sizes = [64, 8], strides = [1, 1]} : vector<128x8xbf16> to vector<64x8xbf16>
    %250 = vector.extract_strided_slice %85 {offsets = [64, 0], sizes = [64, 8], strides = [1, 1]} : vector<128x8xbf16> to vector<64x8xbf16>
    %251 = vector.extract_strided_slice %94 {offsets = [64, 0], sizes = [64, 8], strides = [1, 1]} : vector<128x8xbf16> to vector<64x8xbf16>
    %cst_159 = arith.constant dense<0.000000e+00> : vector<64x64xf32>
    %252 = tpu.matmul %249, %250, %cst_159 {dimension_numbers = #tpu.dot_dimension_numbers<[1], [1], [0], [0], [0, 0, 1, 0], [], []>} : vector<64x8xbf16>, vector<64x8xbf16>, vector<64x64xf32> -> vector<64x64xf32>
    %cst_160 = arith.constant dense<0xFF800000> : vector<64xf32>
    %253 = vector.multi_reduction <maximumf>, %252, %cst_160 [1] : vector<64x64xf32> to vector<64xf32>
    %254 = vector.shape_cast %253 : vector<64xf32> to vector<64x1xf32>
    %255 = vector.broadcast %254 : vector<64x1xf32> to vector<64x64xf32>
    %256 = arith.subf %252, %255 : vector<64x64xf32>
    %257 = math.exp %256 : vector<64x64xf32>
    %cst_161 = arith.constant dense<0.000000e+00> : vector<64xf32>
    %258 = vector.multi_reduction <add>, %257, %cst_161 [1] : vector<64x64xf32> to vector<64xf32>
    %259 = vector.shape_cast %258 : vector<64xf32> to vector<64x1xf32>
    %260 = tpu.reciprocal %259 {approx = true} : vector<64x1xf32> -> vector<64x1xf32>
    %261 = vector.broadcast %260 : vector<64x1xf32> to vector<64x64xf32>
    %262 = arith.mulf %257, %261 : vector<64x64xf32>
    %263 = arith.truncf %262 : vector<64x64xf32> to vector<64x64xbf16>
    %cst_162 = arith.constant dense<0.000000e+00> : vector<64x8xf32>
    %264 = tpu.matmul %263, %251, %cst_162 {dimension_numbers = #tpu.dot_dimension_numbers<[1], [0], [0], [1], [0, 0, 1, 1], [], []>} : vector<64x64xbf16>, vector<64x8xbf16>, vector<64x8xf32> -> vector<64x8xf32>
    %c0_163 = arith.constant 0 : index
    %c2_164 = arith.constant 2 : index
    %c0_165 = arith.constant 0 : index
    %c0_166 = arith.constant 0 : index
    %265 = vector.load %arg5[%c0_163, %c2_164, %c0_165, %c0_166] : memref<2x4x8x32xbf16, #tpu.memory_space<vmem>>, vector<1x1x8x32xbf16>
    %266 = vector.shape_cast %265 : vector<1x1x8x32xbf16> to vector<8x32xbf16>
    %267 = arith.truncf %264 : vector<64x8xf32> to vector<64x8xbf16>
    %cst_167 = arith.constant dense<0.000000e+00> : vector<64x32xf32>
    %268 = tpu.matmul %267, %266, %cst_167 {dimension_numbers = #tpu.dot_dimension_numbers<[1], [0], [0], [1], [0, 0, 1, 1], [], []>} : vector<64x8xbf16>, vector<8x32xbf16>, vector<64x32xf32> -> vector<64x32xf32>
    %269 = arith.addf %248, %268 : vector<64x32xf32>
    %270 = vector.extract_strided_slice %103 {offsets = [64, 0], sizes = [64, 8], strides = [1, 1]} : vector<128x8xbf16> to vector<64x8xbf16>
    %271 = vector.extract_strided_slice %112 {offsets = [64, 0], sizes = [64, 8], strides = [1, 1]} : vector<128x8xbf16> to vector<64x8xbf16>
    %272 = vector.extract_strided_slice %121 {offsets = [64, 0], sizes = [64, 8], strides = [1, 1]} : vector<128x8xbf16> to vector<64x8xbf16>
    %cst_168 = arith.constant dense<0.000000e+00> : vector<64x64xf32>
    %273 = tpu.matmul %270, %271, %cst_168 {dimension_numbers = #tpu.dot_dimension_numbers<[1], [1], [0], [0], [0, 0, 1, 0], [], []>} : vector<64x8xbf16>, vector<64x8xbf16>, vector<64x64xf32> -> vector<64x64xf32>
    %cst_169 = arith.constant dense<0xFF800000> : vector<64xf32>
    %274 = vector.multi_reduction <maximumf>, %273, %cst_169 [1] : vector<64x64xf32> to vector<64xf32>
    %275 = vector.shape_cast %274 : vector<64xf32> to vector<64x1xf32>
    %276 = vector.broadcast %275 : vector<64x1xf32> to vector<64x64xf32>
    %277 = arith.subf %273, %276 : vector<64x64xf32>
    %278 = math.exp %277 : vector<64x64xf32>
    %cst_170 = arith.constant dense<0.000000e+00> : vector<64xf32>
    %279 = vector.multi_reduction <add>, %278, %cst_170 [1] : vector<64x64xf32> to vector<64xf32>
    %280 = vector.shape_cast %279 : vector<64xf32> to vector<64x1xf32>
    %281 = tpu.reciprocal %280 {approx = true} : vector<64x1xf32> -> vector<64x1xf32>
    %282 = vector.broadcast %281 : vector<64x1xf32> to vector<64x64xf32>
    %283 = arith.mulf %278, %282 : vector<64x64xf32>
    %284 = arith.truncf %283 : vector<64x64xf32> to vector<64x64xbf16>
    %cst_171 = arith.constant dense<0.000000e+00> : vector<64x8xf32>
    %285 = tpu.matmul %284, %272, %cst_171 {dimension_numbers = #tpu.dot_dimension_numbers<[1], [0], [0], [1], [0, 0, 1, 1], [], []>} : vector<64x64xbf16>, vector<64x8xbf16>, vector<64x8xf32> -> vector<64x8xf32>
    %c0_172 = arith.constant 0 : index
    %c3_173 = arith.constant 3 : index
    %c0_174 = arith.constant 0 : index
    %c0_175 = arith.constant 0 : index
    %286 = vector.load %arg5[%c0_172, %c3_173, %c0_174, %c0_175] : memref<2x4x8x32xbf16, #tpu.memory_space<vmem>>, vector<1x1x8x32xbf16>
    %287 = vector.shape_cast %286 : vector<1x1x8x32xbf16> to vector<8x32xbf16>
    %288 = arith.truncf %285 : vector<64x8xf32> to vector<64x8xbf16>
    %cst_176 = arith.constant dense<0.000000e+00> : vector<64x32xf32>
    %289 = tpu.matmul %288, %287, %cst_176 {dimension_numbers = #tpu.dot_dimension_numbers<[1], [0], [0], [1], [0, 0, 1, 1], [], []>} : vector<64x8xbf16>, vector<8x32xbf16>, vector<64x32xf32> -> vector<64x32xf32>
    %290 = arith.addf %269, %289 : vector<64x32xf32>
    %291 = vector.shape_cast %13 : vector<32xf32> to vector<1x32xf32>
    %292 = vector.broadcast %291 : vector<1x32xf32> to vector<64x32xf32>
    %293 = arith.addf %290, %292 : vector<64x32xf32>
    %294 = tpu.concatenate %207, %293 in 0 : vector<64x32xf32>, vector<64x32xf32> -> vector<128x32xf32>
    %295 = arith.addf %10, %294 : vector<128x32xf32>
    %c0_177 = arith.constant 0 : index
    %c1_178 = arith.constant 1 : index
    %c0_179 = arith.constant 0 : index
    %296 = vector.load %arg7[%c0_177, %c1_178, %c0_179] : memref<2x3x32xf32, #tpu.memory_space<vmem>>, vector<1x1x32xf32>
    %297 = vector.shape_cast %296 : vector<1x1x32xf32> to vector<32xf32>
    %c0_180 = arith.constant 0 : index
    %c2_181 = arith.constant 2 : index
    %c0_182 = arith.constant 0 : index
    %298 = vector.load %arg7[%c0_180, %c2_181, %c0_182] : memref<2x3x32xf32, #tpu.memory_space<vmem>>, vector<1x1x32xf32>
    %299 = vector.shape_cast %298 : vector<1x1x32xf32> to vector<32xf32>
    %cst_183 = arith.constant dense<0.000000e+00> : vector<128xf32>
    %300 = vector.multi_reduction <add>, %295, %cst_183 [1] : vector<128x32xf32> to vector<128xf32>
    %301 = vector.shape_cast %300 : vector<128xf32> to vector<128x1xf32>
    %cst_184 = arith.constant 3.200000e+01 : f32
    %302 = vector.broadcast %cst_184 : f32 to vector<128x1xf32>
    %303 = arith.divf %301, %302 : vector<128x1xf32>
    %304 = arith.mulf %295, %295 : vector<128x32xf32>
    %cst_185 = arith.constant dense<0.000000e+00> : vector<128xf32>
    %305 = vector.multi_reduction <add>, %304, %cst_185 [1] : vector<128x32xf32> to vector<128xf32>
    %306 = vector.shape_cast %305 : vector<128xf32> to vector<128x1xf32>
    %cst_186 = arith.constant 3.200000e+01 : f32
    %307 = vector.broadcast %cst_186 : f32 to vector<128x1xf32>
    %308 = arith.divf %306, %307 : vector<128x1xf32>
    %309 = arith.mulf %303, %303 : vector<128x1xf32>
    %310 = arith.subf %308, %309 : vector<128x1xf32>
    %311 = vector.broadcast %303 : vector<128x1xf32> to vector<128x32xf32>
    %312 = arith.subf %295, %311 : vector<128x32xf32>
    %cst_187 = arith.constant 9.99999974E-6 : f32
    %313 = vector.broadcast %cst_187 : f32 to vector<128x1xf32>
    %314 = arith.addf %310, %313 : vector<128x1xf32>
    %315 = math.rsqrt %314 : vector<128x1xf32>
    %316 = vector.broadcast %315 : vector<128x1xf32> to vector<128x32xf32>
    %317 = arith.mulf %312, %316 : vector<128x32xf32>
    %318 = vector.shape_cast %297 : vector<32xf32> to vector<1x32xf32>
    %319 = vector.broadcast %318 : vector<1x32xf32> to vector<128x32xf32>
    %320 = arith.mulf %317, %319 : vector<128x32xf32>
    %321 = vector.shape_cast %299 : vector<32xf32> to vector<1x32xf32>
    %322 = vector.broadcast %321 : vector<1x32xf32> to vector<128x32xf32>
    %323 = arith.addf %320, %322 : vector<128x32xf32>
    %324 = arith.truncf %323 : vector<128x32xf32> to vector<128x32xbf16>
    %325 = vector.shape_cast %324 : vector<128x32xbf16> to vector<2x64x32xbf16>
    %c0_188 = arith.constant 0 : index
    %c0_189 = arith.constant 0 : index
    %c0_190 = arith.constant 0 : index
    %326 = vector.load %arg3[%c0_188, %c0_189, %c0_190] : memref<2x8x32xbf16, #tpu.memory_space<vmem>>, vector<2x8x32xbf16>
    %cst_191 = arith.constant dense<0.000000e+00> : vector<2x64x8xf32>
    %327 = tpu.matmul %325, %326, %cst_191 {dimension_numbers = #tpu.dot_dimension_numbers<[2], [2], [1], [1], [0, 0, 0, 1, 1, 1], [0], [0]>} : vector<2x64x32xbf16>, vector<2x8x32xbf16>, vector<2x64x8xf32> -> vector<2x64x8xf32>
    %c0_192 = arith.constant 0 : index
    %c0_193 = arith.constant 0 : index
    %c0_194 = arith.constant 0 : index
    %328 = vector.load %arg2[%c0_192, %c0_193, %c0_194] : memref<2x8x32xbf16, #tpu.memory_space<vmem>>, vector<2x8x32xbf16>
    %329 = vector.shape_cast %328 : vector<2x8x32xbf16> to vector<16x32xbf16>
    %c1_195 = arith.constant 1 : index
    %c0_196 = arith.constant 0 : index
    %c0_197 = arith.constant 0 : index
    %330 = vector.load %arg7[%c1_195, %c0_196, %c0_197] : memref<2x3x32xf32, #tpu.memory_space<vmem>>, vector<1x1x32xf32>
    %331 = vector.shape_cast %330 : vector<1x1x32xf32> to vector<32xf32>
    %c3_198 = arith.constant 3 : index
    %c0_199 = arith.constant 0 : index
    %c0_200 = arith.constant 0 : index
    %c0_201 = arith.constant 0 : index
    %332 = vector.load %arg4[%c3_198, %c0_199, %c0_200, %c0_201] : memref<6x4x32x8xbf16, #tpu.memory_space<vmem>>, vector<1x1x32x8xbf16>
    %333 = vector.shape_cast %332 : vector<1x1x32x8xbf16> to vector<32x8xbf16>
    %cst_202 = arith.constant dense<0.000000e+00> : vector<128x8xf32>
    %334 = tpu.matmul %324, %333, %cst_202 {dimension_numbers = #tpu.dot_dimension_numbers<[1], [0], [0], [1], [0, 0, 1, 1], [], []>} : vector<128x32xbf16>, vector<32x8xbf16>, vector<128x8xf32> -> vector<128x8xf32>
    %c3_203 = arith.constant 3 : index
    %c0_204 = arith.constant 0 : index
    %c0_205 = arith.constant 0 : index
    %335 = vector.load %arg6[%c3_203, %c0_204, %c0_205] : memref<6x4x8xf32, #tpu.memory_space<vmem>>, vector<1x1x8xf32>
    %336 = vector.shape_cast %335 : vector<1x1x8xf32> to vector<8xf32>
    %337 = vector.shape_cast %336 : vector<8xf32> to vector<1x8xf32>
    %338 = vector.broadcast %337 : vector<1x8xf32> to vector<128x8xf32>
    %339 = arith.addf %334, %338 : vector<128x8xf32>
    %340 = arith.truncf %339 : vector<128x8xf32> to vector<128x8xbf16>
    %c4 = arith.constant 4 : index
    %c0_206 = arith.constant 0 : index
    %c0_207 = arith.constant 0 : index
    %c0_208 = arith.constant 0 : index
    %341 = vector.load %arg4[%c4, %c0_206, %c0_207, %c0_208] : memref<6x4x32x8xbf16, #tpu.memory_space<vmem>>, vector<1x1x32x8xbf16>
    %342 = vector.shape_cast %341 : vector<1x1x32x8xbf16> to vector<32x8xbf16>
    %cst_209 = arith.constant dense<0.000000e+00> : vector<16x8xf32>
    %343 = tpu.matmul %329, %342, %cst_209 {dimension_numbers = #tpu.dot_dimension_numbers<[1], [0], [0], [1], [0, 0, 1, 1], [], []>} : vector<16x32xbf16>, vector<32x8xbf16>, vector<16x8xf32> -> vector<16x8xf32>
    %c4_210 = arith.constant 4 : index
    %c0_211 = arith.constant 0 : index
    %c0_212 = arith.constant 0 : index
    %344 = vector.load %arg6[%c4_210, %c0_211, %c0_212] : memref<6x4x8xf32, #tpu.memory_space<vmem>>, vector<1x1x8xf32>
    %345 = vector.shape_cast %344 : vector<1x1x8xf32> to vector<8xf32>
    %346 = vector.shape_cast %345 : vector<8xf32> to vector<1x8xf32>
    %347 = vector.broadcast %346 : vector<1x8xf32> to vector<16x8xf32>
    %348 = arith.addf %343, %347 : vector<16x8xf32>
    %349 = arith.truncf %348 : vector<16x8xf32> to vector<16x8xbf16>
    %c5 = arith.constant 5 : index
    %c0_213 = arith.constant 0 : index
    %c0_214 = arith.constant 0 : index
    %c0_215 = arith.constant 0 : index
    %350 = vector.load %arg4[%c5, %c0_213, %c0_214, %c0_215] : memref<6x4x32x8xbf16, #tpu.memory_space<vmem>>, vector<1x1x32x8xbf16>
    %351 = vector.shape_cast %350 : vector<1x1x32x8xbf16> to vector<32x8xbf16>
    %cst_216 = arith.constant dense<0.000000e+00> : vector<16x8xf32>
    %352 = tpu.matmul %329, %351, %cst_216 {dimension_numbers = #tpu.dot_dimension_numbers<[1], [0], [0], [1], [0, 0, 1, 1], [], []>} : vector<16x32xbf16>, vector<32x8xbf16>, vector<16x8xf32> -> vector<16x8xf32>
    %c5_217 = arith.constant 5 : index
    %c0_218 = arith.constant 0 : index
    %c0_219 = arith.constant 0 : index
    %353 = vector.load %arg6[%c5_217, %c0_218, %c0_219] : memref<6x4x8xf32, #tpu.memory_space<vmem>>, vector<1x1x8xf32>
    %354 = vector.shape_cast %353 : vector<1x1x8xf32> to vector<8xf32>
    %355 = vector.shape_cast %354 : vector<8xf32> to vector<1x8xf32>
    %356 = vector.broadcast %355 : vector<1x8xf32> to vector<16x8xf32>
    %357 = arith.addf %352, %356 : vector<16x8xf32>
    %358 = arith.truncf %357 : vector<16x8xf32> to vector<16x8xbf16>
    %c3_220 = arith.constant 3 : index
    %c1_221 = arith.constant 1 : index
    %c0_222 = arith.constant 0 : index
    %c0_223 = arith.constant 0 : index
    %359 = vector.load %arg4[%c3_220, %c1_221, %c0_222, %c0_223] : memref<6x4x32x8xbf16, #tpu.memory_space<vmem>>, vector<1x1x32x8xbf16>
    %360 = vector.shape_cast %359 : vector<1x1x32x8xbf16> to vector<32x8xbf16>
    %cst_224 = arith.constant dense<0.000000e+00> : vector<128x8xf32>
    %361 = tpu.matmul %324, %360, %cst_224 {dimension_numbers = #tpu.dot_dimension_numbers<[1], [0], [0], [1], [0, 0, 1, 1], [], []>} : vector<128x32xbf16>, vector<32x8xbf16>, vector<128x8xf32> -> vector<128x8xf32>
    %c3_225 = arith.constant 3 : index
    %c1_226 = arith.constant 1 : index
    %c0_227 = arith.constant 0 : index
    %362 = vector.load %arg6[%c3_225, %c1_226, %c0_227] : memref<6x4x8xf32, #tpu.memory_space<vmem>>, vector<1x1x8xf32>
    %363 = vector.shape_cast %362 : vector<1x1x8xf32> to vector<8xf32>
    %364 = vector.shape_cast %363 : vector<8xf32> to vector<1x8xf32>
    %365 = vector.broadcast %364 : vector<1x8xf32> to vector<128x8xf32>
    %366 = arith.addf %361, %365 : vector<128x8xf32>
    %367 = arith.truncf %366 : vector<128x8xf32> to vector<128x8xbf16>
    %c4_228 = arith.constant 4 : index
    %c1_229 = arith.constant 1 : index
    %c0_230 = arith.constant 0 : index
    %c0_231 = arith.constant 0 : index
    %368 = vector.load %arg4[%c4_228, %c1_229, %c0_230, %c0_231] : memref<6x4x32x8xbf16, #tpu.memory_space<vmem>>, vector<1x1x32x8xbf16>
    %369 = vector.shape_cast %368 : vector<1x1x32x8xbf16> to vector<32x8xbf16>
    %cst_232 = arith.constant dense<0.000000e+00> : vector<16x8xf32>
    %370 = tpu.matmul %329, %369, %cst_232 {dimension_numbers = #tpu.dot_dimension_numbers<[1], [0], [0], [1], [0, 0, 1, 1], [], []>} : vector<16x32xbf16>, vector<32x8xbf16>, vector<16x8xf32> -> vector<16x8xf32>
    %c4_233 = arith.constant 4 : index
    %c1_234 = arith.constant 1 : index
    %c0_235 = arith.constant 0 : index
    %371 = vector.load %arg6[%c4_233, %c1_234, %c0_235] : memref<6x4x8xf32, #tpu.memory_space<vmem>>, vector<1x1x8xf32>
    %372 = vector.shape_cast %371 : vector<1x1x8xf32> to vector<8xf32>
    %373 = vector.shape_cast %372 : vector<8xf32> to vector<1x8xf32>
    %374 = vector.broadcast %373 : vector<1x8xf32> to vector<16x8xf32>
    %375 = arith.addf %370, %374 : vector<16x8xf32>
    %376 = arith.truncf %375 : vector<16x8xf32> to vector<16x8xbf16>
    %c5_236 = arith.constant 5 : index
    %c1_237 = arith.constant 1 : index
    %c0_238 = arith.constant 0 : index
    %c0_239 = arith.constant 0 : index
    %377 = vector.load %arg4[%c5_236, %c1_237, %c0_238, %c0_239] : memref<6x4x32x8xbf16, #tpu.memory_space<vmem>>, vector<1x1x32x8xbf16>
    %378 = vector.shape_cast %377 : vector<1x1x32x8xbf16> to vector<32x8xbf16>
    %cst_240 = arith.constant dense<0.000000e+00> : vector<16x8xf32>
    %379 = tpu.matmul %329, %378, %cst_240 {dimension_numbers = #tpu.dot_dimension_numbers<[1], [0], [0], [1], [0, 0, 1, 1], [], []>} : vector<16x32xbf16>, vector<32x8xbf16>, vector<16x8xf32> -> vector<16x8xf32>
    %c5_241 = arith.constant 5 : index
    %c1_242 = arith.constant 1 : index
    %c0_243 = arith.constant 0 : index
    %380 = vector.load %arg6[%c5_241, %c1_242, %c0_243] : memref<6x4x8xf32, #tpu.memory_space<vmem>>, vector<1x1x8xf32>
    %381 = vector.shape_cast %380 : vector<1x1x8xf32> to vector<8xf32>
    %382 = vector.shape_cast %381 : vector<8xf32> to vector<1x8xf32>
    %383 = vector.broadcast %382 : vector<1x8xf32> to vector<16x8xf32>
    %384 = arith.addf %379, %383 : vector<16x8xf32>
    %385 = arith.truncf %384 : vector<16x8xf32> to vector<16x8xbf16>
    %c3_244 = arith.constant 3 : index
    %c2_245 = arith.constant 2 : index
    %c0_246 = arith.constant 0 : index
    %c0_247 = arith.constant 0 : index
    %386 = vector.load %arg4[%c3_244, %c2_245, %c0_246, %c0_247] : memref<6x4x32x8xbf16, #tpu.memory_space<vmem>>, vector<1x1x32x8xbf16>
    %387 = vector.shape_cast %386 : vector<1x1x32x8xbf16> to vector<32x8xbf16>
    %cst_248 = arith.constant dense<0.000000e+00> : vector<128x8xf32>
    %388 = tpu.matmul %324, %387, %cst_248 {dimension_numbers = #tpu.dot_dimension_numbers<[1], [0], [0], [1], [0, 0, 1, 1], [], []>} : vector<128x32xbf16>, vector<32x8xbf16>, vector<128x8xf32> -> vector<128x8xf32>
    %c3_249 = arith.constant 3 : index
    %c2_250 = arith.constant 2 : index
    %c0_251 = arith.constant 0 : index
    %389 = vector.load %arg6[%c3_249, %c2_250, %c0_251] : memref<6x4x8xf32, #tpu.memory_space<vmem>>, vector<1x1x8xf32>
    %390 = vector.shape_cast %389 : vector<1x1x8xf32> to vector<8xf32>
    %391 = vector.shape_cast %390 : vector<8xf32> to vector<1x8xf32>
    %392 = vector.broadcast %391 : vector<1x8xf32> to vector<128x8xf32>
    %393 = arith.addf %388, %392 : vector<128x8xf32>
    %394 = arith.truncf %393 : vector<128x8xf32> to vector<128x8xbf16>
    %c4_252 = arith.constant 4 : index
    %c2_253 = arith.constant 2 : index
    %c0_254 = arith.constant 0 : index
    %c0_255 = arith.constant 0 : index
    %395 = vector.load %arg4[%c4_252, %c2_253, %c0_254, %c0_255] : memref<6x4x32x8xbf16, #tpu.memory_space<vmem>>, vector<1x1x32x8xbf16>
    %396 = vector.shape_cast %395 : vector<1x1x32x8xbf16> to vector<32x8xbf16>
    %cst_256 = arith.constant dense<0.000000e+00> : vector<16x8xf32>
    %397 = tpu.matmul %329, %396, %cst_256 {dimension_numbers = #tpu.dot_dimension_numbers<[1], [0], [0], [1], [0, 0, 1, 1], [], []>} : vector<16x32xbf16>, vector<32x8xbf16>, vector<16x8xf32> -> vector<16x8xf32>
    %c4_257 = arith.constant 4 : index
    %c2_258 = arith.constant 2 : index
    %c0_259 = arith.constant 0 : index
    %398 = vector.load %arg6[%c4_257, %c2_258, %c0_259] : memref<6x4x8xf32, #tpu.memory_space<vmem>>, vector<1x1x8xf32>
    %399 = vector.shape_cast %398 : vector<1x1x8xf32> to vector<8xf32>
    %400 = vector.shape_cast %399 : vector<8xf32> to vector<1x8xf32>
    %401 = vector.broadcast %400 : vector<1x8xf32> to vector<16x8xf32>
    %402 = arith.addf %397, %401 : vector<16x8xf32>
    %403 = arith.truncf %402 : vector<16x8xf32> to vector<16x8xbf16>
    %c5_260 = arith.constant 5 : index
    %c2_261 = arith.constant 2 : index
    %c0_262 = arith.constant 0 : index
    %c0_263 = arith.constant 0 : index
    %404 = vector.load %arg4[%c5_260, %c2_261, %c0_262, %c0_263] : memref<6x4x32x8xbf16, #tpu.memory_space<vmem>>, vector<1x1x32x8xbf16>
    %405 = vector.shape_cast %404 : vector<1x1x32x8xbf16> to vector<32x8xbf16>
    %cst_264 = arith.constant dense<0.000000e+00> : vector<16x8xf32>
    %406 = tpu.matmul %329, %405, %cst_264 {dimension_numbers = #tpu.dot_dimension_numbers<[1], [0], [0], [1], [0, 0, 1, 1], [], []>} : vector<16x32xbf16>, vector<32x8xbf16>, vector<16x8xf32> -> vector<16x8xf32>
    %c5_265 = arith.constant 5 : index
    %c2_266 = arith.constant 2 : index
    %c0_267 = arith.constant 0 : index
    %407 = vector.load %arg6[%c5_265, %c2_266, %c0_267] : memref<6x4x8xf32, #tpu.memory_space<vmem>>, vector<1x1x8xf32>
    %408 = vector.shape_cast %407 : vector<1x1x8xf32> to vector<8xf32>
    %409 = vector.shape_cast %408 : vector<8xf32> to vector<1x8xf32>
    %410 = vector.broadcast %409 : vector<1x8xf32> to vector<16x8xf32>
    %411 = arith.addf %406, %410 : vector<16x8xf32>
    %412 = arith.truncf %411 : vector<16x8xf32> to vector<16x8xbf16>
    %c3_268 = arith.constant 3 : index
    %c3_269 = arith.constant 3 : index
    %c0_270 = arith.constant 0 : index
    %c0_271 = arith.constant 0 : index
    %413 = vector.load %arg4[%c3_268, %c3_269, %c0_270, %c0_271] : memref<6x4x32x8xbf16, #tpu.memory_space<vmem>>, vector<1x1x32x8xbf16>
    %414 = vector.shape_cast %413 : vector<1x1x32x8xbf16> to vector<32x8xbf16>
    %cst_272 = arith.constant dense<0.000000e+00> : vector<128x8xf32>
    %415 = tpu.matmul %324, %414, %cst_272 {dimension_numbers = #tpu.dot_dimension_numbers<[1], [0], [0], [1], [0, 0, 1, 1], [], []>} : vector<128x32xbf16>, vector<32x8xbf16>, vector<128x8xf32> -> vector<128x8xf32>
    %c3_273 = arith.constant 3 : index
    %c3_274 = arith.constant 3 : index
    %c0_275 = arith.constant 0 : index
    %416 = vector.load %arg6[%c3_273, %c3_274, %c0_275] : memref<6x4x8xf32, #tpu.memory_space<vmem>>, vector<1x1x8xf32>
    %417 = vector.shape_cast %416 : vector<1x1x8xf32> to vector<8xf32>
    %418 = vector.shape_cast %417 : vector<8xf32> to vector<1x8xf32>
    %419 = vector.broadcast %418 : vector<1x8xf32> to vector<128x8xf32>
    %420 = arith.addf %415, %419 : vector<128x8xf32>
    %421 = arith.truncf %420 : vector<128x8xf32> to vector<128x8xbf16>
    %c4_276 = arith.constant 4 : index
    %c3_277 = arith.constant 3 : index
    %c0_278 = arith.constant 0 : index
    %c0_279 = arith.constant 0 : index
    %422 = vector.load %arg4[%c4_276, %c3_277, %c0_278, %c0_279] : memref<6x4x32x8xbf16, #tpu.memory_space<vmem>>, vector<1x1x32x8xbf16>
    %423 = vector.shape_cast %422 : vector<1x1x32x8xbf16> to vector<32x8xbf16>
    %cst_280 = arith.constant dense<0.000000e+00> : vector<16x8xf32>
    %424 = tpu.matmul %329, %423, %cst_280 {dimension_numbers = #tpu.dot_dimension_numbers<[1], [0], [0], [1], [0, 0, 1, 1], [], []>} : vector<16x32xbf16>, vector<32x8xbf16>, vector<16x8xf32> -> vector<16x8xf32>
    %c4_281 = arith.constant 4 : index
    %c3_282 = arith.constant 3 : index
    %c0_283 = arith.constant 0 : index
    %425 = vector.load %arg6[%c4_281, %c3_282, %c0_283] : memref<6x4x8xf32, #tpu.memory_space<vmem>>, vector<1x1x8xf32>
    %426 = vector.shape_cast %425 : vector<1x1x8xf32> to vector<8xf32>
    %427 = vector.shape_cast %426 : vector<8xf32> to vector<1x8xf32>
    %428 = vector.broadcast %427 : vector<1x8xf32> to vector<16x8xf32>
    %429 = arith.addf %424, %428 : vector<16x8xf32>
    %430 = arith.truncf %429 : vector<16x8xf32> to vector<16x8xbf16>
    %c5_284 = arith.constant 5 : index
    %c3_285 = arith.constant 3 : index
    %c0_286 = arith.constant 0 : index
    %c0_287 = arith.constant 0 : index
    %431 = vector.load %arg4[%c5_284, %c3_285, %c0_286, %c0_287] : memref<6x4x32x8xbf16, #tpu.memory_space<vmem>>, vector<1x1x32x8xbf16>
    %432 = vector.shape_cast %431 : vector<1x1x32x8xbf16> to vector<32x8xbf16>
    %cst_288 = arith.constant dense<0.000000e+00> : vector<16x8xf32>
    %433 = tpu.matmul %329, %432, %cst_288 {dimension_numbers = #tpu.dot_dimension_numbers<[1], [0], [0], [1], [0, 0, 1, 1], [], []>} : vector<16x32xbf16>, vector<32x8xbf16>, vector<16x8xf32> -> vector<16x8xf32>
    %c5_289 = arith.constant 5 : index
    %c3_290 = arith.constant 3 : index
    %c0_291 = arith.constant 0 : index
    %434 = vector.load %arg6[%c5_289, %c3_290, %c0_291] : memref<6x4x8xf32, #tpu.memory_space<vmem>>, vector<1x1x8xf32>
    %435 = vector.shape_cast %434 : vector<1x1x8xf32> to vector<8xf32>
    %436 = vector.shape_cast %435 : vector<8xf32> to vector<1x8xf32>
    %437 = vector.broadcast %436 : vector<1x8xf32> to vector<16x8xf32>
    %438 = arith.addf %433, %437 : vector<16x8xf32>
    %439 = arith.truncf %438 : vector<16x8xf32> to vector<16x8xbf16>
    %440 = vector.extract_strided_slice %340 {offsets = [0, 0], sizes = [64, 8], strides = [1, 1]} : vector<128x8xbf16> to vector<64x8xbf16>
    %441 = vector.extract_strided_slice %349 {offsets = [0, 0], sizes = [8, 8], strides = [1, 1]} : vector<16x8xbf16> to vector<8x8xbf16>
    %442 = vector.extract_strided_slice %358 {offsets = [0, 0], sizes = [8, 8], strides = [1, 1]} : vector<16x8xbf16> to vector<8x8xbf16>
    %cst_292 = arith.constant dense<0.000000e+00> : vector<64x8xf32>
    %443 = tpu.matmul %440, %441, %cst_292 {dimension_numbers = #tpu.dot_dimension_numbers<[1], [1], [0], [0], [0, 0, 1, 0], [], []>} : vector<64x8xbf16>, vector<8x8xbf16>, vector<64x8xf32> -> vector<64x8xf32>
    %444 = vector.extract_strided_slice %327 {offsets = [0, 0, 0], sizes = [1, 64, 8], strides = [1, 1, 1]} : vector<2x64x8xf32> to vector<1x64x8xf32>
    %445 = vector.shape_cast %444 : vector<1x64x8xf32> to vector<64x8xf32>
    %446 = arith.addf %443, %445 : vector<64x8xf32>
    %cst_293 = arith.constant dense<0xFF800000> : vector<64xf32>
    %447 = vector.multi_reduction <maximumf>, %446, %cst_293 [1] : vector<64x8xf32> to vector<64xf32>
    %448 = vector.shape_cast %447 : vector<64xf32> to vector<64x1xf32>
    %449 = vector.broadcast %448 : vector<64x1xf32> to vector<64x8xf32>
    %450 = arith.subf %446, %449 : vector<64x8xf32>
    %451 = math.exp %450 : vector<64x8xf32>
    %cst_294 = arith.constant dense<0.000000e+00> : vector<64xf32>
    %452 = vector.multi_reduction <add>, %451, %cst_294 [1] : vector<64x8xf32> to vector<64xf32>
    %453 = vector.shape_cast %452 : vector<64xf32> to vector<64x1xf32>
    %454 = tpu.reciprocal %453 {approx = true} : vector<64x1xf32> -> vector<64x1xf32>
    %455 = vector.broadcast %454 : vector<64x1xf32> to vector<64x8xf32>
    %456 = arith.mulf %451, %455 : vector<64x8xf32>
    %457 = arith.truncf %456 : vector<64x8xf32> to vector<64x8xbf16>
    %cst_295 = arith.constant dense<0.000000e+00> : vector<64x8xf32>
    %458 = tpu.matmul %457, %442, %cst_295 {dimension_numbers = #tpu.dot_dimension_numbers<[1], [0], [0], [1], [0, 0, 1, 1], [], []>} : vector<64x8xbf16>, vector<8x8xbf16>, vector<64x8xf32> -> vector<64x8xf32>
    %c1_296 = arith.constant 1 : index
    %c0_297 = arith.constant 0 : index
    %c0_298 = arith.constant 0 : index
    %c0_299 = arith.constant 0 : index
    %459 = vector.load %arg5[%c1_296, %c0_297, %c0_298, %c0_299] : memref<2x4x8x32xbf16, #tpu.memory_space<vmem>>, vector<1x1x8x32xbf16>
    %460 = vector.shape_cast %459 : vector<1x1x8x32xbf16> to vector<8x32xbf16>
    %461 = arith.truncf %458 : vector<64x8xf32> to vector<64x8xbf16>
    %cst_300 = arith.constant dense<0.000000e+00> : vector<64x32xf32>
    %462 = tpu.matmul %461, %460, %cst_300 {dimension_numbers = #tpu.dot_dimension_numbers<[1], [0], [0], [1], [0, 0, 1, 1], [], []>} : vector<64x8xbf16>, vector<8x32xbf16>, vector<64x32xf32> -> vector<64x32xf32>
    %463 = vector.extract_strided_slice %367 {offsets = [0, 0], sizes = [64, 8], strides = [1, 1]} : vector<128x8xbf16> to vector<64x8xbf16>
    %464 = vector.extract_strided_slice %376 {offsets = [0, 0], sizes = [8, 8], strides = [1, 1]} : vector<16x8xbf16> to vector<8x8xbf16>
    %465 = vector.extract_strided_slice %385 {offsets = [0, 0], sizes = [8, 8], strides = [1, 1]} : vector<16x8xbf16> to vector<8x8xbf16>
    %cst_301 = arith.constant dense<0.000000e+00> : vector<64x8xf32>
    %466 = tpu.matmul %463, %464, %cst_301 {dimension_numbers = #tpu.dot_dimension_numbers<[1], [1], [0], [0], [0, 0, 1, 0], [], []>} : vector<64x8xbf16>, vector<8x8xbf16>, vector<64x8xf32> -> vector<64x8xf32>
    %467 = vector.extract_strided_slice %327 {offsets = [0, 0, 0], sizes = [1, 64, 8], strides = [1, 1, 1]} : vector<2x64x8xf32> to vector<1x64x8xf32>
    %468 = vector.shape_cast %467 : vector<1x64x8xf32> to vector<64x8xf32>
    %469 = arith.addf %466, %468 : vector<64x8xf32>
    %cst_302 = arith.constant dense<0xFF800000> : vector<64xf32>
    %470 = vector.multi_reduction <maximumf>, %469, %cst_302 [1] : vector<64x8xf32> to vector<64xf32>
    %471 = vector.shape_cast %470 : vector<64xf32> to vector<64x1xf32>
    %472 = vector.broadcast %471 : vector<64x1xf32> to vector<64x8xf32>
    %473 = arith.subf %469, %472 : vector<64x8xf32>
    %474 = math.exp %473 : vector<64x8xf32>
    %cst_303 = arith.constant dense<0.000000e+00> : vector<64xf32>
    %475 = vector.multi_reduction <add>, %474, %cst_303 [1] : vector<64x8xf32> to vector<64xf32>
    %476 = vector.shape_cast %475 : vector<64xf32> to vector<64x1xf32>
    %477 = tpu.reciprocal %476 {approx = true} : vector<64x1xf32> -> vector<64x1xf32>
    %478 = vector.broadcast %477 : vector<64x1xf32> to vector<64x8xf32>
    %479 = arith.mulf %474, %478 : vector<64x8xf32>
    %480 = arith.truncf %479 : vector<64x8xf32> to vector<64x8xbf16>
    %cst_304 = arith.constant dense<0.000000e+00> : vector<64x8xf32>
    %481 = tpu.matmul %480, %465, %cst_304 {dimension_numbers = #tpu.dot_dimension_numbers<[1], [0], [0], [1], [0, 0, 1, 1], [], []>} : vector<64x8xbf16>, vector<8x8xbf16>, vector<64x8xf32> -> vector<64x8xf32>
    %c1_305 = arith.constant 1 : index
    %c1_306 = arith.constant 1 : index
    %c0_307 = arith.constant 0 : index
    %c0_308 = arith.constant 0 : index
    %482 = vector.load %arg5[%c1_305, %c1_306, %c0_307, %c0_308] : memref<2x4x8x32xbf16, #tpu.memory_space<vmem>>, vector<1x1x8x32xbf16>
    %483 = vector.shape_cast %482 : vector<1x1x8x32xbf16> to vector<8x32xbf16>
    %484 = arith.truncf %481 : vector<64x8xf32> to vector<64x8xbf16>
    %cst_309 = arith.constant dense<0.000000e+00> : vector<64x32xf32>
    %485 = tpu.matmul %484, %483, %cst_309 {dimension_numbers = #tpu.dot_dimension_numbers<[1], [0], [0], [1], [0, 0, 1, 1], [], []>} : vector<64x8xbf16>, vector<8x32xbf16>, vector<64x32xf32> -> vector<64x32xf32>
    %486 = arith.addf %462, %485 : vector<64x32xf32>
    %487 = vector.extract_strided_slice %394 {offsets = [0, 0], sizes = [64, 8], strides = [1, 1]} : vector<128x8xbf16> to vector<64x8xbf16>
    %488 = vector.extract_strided_slice %403 {offsets = [0, 0], sizes = [8, 8], strides = [1, 1]} : vector<16x8xbf16> to vector<8x8xbf16>
    %489 = vector.extract_strided_slice %412 {offsets = [0, 0], sizes = [8, 8], strides = [1, 1]} : vector<16x8xbf16> to vector<8x8xbf16>
    %cst_310 = arith.constant dense<0.000000e+00> : vector<64x8xf32>
    %490 = tpu.matmul %487, %488, %cst_310 {dimension_numbers = #tpu.dot_dimension_numbers<[1], [1], [0], [0], [0, 0, 1, 0], [], []>} : vector<64x8xbf16>, vector<8x8xbf16>, vector<64x8xf32> -> vector<64x8xf32>
    %491 = vector.extract_strided_slice %327 {offsets = [0, 0, 0], sizes = [1, 64, 8], strides = [1, 1, 1]} : vector<2x64x8xf32> to vector<1x64x8xf32>
    %492 = vector.shape_cast %491 : vector<1x64x8xf32> to vector<64x8xf32>
    %493 = arith.addf %490, %492 : vector<64x8xf32>
    %cst_311 = arith.constant dense<0xFF800000> : vector<64xf32>
    %494 = vector.multi_reduction <maximumf>, %493, %cst_311 [1] : vector<64x8xf32> to vector<64xf32>
    %495 = vector.shape_cast %494 : vector<64xf32> to vector<64x1xf32>
    %496 = vector.broadcast %495 : vector<64x1xf32> to vector<64x8xf32>
    %497 = arith.subf %493, %496 : vector<64x8xf32>
    %498 = math.exp %497 : vector<64x8xf32>
    %cst_312 = arith.constant dense<0.000000e+00> : vector<64xf32>
    %499 = vector.multi_reduction <add>, %498, %cst_312 [1] : vector<64x8xf32> to vector<64xf32>
    %500 = vector.shape_cast %499 : vector<64xf32> to vector<64x1xf32>
    %501 = tpu.reciprocal %500 {approx = true} : vector<64x1xf32> -> vector<64x1xf32>
    %502 = vector.broadcast %501 : vector<64x1xf32> to vector<64x8xf32>
    %503 = arith.mulf %498, %502 : vector<64x8xf32>
    %504 = arith.truncf %503 : vector<64x8xf32> to vector<64x8xbf16>
    %cst_313 = arith.constant dense<0.000000e+00> : vector<64x8xf32>
    %505 = tpu.matmul %504, %489, %cst_313 {dimension_numbers = #tpu.dot_dimension_numbers<[1], [0], [0], [1], [0, 0, 1, 1], [], []>} : vector<64x8xbf16>, vector<8x8xbf16>, vector<64x8xf32> -> vector<64x8xf32>
    %c1_314 = arith.constant 1 : index
    %c2_315 = arith.constant 2 : index
    %c0_316 = arith.constant 0 : index
    %c0_317 = arith.constant 0 : index
    %506 = vector.load %arg5[%c1_314, %c2_315, %c0_316, %c0_317] : memref<2x4x8x32xbf16, #tpu.memory_space<vmem>>, vector<1x1x8x32xbf16>
    %507 = vector.shape_cast %506 : vector<1x1x8x32xbf16> to vector<8x32xbf16>
    %508 = arith.truncf %505 : vector<64x8xf32> to vector<64x8xbf16>
    %cst_318 = arith.constant dense<0.000000e+00> : vector<64x32xf32>
    %509 = tpu.matmul %508, %507, %cst_318 {dimension_numbers = #tpu.dot_dimension_numbers<[1], [0], [0], [1], [0, 0, 1, 1], [], []>} : vector<64x8xbf16>, vector<8x32xbf16>, vector<64x32xf32> -> vector<64x32xf32>
    %510 = arith.addf %486, %509 : vector<64x32xf32>
    %511 = vector.extract_strided_slice %421 {offsets = [0, 0], sizes = [64, 8], strides = [1, 1]} : vector<128x8xbf16> to vector<64x8xbf16>
    %512 = vector.extract_strided_slice %430 {offsets = [0, 0], sizes = [8, 8], strides = [1, 1]} : vector<16x8xbf16> to vector<8x8xbf16>
    %513 = vector.extract_strided_slice %439 {offsets = [0, 0], sizes = [8, 8], strides = [1, 1]} : vector<16x8xbf16> to vector<8x8xbf16>
    %cst_319 = arith.constant dense<0.000000e+00> : vector<64x8xf32>
    %514 = tpu.matmul %511, %512, %cst_319 {dimension_numbers = #tpu.dot_dimension_numbers<[1], [1], [0], [0], [0, 0, 1, 0], [], []>} : vector<64x8xbf16>, vector<8x8xbf16>, vector<64x8xf32> -> vector<64x8xf32>
    %515 = vector.extract_strided_slice %327 {offsets = [0, 0, 0], sizes = [1, 64, 8], strides = [1, 1, 1]} : vector<2x64x8xf32> to vector<1x64x8xf32>
    %516 = vector.shape_cast %515 : vector<1x64x8xf32> to vector<64x8xf32>
    %517 = arith.addf %514, %516 : vector<64x8xf32>
    %cst_320 = arith.constant dense<0xFF800000> : vector<64xf32>
    %518 = vector.multi_reduction <maximumf>, %517, %cst_320 [1] : vector<64x8xf32> to vector<64xf32>
    %519 = vector.shape_cast %518 : vector<64xf32> to vector<64x1xf32>
    %520 = vector.broadcast %519 : vector<64x1xf32> to vector<64x8xf32>
    %521 = arith.subf %517, %520 : vector<64x8xf32>
    %522 = math.exp %521 : vector<64x8xf32>
    %cst_321 = arith.constant dense<0.000000e+00> : vector<64xf32>
    %523 = vector.multi_reduction <add>, %522, %cst_321 [1] : vector<64x8xf32> to vector<64xf32>
    %524 = vector.shape_cast %523 : vector<64xf32> to vector<64x1xf32>
    %525 = tpu.reciprocal %524 {approx = true} : vector<64x1xf32> -> vector<64x1xf32>
    %526 = vector.broadcast %525 : vector<64x1xf32> to vector<64x8xf32>
    %527 = arith.mulf %522, %526 : vector<64x8xf32>
    %528 = arith.truncf %527 : vector<64x8xf32> to vector<64x8xbf16>
    %cst_322 = arith.constant dense<0.000000e+00> : vector<64x8xf32>
    %529 = tpu.matmul %528, %513, %cst_322 {dimension_numbers = #tpu.dot_dimension_numbers<[1], [0], [0], [1], [0, 0, 1, 1], [], []>} : vector<64x8xbf16>, vector<8x8xbf16>, vector<64x8xf32> -> vector<64x8xf32>
    %c1_323 = arith.constant 1 : index
    %c3_324 = arith.constant 3 : index
    %c0_325 = arith.constant 0 : index
    %c0_326 = arith.constant 0 : index
    %530 = vector.load %arg5[%c1_323, %c3_324, %c0_325, %c0_326] : memref<2x4x8x32xbf16, #tpu.memory_space<vmem>>, vector<1x1x8x32xbf16>
    %531 = vector.shape_cast %530 : vector<1x1x8x32xbf16> to vector<8x32xbf16>
    %532 = arith.truncf %529 : vector<64x8xf32> to vector<64x8xbf16>
    %cst_327 = arith.constant dense<0.000000e+00> : vector<64x32xf32>
    %533 = tpu.matmul %532, %531, %cst_327 {dimension_numbers = #tpu.dot_dimension_numbers<[1], [0], [0], [1], [0, 0, 1, 1], [], []>} : vector<64x8xbf16>, vector<8x32xbf16>, vector<64x32xf32> -> vector<64x32xf32>
    %534 = arith.addf %510, %533 : vector<64x32xf32>
    %535 = vector.shape_cast %331 : vector<32xf32> to vector<1x32xf32>
    %536 = vector.broadcast %535 : vector<1x32xf32> to vector<64x32xf32>
    %537 = arith.addf %534, %536 : vector<64x32xf32>
    %538 = vector.extract_strided_slice %340 {offsets = [64, 0], sizes = [64, 8], strides = [1, 1]} : vector<128x8xbf16> to vector<64x8xbf16>
    %539 = vector.extract_strided_slice %349 {offsets = [8, 0], sizes = [8, 8], strides = [1, 1]} : vector<16x8xbf16> to vector<8x8xbf16>
    %540 = vector.extract_strided_slice %358 {offsets = [8, 0], sizes = [8, 8], strides = [1, 1]} : vector<16x8xbf16> to vector<8x8xbf16>
    %cst_328 = arith.constant dense<0.000000e+00> : vector<64x8xf32>
    %541 = tpu.matmul %538, %539, %cst_328 {dimension_numbers = #tpu.dot_dimension_numbers<[1], [1], [0], [0], [0, 0, 1, 0], [], []>} : vector<64x8xbf16>, vector<8x8xbf16>, vector<64x8xf32> -> vector<64x8xf32>
    %542 = vector.extract_strided_slice %327 {offsets = [1, 0, 0], sizes = [1, 64, 8], strides = [1, 1, 1]} : vector<2x64x8xf32> to vector<1x64x8xf32>
    %543 = vector.shape_cast %542 : vector<1x64x8xf32> to vector<64x8xf32>
    %544 = arith.addf %541, %543 : vector<64x8xf32>
    %cst_329 = arith.constant dense<0xFF800000> : vector<64xf32>
    %545 = vector.multi_reduction <maximumf>, %544, %cst_329 [1] : vector<64x8xf32> to vector<64xf32>
    %546 = vector.shape_cast %545 : vector<64xf32> to vector<64x1xf32>
    %547 = vector.broadcast %546 : vector<64x1xf32> to vector<64x8xf32>
    %548 = arith.subf %544, %547 : vector<64x8xf32>
    %549 = math.exp %548 : vector<64x8xf32>
    %cst_330 = arith.constant dense<0.000000e+00> : vector<64xf32>
    %550 = vector.multi_reduction <add>, %549, %cst_330 [1] : vector<64x8xf32> to vector<64xf32>
    %551 = vector.shape_cast %550 : vector<64xf32> to vector<64x1xf32>
    %552 = tpu.reciprocal %551 {approx = true} : vector<64x1xf32> -> vector<64x1xf32>
    %553 = vector.broadcast %552 : vector<64x1xf32> to vector<64x8xf32>
    %554 = arith.mulf %549, %553 : vector<64x8xf32>
    %555 = arith.truncf %554 : vector<64x8xf32> to vector<64x8xbf16>
    %cst_331 = arith.constant dense<0.000000e+00> : vector<64x8xf32>
    %556 = tpu.matmul %555, %540, %cst_331 {dimension_numbers = #tpu.dot_dimension_numbers<[1], [0], [0], [1], [0, 0, 1, 1], [], []>} : vector<64x8xbf16>, vector<8x8xbf16>, vector<64x8xf32> -> vector<64x8xf32>
    %c1_332 = arith.constant 1 : index
    %c0_333 = arith.constant 0 : index
    %c0_334 = arith.constant 0 : index
    %c0_335 = arith.constant 0 : index
    %557 = vector.load %arg5[%c1_332, %c0_333, %c0_334, %c0_335] : memref<2x4x8x32xbf16, #tpu.memory_space<vmem>>, vector<1x1x8x32xbf16>
    %558 = vector.shape_cast %557 : vector<1x1x8x32xbf16> to vector<8x32xbf16>
    %559 = arith.truncf %556 : vector<64x8xf32> to vector<64x8xbf16>
    %cst_336 = arith.constant dense<0.000000e+00> : vector<64x32xf32>
    %560 = tpu.matmul %559, %558, %cst_336 {dimension_numbers = #tpu.dot_dimension_numbers<[1], [0], [0], [1], [0, 0, 1, 1], [], []>} : vector<64x8xbf16>, vector<8x32xbf16>, vector<64x32xf32> -> vector<64x32xf32>
    %561 = vector.extract_strided_slice %367 {offsets = [64, 0], sizes = [64, 8], strides = [1, 1]} : vector<128x8xbf16> to vector<64x8xbf16>
    %562 = vector.extract_strided_slice %376 {offsets = [8, 0], sizes = [8, 8], strides = [1, 1]} : vector<16x8xbf16> to vector<8x8xbf16>
    %563 = vector.extract_strided_slice %385 {offsets = [8, 0], sizes = [8, 8], strides = [1, 1]} : vector<16x8xbf16> to vector<8x8xbf16>
    %cst_337 = arith.constant dense<0.000000e+00> : vector<64x8xf32>
    %564 = tpu.matmul %561, %562, %cst_337 {dimension_numbers = #tpu.dot_dimension_numbers<[1], [1], [0], [0], [0, 0, 1, 0], [], []>} : vector<64x8xbf16>, vector<8x8xbf16>, vector<64x8xf32> -> vector<64x8xf32>
    %565 = vector.extract_strided_slice %327 {offsets = [1, 0, 0], sizes = [1, 64, 8], strides = [1, 1, 1]} : vector<2x64x8xf32> to vector<1x64x8xf32>
    %566 = vector.shape_cast %565 : vector<1x64x8xf32> to vector<64x8xf32>
    %567 = arith.addf %564, %566 : vector<64x8xf32>
    %cst_338 = arith.constant dense<0xFF800000> : vector<64xf32>
    %568 = vector.multi_reduction <maximumf>, %567, %cst_338 [1] : vector<64x8xf32> to vector<64xf32>
    %569 = vector.shape_cast %568 : vector<64xf32> to vector<64x1xf32>
    %570 = vector.broadcast %569 : vector<64x1xf32> to vector<64x8xf32>
    %571 = arith.subf %567, %570 : vector<64x8xf32>
    %572 = math.exp %571 : vector<64x8xf32>
    %cst_339 = arith.constant dense<0.000000e+00> : vector<64xf32>
    %573 = vector.multi_reduction <add>, %572, %cst_339 [1] : vector<64x8xf32> to vector<64xf32>
    %574 = vector.shape_cast %573 : vector<64xf32> to vector<64x1xf32>
    %575 = tpu.reciprocal %574 {approx = true} : vector<64x1xf32> -> vector<64x1xf32>
    %576 = vector.broadcast %575 : vector<64x1xf32> to vector<64x8xf32>
    %577 = arith.mulf %572, %576 : vector<64x8xf32>
    %578 = arith.truncf %577 : vector<64x8xf32> to vector<64x8xbf16>
    %cst_340 = arith.constant dense<0.000000e+00> : vector<64x8xf32>
    %579 = tpu.matmul %578, %563, %cst_340 {dimension_numbers = #tpu.dot_dimension_numbers<[1], [0], [0], [1], [0, 0, 1, 1], [], []>} : vector<64x8xbf16>, vector<8x8xbf16>, vector<64x8xf32> -> vector<64x8xf32>
    %c1_341 = arith.constant 1 : index
    %c1_342 = arith.constant 1 : index
    %c0_343 = arith.constant 0 : index
    %c0_344 = arith.constant 0 : index
    %580 = vector.load %arg5[%c1_341, %c1_342, %c0_343, %c0_344] : memref<2x4x8x32xbf16, #tpu.memory_space<vmem>>, vector<1x1x8x32xbf16>
    %581 = vector.shape_cast %580 : vector<1x1x8x32xbf16> to vector<8x32xbf16>
    %582 = arith.truncf %579 : vector<64x8xf32> to vector<64x8xbf16>
    %cst_345 = arith.constant dense<0.000000e+00> : vector<64x32xf32>
    %583 = tpu.matmul %582, %581, %cst_345 {dimension_numbers = #tpu.dot_dimension_numbers<[1], [0], [0], [1], [0, 0, 1, 1], [], []>} : vector<64x8xbf16>, vector<8x32xbf16>, vector<64x32xf32> -> vector<64x32xf32>
    %584 = arith.addf %560, %583 : vector<64x32xf32>
    %585 = vector.extract_strided_slice %394 {offsets = [64, 0], sizes = [64, 8], strides = [1, 1]} : vector<128x8xbf16> to vector<64x8xbf16>
    %586 = vector.extract_strided_slice %403 {offsets = [8, 0], sizes = [8, 8], strides = [1, 1]} : vector<16x8xbf16> to vector<8x8xbf16>
    %587 = vector.extract_strided_slice %412 {offsets = [8, 0], sizes = [8, 8], strides = [1, 1]} : vector<16x8xbf16> to vector<8x8xbf16>
    %cst_346 = arith.constant dense<0.000000e+00> : vector<64x8xf32>
    %588 = tpu.matmul %585, %586, %cst_346 {dimension_numbers = #tpu.dot_dimension_numbers<[1], [1], [0], [0], [0, 0, 1, 0], [], []>} : vector<64x8xbf16>, vector<8x8xbf16>, vector<64x8xf32> -> vector<64x8xf32>
    %589 = vector.extract_strided_slice %327 {offsets = [1, 0, 0], sizes = [1, 64, 8], strides = [1, 1, 1]} : vector<2x64x8xf32> to vector<1x64x8xf32>
    %590 = vector.shape_cast %589 : vector<1x64x8xf32> to vector<64x8xf32>
    %591 = arith.addf %588, %590 : vector<64x8xf32>
    %cst_347 = arith.constant dense<0xFF800000> : vector<64xf32>
    %592 = vector.multi_reduction <maximumf>, %591, %cst_347 [1] : vector<64x8xf32> to vector<64xf32>
    %593 = vector.shape_cast %592 : vector<64xf32> to vector<64x1xf32>
    %594 = vector.broadcast %593 : vector<64x1xf32> to vector<64x8xf32>
    %595 = arith.subf %591, %594 : vector<64x8xf32>
    %596 = math.exp %595 : vector<64x8xf32>
    %cst_348 = arith.constant dense<0.000000e+00> : vector<64xf32>
    %597 = vector.multi_reduction <add>, %596, %cst_348 [1] : vector<64x8xf32> to vector<64xf32>
    %598 = vector.shape_cast %597 : vector<64xf32> to vector<64x1xf32>
    %599 = tpu.reciprocal %598 {approx = true} : vector<64x1xf32> -> vector<64x1xf32>
    %600 = vector.broadcast %599 : vector<64x1xf32> to vector<64x8xf32>
    %601 = arith.mulf %596, %600 : vector<64x8xf32>
    %602 = arith.truncf %601 : vector<64x8xf32> to vector<64x8xbf16>
    %cst_349 = arith.constant dense<0.000000e+00> : vector<64x8xf32>
    %603 = tpu.matmul %602, %587, %cst_349 {dimension_numbers = #tpu.dot_dimension_numbers<[1], [0], [0], [1], [0, 0, 1, 1], [], []>} : vector<64x8xbf16>, vector<8x8xbf16>, vector<64x8xf32> -> vector<64x8xf32>
    %c1_350 = arith.constant 1 : index
    %c2_351 = arith.constant 2 : index
    %c0_352 = arith.constant 0 : index
    %c0_353 = arith.constant 0 : index
    %604 = vector.load %arg5[%c1_350, %c2_351, %c0_352, %c0_353] : memref<2x4x8x32xbf16, #tpu.memory_space<vmem>>, vector<1x1x8x32xbf16>
    %605 = vector.shape_cast %604 : vector<1x1x8x32xbf16> to vector<8x32xbf16>
    %606 = arith.truncf %603 : vector<64x8xf32> to vector<64x8xbf16>
    %cst_354 = arith.constant dense<0.000000e+00> : vector<64x32xf32>
    %607 = tpu.matmul %606, %605, %cst_354 {dimension_numbers = #tpu.dot_dimension_numbers<[1], [0], [0], [1], [0, 0, 1, 1], [], []>} : vector<64x8xbf16>, vector<8x32xbf16>, vector<64x32xf32> -> vector<64x32xf32>
    %608 = arith.addf %584, %607 : vector<64x32xf32>
    %609 = vector.extract_strided_slice %421 {offsets = [64, 0], sizes = [64, 8], strides = [1, 1]} : vector<128x8xbf16> to vector<64x8xbf16>
    %610 = vector.extract_strided_slice %430 {offsets = [8, 0], sizes = [8, 8], strides = [1, 1]} : vector<16x8xbf16> to vector<8x8xbf16>
    %611 = vector.extract_strided_slice %439 {offsets = [8, 0], sizes = [8, 8], strides = [1, 1]} : vector<16x8xbf16> to vector<8x8xbf16>
    %cst_355 = arith.constant dense<0.000000e+00> : vector<64x8xf32>
    %612 = tpu.matmul %609, %610, %cst_355 {dimension_numbers = #tpu.dot_dimension_numbers<[1], [1], [0], [0], [0, 0, 1, 0], [], []>} : vector<64x8xbf16>, vector<8x8xbf16>, vector<64x8xf32> -> vector<64x8xf32>
    %613 = vector.extract_strided_slice %327 {offsets = [1, 0, 0], sizes = [1, 64, 8], strides = [1, 1, 1]} : vector<2x64x8xf32> to vector<1x64x8xf32>
    %614 = vector.shape_cast %613 : vector<1x64x8xf32> to vector<64x8xf32>
    %615 = arith.addf %612, %614 : vector<64x8xf32>
    %cst_356 = arith.constant dense<0xFF800000> : vector<64xf32>
    %616 = vector.multi_reduction <maximumf>, %615, %cst_356 [1] : vector<64x8xf32> to vector<64xf32>
    %617 = vector.shape_cast %616 : vector<64xf32> to vector<64x1xf32>
    %618 = vector.broadcast %617 : vector<64x1xf32> to vector<64x8xf32>
    %619 = arith.subf %615, %618 : vector<64x8xf32>
    %620 = math.exp %619 : vector<64x8xf32>
    %cst_357 = arith.constant dense<0.000000e+00> : vector<64xf32>
    %621 = vector.multi_reduction <add>, %620, %cst_357 [1] : vector<64x8xf32> to vector<64xf32>
    %622 = vector.shape_cast %621 : vector<64xf32> to vector<64x1xf32>
    %623 = tpu.reciprocal %622 {approx = true} : vector<64x1xf32> -> vector<64x1xf32>
    %624 = vector.broadcast %623 : vector<64x1xf32> to vector<64x8xf32>
    %625 = arith.mulf %620, %624 : vector<64x8xf32>
    %626 = arith.truncf %625 : vector<64x8xf32> to vector<64x8xbf16>
    %cst_358 = arith.constant dense<0.000000e+00> : vector<64x8xf32>
    %627 = tpu.matmul %626, %611, %cst_358 {dimension_numbers = #tpu.dot_dimension_numbers<[1], [0], [0], [1], [0, 0, 1, 1], [], []>} : vector<64x8xbf16>, vector<8x8xbf16>, vector<64x8xf32> -> vector<64x8xf32>
    %c1_359 = arith.constant 1 : index
    %c3_360 = arith.constant 3 : index
    %c0_361 = arith.constant 0 : index
    %c0_362 = arith.constant 0 : index
    %628 = vector.load %arg5[%c1_359, %c3_360, %c0_361, %c0_362] : memref<2x4x8x32xbf16, #tpu.memory_space<vmem>>, vector<1x1x8x32xbf16>
    %629 = vector.shape_cast %628 : vector<1x1x8x32xbf16> to vector<8x32xbf16>
    %630 = arith.truncf %627 : vector<64x8xf32> to vector<64x8xbf16>
    %cst_363 = arith.constant dense<0.000000e+00> : vector<64x32xf32>
    %631 = tpu.matmul %630, %629, %cst_363 {dimension_numbers = #tpu.dot_dimension_numbers<[1], [0], [0], [1], [0, 0, 1, 1], [], []>} : vector<64x8xbf16>, vector<8x32xbf16>, vector<64x32xf32> -> vector<64x32xf32>
    %632 = arith.addf %608, %631 : vector<64x32xf32>
    %633 = vector.shape_cast %331 : vector<32xf32> to vector<1x32xf32>
    %634 = vector.broadcast %633 : vector<1x32xf32> to vector<64x32xf32>
    %635 = arith.addf %632, %634 : vector<64x32xf32>
    %636 = tpu.concatenate %537, %635 in 0 : vector<64x32xf32>, vector<64x32xf32> -> vector<128x32xf32>
    %637 = arith.addf %323, %636 : vector<128x32xf32>
    %c1_364 = arith.constant 1 : index
    %c1_365 = arith.constant 1 : index
    %c0_366 = arith.constant 0 : index
    %638 = vector.load %arg7[%c1_364, %c1_365, %c0_366] : memref<2x3x32xf32, #tpu.memory_space<vmem>>, vector<1x1x32xf32>
    %639 = vector.shape_cast %638 : vector<1x1x32xf32> to vector<32xf32>
    %c1_367 = arith.constant 1 : index
    %c2_368 = arith.constant 2 : index
    %c0_369 = arith.constant 0 : index
    %640 = vector.load %arg7[%c1_367, %c2_368, %c0_369] : memref<2x3x32xf32, #tpu.memory_space<vmem>>, vector<1x1x32xf32>
    %641 = vector.shape_cast %640 : vector<1x1x32xf32> to vector<32xf32>
    %cst_370 = arith.constant dense<0.000000e+00> : vector<128xf32>
    %642 = vector.multi_reduction <add>, %637, %cst_370 [1] : vector<128x32xf32> to vector<128xf32>
    %643 = vector.shape_cast %642 : vector<128xf32> to vector<128x1xf32>
    %cst_371 = arith.constant 3.200000e+01 : f32
    %644 = vector.broadcast %cst_371 : f32 to vector<128x1xf32>
    %645 = arith.divf %643, %644 : vector<128x1xf32>
    %646 = arith.mulf %637, %637 : vector<128x32xf32>
    %cst_372 = arith.constant dense<0.000000e+00> : vector<128xf32>
    %647 = vector.multi_reduction <add>, %646, %cst_372 [1] : vector<128x32xf32> to vector<128xf32>
    %648 = vector.shape_cast %647 : vector<128xf32> to vector<128x1xf32>
    %cst_373 = arith.constant 3.200000e+01 : f32
    %649 = vector.broadcast %cst_373 : f32 to vector<128x1xf32>
    %650 = arith.divf %648, %649 : vector<128x1xf32>
    %651 = arith.mulf %645, %645 : vector<128x1xf32>
    %652 = arith.subf %650, %651 : vector<128x1xf32>
    %653 = vector.broadcast %645 : vector<128x1xf32> to vector<128x32xf32>
    %654 = arith.subf %637, %653 : vector<128x32xf32>
    %cst_374 = arith.constant 9.99999974E-6 : f32
    %655 = vector.broadcast %cst_374 : f32 to vector<128x1xf32>
    %656 = arith.addf %652, %655 : vector<128x1xf32>
    %657 = math.rsqrt %656 : vector<128x1xf32>
    %658 = vector.broadcast %657 : vector<128x1xf32> to vector<128x32xf32>
    %659 = arith.mulf %654, %658 : vector<128x32xf32>
    %660 = vector.shape_cast %639 : vector<32xf32> to vector<1x32xf32>
    %661 = vector.broadcast %660 : vector<1x32xf32> to vector<128x32xf32>
    %662 = arith.mulf %659, %661 : vector<128x32xf32>
    %663 = vector.shape_cast %641 : vector<32xf32> to vector<1x32xf32>
    %664 = vector.broadcast %663 : vector<1x32xf32> to vector<128x32xf32>
    %665 = arith.addf %662, %664 : vector<128x32xf32>
    %666 = arith.truncf %665 : vector<128x32xf32> to vector<128x32xbf16>
    %c1_375 = arith.constant 1 : index
    %c0_376 = arith.constant 0 : index
    %c0_377 = arith.constant 0 : index
    %667 = vector.load %arg8[%c1_375, %c0_376, %c0_377] : memref<2x64x256xbf16, #tpu.memory_space<vmem>>, vector<1x64x256xbf16>
    %668 = vector.shape_cast %667 : vector<1x64x256xbf16> to vector<64x256xbf16>
    %669 = vector.extract_strided_slice %666 {offsets = [0, 0], sizes = [64, 32], strides = [1, 1]} : vector<128x32xbf16> to vector<64x32xbf16>
    %cst_378 = arith.constant dense<0.000000e+00> : vector<32x256xf32>
    %670 = tpu.matmul %669, %668, %cst_378 {dimension_numbers = #tpu.dot_dimension_numbers<[0], [0], [1], [1], [0, 1, 1, 1], [], []>} : vector<64x32xbf16>, vector<64x256xbf16>, vector<32x256xf32> -> vector<32x256xf32>
    %c0_379 = arith.constant 0 : index
    %c0_380 = arith.constant 0 : index
    %c0_381 = arith.constant 0 : index
    %671 = vector.load %arg1[%c0_379, %c0_380, %c0_381] : memref<2x32x256xf32, #tpu.memory_space<vmem>>, vector<1x32x256xf32>
    %672 = vector.shape_cast %671 : vector<1x32x256xf32> to vector<32x256xf32>
    %673 = arith.addf %670, %672 : vector<32x256xf32>
    %c0_382 = arith.constant 0 : index
    %c0_383 = arith.constant 0 : index
    %c0_384 = arith.constant 0 : index
    %674 = vector.load %arg9[%c0_382, %c0_383, %c0_384] : memref<2x32x256xf32, #tpu.memory_space<vmem>>, vector<1x32x256xf32>
    %675 = vector.shape_cast %674 : vector<1x32x256xf32> to vector<32x256xf32>
    %676 = vector.shape_cast %673 : vector<32x256xf32> to vector<1x32x256xf32>
    tpu.vector_store %arg9[%c0_382, %c0_383, %c0_384], %676 {strides = array<i32>} : memref<2x32x256xf32, #tpu.memory_space<vmem>>, vector<1x32x256xf32>,
    %677 = vector.extract_strided_slice %666 {offsets = [64, 0], sizes = [64, 32], strides = [1, 1]} : vector<128x32xbf16> to vector<64x32xbf16>
    %cst_385 = arith.constant dense<0.000000e+00> : vector<32x256xf32>
    %678 = tpu.matmul %677, %668, %cst_385 {dimension_numbers = #tpu.dot_dimension_numbers<[0], [0], [1], [1], [0, 1, 1, 1], [], []>} : vector<64x32xbf16>, vector<64x256xbf16>, vector<32x256xf32> -> vector<32x256xf32>
    %c1_386 = arith.constant 1 : index
    %c0_387 = arith.constant 0 : index
    %c0_388 = arith.constant 0 : index
    %679 = vector.load %arg1[%c1_386, %c0_387, %c0_388] : memref<2x32x256xf32, #tpu.memory_space<vmem>>, vector<1x32x256xf32>
    %680 = vector.shape_cast %679 : vector<1x32x256xf32> to vector<32x256xf32>
    %681 = arith.addf %678, %680 : vector<32x256xf32>
    %c1_389 = arith.constant 1 : index
    %c0_390 = arith.constant 0 : index
    %c0_391 = arith.constant 0 : index
    %682 = vector.load %arg9[%c1_389, %c0_390, %c0_391] : memref<2x32x256xf32, #tpu.memory_space<vmem>>, vector<1x32x256xf32>
    %683 = vector.shape_cast %682 : vector<1x32x256xf32> to vector<32x256xf32>
    %684 = vector.shape_cast %681 : vector<32x256xf32> to vector<1x32x256xf32>
    tpu.vector_store %arg9[%c1_389, %c0_390, %c0_391], %684 {strides = array<i32>} : memref<2x32x256xf32, #tpu.memory_space<vmem>>, vector<1x32x256xf32>,
    %cst_392 = arith.constant dense<0.000000e+00> : vector<2x8x64xf32>
    %685 = tpu.matmul %326, %325, %cst_392 {dimension_numbers = #tpu.dot_dimension_numbers<[2], [2], [1], [1], [0, 0, 0, 1, 1, 1], [0], [0]>} : vector<2x8x32xbf16>, vector<2x64x32xbf16>, vector<2x8x64xf32> -> vector<2x8x64xf32>
    %c0_393 = arith.constant 0 : index
    %c0_394 = arith.constant 0 : index
    %c0_395 = arith.constant 0 : index
    %686 = vector.load %arg10[%c0_393, %c0_394, %c0_395] : memref<2x8x64xf32, #tpu.memory_space<vmem>>, vector<2x8x64xf32>
    tpu.vector_store %arg10[%c0_393, %c0_394, %c0_395], %685 {strides = array<i32>} : memref<2x8x64xf32, #tpu.memory_space<vmem>>, vector<2x8x64xf32>,
    return
  }
  func.func @transform_0(%arg0: i32) -> (i32, i32, i32) {
    %c0_i32 = arith.constant 0 : i32
    %c0_i32_0 = arith.constant 0 : i32
    %c0_i32_1 = arith.constant 0 : i32
    return %arg0, %c0_i32, %c0_i32_0 : i32, i32, i32
  }
  func.func @transform_1(%arg0: i32) -> (i32, i32, i32) {
    %c0_i32 = arith.constant 0 : i32
    %c0_i32_0 = arith.constant 0 : i32
    %c0_i32_1 = arith.constant 0 : i32
    return %arg0, %c0_i32, %c0_i32_0 : i32, i32, i32
  }
  func.func @transform_2(%arg0: i32) -> (i32, i32, i32) {
    %c0_i32 = arith.constant 0 : i32
    %c0_i32_0 = arith.constant 0 : i32
    %c0_i32_1 = arith.constant 0 : i32
    return %arg0, %c0_i32, %c0_i32_0 : i32, i32, i32
  }
  func.func @transform_3(%arg0: i32) -> (i32, i32, i32, i32) {
    %c0_i32 = arith.constant 0 : i32
    %c0_i32_0 = arith.constant 0 : i32
    %c0_i32_1 = arith.constant 0 : i32
    %c0_i32_2 = arith.constant 0 : i32
    %c0_i32_3 = arith.constant 0 : i32
    return %c0_i32, %c0_i32_0, %c0_i32_1, %c0_i32_2 : i32, i32, i32, i32
  }
  func.func @transform_4(%arg0: i32) -> (i32, i32, i32, i32) {
    %c0_i32 = arith.constant 0 : i32
    %c0_i32_0 = arith.constant 0 : i32
    %c0_i32_1 = arith.constant 0 : i32
    %c0_i32_2 = arith.constant 0 : i32
    %c0_i32_3 = arith.constant 0 : i32
    return %c0_i32, %c0_i32_0, %c0_i32_1, %c0_i32_2 : i32, i32, i32, i32
  }
  func.func @transform_5(%arg0: i32) -> (i32, i32, i32) {
    %c0_i32 = arith.constant 0 : i32
    %c0_i32_0 = arith.constant 0 : i32
    %c0_i32_1 = arith.constant 0 : i32
    %c0_i32_2 = arith.constant 0 : i32
    return %c0_i32, %c0_i32_0, %c0_i32_1 : i32, i32, i32
  }
  func.func @transform_6(%arg0: i32) -> (i32, i32, i32) {
    %c0_i32 = arith.constant 0 : i32
    %c0_i32_0 = arith.constant 0 : i32
    %c0_i32_1 = arith.constant 0 : i32
    %c0_i32_2 = arith.constant 0 : i32
    return %c0_i32, %c0_i32_0, %c0_i32_1 : i32, i32, i32
  }
  func.func @transform_7(%arg0: i32) -> (i32, i32, i32) {
    %c0_i32 = arith.constant 0 : i32
    %c0_i32_0 = arith.constant 0 : i32
    %c0_i32_1 = arith.constant 0 : i32
    %c0_i32_2 = arith.constant 0 : i32
    return %c0_i32, %c0_i32_0, %c0_i32_1 : i32, i32, i32
  }
  func.func @transform_8(%arg0: i32) -> (i32, i32, i32) {
    %c0_i32 = arith.constant 0 : i32
    %c0_i32_0 = arith.constant 0 : i32
    %c0_i32_1 = arith.constant 0 : i32
    return %arg0, %c0_i32, %c0_i32_0 : i32, i32, i32
  }
  func.func @transform_9(%arg0: i32) -> (i32, i32, i32) {
    %c0_i32 = arith.constant 0 : i32
    %c0_i32_0 = arith.constant 0 : i32
    %c0_i32_1 = arith.constant 0 : i32
    return %arg0, %c0_i32, %c0_i32_0 : i32, i32, i32
  }
}

</mosaic_0001>

<bundles_post_ra>
// kernel: occformer_decoder_layer.1
= control target key start
LH: loop header
LB: loop body
LE: loop exit
PB: predicated region body
PF: predicated region fallthrough
CT: control target
= control target key end

     0   :  { %s12942_s30 = smov 0   ;;  %s17072_s0 = inlined_call_operand.vmem [shape: f32[4,32,256], index: 0, kind: input, shape index: {}]   ;;  %s17073_s1 = inlined_call_operand.vmem [shape: bf16[4,8,32], index: 1, kind: input, shape index: {}]   ;;  %s17074_s2 = inlined_call_operand.vmem [shape: bf16[4,8,32], index: 2, kind: input, shape index: {}]   ;;  %s17075_s3 = inlined_call_operand.vmem [shape: bf16[6,4,32,8], index: 3, kind: input, shape index: {}]   ;;  %s17076_s4 = inlined_call_operand.vmem [shape: bf16[2,4,8,32], index: 4, kind: input, shape index: {}]   ;;  %s17077_s5 = inlined_call_operand.vmem [shape: f32[6,4,8], index: 5, kind: input, shape index: {}]   ;;  %s17078_s6 = inlined_call_operand.vmem [shape: f32[2,3,32], index: 6, kind: input, shape index: {}]   ;;  %s17079_s7 = inlined_call_operand.vmem [shape: bf16[2,64,256], index: 7, kind: input, shape index: {}]   ;;  %s17080_s8 = inlined_call_operand.vmem [shape: f32[4,32,256], index: 8, kind: output, shape index: {0}]   ;;  %s17081_s9 = inlined_call_operand.vmem [shape: f32[4,8,64], index: 9, kind: output, shape index: {1}]  }
   0x1 LB: > { %s9932_s10 = sadd.s32 4294967295, %s12887_s30   ;;  %p9936_p0 = scmp.ge.s32.totalorder %s12887_s30, 1  ;;  %s12887_s30 = sphi %s12942_s30, %s20_s30  }
   0x2   : > { %p314_p1 = scmp.lt.s32.totalorder %s12887_s30, 3 }
   0x4   : > { %p315_p2 = pnand %p9936_p0, %p314_p1 }
   0x6   : > { %318 = sbr.rel (%p315_p2) target bundleno = 7703 (0x1e17), region = 52 }
   0xd   : > { %s9937_s11 = sshll.u32 %s9932_s10, 1  ;;  %v12219_v0 = vld [vmem:[%s17079_s7 + $0x4] ss:$8 sps:$4 sm:$0xff]   ;;  %v12217_v26 = vld [vmem:[%s17079_s7] ss:$8 sps:$4 sm:$0xff]   ;;  %vm633_vm0 = vcmask 261120  }
   0xe   : > { %p368_p3 = scmp.lt.s32.totalorder %s9937_s11, 3  ;;  %492 = vmatprep.mubr.bf16.mxu0 %v12219_v0  ;;  %570 = vmatprep.mubr.bf16.mxu1 %v12219_v0  ;;  %v12229_v23 = vld [vmem:[%s17075_s3] sm:$0xff]   ;;  %v12220_v27 = vld [vmem:[%s17079_s7 + $0x14] ss:$8 sps:$4 sm:$0xff]   ;;  %v12222_v28 = vld [vmem:[%s17079_s7 + $0x10] ss:$8 sps:$4 sm:$0xff]  }
   0xf   : > { %v12223_v29 = vld [vmem:[%s17079_s7 + $0x24] ss:$8 sps:$4 sm:$0xff]   ;;  %v12225_v30 = vld [vmem:[%s17079_s7 + $0x20] ss:$8 sps:$4 sm:$0xff]   ;;  %v12226_v31 = vld [vmem:[%s17079_s7 + $0x34] ss:$8 sps:$4 sm:$0xff]  }
  0x10   : > { %s17555_s11 = smov (!%p368_p3, %s9937_s11), 3  ;;  %v12228_v32 = vld [vmem:[%s17079_s7 + $0x30] ss:$8 sps:$4 sm:$0xff]   ;;  %v12230_v33 = vld [vmem:[%s17075_s3 + $0x8] sm:$0xff]   ;;  %v12231_v34 = vld [vmem:[%s17075_s3 + $0x80] sm:$0xff]   ;;  %vm2162_vm1 = vcmask 64512  }
  0x11   : > { %s10542_s14 = sshll.u32 %s17555_s11, 6  ;;  %v12232_v35 = vld [vmem:[%s17075_s3 + $0x40] sm:$0xff]   ;;  %v12234_v54 = vld [vmem:[%s17075_s3 + $0x88] sm:$0xff]   ;;  %v12235_v57 = vld [vmem:[%s17075_s3 + $0x50] sm:$0xff]   ;;  %vm2252_vm2 = vcmask 523264   ;;  %vm2703_vm3 = vcmask 1043456  }
  0x12   : > { %s12961_s17 = scalar_lea.vmem %s17072_s0, %s10542_s14  ;;  %s9941_s15 = sshll.u32 %s17555_s11, 2  ;;  %vm12890_vm4 = vmmov 0  }
  0x13   : > { %v409_v1 = vld [vmem:[%s12961_s17 + $0x8] sm:$0xff]  ;;  %v411_v2 = vld [vmem:[%s12961_s17 + $0x18] sm:$0xff]  ;;  %v408_v6 = vld [vmem:[%s12961_s17] sm:$0xff]  ;;  %s15032_s19 = scalar_lea.vmem %s17074_s2, %s9941_s15  ;;  %s15068_s24 = scalar_lea.vmem %s17073_s1, %s9941_s15 }
  0x14   : > { %v9958_v3 = vld [vmem:[%s12961_s17 + $0x48] sm:$0xff]  ;;  %v417_v4 = vpack.c.bf16 %v411_v2, %v409_v1  ;;  %v9960_v5 = vld [vmem:[%s12961_s17 + $0x58] sm:$0xff]  ;;  %v410_v7 = vld [vmem:[%s12961_s17 + $0x10] sm:$0xff]  ;;  %s9948_s23 = sshll.u32 %s17555_s11, 3  ;;  %s17031_s10 = scalar_lea.vmem %s17080_s8, %s10542_s14 }
  0x15   : > { %v535_v8 = vpack.c.bf16 %v9960_v5, %v9958_v3  ;;  %v416_v9 = vpack.c.bf16 %v410_v7, %v408_v6  ;;  %v9957_v10 = vld [vmem:[%s12961_s17 + $0x40] sm:$0xff]  ;;  %v9959_v11 = vld [vmem:[%s12961_s17 + $0x50] sm:$0xff]  ;;  %v413_v12 = vld [vmem:[%s12961_s17 + $0x28] sm:$0xff]  ;;  %s17024_s27 = scalar_lea.vmem %s17081_s9, %s9948_s23 }
  0x16   : > { %460 = vmatprep.subr.bf16.mxu0 %v417_v4  ;;  %v534_v13 = vpack.c.bf16 %v9959_v11, %v9957_v10  ;;  %v415_v14 = vld [vmem:[%s12961_s17 + $0x38] sm:$0xff]  ;;  %v9962_v15 = vld [vmem:[%s12961_s17 + $0x68] sm:$0xff]  ;;  %v412_v19 = vld [vmem:[%s12961_s17 + $0x20] sm:$0xff] }
  0x17   : > { %v9964_v16 = vld [vmem:[%s12961_s17 + $0x78] sm:$0xff]  ;;  %538 = vmatprep.subr.bf16.mxu1 %v535_v8  ;;  %461 = vmatpush1.bf16.xpose.msra.mxu0 %v416_v9  ;;  %v419_v17 = vpack.c.bf16 %v415_v14, %v413_v12  ;;  %v414_v20 = vld [vmem:[%s12961_s17 + $0x30] sm:$0xff]  ;;  %v9961_v21 = vld [vmem:[%s12961_s17 + $0x60] sm:$0xff] }
  0x18   : > { %v537_v18 = vpack.c.bf16 %v9964_v16, %v9962_v15  ;;  %539 = vmatpush1.bf16.xpose.msra.mxu1 %v534_v13  ;;  %v9963_v22 = vld [vmem:[%s12961_s17 + $0x70] sm:$0xff]  ;;  %v418_v24 = vpack.c.bf16 %v414_v20, %v412_v19  ;;  %v12233_v14 = vld [vmem:[%s17075_s3 + $0x48] sm:$0xff]   ;;  %v12238_v16 = vld [vmem:[%s17075_s3 + $0x18] sm:$0xff]  }
  0x19   : > { %462 = vmatprep.subr.bf16.mxu0 %v419_v17  ;;  %v536_v25 = vpack.c.bf16 %v9963_v22, %v9961_v21  ;;  %v12236_v15 = vld [vmem:[%s17075_s3 + $0x10] sm:$0xff]   ;;  %v12241_v19 = vld [vmem:[%s17075_s3 + $0x20] sm:$0xff]   ;;  %v12240_v20 = vld [vmem:[%s17075_s3 + $0x98] sm:$0xff]  }
  0x1a   : > { %540 = vmatprep.subr.bf16.mxu1 %v537_v18  ;;  %v12239_v17 = vld [vmem:[%s17075_s3 + $0x90] sm:$0xff]   ;;  %v12237_v18 = vld [vmem:[%s17075_s3 + $0x58] sm:$0xff]   ;;  %v12243_v21 = vld [vmem:[%s17075_s3 + $0x60] sm:$0xff]  }
  0x1b   : > { %v12242_v22 = vld [vmem:[%s17075_s3 + $0x28] sm:$0xff]  }
  0x1f   : > { %463 = vmatpush1.bf16.xpose.msra.mxu0 %v418_v24  ;;  %v12244_v24 = vld [vmem:[%s17075_s3 + $0x68] sm:$0xff]  }
  0x20   : > { %541 = vmatpush1.bf16.xpose.msra.mxu1 %v536_v25  ;;  %11036 = vmatprep.subr.bf16.mxu0 %v12229_v23  ;;  %v12247_v25 = vld [vmem:[%s17075_s3 + $0x30] sm:$0xff]  }
  0x21   : > { %12040 = vmatprep.subr.bf16.mxu1 %v12229_v23 }
  0x26   : > { %493 = vmatmul.mubr.bf16.vlgmr.msra.gmra.mrb[0].mxu0 %v12217_v26 }
  0x27   : > { %571 = vmatmul.mubr.bf16.vlgmr.msra.gmra.mrb[0].mxu1 %v12217_v26  ;;  %500 = vmatprep.mubr.bf16.mxu0 %v12220_v27  ;;  %v12246_v26 = vld [vmem:[%s17075_s3 + $0xa8] sm:$0xff]  }
  0x28   : > { %578 = vmatprep.mubr.bf16.mxu1 %v12220_v27  ;;  %11037 = vmatpush3.bf16.msra.mxu0 %v12229_v23  ;;  %v12249_v27 = vld [vmem:[%s17075_s3 + $0x70] sm:$0xff]  }
  0x29   : > { %12042 = vmatpush3.bf16.msra.mxu1 %v12229_v23  ;;  %11038 = vmatprep.subr.bf16.mxu0 %v12230_v33  ;;  %v12245_v23 = vld [vmem:[%s17075_s3 + $0xa0] sm:$0xff]  }
  0x2a   : > { %12041 = vmatprep.subr.bf16.mxu1 %v12230_v33 }
  0x2c   : > { %11039 = vmatpush3.bf16.msra.mxu0 %v12230_v33 }
  0x2d   : > { %12043 = vmatpush3.bf16.msra.mxu1 %v12230_v33  ;;  %11076 = vmatprep.subr.bf16.mxu0 %v12231_v34  ;;  %v9965_v33 = vld [vmem:[%s17077_s5] ss:$0 sm:$0xff] }
  0x2e   : > { %501 = vmatmul.mubr.bf16.gmra.mrb[4].mxu0 %v12222_v28  ;;  %11056 = vmatprep.subr.bf16.mxu1 %v12232_v35 }
  0x2f   : > { %579 = vmatmul.mubr.bf16.gmra.mrb[4].mxu1 %v12222_v28  ;;  %508 = vmatprep.mubr.bf16.mxu0 %v12223_v29  ;;  %v12248_v28 = vld [vmem:[%s17075_s3 + $0x38] sm:$0xff]  }
  0x30   : > { %586 = vmatprep.mubr.bf16.mxu1 %v12223_v29  ;;  %v12251_v29 = vld [vmem:[%s17075_s3 + $0xb0] sm:$0xff]  }
  0x36   : > { %509 = vmatmul.mubr.bf16.gmra.mrb[8].mxu0 %v12225_v30 }
  0x37   : > { %587 = vmatmul.mubr.bf16.gmra.mrb[8].mxu1 %v12225_v30  ;;  %516 = vmatprep.mubr.bf16.mxu0 %v12226_v31  ;;  %v12250_v30 = vld [vmem:[%s17075_s3 + $0x78] sm:$0xff]  }
  0x38   : > { %594 = vmatprep.mubr.bf16.mxu1 %v12226_v31  ;;  %v12252_v31 = vld [vmem:[%s17075_s3 + $0xb8] sm:$0xff]  }
  0x3e   : > { %517 = vmatmul.mubr.bf16.gmra.mrb[12].mxu0 %v12228_v32 }
  0x3f   : > { %595 = vmatmul.mubr.bf16.gmra.mrb[12].mxu1 %v12228_v32 }
  0xf9   : > { %v13012_v36 = vpop.f32.mrb[0].mxu0 }
  0xfa   : > { %17222 = vst [vmem:[#allocation2_spill] sm:$0xff] %v13012_v36  ;;  %v496_v37 = vpop.f32.mrb[1].mxu0  ;;  %v13014_v38 = vpop.f32.mrb[0].mxu1 }
  0xfb   : > { %17223 = vst [vmem:[#allocation3_spill] sm:$0xff] %v13014_v38  ;;  %v13016_v39 = vpop.f32.mrb[2].mxu0  ;;  %v574_v40 = vpop.f32.mrb[1].mxu1 }
  0xfc   : > { %17224 = vst [vmem:[#allocation4_spill] sm:$0xff] %v13016_v39  ;;  %v13020_v41 = vpack.c.bf16 %v13016_v39, %v13012_v36  ;;  %v499_v42 = vpop.f32.mrb[3].mxu0  ;;  %v13022_v43 = vpop.f32.mrb[2].mxu1 }
  0xfd   : > { %17225 = vst [vmem:[#allocation5_spill] sm:$0xff] %v13022_v43  ;;  %v13026_v44 = vpack.c.bf16 %v13022_v43, %v13014_v38  ;;  %v577_v45 = vpop.f32.mrb[3].mxu1 }
  0xfe   : > { %11040 = vmatprep.mubr.msk.bf16.mxu0 %vm633_vm0, %v13020_v41 }
 0x101   : > { %v13030_v46 = vpop.f32.mrb[4].mxu0 }
 0x102   : > { %17226 = vst [vmem:[#allocation6_spill] sm:$0xff] %v13030_v46  ;;  %v504_v47 = vpop.f32.mrb[5].mxu0  ;;  %v13032_v48 = vpop.f32.mrb[4].mxu1 }
 0x103   : > { %17227 = vst [vmem:[#allocation7_spill] sm:$0xff] %v13032_v48  ;;  %v13034_v49 = vpop.f32.mrb[6].mxu0  ;;  %v582_v50 = vpop.f32.mrb[5].mxu1 }
 0x104   : > { %17228 = vst [vmem:[#allocation8_spill] sm:$0xff] %v13034_v49  ;;  %v13038_v51 = vpack.c.bf16 %v13034_v49, %v13030_v46  ;;  %v507_v52 = vpop.f32.mrb[7].mxu0  ;;  %v13040_v53 = vpop.f32.mrb[6].mxu1 }
 0x105   : > { %17229 = vst [vmem:[#allocation9_spill] sm:$0xff] %v13040_v53  ;;  %v13047_v55 = vpack.c.bf16 %v13040_v53, %v13032_v48  ;;  %v585_v56 = vpop.f32.mrb[7].mxu1 }
 0x106   : > { %11041 = vmatmul.mubr.msk.bf16.vlgmr.msra.gmra.mrb[16].mxu0 %vm633_vm0, %v13038_v51 }
 0x107   : > { %11077 = vmatpush3.bf16.msra.mxu0 %v12231_v34 }
 0x108   : > { %11078 = vmatprep.subr.bf16.mxu0 %v12234_v54 }
 0x109   : > { %v13054_v58 = vpop.f32.mrb[8].mxu0 }
 0x10a   : > { %17230 = vst [vmem:[#allocation10_spill] sm:$0xff] %v13054_v58  ;;  %v512_v59 = vpop.f32.mrb[9].mxu0  ;;  %v13056_v60 = vpop.f32.mrb[8].mxu1 }
 0x10b   : > { %17231 = vst [vmem:[#allocation11_spill] sm:$0xff] %v13056_v60  ;;  %v13058_v61 = vpop.f32.mrb[10].mxu0  ;;  %v590_v62 = vpop.f32.mrb[9].mxu1  ;;  %11079 = vmatpush3.bf16.msra.mxu0 %v12234_v54 }
 0x10c   : > { %17232 = vst [vmem:[#allocation12_spill] sm:$0xff] %v13058_v61  ;;  %v13062_v63 = vpack.c.bf16 %v13058_v61, %v13054_v58  ;;  %v515_v0 = vpop.f32.mrb[11].mxu0  ;;  %v13064_v1 = vpop.f32.mrb[10].mxu1  ;;  %11116 = vmatprep.subr.bf16.mxu0 %v12235_v57 }
 0x10d   : > { %17233 = vst [vmem:[#allocation13_spill] sm:$0xff] %v13064_v1  ;;  %v13068_v2 = vpack.c.bf16 %v13064_v1, %v13056_v60  ;;  %v593_v3 = vpop.f32.mrb[11].mxu1 }
 0x10e   : > { %11044 = vmatprep.mubr.msk.bf16.mxu0 %vm633_vm0, %v13062_v63 }
 0x10f   : > { %11052 = vmatprep.mubr.msk.bf16.mxu1 %vm633_vm0, %v13068_v2 }
 0x111   : > { %v13074_v4 = vpop.f32.mrb[12].mxu0 }
 0x112   : > { %17234 = vst [vmem:[#allocation14_spill] sm:$0xff] %v13074_v4  ;;  %v13076_v5 = vpop.f32.mrb[12].mxu1  ;;  %v520_v6 = vpop.f32.mrb[13].mxu0 }
 0x113   : > { %17235 = vst [vmem:[#allocation15_spill] sm:$0xff] %v13076_v5  ;;  %v598_v7 = vpop.f32.mrb[13].mxu1  ;;  %v13078_v8 = vpop.f32.mrb[14].mxu0 }
 0x114   : > { %17236 = vst [vmem:[#allocation16_spill] sm:$0xff] %v13078_v8  ;;  %v13082_v9 = vpack.c.bf16 %v13078_v8, %v13074_v4  ;;  %v13084_v10 = vpop.f32.mrb[14].mxu1  ;;  %v523_v11 = vpop.f32.mrb[15].mxu0 }
 0x115   : > { %17237 = vst [vmem:[#allocation17_spill] sm:$0xff] %v13084_v10  ;;  %v13088_v12 = vpack.c.bf16 %v13084_v10, %v13076_v5  ;;  %v601_v13 = vpop.f32.mrb[15].mxu1 }
 0x116   : > { %11045 = vmatmul.mubr.msk.bf16.gmra.mrb[20].mxu0 %vm633_vm0, %v13082_v9 }
 0x117   : > { %11053 = vmatmul.mubr.msk.bf16.vlgmr.msra.gmra.mrb[16].mxu1 %vm633_vm0, %v13088_v12  ;;  %11048 = vmatprep.mubr.msk.bf16.mxu0 %vm633_vm0, %v13026_v44 }
 0x118   : > { %11057 = vmatpush3.bf16.msra.mxu1 %v12232_v35  ;;  %11060 = vmatprep.mubr.msk.bf16.mxu1 %vm633_vm0, %v13020_v41 }
 0x119   : > { %11058 = vmatprep.subr.bf16.mxu1 %v12233_v14 }
 0x11c   : > { %11059 = vmatpush3.bf16.msra.mxu1 %v12233_v14 }
 0x11d   : > { %11096 = vmatprep.subr.bf16.mxu1 %v12236_v15 }
 0x11e   : > { %11049 = vmatmul.mubr.msk.bf16.gmra.mrb[24].mxu0 %vm633_vm0, %v13047_v55 }
 0x11f   : > { %11061 = vmatmul.mubr.msk.bf16.vlgmr.msra.gmra.mrb[20].mxu1 %vm633_vm0, %v13038_v51  ;;  %11080 = vmatprep.mubr.msk.bf16.mxu0 %vm633_vm0, %v13020_v41 }
 0x120   : > { %11064 = vmatprep.mubr.msk.bf16.mxu1 %vm633_vm0, %v13062_v63  ;;  %11097 = vmatpush3.bf16.msra.mxu1 %v12236_v15 }
 0x121   : > { %11098 = vmatprep.subr.bf16.mxu1 %v12238_v16 }
 0x124   : > { %11099 = vmatpush3.bf16.msra.mxu1 %v12238_v16 }
 0x125   : > { %11136 = vmatprep.subr.bf16.mxu1 %v12239_v17 }
 0x126   : > { %11081 = vmatmul.mubr.msk.bf16.vlgmr.msra.gmra.mrb[28].mxu0 %vm633_vm0, %v13038_v51 }
 0x127   : > { %11065 = vmatmul.mubr.msk.bf16.gmra.mrb[24].mxu1 %vm633_vm0, %v13082_v9  ;;  %11084 = vmatprep.mubr.msk.bf16.mxu0 %vm633_vm0, %v13062_v63 }
 0x128   : > { %11068 = vmatprep.mubr.msk.bf16.mxu1 %vm633_vm0, %v13026_v44  ;;  %11117 = vmatpush3.bf16.msra.mxu0 %v12235_v57 }
 0x129   : > { %11118 = vmatprep.subr.bf16.mxu0 %v12237_v18 }
 0x12c   : > { %11119 = vmatpush3.bf16.msra.mxu0 %v12237_v18  ;;  %v13367_v18 = vld [vmem:[%s17077_s5 + $0x4] ss:$0 sm:$0xff] }
 0x12d   : > { %11156 = vmatprep.subr.bf16.mxu0 %v12241_v19 }
 0x12e   : > { %11085 = vmatmul.mubr.msk.bf16.gmra.mrb[32].mxu0 %vm633_vm0, %v13082_v9 }
 0x12f   : > { %11069 = vmatmul.mubr.msk.bf16.gmra.mrb[28].mxu1 %vm633_vm0, %v13047_v55  ;;  %11088 = vmatprep.mubr.msk.bf16.mxu0 %vm633_vm0, %v13026_v44 }
 0x130   : > { %11072 = vmatprep.mubr.msk.bf16.mxu1 %vm633_vm0, %v13068_v2 }
 0x136   : > { %11089 = vmatmul.mubr.msk.bf16.gmra.mrb[36].mxu0 %vm633_vm0, %v13047_v55 }
 0x137   : > { %11073 = vmatmul.mubr.msk.bf16.gmra.mrb[32].mxu1 %vm633_vm0, %v13088_v12  ;;  %11092 = vmatprep.mubr.msk.bf16.mxu0 %vm633_vm0, %v13068_v2 }
 0x138   : > { %11100 = vmatprep.mubr.msk.bf16.mxu1 %vm633_vm0, %v13020_v41 }
 0x13e   : > { %11093 = vmatmul.mubr.msk.bf16.gmra.mrb[40].mxu0 %vm633_vm0, %v13088_v12 }
 0x13f   : > { %11101 = vmatmul.mubr.msk.bf16.vlgmr.msra.gmra.mrb[36].mxu1 %vm633_vm0, %v13038_v51  ;;  %11120 = vmatprep.mubr.msk.bf16.mxu0 %vm633_vm0, %v13020_v41 }
 0x140   : > { %11104 = vmatprep.mubr.msk.bf16.mxu1 %vm633_vm0, %v13062_v63  ;;  %11137 = vmatpush3.bf16.msra.mxu1 %v12239_v17 }
 0x141   : > { %11138 = vmatprep.subr.bf16.mxu1 %v12240_v20 }
 0x144   : > { %11139 = vmatpush3.bf16.msra.mxu1 %v12240_v20 }
 0x145   : > { %11176 = vmatprep.subr.bf16.mxu1 %v12243_v21 }
 0x146   : > { %11121 = vmatmul.mubr.msk.bf16.vlgmr.msra.gmra.mrb[44].mxu0 %vm633_vm0, %v13038_v51 }
 0x147   : > { %11105 = vmatmul.mubr.msk.bf16.gmra.mrb[40].mxu1 %vm633_vm0, %v13082_v9  ;;  %11124 = vmatprep.mubr.msk.bf16.mxu0 %vm633_vm0, %v13062_v63 }
 0x148   : > { %11108 = vmatprep.mubr.msk.bf16.mxu1 %vm633_vm0, %v13026_v44  ;;  %11157 = vmatpush3.bf16.msra.mxu0 %v12241_v19 }
 0x149   : > { %11158 = vmatprep.subr.bf16.mxu0 %v12242_v22 }
 0x14c   : > { %11159 = vmatpush3.bf16.msra.mxu0 %v12242_v22 }
 0x14d   : > { %11196 = vmatprep.subr.bf16.mxu0 %v12245_v23 }
 0x14e   : > { %11125 = vmatmul.mubr.msk.bf16.gmra.mrb[48].mxu0 %vm633_vm0, %v13082_v9 }
 0x14f   : > { %11109 = vmatmul.mubr.msk.bf16.gmra.mrb[44].mxu1 %vm633_vm0, %v13047_v55  ;;  %11128 = vmatprep.mubr.msk.bf16.mxu0 %vm633_vm0, %v13026_v44 }
 0x150   : > { %11112 = vmatprep.mubr.msk.bf16.mxu1 %vm633_vm0, %v13068_v2 }
 0x156   : > { %11129 = vmatmul.mubr.msk.bf16.gmra.mrb[52].mxu0 %vm633_vm0, %v13047_v55 }
 0x157   : > { %11113 = vmatmul.mubr.msk.bf16.gmra.mrb[48].mxu1 %vm633_vm0, %v13088_v12  ;;  %11132 = vmatprep.mubr.msk.bf16.mxu0 %vm633_vm0, %v13068_v2 }
 0x158   : > { %11140 = vmatprep.mubr.msk.bf16.mxu1 %vm633_vm0, %v13020_v41 }
 0x15e   : > { %11133 = vmatmul.mubr.msk.bf16.gmra.mrb[56].mxu0 %vm633_vm0, %v13088_v12 }
 0x15f   : > { %11141 = vmatmul.mubr.msk.bf16.vlgmr.msra.gmra.mrb[52].mxu1 %vm633_vm0, %v13038_v51  ;;  %11160 = vmatprep.mubr.msk.bf16.mxu0 %vm633_vm0, %v13020_v41 }
 0x160   : > { %11144 = vmatprep.mubr.msk.bf16.mxu1 %vm633_vm0, %v13062_v63  ;;  %11177 = vmatpush3.bf16.msra.mxu1 %v12243_v21 }
 0x161   : > { %11178 = vmatprep.subr.bf16.mxu1 %v12244_v24 }
 0x164   : > { %11179 = vmatpush3.bf16.msra.mxu1 %v12244_v24 }
 0x165   : > { %11216 = vmatprep.subr.bf16.mxu1 %v12247_v25 }
 0x166   : > { %11161 = vmatmul.mubr.msk.bf16.vlgmr.msra.gmra.mrb[60].mxu0 %vm633_vm0, %v13038_v51 }
 0x167   : > { %11145 = vmatmul.mubr.msk.bf16.gmra.mrb[56].mxu1 %vm633_vm0, %v13082_v9  ;;  %11164 = vmatprep.mubr.msk.bf16.mxu0 %vm633_vm0, %v13062_v63 }
 0x168   : > { %11148 = vmatprep.mubr.msk.bf16.mxu1 %vm633_vm0, %v13026_v44  ;;  %11197 = vmatpush3.bf16.msra.mxu0 %v12245_v23 }
 0x169   : > { %11198 = vmatprep.subr.bf16.mxu0 %v12246_v26 }
 0x16c   : > { %11199 = vmatpush3.bf16.msra.mxu0 %v12246_v26 }
 0x16d   : > { %11236 = vmatprep.subr.bf16.mxu0 %v12249_v27 }
 0x16e   : > { %11165 = vmatmul.mubr.msk.bf16.gmra.mrb[64].mxu0 %vm633_vm0, %v13082_v9 }
 0x16f   : > { %11149 = vmatmul.mubr.msk.bf16.gmra.mrb[60].mxu1 %vm633_vm0, %v13047_v55  ;;  %11168 = vmatprep.mubr.msk.bf16.mxu0 %vm633_vm0, %v13026_v44 }
 0x170   : > { %11152 = vmatprep.mubr.msk.bf16.mxu1 %vm633_vm0, %v13068_v2 }
 0x176   : > { %11169 = vmatmul.mubr.msk.bf16.gmra.mrb[68].mxu0 %vm633_vm0, %v13047_v55 }
 0x177   : > { %11153 = vmatmul.mubr.msk.bf16.gmra.mrb[64].mxu1 %vm633_vm0, %v13088_v12  ;;  %11172 = vmatprep.mubr.msk.bf16.mxu0 %vm633_vm0, %v13068_v2 }
 0x178   : > { %11180 = vmatprep.mubr.msk.bf16.mxu1 %vm633_vm0, %v13020_v41 }
 0x17e   : > { %11173 = vmatmul.mubr.msk.bf16.gmra.mrb[72].mxu0 %vm633_vm0, %v13088_v12 }
 0x17f   : > { %11181 = vmatmul.mubr.msk.bf16.vlgmr.msra.gmra.mrb[68].mxu1 %vm633_vm0, %v13038_v51  ;;  %11200 = vmatprep.mubr.msk.bf16.mxu0 %vm633_vm0, %v13020_v41 }
 0x180   : > { %11184 = vmatprep.mubr.msk.bf16.mxu1 %vm633_vm0, %v13062_v63  ;;  %11217 = vmatpush3.bf16.msra.mxu1 %v12247_v25 }
 0x181   : > { %11218 = vmatprep.subr.bf16.mxu1 %v12248_v28 }
 0x184   : > { %11219 = vmatpush3.bf16.msra.mxu1 %v12248_v28 }
 0x185   : > { %11256 = vmatprep.subr.bf16.mxu1 %v12251_v29 }
 0x186   : > { %11201 = vmatmul.mubr.msk.bf16.vlgmr.msra.gmra.mrb[76].mxu0 %vm633_vm0, %v13038_v51 }
 0x187   : > { %11185 = vmatmul.mubr.msk.bf16.gmra.mrb[72].mxu1 %vm633_vm0, %v13082_v9  ;;  %11204 = vmatprep.mubr.msk.bf16.mxu0 %vm633_vm0, %v13062_v63 }
 0x188   : > { %11188 = vmatprep.mubr.msk.bf16.mxu1 %vm633_vm0, %v13026_v44  ;;  %11237 = vmatpush3.bf16.msra.mxu0 %v12249_v27 }
 0x189   : > { %11238 = vmatprep.subr.bf16.mxu0 %v12250_v30 }
 0x18c   : > { %11239 = vmatpush3.bf16.msra.mxu0 %v12250_v30 }
 0x18e   : > { %11205 = vmatmul.mubr.msk.bf16.gmra.mrb[80].mxu0 %vm633_vm0, %v13082_v9 }
 0x18f   : > { %11189 = vmatmul.mubr.msk.bf16.gmra.mrb[76].mxu1 %vm633_vm0, %v13047_v55  ;;  %11208 = vmatprep.mubr.msk.bf16.mxu0 %vm633_vm0, %v13026_v44 }
 0x190   : > { %11192 = vmatprep.mubr.msk.bf16.mxu1 %vm633_vm0, %v13068_v2 }
 0x196   : > { %11209 = vmatmul.mubr.msk.bf16.gmra.mrb[84].mxu0 %vm633_vm0, %v13047_v55 }
 0x197   : > { %11193 = vmatmul.mubr.msk.bf16.gmra.mrb[80].mxu1 %vm633_vm0, %v13088_v12  ;;  %11212 = vmatprep.mubr.msk.bf16.mxu0 %vm633_vm0, %v13068_v2 }
 0x198   : > { %11220 = vmatprep.mubr.msk.bf16.mxu1 %vm633_vm0, %v13020_v41 }
 0x19e   : > { %11213 = vmatmul.mubr.msk.bf16.gmra.mrb[88].mxu0 %vm633_vm0, %v13088_v12 }
 0x19f   : > { %11221 = vmatmul.mubr.msk.bf16.vlgmr.msra.gmra.mrb[84].mxu1 %vm633_vm0, %v13038_v51  ;;  %11240 = vmatprep.mubr.msk.bf16.mxu0 %vm633_vm0, %v13020_v41 }
 0x1a0   : > { %11224 = vmatprep.mubr.msk.bf16.mxu1 %vm633_vm0, %v13062_v63  ;;  %11257 = vmatpush3.bf16.msra.mxu1 %v12251_v29 }
 0x1a1   : > { %11258 = vmatprep.subr.bf16.mxu1 %v12252_v31 }
 0x1a4   : > { %11259 = vmatpush3.bf16.msra.mxu1 %v12252_v31 }
 0x1a6   : > { %11241 = vmatmul.mubr.msk.bf16.vlgmr.msra.gmra.mrb[92].mxu0 %vm633_vm0, %v13038_v51 }
 0x1a7   : > { %11225 = vmatmul.mubr.msk.bf16.gmra.mrb[88].mxu1 %vm633_vm0, %v13082_v9  ;;  %11244 = vmatprep.mubr.msk.bf16.mxu0 %vm633_vm0, %v13062_v63 }
 0x1a8   : > { %11228 = vmatprep.mubr.msk.bf16.mxu1 %vm633_vm0, %v13026_v44 }
 0x1ae   : > { %11245 = vmatmul.mubr.msk.bf16.gmra.mrb[96].mxu0 %vm633_vm0, %v13082_v9 }
 0x1af   : > { %11229 = vmatmul.mubr.msk.bf16.gmra.mrb[92].mxu1 %vm633_vm0, %v13047_v55  ;;  %11248 = vmatprep.mubr.msk.bf16.mxu0 %vm633_vm0, %v13026_v44 }
 0x1b0   : > { %11232 = vmatprep.mubr.msk.bf16.mxu1 %vm633_vm0, %v13068_v2 }
 0x1b6   : > { %11249 = vmatmul.mubr.msk.bf16.gmra.mrb[100].mxu0 %vm633_vm0, %v13047_v55 }
 0x1b7   : > { %11233 = vmatmul.mubr.msk.bf16.gmra.mrb[96].mxu1 %vm633_vm0, %v13088_v12  ;;  %11252 = vmatprep.mubr.msk.bf16.mxu0 %vm633_vm0, %v13068_v2 }
 0x1b8   : > { %11260 = vmatprep.mubr.msk.bf16.mxu1 %vm633_vm0, %v13020_v41 }
 0x1be   : > { %11253 = vmatmul.mubr.msk.bf16.gmra.mrb[104].mxu0 %vm633_vm0, %v13088_v12 }
 0x1bf   : > { %11261 = vmatmul.mubr.msk.bf16.vlgmr.msra.gmra.mrb[100].mxu1 %vm633_vm0, %v13038_v51 }
 0x1c0   : > { %11264 = vmatprep.mubr.msk.bf16.mxu1 %vm633_vm0, %v13062_v63 }
 0x1c7   : > { %11265 = vmatmul.mubr.msk.bf16.gmra.mrb[104].mxu1 %vm633_vm0, %v13082_v9 }
 0x1c8   : > { %11268 = vmatprep.mubr.msk.bf16.mxu1 %vm633_vm0, %v13026_v44 }
 0x1cf   : > { %11269 = vmatmul.mubr.msk.bf16.gmra.mrb[108].mxu1 %vm633_vm0, %v13047_v55 }
 0x1d0   : > { %11272 = vmatprep.mubr.msk.bf16.mxu1 %vm633_vm0, %v13068_v2 }
 0x1d7   : > { %11273 = vmatmul.mubr.msk.bf16.gmra.mrb[112].mxu1 %vm633_vm0, %v13088_v12 }
 0x1d9   : > { %v11042_v32 = vpop.f32.mrb[16].mxu0 }
 0x1da   : > { %v692_v34 = vpop.f32.mrb[17].mxu0  ;;  %v13331_v37 = vadd.f32 %v11042_v32, %v9965_v33 }
 0x1db   : > { %v11043_v35 = vpop.f32.mrb[18].mxu0  ;;  %v693_v42 = vadd.f32 %v9965_v33, %v692_v34 }
 0x1dc   : > { %v13333_v40 = vadd.f32 %v11043_v35, %v9965_v33  ;;  %v695_v41 = vpop.f32.mrb[19].mxu0 }
 0x1dd   : > { %v696_v44 = vadd.f32 %v9965_v33, %v695_v41 }
 0x1de   : > { %v756_v45 = vpack.c.bf16 %v13333_v40, %v13331_v37 }
 0x1df   : > { %v755_v47 = vpack.c.bf16 %v696_v44, %v693_v42  ;;  %v13386_v44 = vld [vmem:[%s17077_s5 + $0x8] ss:$0 sm:$0xff] }
 0x1e1   : > { %11284 = vmatprep.mubr.msk.bf16.mxu0 %vm2162_vm1, %v755_v47 }
 0x1e9   : > { %v11046_v50 = vpop.f32.mrb[20].mxu0 }
 0x1ea   : > { %v13338_v51 = vadd.f32 %v11046_v50, %v9965_v33  ;;  %v708_v52 = vpop.f32.mrb[21].mxu0  ;;  %v11054_v54 = vpop.f32.mrb[16].mxu1 }
 0x1eb   : > { %v11047_v55 = vpop.f32.mrb[22].mxu0  ;;  %v13340_v56 = vadd.f32 %v11054_v54, %v9965_v33  ;;  %v740_v57 = vpop.f32.mrb[17].mxu1  ;;  %v13346_v2 = vadd.f32 %v9965_v33, %v708_v52 }
 0x1ec   : > { %v13342_v59 = vadd.f32 %v11047_v55, %v9965_v33  ;;  %v711_v62 = vpop.f32.mrb[23].mxu0  ;;  %v13344_v63 = vadd.f32 %v9965_v33, %v740_v57  ;;  %v11055_v0 = vpop.f32.mrb[18].mxu1 }
 0x1ed   : > { %v13348_v3 = vadd.f32 %v9965_v33, %v711_v62  ;;  %v13350_v6 = vadd.f32 %v11055_v0, %v9965_v33  ;;  %v743_v7 = vpop.f32.mrb[19].mxu1 }
 0x1ee   : > { %v758_v9 = vpack.c.bf16 %v13342_v59, %v13338_v51  ;;  %v13354_v11 = vadd.f32 %v9965_v33, %v743_v7 }
 0x1ef   : > { %v757_v12 = vpack.c.bf16 %v13348_v3, %v13346_v2 }
 0x1f1   : > { %v11050_v15 = vpop.f32.mrb[24].mxu0 }
 0x1f2   : > { %v13362_v16 = vadd.f32 %v11050_v15, %v9965_v33  ;;  %v11062_v17 = vpop.f32.mrb[20].mxu1  ;;  %v724_v19 = vpop.f32.mrb[25].mxu0 }
 0x1f3   : > { %v13369_v20 = vadd.f32 %v9965_v33, %v724_v19  ;;  %v820_v21 = vpop.f32.mrb[21].mxu1  ;;  %v11051_v22 = vpop.f32.mrb[26].mxu0  ;;  %v829_v26 = vadd.f32 %v11062_v17, %v13367_v18 }
 0x1f4   : > { %v13371_v23 = vadd.f32 %v11051_v22, %v9965_v33  ;;  %v11063_v24 = vpop.f32.mrb[22].mxu1  ;;  %v727_v25 = vpop.f32.mrb[27].mxu0  ;;  %v821_v30 = vadd.f32 %v13367_v18, %v820_v21 }
 0x1f5   : > { %v832_v27 = vadd.f32 %v11063_v24, %v13367_v18  ;;  %v13375_v28 = vadd.f32 %v9965_v33, %v727_v25  ;;  %v823_v29 = vpop.f32.mrb[23].mxu1 }
 0x1f6   : > { %v824_v32 = vadd.f32 %v13367_v18, %v823_v29 }
 0x1f7   : > { %v884_v34 = vpack.c.bf16 %v832_v27, %v829_v26 }
 0x1f8   : > { %v883_v41 = vpack.c.bf16 %v824_v32, %v821_v30 }
 0x1f9   : > { %v11082_v42 = vpop.f32.mrb[28].mxu0 }
 0x1fa   : > { %v11066_v33 = vpop.f32.mrb[24].mxu1  ;;  %12140 = vmatprep.subr.msk.bf16.mxu0 %vm2162_vm1, %v883_v41  ;;  %v948_v47 = vpop.f32.mrb[29].mxu0  ;;  %v2176_v50 = vsel %vm2162_vm1, %v883_v41, 0  ;;  %v957_v55 = vadd.f32 %v11082_v42, %v13386_v44  ;;  %v2179_v42 = vsel %vm2162_vm1, %v884_v34, 0 }
 0x1fb   : > { %v836_v52 = vpop.f32.mrb[25].mxu1  ;;  %11277 = vmatpush3.bf16.xpose.msra.mxu0 %v2176_v50  ;;  %v11083_v54 = vpop.f32.mrb[30].mxu0  ;;  %v845_v7 = vadd.f32 %v11066_v33, %v13367_v18  ;;  %v949_v15 = vadd.f32 %v13386_v44, %v948_v47 }
 0x1fc   : > { %v11067_v57 = vpop.f32.mrb[26].mxu1  ;;  %v960_v62 = vadd.f32 %v11083_v54, %v13386_v44  ;;  %12141 = vmatprep.subr.msk.bf16.mxu0 %vm2162_vm1, %v884_v34  ;;  %v951_v0 = vpop.f32.mrb[31].mxu0  ;;  %v837_v22 = vadd.f32 %v13367_v18, %v836_v52 }
 0x1fd   : > { %v848_v17 = vadd.f32 %v11067_v57, %v13367_v18  ;;  %v839_v19 = vpop.f32.mrb[27].mxu1  ;;  %v952_v21 = vadd.f32 %v13386_v44, %v951_v0 }
 0x1fe   : > { %v840_v24 = vadd.f32 %v13367_v18, %v839_v19  ;;  %v1012_v25 = vpack.c.bf16 %v960_v62, %v957_v55 }
 0x1ff   : > { %v886_v26 = vpack.c.bf16 %v848_v17, %v845_v7  ;;  %v1011_v27 = vpack.c.bf16 %v952_v21, %v949_v15 }
 0x200   : > { %v885_v29 = vpack.c.bf16 %v840_v24, %v837_v22 }
 0x201   : > { %v11086_v30 = vpop.f32.mrb[32].mxu0  ;;  %11292 = vmatprep.subr.bf16.mxu1 %v1011_v27 }
 0x202   : > { %v11070_v32 = vpop.f32.mrb[28].mxu1  ;;  %v964_v41 = vpop.f32.mrb[33].mxu0  ;;  %11293 = vmatpush3.bf16.msra.mxu1 %v1011_v27  ;;  %v973_v52 = vadd.f32 %v11086_v30, %v13386_v44 }
 0x203   : > { %v852_v33 = vpop.f32.mrb[29].mxu1  ;;  %11279 = vmatpush3.bf16.xpose.msra.mxu0 %v2179_v42  ;;  %v11087_v47 = vpop.f32.mrb[34].mxu0  ;;  %11294 = vmatprep.subr.bf16.mxu1 %v1012_v25  ;;  %v861_v50 = vadd.f32 %v11070_v32, %v13367_v18  ;;  %v965_v0 = vadd.f32 %v13386_v44, %v964_v41  ;;  %v2182_v42 = vsel %vm2162_vm1, %v885_v29, 0 }
 0x204   : > { %v11071_v54 = vpop.f32.mrb[30].mxu1  ;;  %v976_v55 = vadd.f32 %v11087_v47, %v13386_v44  ;;  %12142 = vmatprep.subr.msk.bf16.mxu0 %vm2162_vm1, %v885_v29  ;;  %v967_v57 = vpop.f32.mrb[35].mxu0  ;;  %v853_v62 = vadd.f32 %v13367_v18, %v852_v33 }
 0x205   : > { %v855_v34 = vpop.f32.mrb[31].mxu1  ;;  %v968_v7 = vadd.f32 %v13386_v44, %v967_v57  ;;  %v864_v15 = vadd.f32 %v11071_v54, %v13367_v18 }
 0x206   : > { %11295 = vmatpush3.bf16.msra.mxu1 %v1012_v25  ;;  %v1014_v17 = vpack.c.bf16 %v976_v55, %v973_v52  ;;  %v856_v19 = vadd.f32 %v13367_v18, %v855_v34 }
 0x207   : > { %v1013_v21 = vpack.c.bf16 %v968_v7, %v965_v0  ;;  %v13409_v22 = vpack.c.bf16 %v864_v15, %v861_v50 }
 0x208   : > { %v13411_v24 = vpack.c.bf16 %v856_v19, %v853_v62 }
 0x209   : > { %v11090_v27 = vpop.f32.mrb[36].mxu0  ;;  %11296 = vmatprep.subr.bf16.mxu1 %v1013_v21 }
 0x20a   : > { %v11074_v30 = vpop.f32.mrb[32].mxu1  ;;  %v989_v32 = vadd.f32 %v11090_v27, %v13386_v44  ;;  %v980_v41 = vpop.f32.mrb[37].mxu0  ;;  %11297 = vmatpush3.bf16.msra.mxu1 %v1013_v21 }
 0x20b   : > { %v868_v33 = vpop.f32.mrb[33].mxu1  ;;  %v981_v25 = vadd.f32 %v13386_v44, %v980_v41  ;;  %11281 = vmatpush3.bf16.xpose.msra.mxu0 %v2182_v42  ;;  %v11091_v47 = vpop.f32.mrb[38].mxu0  ;;  %11298 = vmatprep.subr.bf16.mxu1 %v1014_v17  ;;  %v877_v50 = vadd.f32 %v11074_v30, %v13367_v18  ;;  %v13435_v42 = vld [vmem:[%s17077_s5 + $0x1] ss:$0 sm:$0xff] }
 0x20c   : > { %v11075_v52 = vpop.f32.mrb[34].mxu1  ;;  %v992_v54 = vadd.f32 %v11091_v47, %v13386_v44  ;;  %12143 = vmatprep.subr.msk.bf16.mxu0 %vm2162_vm1, %v886_v26  ;;  %v983_v55 = vpop.f32.mrb[39].mxu0  ;;  %v869_v57 = vadd.f32 %v13367_v18, %v868_v33 }
 0x20d   : > { %v871_v62 = vpop.f32.mrb[35].mxu1  ;;  %v984_v29 = vadd.f32 %v13386_v44, %v983_v55  ;;  %v880_v0 = vadd.f32 %v11075_v52, %v13367_v18 }
 0x20e   : > { %11299 = vmatpush3.bf16.msra.mxu1 %v1014_v17  ;;  %v872_v34 = vadd.f32 %v13367_v18, %v871_v62  ;;  %v13423_v7 = vpack.c.bf16 %v992_v54, %v989_v32  ;;  %v2185_v18 = vsel %vm2162_vm1, %v886_v26, 0 }
 0x20f   : > { %v13425_v15 = vpack.c.bf16 %v880_v0, %v877_v50  ;;  %v13427_v19 = vpack.c.bf16 %v984_v29, %v981_v25 }
 0x210   : > { %17238 = vst [vmem:[#allocation18_spill] sm:$0xff] %v13423_v7  ;;  %v13429_v21 = vpack.c.bf16 %v872_v34, %v869_v57 }
 0x211   : > { %17239 = vst [vmem:[#allocation19_spill] sm:$0xff] %v13427_v19  ;;  %v11094_v27 = vpop.f32.mrb[40].mxu0 }
 0x212   : > { %v1005_v30 = vadd.f32 %v11094_v27, %v13386_v44  ;;  %v11102_v41 = vpop.f32.mrb[36].mxu1  ;;  %v996_v17 = vpop.f32.mrb[41].mxu0 }
 0x213   : > { %v997_v32 = vadd.f32 %v13386_v44, %v996_v17  ;;  %v1075_v33 = vpop.f32.mrb[37].mxu1  ;;  %11283 = vmatpush3.bf16.xpose.msra.mxu0 %v2185_v18  ;;  %v11095_v25 = vpop.f32.mrb[42].mxu0  ;;  %v13441_v54 = vadd.f32 %v11102_v41, %v13435_v42  ;;  %v13458_v18 = vld [vmem:[%s17077_s5 + $0x5] ss:$0 sm:$0xff] }
 0x214   : > { %v1008_v47 = vadd.f32 %v11095_v25, %v13386_v44  ;;  %v11103_v50 = vpop.f32.mrb[38].mxu1  ;;  %v999_v52 = vpop.f32.mrb[43].mxu0  ;;  %v1076_v26 = vadd.f32 %v13435_v42, %v1075_v33 }
 0x215   : > { %v13444_v55 = vadd.f32 %v11103_v50, %v13435_v42  ;;  %v1000_v57 = vadd.f32 %v13386_v44, %v999_v52  ;;  %v1078_v62 = vpop.f32.mrb[39].mxu1 }
 0x216   : > { %v1079_v29 = vadd.f32 %v13435_v42, %v1078_v62  ;;  %v13449_v0 = vpack.c.bf16 %v1008_v47, %v1005_v30 }
 0x217   : > { %v13453_v27 = vpack.c.bf16 %v1000_v57, %v997_v32 }
 0x218   : > { %17240 = vst [vmem:[#allocation20_spill] sm:$0xff] %v13449_v0  ;;  %v1138_v17 = vpack.c.bf16 %v1079_v29, %v1076_v26 }
 0x219   : > { %17241 = vst [vmem:[#allocation21_spill] sm:$0xff] %v13453_v27  ;;  %v11122_v41 = vpop.f32.mrb[44].mxu0 }
 0x21a   : > { %v11106_v44 = vpop.f32.mrb[40].mxu1  ;;  %11285 = vmatmul.mubr.msk.bf16.vlgmr.msra.gmra.mrb[108].mxu0 %vm2162_vm1, %v756_v45  ;;  %v1202_v30 = vpop.f32.mrb[45].mxu0  ;;  %v1211_v25 = vadd.f32 %v11122_v41, %v13458_v18 }
 0x21b   : > { %v1091_v33 = vpop.f32.mrb[41].mxu1  ;;  %11288 = vmatprep.mubr.msk.bf16.mxu0 %vm2162_vm1, %v757_v12  ;;  %v11123_v32 = vpop.f32.mrb[46].mxu0  ;;  %v13471_v57 = vadd.f32 %v11106_v44, %v13435_v42  ;;  %v1203_v37 = vadd.f32 %v13458_v18, %v1202_v30 }
 0x21c   : > { %v11107_v47 = vpop.f32.mrb[42].mxu1  ;;  %v1214_v50 = vadd.f32 %v11123_v32, %v13458_v18  ;;  %v1205_v52 = vpop.f32.mrb[47].mxu0  ;;  %v13479_v3 = vadd.f32 %v13435_v42, %v1091_v33 }
 0x21d   : > { %v13475_v40 = vadd.f32 %v11107_v47, %v13435_v42  ;;  %v1094_v45 = vpop.f32.mrb[43].mxu1  ;;  %v1206_v2 = vadd.f32 %v13458_v18, %v1205_v52 }
 0x21e   : > { %v1266_v12 = vpack.c.bf16 %v1214_v50, %v1211_v25  ;;  %v13482_v62 = vadd.f32 %v13435_v42, %v1094_v45 }
 0x21f   : > { %v1265_v29 = vpack.c.bf16 %v1206_v2, %v1203_v37 }
 0x220   : > { %v2443_v31 = vsel %vm2162_vm1, %v1266_v12, 0 }
 0x221   : > { %v11126_v44 = vpop.f32.mrb[48].mxu0  ;;  %12144 = vmatprep.subr.msk.bf16.mxu0 %vm2162_vm1, %v1265_v29  ;;  %v2440_v30 = vsel %vm2162_vm1, %v1265_v29, 0 }
 0x222   : > { %v11110_v32 = vpop.f32.mrb[44].mxu1  ;;  %11289 = vmatmul.mubr.msk.bf16.gmra.mrb[112].mxu0 %vm2162_vm1, %v758_v9  ;;  %v1218_v33 = vpop.f32.mrb[49].mxu0  ;;  %v1227_v52 = vadd.f32 %v11126_v44, %v13458_v18 }
 0x223   : > { %v13495_v25 = vadd.f32 %v11110_v32, %v13435_v42  ;;  %v1107_v47 = vpop.f32.mrb[45].mxu1  ;;  %11309 = vmatpush3.bf16.xpose.msra.mxu0 %v2440_v30  ;;  %11316 = vmatprep.mubr.msk.bf16.mxu0 %vm2162_vm1, %v1138_v17  ;;  %v11127_v50 = vpop.f32.mrb[50].mxu0  ;;  %v1219_v59 = vadd.f32 %v13458_v18, %v1218_v33 }
 0x224   : > { %v13500_v37 = vadd.f32 %v13435_v42, %v1107_v47  ;;  %v11111_v45 = vpop.f32.mrb[46].mxu1  ;;  %v1230_v2 = vadd.f32 %v11127_v50, %v13458_v18  ;;  %12145 = vmatprep.subr.msk.bf16.mxu0 %vm2162_vm1, %v1266_v12  ;;  %v1221_v51 = vpop.f32.mrb[51].mxu0 }
 0x225   : > { %v13506_v9 = vadd.f32 %v11111_v45, %v13435_v42  ;;  %v1110_v29 = vpop.f32.mrb[47].mxu1  ;;  %v1222_v17 = vadd.f32 %v13458_v18, %v1221_v51 }
 0x226   : > { %v1268_v30 = vpack.c.bf16 %v1230_v2, %v1227_v52  ;;  %v13510_v44 = vadd.f32 %v13435_v42, %v1110_v29 }
 0x227   : > { %v1267_v47 = vpack.c.bf16 %v1222_v17, %v1219_v59 }
 0x229   : > { %v11130_v13 = vpop.f32.mrb[52].mxu0 }
 0x22a   : > { %v11114_v14 = vpop.f32.mrb[48].mxu1  ;;  %v1243_v33 = vadd.f32 %v11130_v13, %v13458_v18  ;;  %v1234_v45 = vpop.f32.mrb[53].mxu0 }
 0x22b   : > { %v13519_v51 = vadd.f32 %v11114_v14, %v13435_v42  ;;  %v1123_v52 = vpop.f32.mrb[49].mxu1  ;;  %v1235_v2 = vadd.f32 %v13458_v18, %v1234_v45  ;;  %11311 = vmatpush3.bf16.xpose.msra.mxu0 %v2443_v31  ;;  %v11131_v29 = vpop.f32.mrb[54].mxu0 }
 0x22c   : > { %v13523_v59 = vadd.f32 %v13435_v42, %v1123_v52  ;;  %v11115_v17 = vpop.f32.mrb[50].mxu1  ;;  %v1246_v32 = vadd.f32 %v11131_v29, %v13458_v18  ;;  %12146 = vmatprep.subr.msk.bf16.mxu0 %vm2162_vm1, %v1267_v47  ;;  %v1237_v13 = vpop.f32.mrb[55].mxu0 }
 0x22d   : > { %v13528_v50 = vadd.f32 %v11115_v17, %v13435_v42  ;;  %v1126_v12 = vpop.f32.mrb[51].mxu1  ;;  %v1238_v14 = vadd.f32 %v13458_v18, %v1237_v13  ;;  %v13545_v17 = vld [vmem:[%s17077_s5 + $0x9] ss:$0 sm:$0xff] }
 0x22e   : > { %v13531_v35 = vpack.c.bf16 %v1246_v32, %v1243_v33  ;;  %v13534_v31 = vadd.f32 %v13435_v42, %v1126_v12  ;;  %v2446_v42 = vsel %vm2162_vm1, %v1267_v47, 0 }
 0x22f   : > { %v13538_v52 = vpack.c.bf16 %v1238_v14, %v1235_v2 }
 0x231   : > { %v11134_v26 = vpop.f32.mrb[56].mxu0 }
 0x232   : > { %v1259_v32 = vadd.f32 %v11134_v26, %v13458_v18  ;;  %v11142_v33 = vpop.f32.mrb[52].mxu1  ;;  %v1250_v13 = vpop.f32.mrb[57].mxu0 }
 0x233   : > { %v1338_v12 = vadd.f32 %v11142_v33, %v13545_v17  ;;  %v1251_v2 = vadd.f32 %v13458_v18, %v1250_v13  ;;  %v1329_v14 = vpop.f32.mrb[53].mxu1  ;;  %11313 = vmatpush3.bf16.xpose.msra.mxu0 %v2446_v42  ;;  %v11135_v45 = vpop.f32.mrb[58].mxu0 }
 0x234   : > { %v1262_v29 = vadd.f32 %v11135_v45, %v13458_v18  ;;  %v11143_v41 = vpop.f32.mrb[54].mxu1  ;;  %12147 = vmatprep.subr.msk.bf16.mxu0 %vm2162_vm1, %v1268_v30  ;;  %v1253_v34 = vpop.f32.mrb[59].mxu0  ;;  %v1330_v47 = vadd.f32 %v13545_v17, %v1329_v14 }
 0x235   : > { %v1341_v1 = vadd.f32 %v11143_v41, %v13545_v17  ;;  %v1254_v26 = vadd.f32 %v13458_v18, %v1253_v34  ;;  %v1332_v10 = vpop.f32.mrb[55].mxu1  ;;  %v13568_v41 = vld [vmem:[%s17077_s5 + $0x2] ss:$0 sm:$0xff] }
 0x236   : > { %v13556_v60 = vpack.c.bf16 %v1262_v29, %v1259_v32  ;;  %v1333_v33 = vadd.f32 %v13545_v17, %v1332_v10  ;;  %v2449_v29 = vsel %vm2162_vm1, %v1268_v30, 0 }
 0x237   : > { %v13559_v13 = vpack.c.bf16 %v1341_v1, %v1338_v12  ;;  %v13561_v42 = vpack.c.bf16 %v1254_v26, %v1251_v2 }
 0x238   : > { %v13563_v45 = vpack.c.bf16 %v1333_v33, %v1330_v47 }
 0x239   : > { %17242 = vst [vmem:[#allocation22_spill] sm:$0xff] %v13559_v13  ;;  %v11162_v5 = vpop.f32.mrb[60].mxu0 }
 0x23a   : > { %17243 = vst [vmem:[#allocation23_spill] sm:$0xff] %v13563_v45  ;;  %v11146_v34 = vpop.f32.mrb[56].mxu1  ;;  %11324 = vmatprep.subr.bf16.mxu1 %v13563_v45  ;;  %v1456_v18 = vpop.f32.mrb[61].mxu0  ;;  %v13574_v12 = vadd.f32 %v11162_v5, %v13568_v41 }
 0x23b   : > { %v1354_v10 = vadd.f32 %v11146_v34, %v13545_v17  ;;  %v1345_v1 = vpop.f32.mrb[57].mxu1  ;;  %11315 = vmatpush3.bf16.xpose.msra.mxu0 %v2449_v29  ;;  %v11163_v32 = vpop.f32.mrb[62].mxu0  ;;  %v1457_v33 = vadd.f32 %v13568_v41, %v1456_v18  ;;  %v17246_v18 = vpack.c.bf16 %v13444_v55, %v13441_v54  ;;  %v17247_v29 = vpack.c.bf16 %v13482_v62, %v13479_v3 }
 0x23c   : > { %v1346_v2 = vadd.f32 %v13545_v17, %v1345_v1  ;;  %v11147_v14 = vpop.f32.mrb[58].mxu1  ;;  %v13578_v26 = vadd.f32 %v11163_v32, %v13568_v41  ;;  %v1459_v47 = vpop.f32.mrb[63].mxu0 }
 0x23d   : > { %v1357_v43 = vadd.f32 %v11147_v14, %v13545_v17  ;;  %v1348_v30 = vpop.f32.mrb[59].mxu1  ;;  %v1460_v34 = vadd.f32 %v13568_v41, %v1459_v47 }
 0x23e   : > { %v1349_v5 = vadd.f32 %v13545_v17, %v1348_v30 }
 0x23f   : > { %v13586_v53 = vpack.c.bf16 %v1357_v43, %v1354_v10  ;;  %v1519_v1 = vpack.c.bf16 %v1460_v34, %v1457_v33 }
 0x240   : > { %v13588_v38 = vpack.c.bf16 %v1349_v5, %v1346_v2 }
 0x241   : > { %17244 = vst [vmem:[#allocation24_spill] sm:$0xff] %v13586_v53  ;;  %v11166_v32 = vpop.f32.mrb[64].mxu0 }
 0x242   : > { %17245 = vst [vmem:[#allocation25_spill] sm:$0xff] %v13588_v38  ;;  %v11150_v48 = vpop.f32.mrb[60].mxu1  ;;  %11317 = vmatmul.mubr.msk.bf16.vlgmr.msra.gmra.mrb[116].mxu0 %vm2162_vm1, %v17246_v18  ;;  %v1472_v14 = vpop.f32.mrb[65].mxu0  ;;  %v13600_v10 = vadd.f32 %v11166_v32, %v13568_v41 }
 0x243   : > { %v1370_v47 = vadd.f32 %v11150_v48, %v13545_v17  ;;  %v1361_v61 = vpop.f32.mrb[61].mxu1  ;;  %11320 = vmatprep.mubr.msk.bf16.mxu0 %vm2162_vm1, %v17247_v29  ;;  %v11167_v43 = vpop.f32.mrb[66].mxu0  ;;  %v13607_v30 = vadd.f32 %v13568_v41, %v1472_v14 }
 0x244   : > { %v1362_v2 = vadd.f32 %v13545_v17, %v1361_v61  ;;  %v11151_v33 = vpop.f32.mrb[62].mxu1  ;;  %v13604_v54 = vadd.f32 %v11167_v43, %v13568_v41  ;;  %v1475_v55 = vpop.f32.mrb[67].mxu0 }
 0x245   : > { %v1373_v48 = vadd.f32 %v11151_v33, %v13545_v17  ;;  %v1364_v34 = vpop.f32.mrb[63].mxu1  ;;  %v13611_v3 = vadd.f32 %v13568_v41, %v1475_v55  ;;  %v17250_v33 = vpack.c.bf16 %v13475_v40, %v13471_v57 }
 0x246   : > { %v1365_v29 = vadd.f32 %v13545_v17, %v1364_v34 }
 0x247   : > { %v13616_v61 = vpack.c.bf16 %v1373_v48, %v1370_v47 }
 0x248   : > { %v13620_v32 = vpack.c.bf16 %v1365_v29, %v1362_v2 }
 0x249   : > { %17248 = vst [vmem:[#allocation26_spill] sm:$0xff] %v13616_v61  ;;  %v11170_v18 = vpop.f32.mrb[68].mxu0 }
 0x24a   : > { %17249 = vst [vmem:[#allocation27_spill] sm:$0xff] %v13620_v32  ;;  %v11154_v14 = vpop.f32.mrb[64].mxu1  ;;  %v13623_v43 = vadd.f32 %v11170_v18, %v13568_v41  ;;  %11321 = vmatmul.mubr.msk.bf16.gmra.mrb[120].mxu0 %vm2162_vm1, %v17250_v33  ;;  %v1488_v55 = vpop.f32.mrb[69].mxu0 }
 0x24b   : > { %v1386_v34 = vadd.f32 %v11154_v14, %v13545_v17  ;;  %v1377_v47 = vpop.f32.mrb[65].mxu1  ;;  %v13631_v48 = vadd.f32 %v13568_v41, %v1488_v55  ;;  %11368 = vmatprep.mubr.msk.bf16.mxu0 %vm2162_vm1, %v1519_v1  ;;  %v11171_v2 = vpop.f32.mrb[70].mxu0 }
 0x24c   : > { %v1378_v29 = vadd.f32 %v13545_v17, %v1377_v47  ;;  %v11155_v62 = vpop.f32.mrb[66].mxu1  ;;  %v13636_v18 = vadd.f32 %v11171_v2, %v13568_v41  ;;  %v1491_v5 = vpop.f32.mrb[71].mxu0 }
 0x24d   : > { %v1389_v57 = vadd.f32 %v11155_v62, %v13545_v17  ;;  %v1380_v40 = vpop.f32.mrb[67].mxu1  ;;  %v13640_v33 = vadd.f32 %v13568_v41, %v1491_v5  ;;  %v13657_v5 = vld [vmem:[%s17077_s5 + $0x6] ss:$0 sm:$0xff] }
 0x24e   : > { %v1381_v55 = vadd.f32 %v13545_v17, %v1380_v40 }
 0x24f   : > { %v13645_v1 = vpack.c.bf16 %v1389_v57, %v1386_v34 }
 0x250   : > { %v13649_v8 = vpack.c.bf16 %v1381_v55, %v1378_v29 }
 0x251   : > { %17251 = vst [vmem:[#allocation28_spill] sm:$0xff] %v13645_v1  ;;  %v11174_v2 = vpop.f32.mrb[72].mxu0 }
 0x252   : > { %17252 = vst [vmem:[#allocation29_spill] sm:$0xff] %v13649_v8  ;;  %v13652_v58 = vadd.f32 %v11174_v2, %v13568_v41  ;;  %v11182_v62 = vpop.f32.mrb[68].mxu1  ;;  %v1504_v14 = vpop.f32.mrb[73].mxu0 }
 0x253   : > { %v13660_v17 = vadd.f32 %v13568_v41, %v1504_v14  ;;  %v1583_v34 = vpop.f32.mrb[69].mxu1  ;;  %v11175_v57 = vpop.f32.mrb[74].mxu0  ;;  %v1592_v2 = vadd.f32 %v11182_v62, %v13657_v5  ;;  %v13679_v62 = vld [vmem:[%s17077_s5 + $0xa] ss:$0 sm:$0xff] }
 0x254   : > { %17253 = vst [vmem:[#allocation30_spill] sm:$0xff] %v13652_v58  ;;  %v13663_v40 = vadd.f32 %v11175_v57, %v13568_v41  ;;  %v11183_v29 = vpop.f32.mrb[70].mxu1  ;;  %v1507_v55 = vpop.f32.mrb[75].mxu0  ;;  %v1584_v49 = vadd.f32 %v13657_v5, %v1583_v34 }
 0x255   : > { %v1595_v47 = vadd.f32 %v11183_v29, %v13657_v5  ;;  %v13668_v4 = vadd.f32 %v13568_v41, %v1507_v55  ;;  %v1586_v39 = vpop.f32.mrb[71].mxu1 }
 0x256   : > { %17254 = vst [vmem:[#allocation31_spill] sm:$0xff] %v13663_v40  ;;  %v1587_v36 = vadd.f32 %v13657_v5, %v1586_v39 }
 0x257   : > { %v1647_v46 = vpack.c.bf16 %v1595_v47, %v1592_v2 }
 0x258   : > { %v1646_v1 = vpack.c.bf16 %v1587_v36, %v1584_v49 }
 0x259   : > { %v11202_v8 = vpop.f32.mrb[76].mxu0 }
 0x25a   : > { %v11186_v41 = vpop.f32.mrb[72].mxu1  ;;  %12150 = vmatprep.subr.msk.bf16.mxu0 %vm2162_vm1, %v1646_v1  ;;  %v1710_v34 = vpop.f32.mrb[77].mxu0  ;;  %v2865_v29 = vsel %vm2162_vm1, %v1646_v1, 0  ;;  %v1719_v47 = vadd.f32 %v11202_v8, %v13679_v62 }
 0x25b   : > { %v1599_v55 = vpop.f32.mrb[73].mxu1  ;;  %11361 = vmatpush3.bf16.xpose.msra.mxu0 %v2865_v29  ;;  %v11203_v39 = vpop.f32.mrb[78].mxu0  ;;  %v1608_v14 = vadd.f32 %v11186_v41, %v13657_v5  ;;  %v1711_v57 = vadd.f32 %v13679_v62, %v1710_v34  ;;  %v2868_v34 = vsel %vm2162_vm1, %v1647_v46, 0 }
 0x25c   : > { %v11187_v2 = vpop.f32.mrb[74].mxu1  ;;  %v1722_v36 = vadd.f32 %v11203_v39, %v13679_v62  ;;  %12151 = vmatprep.subr.msk.bf16.mxu0 %vm2162_vm1, %v1647_v46  ;;  %v1713_v49 = vpop.f32.mrb[79].mxu0  ;;  %v1600_v29 = vadd.f32 %v13657_v5, %v1599_v55 }
 0x25d   : > { %v1611_v61 = vadd.f32 %v11187_v2, %v13657_v5  ;;  %v1602_v32 = vpop.f32.mrb[75].mxu1  ;;  %v1714_v1 = vadd.f32 %v13679_v62, %v1713_v49 }
 0x25e   : > { %v1603_v0 = vadd.f32 %v13657_v5, %v1602_v32  ;;  %v13692_v8 = vpack.c.bf16 %v1722_v36, %v1719_v47 }
 0x25f   : > { %v1649_v27 = vpack.c.bf16 %v1611_v61, %v1608_v14  ;;  %v13694_v39 = vpack.c.bf16 %v1714_v1, %v1711_v57 }
 0x260   : > { %17255 = vst [vmem:[#allocation32_spill] sm:$0xff] %v13692_v8  ;;  %v1648_v7 = vpack.c.bf16 %v1603_v0, %v1600_v29 }
 0x261   : > { %17256 = vst [vmem:[#allocation33_spill] sm:$0xff] %v13694_v39  ;;  %v11206_v19 = vpop.f32.mrb[80].mxu0 }
 0x262   : > { %v11190_v53 = vpop.f32.mrb[76].mxu1  ;;  %v1726_v41 = vpop.f32.mrb[81].mxu0  ;;  %v1735_v55 = vadd.f32 %v11206_v19, %v13679_v62 }
 0x263   : > { %v1624_v2 = vadd.f32 %v11190_v53, %v13657_v5  ;;  %v1615_v38 = vpop.f32.mrb[77].mxu1  ;;  %11363 = vmatpush3.bf16.xpose.msra.mxu0 %v2868_v34  ;;  %v11207_v49 = vpop.f32.mrb[82].mxu0  ;;  %v1727_v14 = vadd.f32 %v13679_v62, %v1726_v41 }
 0x264   : > { %v1616_v32 = vadd.f32 %v13657_v5, %v1615_v38  ;;  %v11191_v47 = vpop.f32.mrb[78].mxu1  ;;  %v1738_v61 = vadd.f32 %v11207_v49, %v13679_v62  ;;  %12152 = vmatprep.subr.msk.bf16.mxu0 %vm2162_vm1, %v1648_v7  ;;  %v1729_v0 = vpop.f32.mrb[83].mxu0 }
 0x265   : > { %v1627_v57 = vadd.f32 %v11191_v47, %v13657_v5  ;;  %v1618_v46 = vpop.f32.mrb[79].mxu1  ;;  %v1730_v53 = vadd.f32 %v13679_v62, %v1729_v0  ;;  %v2871_v47 = vsel %vm2162_vm1, %v1648_v7, 0 }
 0x266   : > { %v1619_v36 = vadd.f32 %v13657_v5, %v1618_v46  ;;  %v13706_v1 = vpack.c.bf16 %v1738_v61, %v1735_v55 }
 0x267   : > { %v13708_v19 = vpack.c.bf16 %v1627_v57, %v1624_v2  ;;  %v13710_v38 = vpack.c.bf16 %v1730_v53, %v1727_v14 }
 0x268   : > { %17257 = vst [vmem:[#allocation34_spill] sm:$0xff] %v13706_v1  ;;  %v13712_v29 = vpack.c.bf16 %v1619_v36, %v1616_v32 }
 0x269   : > { %17258 = vst [vmem:[#allocation35_spill] sm:$0xff] %v13710_v38  ;;  %v11210_v34 = vpop.f32.mrb[84].mxu0 }
 0x26a   : > { %v11194_v49 = vpop.f32.mrb[80].mxu1  ;;  %v1751_v8 = vadd.f32 %v11210_v34, %v13679_v62  ;;  %v1742_v41 = vpop.f32.mrb[85].mxu0 }
 0x26b   : > { %v1640_v39 = vadd.f32 %v11194_v49, %v13657_v5  ;;  %v1631_v0 = vpop.f32.mrb[81].mxu1  ;;  %v1743_v46 = vadd.f32 %v13679_v62, %v1742_v41  ;;  %11365 = vmatpush3.bf16.xpose.msra.mxu0 %v2871_v47  ;;  %v11211_v55 = vpop.f32.mrb[86].mxu0 }
 0x26c   : > { %v1632_v2 = vadd.f32 %v13657_v5, %v1631_v0  ;;  %v11195_v61 = vpop.f32.mrb[82].mxu1  ;;  %v1754_v32 = vadd.f32 %v11211_v55, %v13679_v62  ;;  %12153 = vmatprep.subr.msk.bf16.mxu0 %vm2162_vm1, %v1649_v27  ;;  %v1745_v14 = vpop.f32.mrb[87].mxu0 }
 0x26d   : > { %v1643_v57 = vadd.f32 %v11195_v61, %v13657_v5  ;;  %v1634_v53 = vpop.f32.mrb[83].mxu1  ;;  %v1746_v7 = vadd.f32 %v13679_v62, %v1745_v14  ;;  %v13736_v61 = vld [vmem:[%s17077_s5 + $0x3] ss:$0 sm:$0xff] }
 0x26e   : > { %v1635_v36 = vadd.f32 %v13657_v5, %v1634_v53  ;;  %v13724_v34 = vpack.c.bf16 %v1754_v32, %v1751_v8  ;;  %v2874_v5 = vsel %vm2162_vm1, %v1649_v27, 0 }
 0x26f   : > { %v13726_v49 = vpack.c.bf16 %v1643_v57, %v1640_v39  ;;  %v13728_v41 = vpack.c.bf16 %v1746_v7, %v1743_v46 }
 0x270   : > { %17259 = vst [vmem:[#allocation36_spill] sm:$0xff] %v13724_v34  ;;  %v13730_v47 = vpack.c.bf16 %v1635_v36, %v1632_v2 }
 0x271   : > { %17260 = vst [vmem:[#allocation37_spill] sm:$0xff] %v13728_v41  ;;  %v11214_v0 = vpop.f32.mrb[88].mxu0 }
 0x272   : > { %v1767_v55 = vadd.f32 %v11214_v0, %v13679_v62  ;;  %v11222_v1 = vpop.f32.mrb[84].mxu1  ;;  %v1758_v14 = vpop.f32.mrb[89].mxu0 }
 0x273   : > { %v1759_v8 = vadd.f32 %v13679_v62, %v1758_v14  ;;  %v1837_v39 = vpop.f32.mrb[85].mxu1  ;;  %11367 = vmatpush3.bf16.xpose.msra.mxu0 %v2874_v5  ;;  %v11215_v46 = vpop.f32.mrb[90].mxu0  ;;  %v13742_v53 = vadd.f32 %v11222_v1, %v13736_v61 }
 0x274   : > { %v1770_v2 = vadd.f32 %v11215_v46, %v13679_v62  ;;  %v11223_v32 = vpop.f32.mrb[86].mxu1  ;;  %v1761_v57 = vpop.f32.mrb[91].mxu0  ;;  %v1838_v27 = vadd.f32 %v13736_v61, %v1837_v39  ;;  %v17263_v39 = vpack.c.bf16 %v13578_v26, %v13574_v12 }
 0x275   : > { %v13745_v7 = vadd.f32 %v11223_v32, %v13736_v61  ;;  %v1762_v36 = vadd.f32 %v13679_v62, %v1761_v57  ;;  %v1840_v0 = vpop.f32.mrb[87].mxu1  ;;  %v13759_v32 = vld [vmem:[%s17077_s5 + $0x7] ss:$0 sm:$0xff]  ;;  %v17264_v57 = vpack.c.bf16 %v13611_v3, %v13607_v30 }
 0x276   : > { %v13749_v34 = vpack.c.bf16 %v1770_v2, %v1767_v55  ;;  %v1841_v14 = vadd.f32 %v13736_v61, %v1840_v0 }
 0x277   : > { %v13754_v46 = vpack.c.bf16 %v1762_v36, %v1759_v8 }
 0x278   : > { %17261 = vst [vmem:[#allocation38_spill] sm:$0xff] %v13749_v34  ;;  %v1900_v41 = vpack.c.bf16 %v1841_v14, %v1838_v27 }
 0x279   : > { %17262 = vst [vmem:[#allocation39_spill] sm:$0xff] %v13754_v46  ;;  %v11242_v1 = vpop.f32.mrb[92].mxu0 }
 0x27a   : > { %v11226_v62 = vpop.f32.mrb[88].mxu1  ;;  %11369 = vmatmul.mubr.msk.bf16.vlgmr.msra.gmra.mrb[124].mxu0 %vm2162_vm1, %v17263_v39  ;;  %v1964_v55 = vpop.f32.mrb[93].mxu0  ;;  %v1973_v36 = vadd.f32 %v11242_v1, %v13759_v32 }
 0x27b   : > { %v1853_v2 = vpop.f32.mrb[89].mxu1  ;;  %11372 = vmatprep.mubr.msk.bf16.mxu0 %vm2162_vm1, %v17264_v57  ;;  %v11243_v8 = vpop.f32.mrb[94].mxu0  ;;  %v13772_v5 = vadd.f32 %v11226_v62, %v13736_v61  ;;  %v1965_v12 = vadd.f32 %v13759_v32, %v1964_v55 }
 0x27c   : > { %v11227_v0 = vpop.f32.mrb[90].mxu1  ;;  %v1976_v27 = vadd.f32 %v11243_v8, %v13759_v32  ;;  %v1967_v14 = vpop.f32.mrb[95].mxu0  ;;  %v13780_v3 = vadd.f32 %v13736_v61, %v1853_v2  ;;  %v17265_v2 = vpack.c.bf16 %v13604_v54, %v13600_v10 }
 0x27d   : > { %v13776_v26 = vadd.f32 %v11227_v0, %v13736_v61  ;;  %v1856_v39 = vpop.f32.mrb[91].mxu1  ;;  %v1968_v30 = vadd.f32 %v13759_v32, %v1967_v14 }
 0x27e   : > { %v2028_v57 = vpack.c.bf16 %v1976_v27, %v1973_v36  ;;  %v13783_v1 = vadd.f32 %v13736_v61, %v1856_v39 }
 0x27f   : > { %v2027_v62 = vpack.c.bf16 %v1968_v30, %v1965_v12 }
 0x280   : > { %v3220_v45 = vsel %vm2162_vm1, %v2028_v57, 0 }
 0x281   : > { %v11246_v34 = vpop.f32.mrb[96].mxu0  ;;  %12155 = vmatprep.subr.msk.bf16.mxu0 %vm2162_vm1, %v2027_v62  ;;  %v3217_v0 = vsel %vm2162_vm1, %v2027_v62, 0 }
 0x282   : > { %v11230_v14 = vpop.f32.mrb[92].mxu1  ;;  %11373 = vmatmul.mubr.msk.bf16.gmra.mrb[128].mxu0 %vm2162_vm1, %v17265_v2  ;;  %v1980_v36 = vpop.f32.mrb[97].mxu0  ;;  %v1989_v30 = vadd.f32 %v11246_v34, %v13759_v32 }
 0x283   : > { %v13796_v27 = vadd.f32 %v11230_v14, %v13736_v61  ;;  %v1869_v39 = vpop.f32.mrb[93].mxu1  ;;  %11403 = vmatpush3.bf16.xpose.msra.mxu0 %v3217_v0  ;;  %11410 = vmatprep.mubr.msk.bf16.mxu0 %vm2162_vm1, %v1900_v41  ;;  %v11247_v12 = vpop.f32.mrb[98].mxu0  ;;  %v1981_v54 = vadd.f32 %v13759_v32, %v1980_v36 }
 0x284   : > { %v13801_v8 = vadd.f32 %v13736_v61, %v1869_v39  ;;  %v11231_v62 = vpop.f32.mrb[94].mxu1  ;;  %v1992_v55 = vadd.f32 %v11247_v12, %v13759_v32  ;;  %12156 = vmatprep.subr.msk.bf16.mxu0 %vm2162_vm1, %v2028_v57  ;;  %v1983_v10 = vpop.f32.mrb[99].mxu0 }
 0x285   : > { %17266 = vst [vmem:[#allocation40_spill] sm:$0xff] %v13796_v27  ;;  %v13807_v14 = vadd.f32 %v11231_v62, %v13736_v61  ;;  %v1872_v0 = vpop.f32.mrb[95].mxu1  ;;  %v1984_v41 = vadd.f32 %v13759_v32, %v1983_v10 }
 0x286   : > { %17267 = vst [vmem:[#allocation41_spill] sm:$0xff] %v13801_v8  ;;  %v2030_v2 = vpack.c.bf16 %v1992_v55, %v1989_v30  ;;  %v13811_v34 = vadd.f32 %v13736_v61, %v1872_v0 }
 0x287   : > { %17268 = vst [vmem:[#allocation42_spill] sm:$0xff] %v13807_v14  ;;  %v2029_v46 = vpack.c.bf16 %v1984_v41, %v1981_v54 }
 0x288   : > { %17269 = vst [vmem:[#allocation43_spill] sm:$0xff] %v13811_v34  ;;  %v3226_v58 = vsel %vm2162_vm1, %v2030_v2, 0 }
 0x289   : > { %v11250_v38 = vpop.f32.mrb[100].mxu0 }
 0x28a   : > { %v11234_v13 = vpop.f32.mrb[96].mxu1  ;;  %v2005_v36 = vadd.f32 %v11250_v38, %v13759_v32  ;;  %v1996_v62 = vpop.f32.mrb[101].mxu0 }
 0x28b   : > { %v13820_v10 = vadd.f32 %v11234_v13, %v13736_v61  ;;  %v1885_v55 = vpop.f32.mrb[97].mxu1  ;;  %v1997_v30 = vadd.f32 %v13759_v32, %v1996_v62  ;;  %11405 = vmatpush3.bf16.xpose.msra.mxu0 %v3220_v45  ;;  %v11251_v0 = vpop.f32.mrb[102].mxu0 }
 0x28c   : > { %v13824_v54 = vadd.f32 %v13736_v61, %v1885_v55  ;;  %v11235_v41 = vpop.f32.mrb[98].mxu1  ;;  %v2008_v39 = vadd.f32 %v11251_v0, %v13759_v32  ;;  %12157 = vmatprep.subr.msk.bf16.mxu0 %vm2162_vm1, %v2029_v46  ;;  %v1999_v38 = vpop.f32.mrb[103].mxu0 }
 0x28d   : > { %17270 = vst [vmem:[#allocation44_spill] sm:$0xff] %v13820_v10  ;;  %v13829_v12 = vadd.f32 %v11235_v41, %v13736_v61  ;;  %v1888_v57 = vpop.f32.mrb[99].mxu1  ;;  %v2000_v13 = vadd.f32 %v13759_v32, %v1999_v38  ;;  %v13846_v41 = vld [vmem:[%s17077_s5 + $0xb] ss:$0 sm:$0xff] }
 0x28e   : > { %17271 = vst [vmem:[#allocation45_spill] sm:$0xff] %v13824_v54  ;;  %v13832_v27 = vpack.c.bf16 %v2008_v39, %v2005_v36  ;;  %v13835_v45 = vadd.f32 %v13736_v61, %v1888_v57  ;;  %v3223_v61 = vsel %vm2162_vm1, %v2029_v46, 0 }
 0x28f   : > { %17272 = vst [vmem:[#allocation46_spill] sm:$0xff] %v13829_v12  ;;  %v13839_v55 = vpack.c.bf16 %v2000_v13, %v1997_v30 }
 0x290   : > { %17273 = vst [vmem:[#allocation47_spill] sm:$0xff] %v13835_v45 }
 0x291   : > { %v11254_v14 = vpop.f32.mrb[104].mxu0 }
 0x292   : > { %v2021_v39 = vadd.f32 %v11254_v14, %v13759_v32  ;;  %v11262_v36 = vpop.f32.mrb[100].mxu1  ;;  %v2012_v38 = vpop.f32.mrb[105].mxu0 }
 0x293   : > { %v2100_v57 = vadd.f32 %v11262_v36, %v13846_v41  ;;  %v2013_v30 = vadd.f32 %v13759_v32, %v2012_v38  ;;  %v2091_v13 = vpop.f32.mrb[101].mxu1  ;;  %11407 = vmatpush3.bf16.xpose.msra.mxu0 %v3223_v61  ;;  %v11255_v62 = vpop.f32.mrb[106].mxu0 }
 0x294   : > { %v2024_v0 = vadd.f32 %v11255_v62, %v13759_v32  ;;  %v11263_v10 = vpop.f32.mrb[102].mxu1  ;;  %12158 = vmatprep.subr.msk.bf16.mxu0 %vm2162_vm1, %v2030_v2  ;;  %v2015_v12 = vpop.f32.mrb[107].mxu0  ;;  %v2092_v46 = vadd.f32 %v13846_v41, %v2091_v13  ;;  %v17278_v13 = vpack.c.bf16 %v13783_v1, %v13780_v3  ;;  %v17281_v3 = vpack.c.bf16 %v13776_v26, %v13772_v5 }
 0x295   : > { %v2103_v54 = vadd.f32 %v11263_v10, %v13846_v41  ;;  %v2016_v14 = vadd.f32 %v13759_v32, %v2015_v12  ;;  %v2094_v45 = vpop.f32.mrb[103].mxu1  ;;  %v3584_v1 = vsel %vm2162_vm1, %v13409_v22, 0 }
 0x296   : > { %v13857_v8 = vpack.c.bf16 %v2024_v0, %v2021_v39  ;;  %v2095_v36 = vadd.f32 %v13846_v41, %v2094_v45 }
 0x297   : > { %v13860_v38 = vpack.c.bf16 %v2103_v54, %v2100_v57  ;;  %v13862_v61 = vpack.c.bf16 %v2016_v14, %v2013_v30 }
 0x298   : > { %v13864_v62 = vpack.c.bf16 %v2095_v36, %v2092_v46 }
 0x299   : > { %17274 = vst [vmem:[#allocation48_spill] sm:$0xff] %v13860_v38 }
 0x29a   : > { %v11266_v34 = vpop.f32.mrb[104].mxu1 }
 0x29b   : > { %v2116_v10 = vadd.f32 %v11266_v34, %v13846_v41  ;;  %v2107_v40 = vpop.f32.mrb[105].mxu1  ;;  %11409 = vmatpush3.bf16.xpose.msra.mxu0 %v3226_v58  ;;  %v17277_v34 = vpack.c.bf16 %v13745_v7, %v13742_v53  ;;  %v3581_v58 = vsel %vm2162_vm1, %v13411_v24, 0 }
 0x29c   : > { %v2108_v32 = vadd.f32 %v13846_v41, %v2107_v40  ;;  %v11267_v12 = vpop.f32.mrb[106].mxu1  ;;  %12160 = vmatprep.subr.msk.bf16.mxu0 %vm2162_vm1, %v13411_v24 }
 0x29d   : > { %v2119_v54 = vadd.f32 %v11267_v12, %v13846_v41  ;;  %v2110_v45 = vpop.f32.mrb[107].mxu1 }
 0x29e   : > { %v2111_v0 = vadd.f32 %v13846_v41, %v2110_v45  ;;  %v17282_v45 = vpack.c.bf16 %v13375_v28, %v13369_v20  ;;  %v3587_v20 = vsel %vm2162_vm1, %v13429_v21, 0  ;;  %v3590_v28 = vsel %vm2162_vm1, %v13425_v15, 0 }
 0x29f   : > { %v13873_v39 = vpack.c.bf16 %v2119_v54, %v2116_v10 }
 0x2a0   : > { %v13875_v57 = vpack.c.bf16 %v2111_v0, %v2108_v32 }
 0x2a1   : > { %17275 = vst [vmem:[#allocation49_spill] sm:$0xff] %v13873_v39 }
 0x2a2   : > { %17276 = vst [vmem:[#allocation50_spill] sm:$0xff] %v13875_v57  ;;  %v11270_v2 = vpop.f32.mrb[108].mxu1  ;;  %11411 = vmatmul.mubr.msk.bf16.vlgmr.msra.gmra.mrb[132].mxu0 %vm2162_vm1, %v17277_v34 }
 0x2a3   : > { %v2132_v40 = vadd.f32 %v11270_v2, %v13846_v41  ;;  %v2123_v30 = vpop.f32.mrb[109].mxu1  ;;  %11414 = vmatprep.mubr.msk.bf16.mxu0 %vm2162_vm1, %v17278_v13  ;;  %11445 = vmatpush3.bf16.xpose.msra.mxu0 %v3581_v58 }
 0x2a4   : > { %v2124_v14 = vadd.f32 %v13846_v41, %v2123_v30  ;;  %v11271_v46 = vpop.f32.mrb[110].mxu1  ;;  %12161 = vmatprep.subr.msk.bf16.mxu0 %vm2162_vm1, %v13409_v22 }
 0x2a5   : > { %v2135_v53 = vadd.f32 %v11271_v46, %v13846_v41  ;;  %v2126_v7 = vpop.f32.mrb[111].mxu1 }
 0x2a6   : > { %v2127_v24 = vadd.f32 %v13846_v41, %v2126_v7  ;;  %v17293_v7 = vpack.c.bf16 %v13636_v18, %v13623_v43  ;;  %v4609_v43 = vsel %vm2162_vm1, %v13832_v27, 0  ;;  %v17298_v18 = vld [vmem:[#allocation43_spill] sm:$0xff] }
 0x2a7   : > { %v13893_v36 = vpack.c.bf16 %v2135_v53, %v2132_v40  ;;  %v3843_v40 = vsel %vm2162_vm1, %v13538_v52, 0 }
 0x2a8   : > { %v13895_v10 = vpack.c.bf16 %v2127_v24, %v2124_v14  ;;  %v4268_v14 = vsel %vm2162_vm1, %v13726_v49, 0  ;;  %v17294_v24 = vpack.c.bf16 %v13668_v4, %v13660_v17  ;;  %v4612_v4 = vsel %vm2162_vm1, %v13862_v61, 0 }
 0x2a9   : > { %17279 = vst [vmem:[#allocation51_spill] sm:$0xff] %v13893_v36 }
 0x2aa   : > { %17280 = vst [vmem:[#allocation52_spill] sm:$0xff] %v13895_v10  ;;  %v11274_v32 = vpop.f32.mrb[112].mxu1  ;;  %11415 = vmatmul.mubr.msk.bf16.gmra.mrb[136].mxu0 %vm2162_vm1, %v17281_v3  ;;  %v17296_v3 = vld [vmem:[#allocation30_spill] sm:$0xff] }
 0x2ab   : > { %v2148_v12 = vadd.f32 %v11274_v32, %v13846_v41  ;;  %v2139_v54 = vpop.f32.mrb[113].mxu1  ;;  %11447 = vmatpush3.bf16.xpose.msra.mxu0 %v3584_v1  ;;  %11452 = vmatprep.mubr.msk.bf16.mxu0 %vm2162_vm1, %v17282_v45  ;;  %v17295_v32 = vld [vmem:[#allocation31_spill] sm:$0xff] }
 0x2ac   : > { %v2140_v0 = vadd.f32 %v13846_v41, %v2139_v54  ;;  %v11275_v2 = vpop.f32.mrb[114].mxu1  ;;  %12162 = vmatprep.subr.msk.bf16.mxu0 %vm2162_vm1, %v13429_v21  ;;  %v17286_v21 = vpack.c.bf16 %v13354_v11, %v13344_v63  ;;  %v3849_v63 = vsel %vm2162_vm1, %v13561_v42, 0  ;;  %v4259_v11 = vsel %vm2162_vm1, %v13712_v29, 0 }
 0x2ad   : > { %v2151_v5 = vadd.f32 %v11275_v2, %v13846_v41  ;;  %v2142_v26 = vpop.f32.mrb[115].mxu1  ;;  %v17297_v1 = vpack.c.bf16 %v17295_v32, %v17296_v3 }
 0x2ae   : > { %v2143_v22 = vadd.f32 %v13846_v41, %v2142_v26  ;;  %v17285_v41 = vpack.c.bf16 %v13371_v23, %v13362_v16  ;;  %v3846_v16 = vsel %vm2162_vm1, %v13531_v35, 0  ;;  %v17288_v23 = vpack.c.bf16 %v13510_v44, %v13500_v37 }
 0x2af   : > { %v13913_v34 = vpack.c.bf16 %v2151_v5, %v2148_v12  ;;  %v17292_v37 = vpack.c.bf16 %v13640_v33, %v13631_v48 }
 0x2b0   : > { %v13915_v58 = vpack.c.bf16 %v2143_v22, %v2140_v0 }
 0x2b1   : > { %17283 = vst [vmem:[#allocation53_spill] sm:$0xff] %v13913_v34 }
 0x2b2   : > { %17284 = vst [vmem:[#allocation54_spill] sm:$0xff] %v13915_v58 }
 0x2b3   : > { %11449 = vmatpush3.bf16.xpose.msra.mxu0 %v3587_v20 }
 0x2b4   : > { %12163 = vmatprep.subr.msk.bf16.mxu0 %vm2162_vm1, %v13425_v15  ;;  %v17287_v15 = vpack.c.bf16 %v13350_v6, %v13340_v56  ;;  %v3852_v56 = vsel %vm2162_vm1, %v13556_v60, 0  ;;  %v17289_v6 = vpack.c.bf16 %v13506_v9, %v13495_v25  ;;  %v4262_v25 = vsel %vm2162_vm1, %v13708_v19, 0 }
 0x2bb   : > { %11451 = vmatpush3.bf16.xpose.msra.mxu0 %v3590_v28 }
 0x2bc   : > { %12164 = vmatprep.subr.msk.bf16.mxu0 %vm2162_vm1, %v13538_v52  ;;  %v4265_v52 = vsel %vm2162_vm1, %v13730_v47, 0 }
 0x2c2   : > { %11453 = vmatmul.mubr.msk.bf16.vlgmr.msra.gmra.mrb[140].mxu0 %vm2162_vm1, %v17285_v41 }
 0x2c3   : > { %11456 = vmatprep.mubr.msk.bf16.mxu0 %vm2162_vm1, %v17286_v21  ;;  %11477 = vmatpush3.bf16.xpose.msra.mxu0 %v3843_v40  ;;  %v17301_v21 = vld [vmem:[#allocation42_spill] sm:$0xff] }
 0x2c4   : > { %12165 = vmatprep.subr.msk.bf16.mxu0 %vm2162_vm1, %v13531_v35  ;;  %v17290_v35 = vpack.c.bf16 %v13534_v31, %v13523_v59 }
 0x2ca   : > { %11457 = vmatmul.mubr.msk.bf16.gmra.mrb[144].mxu0 %vm2162_vm1, %v17287_v15  ;;  %v17302_v15 = vld [vmem:[#allocation40_spill] sm:$0xff] }
 0x2cb   : > { %11479 = vmatpush3.bf16.xpose.msra.mxu0 %v3846_v16  ;;  %11484 = vmatprep.mubr.msk.bf16.mxu0 %vm2162_vm1, %v17288_v23  ;;  %v17303_v16 = vpack.c.bf16 %v17301_v21, %v17302_v15  ;;  %v17304_v23 = vld [vmem:[#allocation47_spill] sm:$0xff] }
 0x2cc   : > { %12166 = vmatprep.subr.msk.bf16.mxu0 %vm2162_vm1, %v13561_v42 }
 0x2d3   : > { %11481 = vmatpush3.bf16.xpose.msra.mxu0 %v3849_v63  ;;  %v17305_v63 = vld [vmem:[#allocation45_spill] sm:$0xff] }
 0x2d4   : > { %12167 = vmatprep.subr.msk.bf16.mxu0 %vm2162_vm1, %v13556_v60  ;;  %v17291_v60 = vpack.c.bf16 %v13528_v50, %v13519_v51 }
 0x2db   : > { %11483 = vmatpush3.bf16.xpose.msra.mxu0 %v3852_v56  ;;  %v17306_v56 = vpack.c.bf16 %v17304_v23, %v17305_v63 }
 0x2dc   : > { %12170 = vmatprep.subr.msk.bf16.mxu0 %vm2162_vm1, %v13712_v29 }
 0x2e2   : > { %11485 = vmatmul.mubr.msk.bf16.vlgmr.msra.gmra.mrb[148].mxu0 %vm2162_vm1, %v17289_v6 }
 0x2e3   : > { %11488 = vmatprep.mubr.msk.bf16.mxu0 %vm2162_vm1, %v17290_v35  ;;  %11529 = vmatpush3.bf16.xpose.msra.mxu0 %v4259_v11  ;;  %v17307_v35 = vld [vmem:[#allocation46_spill] sm:$0xff] }
 0x2e4   : > { %12171 = vmatprep.subr.msk.bf16.mxu0 %vm2162_vm1, %v13708_v19 }
 0x2ea   : > { %11489 = vmatmul.mubr.msk.bf16.gmra.mrb[152].mxu0 %vm2162_vm1, %v17291_v60  ;;  %v17308_v60 = vld [vmem:[#allocation44_spill] sm:$0xff] }
 0x2eb   : > { %11531 = vmatpush3.bf16.xpose.msra.mxu0 %v4262_v25  ;;  %11536 = vmatprep.mubr.msk.bf16.mxu0 %vm2162_vm1, %v17292_v37  ;;  %v17309_v25 = vpack.c.bf16 %v17307_v35, %v17308_v60 }
 0x2ec   : > { %12172 = vmatprep.subr.msk.bf16.mxu0 %vm2162_vm1, %v13730_v47 }
 0x2ed   : > { %v13981_v9 = vpop.f32.mrb[108].mxu0 }
 0x2ee   : > { %v13983_v44 = vpop.f32.mrb[109].mxu0  ;;  %v2259_v50 = vsel %vm2252_vm2, %v13981_v9, -inf }
 0x2ef   : > { %2260 = vmax.xlane.f32.xlu1 %v2259_v50  ;;  %v13987_v51 = vpop.f32.mrb[110].mxu0  ;;  %v2253_v59 = vsel %vm2252_vm2, %v13983_v44, -inf }
 0x2f0   : > { %2254 = vmax.xlane.f32.xlu0 %v2253_v59  ;;  %v13991_v31 = vpop.f32.mrb[111].mxu0  ;;  %v2262_v42 = vsel %vm2252_vm2, %v13987_v51, -inf }
 0x2f1   : > { %v2256_v48 = vsel %vm2252_vm2, %v13991_v31, -inf }
 0x2f3   : > { %11533 = vmatpush3.bf16.xpose.msra.mxu0 %v4265_v52  ;;  %2263 = vmax.xlane.f32.xlu1 %v2262_v42 }
 0x2f4   : > { %12173 = vmatprep.subr.msk.bf16.mxu0 %vm2162_vm1, %v13726_v49  ;;  %2257 = vmax.xlane.f32.xlu0 %v2256_v48  ;;  %v4606_v49 = vsel %vm2162_vm1, %v13839_v55, 0 }
 0x2f5   : > { %v14001_v33 = vpop.f32.mrb[112].mxu0 }
 0x2f6   : > { %v14003_v19 = vpop.f32.mrb[113].mxu0  ;;  %v2271_v46 = vsel %vm2252_vm2, %v14001_v33, -inf }
 0x2f7   : > { %v14005_v29 = vpop.f32.mrb[114].mxu0  ;;  %v2265_v47 = vsel %vm2252_vm2, %v14003_v19, -inf }
 0x2f8   : > { %2266 = vmax.xlane.f32.xlu0 %v2265_v47  ;;  %v14009_v30 = vpop.f32.mrb[115].mxu0  ;;  %v2274_v53 = vsel %vm2252_vm2, %v14005_v29, -inf }
 0x2f9   : > { %v2268_v13 = vsel %vm2252_vm2, %v14009_v30, -inf }
 0x2fa   : > { %2269 = vmax.xlane.f32.xlu1 %v2268_v13 }
 0x2fb   : > { %11535 = vmatpush3.bf16.xpose.msra.mxu0 %v4268_v14 }
 0x2fc   : > { %12175 = vmatprep.subr.msk.bf16.mxu0 %vm2162_vm1, %v13839_v55  ;;  %2272 = vmax.xlane.f32.xlu0 %v2271_v46  ;;  %v17299_v55 = vld [vmem:[#allocation41_spill] sm:$0xff] }
 0x2fd   : > { %v17300_v12 = vpack.c.bf16 %v17298_v18, %v17299_v55 }
 0x2fe   : > { %2275 = vmax.xlane.f32.xlu1 %v2274_v53 }
 0x302   : > { %11537 = vmatmul.mubr.msk.bf16.vlgmr.msra.gmra.mrb[156].mxu0 %vm2162_vm1, %v17293_v7 }
 0x303   : > { %11540 = vmatprep.mubr.msk.bf16.mxu0 %vm2162_vm1, %v17294_v24  ;;  %11571 = vmatpush3.bf16.xpose.msra.mxu0 %v4606_v49 }
 0x304   : > { %12176 = vmatprep.subr.msk.bf16.mxu0 %vm2162_vm1, %v13832_v27 }
 0x30a   : > { %11541 = vmatmul.mubr.msk.bf16.gmra.mrb[160].mxu0 %vm2162_vm1, %v17297_v1 }
 0x30b   : > { %11573 = vmatpush3.bf16.xpose.msra.mxu0 %v4609_v43  ;;  %11578 = vmatprep.mubr.msk.bf16.mxu0 %vm2162_vm1, %v17300_v12 }
 0x30c   : > { %12177 = vmatprep.subr.msk.bf16.mxu0 %vm2162_vm1, %v13862_v61  ;;  %v4615_v61 = vsel %vm2162_vm1, %v13857_v8, 0 }
 0x313   : > { %11575 = vmatpush3.bf16.xpose.msra.mxu0 %v4612_v4 }
 0x314   : > { %12178 = vmatprep.subr.msk.bf16.mxu0 %vm2162_vm1, %v13857_v8 }
 0x315   : > { %v14049_v17 = vpop.f32.mrb[116].mxu0 }
 0x316   : > { %v14051_v54 = vpop.f32.mrb[117].mxu0  ;;  %v2522_v5 = vsel %vm2252_vm2, %v14049_v17, -inf }
 0x317   : > { %v14053_v27 = vpop.f32.mrb[118].mxu0  ;;  %v2516_v45 = vsel %vm2252_vm2, %v14051_v54, -inf }
 0x318   : > { %2517 = vmax.xlane.f32.xlu0 %v2516_v45  ;;  %v14057_v0 = vpop.f32.mrb[119].mxu0  ;;  %v2525_v22 = vsel %vm2252_vm2, %v14053_v27, -inf }
 0x319   : > { %v2519_v2 = vsel %vm2252_vm2, %v14057_v0, -inf }
 0x31a   : > { %2520 = vmax.xlane.f32.xlu1 %v2519_v2 }
 0x31b   : > { %11577 = vmatpush3.bf16.xpose.msra.mxu0 %v4615_v61 }
 0x31c   : > { %2523 = vmax.xlane.f32.xlu0 %v2522_v5 }
 0x31d   : > { %v14065_v26 = vpop.f32.mrb[120].mxu0 }
 0x31e   : > { %v14069_v20 = vpop.f32.mrb[121].mxu0  ;;  %2526 = vmax.xlane.f32.xlu1 %v2525_v22  ;;  %v2534_v6 = vsel %vm2252_vm2, %v14065_v26, -inf }
 0x31f   : > { %v14071_v28 = vpop.f32.mrb[122].mxu0  ;;  %v2528_v41 = vsel %vm2252_vm2, %v14069_v20, -inf }
 0x320   : > { %2529 = vmax.xlane.f32.xlu0 %v2528_v41  ;;  %v14075_v8 = vpop.f32.mrb[123].mxu0  ;;  %v2537_v11 = vsel %vm2252_vm2, %v14071_v28, -inf }
 0x321   : > { %v2531_v40 = vsel %vm2252_vm2, %v14075_v8, -inf }
 0x322   : > { %11579 = vmatmul.mubr.msk.bf16.vlgmr.msra.gmra.mrb[164].mxu0 %vm2162_vm1, %v17303_v16  ;;  %2532 = vmax.xlane.f32.xlu1 %v2531_v40 }
 0x323   : > { %11582 = vmatprep.mubr.msk.bf16.mxu0 %vm2162_vm1, %v17306_v56 }
 0x324   : > { %2535 = vmax.xlane.f32.xlu0 %v2534_v6 }
 0x326   : > { %2538 = vmax.xlane.f32.xlu1 %v2537_v11 }
 0x32a   : > { %11583 = vmatmul.mubr.msk.bf16.gmra.mrb[168].mxu0 %vm2162_vm1, %v17309_v25 }
 0x34d   : > { %v14095_v37 = vpop.f32.mrb[124].mxu0 }
 0x34e   : > { %v14097_v50 = vpop.f32.mrb[125].mxu0 }
 0x34f   : > { %v14099_v59 = vpop.f32.mrb[126].mxu0 }
 0x350   : > { %v14101_v52 = vpop.f32.mrb[127].mxu0 }
 0x355   : > { %v14103_v42 = vpop.f32.mrb[128].mxu0 }
 0x356   : > { %v14105_v48 = vpop.f32.mrb[129].mxu0 }
 0x357   : > { %v14107_v47 = vpop.f32.mrb[130].mxu0 }
 0x358   : > { %v14109_v13 = vpop.f32.mrb[131].mxu0 }
 0x375   : > { %v14111_v14 = vpop.f32.mrb[132].mxu0 }
 0x376   : > { %v14113_v46 = vpop.f32.mrb[133].mxu0 }
 0x377   : > { %v14115_v53 = vpop.f32.mrb[134].mxu0 }
 0x378   : > { %v14117_v7 = vpop.f32.mrb[135].mxu0 }
 0x37c   : > { %v2261_v49 = vpop.xlane.xlu1 %2260 }
 0x37d   : > { %v2279_v24 = vsub.f32 %v13981_v9, %v2261_v49  ;;  %v2255_v32 = vpop.xlane.xlu0 %2254  ;;  %v14120_v3 = vpop.f32.mrb[136].mxu0 }
 0x37e   : > { %v2277_v1 = vsub.f32 %v13983_v44, %v2255_v32  ;;  %v14123_v43 = vpop.f32.mrb[137].mxu0 }
 0x37f   : > { %v14125_v18 = vpop.f32.mrb[138].mxu0  ;;  %v2289_v55 = vmul.f32 1.442695, %v2279_v24 }
 0x380   : > { %v2285_v12 = vmul.f32 1.442695, %v2277_v1  ;;  %v2264_v4 = vpop.xlane.xlu1 %2263  ;;  %v14127_v45 = vpop.f32.mrb[139].mxu0 }
 0x381   : > { %v2280_v2 = vsub.f32 %v13987_v51, %v2264_v4  ;;  %v2258_v61 = vpop.xlane.xlu0 %2257 }
 0x382   : > { %12290 = vpow2.f32 %v2285_v12  ;;  %v2278_v9 = vsub.f32 %v13991_v31, %v2258_v61 }
 0x383   : > { %12292 = vpow2.f32 %v2289_v55  ;;  %v2291_v5 = vmul.f32 1.442695, %v2280_v2 }
 0x384   : > { %v2287_v22 = vmul.f32 1.442695, %v2278_v9 }
 0x385   : > { %v2267_v41 = vpop.xlane.xlu0 %2266 }
 0x386   : > { %12294 = vpow2.f32 %v2287_v22  ;;  %v2281_v44 = vsub.f32 %v14003_v19, %v2267_v41 }
 0x387   : > { %v2270_v40 = vpop.xlane.xlu1 %2269  ;;  %12296 = vpow2.f32 %v2291_v5 }
 0x388   : > { %v2293_v21 = vmul.f32 1.442695, %v2281_v44  ;;  %v2282_v15 = vsub.f32 %v14009_v30, %v2270_v40 }
 0x389   : > { %v2273_v16 = vpop.xlane.xlu0 %2272 }
 0x38a   : > { %12298 = vpow2.f32 %v2293_v21  ;;  %v2295_v23 = vmul.f32 1.442695, %v2282_v15  ;;  %v2283_v51 = vsub.f32 %v14001_v33, %v2273_v16 }
 0x38b   : > { %v2276_v63 = vpop.xlane.xlu1 %2275 }
 0x38c   : > { %v14134_v56 = vpop.eup %12290  ;;  %12300 = vpow2.f32 %v2295_v23  ;;  %v2297_v31 = vmul.f32 1.442695, %v2283_v51  ;;  %v2284_v6 = vsub.f32 %v14005_v29, %v2276_v63 }
 0x38d   : > { %v2301_v19 = vsel %vm2252_vm2, %v14134_v56, 0.0  ;;  %v14139_v11 = vpop.eup %12292 }
 0x38e   : > { %12302 = vpow2.f32 %v2297_v31  ;;  %v2299_v35 = vmul.f32 1.442695, %v2284_v6  ;;  %2302 = vadd.xlane.f32.xlu0 %v2301_v19  ;;  %v2307_v33 = vsel %vm2252_vm2, %v14139_v11, 0.0 }
 0x390   : > { %v14141_v30 = vpop.eup %12294  ;;  %12304 = vpow2.f32 %v2299_v35 }
 0x391   : > { %v2304_v60 = vsel %vm2252_vm2, %v14141_v30, 0.0  ;;  %v14147_v25 = vpop.eup %12296 }
 0x392   : > { %2308 = vadd.xlane.f32.xlu0 %v2307_v33  ;;  %2305 = vadd.xlane.f32.xlu1 %v2304_v60  ;;  %v2310_v32 = vsel %vm2252_vm2, %v14147_v25, 0.0 }
 0x394   : > { %v14149_v29 = vpop.eup %12298 }
 0x395   : > { %v14151_v49 = vpop.f32.mrb[140].mxu0  ;;  %v2313_v24 = vsel %vm2252_vm2, %v14149_v29, 0.0 }
 0x396   : > { %v14157_v1 = vpop.eup %12300  ;;  %2314 = vadd.xlane.f32.xlu0 %v2313_v24  ;;  %v14159_v55 = vpop.f32.mrb[141].mxu0  ;;  %2311 = vadd.xlane.f32.xlu1 %v2310_v32 }
 0x397   : > { %v14161_v12 = vpop.f32.mrb[142].mxu0  ;;  %v2316_v9 = vsel %vm2252_vm2, %v14157_v1, 0.0 }
 0x398   : > { %v14163_v4 = vpop.eup %12302  ;;  %v14165_v2 = vpop.f32.mrb[143].mxu0 }
 0x399   : > { %v2319_v61 = vsel %vm2252_vm2, %v14163_v4, 0.0 }
 0x39a   : > { %v14171_v5 = vpop.eup %12304  ;;  %2320 = vadd.xlane.f32.xlu0 %v2319_v61  ;;  %2317 = vadd.xlane.f32.xlu1 %v2316_v9 }
 0x39b   : > { %v2322_v41 = vsel %vm2252_vm2, %v14171_v5, 0.0 }
 0x39d   : > { %v14173_v22 = vpop.f32.mrb[144].mxu0 }
 0x39e   : > { %v14177_v44 = vpop.f32.mrb[145].mxu0  ;;  %2323 = vadd.xlane.f32.xlu1 %v2322_v41 }
 0x39f   : > { %v14179_v40 = vpop.f32.mrb[146].mxu0 }
 0x3a0   : > { %v14181_v21 = vpop.f32.mrb[147].mxu0 }
 0x3a5   : > { %v2518_v15 = vpop.xlane.xlu0 %2517 }
 0x3a6   : > { %v2540_v16 = vsub.f32 %v14051_v54, %v2518_v15 }
 0x3a7   : > { %v2521_v23 = vpop.xlane.xlu1 %2520 }
 0x3a8   : > { %v2548_v51 = vmul.f32 1.442695, %v2540_v16  ;;  %v2541_v63 = vsub.f32 %v14057_v0, %v2521_v23 }
 0x3a9   : > { %v2524_v31 = vpop.xlane.xlu0 %2523 }
 0x3aa   : > { %12306 = vpow2.f32 %v2548_v51  ;;  %v2550_v6 = vmul.f32 1.442695, %v2541_v63  ;;  %v2542_v19 = vsub.f32 %v14049_v17, %v2524_v31 }
 0x3ab   : > { %v2527_v35 = vpop.xlane.xlu1 %2526 }
 0x3ac   : > { %12308 = vpow2.f32 %v2550_v6  ;;  %v2552_v33 = vmul.f32 1.442695, %v2542_v19  ;;  %v2543_v60 = vsub.f32 %v14053_v27, %v2527_v35 }
 0x3ad   : > { %v2530_v24 = vpop.xlane.xlu0 %2529 }
 0x3ae   : > { %12310 = vpow2.f32 %v2552_v33  ;;  %v2554_v32 = vmul.f32 1.442695, %v2543_v60  ;;  %v2544_v61 = vsub.f32 %v14069_v20, %v2530_v24 }
 0x3af   : > { %v2533_v54 = vpop.xlane.xlu1 %2532 }
 0x3b0   : > { %12312 = vpow2.f32 %v2554_v32  ;;  %v2556_v9 = vmul.f32 1.442695, %v2544_v61  ;;  %v2545_v0 = vsub.f32 %v14075_v8, %v2533_v54 }
 0x3b1   : > { %v2536_v41 = vpop.xlane.xlu0 %2535 }
 0x3b2   : > { %12314 = vpow2.f32 %v2556_v9  ;;  %v2558_v15 = vmul.f32 1.442695, %v2545_v0  ;;  %v2546_v17 = vsub.f32 %v14065_v26, %v2536_v41 }
 0x3b3   : > { %v2539_v16 = vpop.xlane.xlu1 %2538 }
 0x3b4   : > { %v14190_v23 = vpop.eup %12306  ;;  %12316 = vpow2.f32 %v2558_v15  ;;  %v2560_v27 = vmul.f32 1.442695, %v2546_v17  ;;  %v2547_v51 = vsub.f32 %v14071_v28, %v2539_v16 }
 0x3b5   : > { %v14193_v63 = vpop.f32.mrb[148].mxu0  ;;  %v2564_v20 = vsel %vm2252_vm2, %v14190_v23, 0.0 }
 0x3b6   : > { %v14197_v31 = vpop.eup %12308  ;;  %12318 = vpow2.f32 %v2560_v27  ;;  %v2562_v8 = vmul.f32 1.442695, %v2547_v51  ;;  %2565 = vadd.xlane.f32.xlu0 %v2564_v20  ;;  %v14199_v6 = vpop.f32.mrb[149].mxu0 }
 0x3b7   : > { %v14201_v26 = vpop.f32.mrb[150].mxu0  ;;  %v2567_v19 = vsel %vm2252_vm2, %v14197_v31, 0.0 }
 0x3b8   : > { %v14205_v35 = vpop.eup %12310  ;;  %12320 = vpow2.f32 %v2562_v8  ;;  %v14207_v28 = vpop.f32.mrb[151].mxu0  ;;  %2568 = vadd.xlane.f32.xlu1 %v2567_v19  ;;  %v2941_v8 = vsel %vm2252_vm2, %v14097_v50, -inf  ;;  %v2944_v19 = vsel %vm2252_vm2, %v14101_v52, -inf }
 0x3b9   : > { %v2570_v33 = vsel %vm2252_vm2, %v14205_v35, 0.0 }
 0x3ba   : > { %v14211_v60 = vpop.eup %12312  ;;  %2571 = vadd.xlane.f32.xlu0 %v2570_v33  ;;  %v2947_v33 = vsel %vm2252_vm2, %v14095_v37, -inf }
 0x3bb   : > { %v2573_v24 = vsel %vm2252_vm2, %v14211_v60, 0.0 }
 0x3bc   : > { %v14215_v32 = vpop.eup %12314  ;;  %2574 = vadd.xlane.f32.xlu1 %v2573_v24  ;;  %v2950_v24 = vsel %vm2252_vm2, %v14099_v59, -inf }
 0x3bd   : > { %v14217_v61 = vpop.f32.mrb[152].mxu0  ;;  %v2576_v54 = vsel %vm2252_vm2, %v14215_v32, 0.0 }
 0x3be   : > { %v14221_v9 = vpop.eup %12316  ;;  %2577 = vadd.xlane.f32.xlu0 %v2576_v54  ;;  %v14223_v0 = vpop.f32.mrb[153].mxu0  ;;  %v2953_v54 = vsel %vm2252_vm2, %v14105_v48, -inf }
 0x3bf   : > { %v14225_v41 = vpop.f32.mrb[154].mxu0  ;;  %v2579_v15 = vsel %vm2252_vm2, %v14221_v9, 0.0 }
 0x3c0   : > { %v14229_v17 = vpop.eup %12318  ;;  %v14231_v16 = vpop.f32.mrb[155].mxu0  ;;  %2580 = vadd.xlane.f32.xlu1 %v2579_v15  ;;  %v2956_v15 = vsel %vm2252_vm2, %v14109_v13, -inf }
 0x3c1   : > { %v2582_v27 = vsel %vm2252_vm2, %v14229_v17, 0.0 }
 0x3c2   : > { %v14235_v51 = vpop.eup %12320  ;;  %2583 = vadd.xlane.f32.xlu0 %v2582_v27  ;;  %v2959_v27 = vsel %vm2252_vm2, %v14103_v42, -inf }
 0x3c3   : > { %v2585_v20 = vsel %vm2252_vm2, %v14235_v51, 0.0 }
 0x3c4   : > { %2586 = vadd.xlane.f32.xlu1 %v2585_v20  ;;  %v2962_v20 = vsel %vm2252_vm2, %v14107_v47, -inf }
 0x3c6   : > { %2942 = vmax.xlane.f32.xlu0 %v2941_v8 }
 0x3c8   : > { %2945 = vmax.xlane.f32.xlu1 %v2944_v19 }
 0x3ca   : > { %2948 = vmax.xlane.f32.xlu0 %v2947_v33 }
 0x3cc   : > { %2951 = vmax.xlane.f32.xlu1 %v2950_v24 }
 0x3ce   : > { %2954 = vmax.xlane.f32.xlu0 %v2953_v54 }
 0x3d0   : > { %2957 = vmax.xlane.f32.xlu1 %v2956_v15 }
 0x3d2   : > { %2960 = vmax.xlane.f32.xlu0 %v2959_v27 }
 0x3d4   : > { %2963 = vmax.xlane.f32.xlu1 %v2962_v20 }
 0x3d5   : > { %v14255_v8 = vpop.f32.mrb[156].mxu0 }
 0x3d6   : > { %17310 = vst [vmem:[#allocation31_spill] sm:$0xff] %v14255_v8  ;;  %v14257_v19 = vpop.f32.mrb[157].mxu0 }
 0x3d7   : > { %v14259_v33 = vpop.f32.mrb[158].mxu0 }
 0x3d8   : > { %17311 = vst [vmem:[#allocation30_spill] sm:$0xff] %v14259_v33  ;;  %v14261_v24 = vpop.f32.mrb[159].mxu0 }
 0x3d9   : > { %17312 = vst [vmem:[#allocation43_spill] sm:$0xff] %v14261_v24 }
 0x3dd   : > { %v14263_v54 = vpop.f32.mrb[160].mxu0 }
 0x3de   : > { %17313 = vst [vmem:[#allocation41_spill] sm:$0xff] %v14263_v54  ;;  %v14265_v34 = vpop.f32.mrb[161].mxu0 }
 0x3df   : > { %17314 = vst [vmem:[#allocation42_spill] sm:$0xff] %v14265_v34  ;;  %v14267_v15 = vpop.f32.mrb[162].mxu0 }
 0x3e0   : > { %17315 = vst [vmem:[#allocation40_spill] sm:$0xff] %v14267_v15  ;;  %v14269_v58 = vpop.f32.mrb[163].mxu0 }
 0x3e1   : > { %17316 = vst [vmem:[#allocation47_spill] sm:$0xff] %v14269_v58 }
 0x3f5   : > { %v14271_v27 = vpop.f32.mrb[164].mxu0 }
 0x3f6   : > { %17317 = vst [vmem:[#allocation45_spill] sm:$0xff] %v14271_v27  ;;  %v14273_v36 = vpop.f32.mrb[165].mxu0 }
 0x3f7   : > { %17318 = vst [vmem:[#allocation46_spill] sm:$0xff] %v14273_v36  ;;  %v14275_v20 = vpop.f32.mrb[166].mxu0 }
 0x3f8   : > { %17319 = vst [vmem:[#allocation44_spill] sm:$0xff] %v14275_v20  ;;  %v14277_v10 = vpop.f32.mrb[167].mxu0 }
 0x3f9   : > { %17320 = vst [vmem:[#allocation55_spill] sm:$0xff] %v14277_v10 }
 0x3fd   : > { %v14279_v39 = vpop.f32.mrb[168].mxu0 }
 0x3fe   : > { %17321 = vst [vmem:[#allocation56_spill] sm:$0xff] %v14279_v39  ;;  %v14281_v57 = vpop.f32.mrb[169].mxu0 }
 0x3ff   : > { %17322 = vst [vmem:[#allocation57_spill] sm:$0xff] %v14281_v57  ;;  %v14283_v38 = vpop.f32.mrb[170].mxu0 }
 0x400   : > { %17323 = vst [vmem:[#allocation58_spill] sm:$0xff] %v14283_v38  ;;  %v14285_v54 = vpop.f32.mrb[171].mxu0 }
 0x401   : > { %17324 = vst [vmem:[#allocation59_spill] sm:$0xff] %v14285_v54 }
 0x41b   : > { %v2303_v34 = vpop.xlane.xlu0 %2302 }
 0x41c   : > { %12322 = vrcp.f32 %v2303_v34 }
 0x41f   : > { %v2309_v15 = vpop.xlane.xlu0 %2308  ;;  %v2306_v58 = vpop.xlane.xlu1 %2305 }
 0x420   : > { %12324 = vrcp.f32 %v2306_v58 }
 0x421   : > { %12326 = vrcp.f32 %v2309_v15 }
 0x423   : > { %v2315_v27 = vpop.xlane.xlu0 %2314  ;;  %v2312_v36 = vpop.xlane.xlu1 %2311 }
 0x424   : > { %12328 = vrcp.f32 %v2312_v36 }
 0x425   : > { %12330 = vrcp.f32 %v2315_v27 }
 0x426   : > { %v12323_v33 = vpop.eup %12322 }
 0x427   : > { %v2321_v20 = vpop.xlane.xlu0 %2320  ;;  %v2318_v10 = vpop.xlane.xlu1 %2317  ;;  %v2333_v38 = vmul.f32 %v12323_v33, %v14134_v56 }
 0x428   : > { %12332 = vrcp.f32 %v2318_v10 }
 0x429   : > { %12334 = vrcp.f32 %v2321_v20 }
 0x42a   : > { %v12325_v39 = vpop.eup %12324 }
 0x42b   : > { %v2324_v57 = vpop.xlane.xlu1 %2323  ;;  %v2334_v34 = vmul.f32 %v12325_v39, %v14141_v30  ;;  %v12327_v54 = vpop.eup %12326  ;;  %v17325_v39 = vld [vmem:[#allocation23_spill] sm:$0xff]  ;;  %v17326_v30 = vld [vmem:[#allocation22_spill] sm:$0xff] }
 0x42c   : > { %12336 = vrcp.f32 %v2324_v57  ;;  %v2335_v15 = vmul.f32 %v12327_v54, %v14139_v11 }
 0x42d   : > { %v2341_v8 = vpack.c.bf16 %v2334_v34, %v2333_v38 }
 0x42e   : > { %v12329_v58 = vpop.eup %12328 }
 0x42f   : > { %v2336_v36 = vmul.f32 %v12329_v58, %v14147_v25  ;;  %11300 = vmatprep.mubr.msk.bf16.mxu1 %vm2252_vm2, %v2341_v8  ;;  %v12331_v27 = vpop.eup %12330 }
 0x430   : > { %v2337_v57 = vmul.f32 %v12331_v27, %v14149_v29  ;;  %v17328_v29 = vld [vmem:[#allocation24_spill] sm:$0xff] }
 0x431   : > { %v2342_v24 = vpack.c.bf16 %v2336_v36, %v2335_v15 }
 0x432   : > { %v12333_v10 = vpop.eup %12332 }
 0x433   : > { %v12335_v20 = vpop.eup %12334  ;;  %11301 = vmatmul.mubr.msk.bf16.vlgmr.msra.gmra.mrb[116].mxu1 %vm2252_vm2, %v2342_v24  ;;  %v2338_v56 = vmul.f32 %v12333_v10, %v14157_v1  ;;  %v17327_v24 = vld [vmem:[#allocation25_spill] sm:$0xff] }
 0x434   : > { %11325 = vmatpush3.bf16.msra.mxu1 %v17325_v39  ;;  %v2339_v25 = vmul.f32 %v12335_v20, %v14163_v4 }
 0x435   : > { %11326 = vmatprep.subr.bf16.mxu1 %v17326_v30  ;;  %v2343_v11 = vpack.c.bf16 %v2338_v56, %v2337_v57 }
 0x436   : > { %v12337_v38 = vpop.eup %12336 }
 0x437   : > { %v2340_v8 = vmul.f32 %v12337_v38, %v14171_v5  ;;  %11304 = vmatprep.mubr.msk.bf16.mxu1 %vm2252_vm2, %v2343_v11 }
 0x438   : > { %11327 = vmatpush3.bf16.msra.mxu1 %v17326_v30 }
 0x439   : > { %v2344_v33 = vpack.c.bf16 %v2340_v8, %v2339_v25  ;;  %11328 = vmatprep.subr.bf16.mxu1 %v17327_v24 }
 0x43b   : > { %11305 = vmatmul.mubr.msk.bf16.gmra.mrb[120].mxu1 %vm2252_vm2, %v2344_v33 }
 0x43c   : > { %11329 = vmatpush3.bf16.msra.mxu1 %v17327_v24 }
 0x43d   : > { %11330 = vmatprep.subr.bf16.mxu1 %v17328_v29 }
 0x440   : > { %11331 = vmatpush3.bf16.msra.mxu1 %v17328_v29 }
 0x443   : > { %v2566_v1 = vpop.xlane.xlu0 %2565 }
 0x444   : > { %12338 = vrcp.f32 %v2566_v1 }
 0x445   : > { %v2569_v4 = vpop.xlane.xlu1 %2568 }
 0x446   : > { %12340 = vrcp.f32 %v2569_v4 }
 0x447   : > { %v2572_v5 = vpop.xlane.xlu0 %2571 }
 0x448   : > { %12342 = vrcp.f32 %v2572_v5 }
 0x449   : > { %v2575_v54 = vpop.xlane.xlu1 %2574 }
 0x44a   : > { %12344 = vrcp.f32 %v2575_v54 }
 0x44b   : > { %v2578_v34 = vpop.xlane.xlu0 %2577 }
 0x44c   : > { %12346 = vrcp.f32 %v2578_v34 }
 0x44d   : > { %v2581_v58 = vpop.xlane.xlu1 %2580 }
 0x44e   : > { %v12339_v15 = vpop.eup %12338  ;;  %12348 = vrcp.f32 %v2581_v58 }
 0x44f   : > { %v2584_v36 = vpop.xlane.xlu0 %2583  ;;  %v2596_v20 = vmul.f32 %v12339_v15, %v14190_v23 }
 0x450   : > { %v12341_v27 = vpop.eup %12340  ;;  %12350 = vrcp.f32 %v2584_v36 }
 0x451   : > { %v2587_v10 = vpop.xlane.xlu1 %2586  ;;  %v2597_v57 = vmul.f32 %v12341_v27, %v14197_v31 }
 0x452   : > { %v12343_v56 = vpop.eup %12342  ;;  %12352 = vrcp.f32 %v2587_v10 }
 0x453   : > { %v2943_v39 = vpop.xlane.xlu0 %2942  ;;  %v2604_v38 = vpack.c.bf16 %v2597_v57, %v2596_v20  ;;  %v2598_v25 = vmul.f32 %v12343_v56, %v14205_v35 }
 0x454   : > { %v12345_v30 = vpop.eup %12344  ;;  %v2965_v11 = vsub.f32 %v14097_v50, %v2943_v39 }
 0x455   : > { %v2599_v8 = vmul.f32 %v12345_v30, %v14211_v60  ;;  %11332 = vmatprep.mubr.msk.bf16.mxu1 %vm2252_vm2, %v2604_v38  ;;  %v2946_v33 = vpop.xlane.xlu1 %2945 }
 0x456   : > { %v12347_v24 = vpop.eup %12346  ;;  %v2973_v29 = vmul.f32 1.442695, %v2965_v11  ;;  %v2966_v23 = vsub.f32 %v14101_v52, %v2946_v33 }
 0x457   : > { %v2605_v1 = vpack.c.bf16 %v2599_v8, %v2598_v25  ;;  %v2949_v31 = vpop.xlane.xlu0 %2948  ;;  %v2600_v35 = vmul.f32 %v12347_v24, %v14215_v32 }
 0x458   : > { %v12349_v4 = vpop.eup %12348  ;;  %12354 = vpow2.f32 %v2973_v29  ;;  %v2975_v5 = vmul.f32 1.442695, %v2966_v23  ;;  %v2967_v54 = vsub.f32 %v14095_v37, %v2949_v31 }
 0x459   : > { %11333 = vmatmul.mubr.msk.bf16.vlgmr.msra.gmra.mrb[124].mxu1 %vm2252_vm2, %v2605_v1  ;;  %v2952_v50 = vpop.xlane.xlu1 %2951  ;;  %v2601_v60 = vmul.f32 %v12349_v4, %v14221_v9 }
 0x45a   : > { %v12351_v34 = vpop.eup %12350  ;;  %12356 = vpow2.f32 %v2975_v5  ;;  %v2977_v58 = vmul.f32 1.442695, %v2967_v54  ;;  %v2968_v15 = vsub.f32 %v14099_v59, %v2952_v50 }
 0x45b   : > { %v2955_v52 = vpop.xlane.xlu0 %2954  ;;  %v2606_v36 = vpack.c.bf16 %v2601_v60, %v2600_v35  ;;  %v2602_v57 = vmul.f32 %v12351_v34, %v14229_v17  ;;  %v3293_v60 = vsel %vm2252_vm2, %v14113_v46, -inf  ;;  %v3296_v34 = vsel %vm2252_vm2, %v14117_v7, -inf }
 0x45c   : > { %v12353_v27 = vpop.eup %12352  ;;  %12358 = vpow2.f32 %v2977_v58  ;;  %v2979_v10 = vmul.f32 1.442695, %v2968_v15  ;;  %v2969_v20 = vsub.f32 %v14105_v48, %v2955_v52  ;;  %v3299_v58 = vsel %vm2252_vm2, %v14111_v14, -inf }
 0x45d   : > { %11336 = vmatprep.mubr.msk.bf16.mxu1 %vm2252_vm2, %v2606_v36  ;;  %v2958_v37 = vpop.xlane.xlu1 %2957  ;;  %v2603_v32 = vmul.f32 %v12353_v27, %v14235_v51  ;;  %v3302_v15 = vsel %vm2252_vm2, %v14115_v53, -inf  ;;  %v3305_v52 = vsel %vm2252_vm2, %v14123_v43, -inf  ;;  %v3308_v36 = vsel %vm2252_vm2, %v14127_v45, -inf }
 0x45e   : > { %12360 = vpow2.f32 %v2979_v10  ;;  %v2981_v9 = vmul.f32 1.442695, %v2969_v20  ;;  %v2970_v56 = vsub.f32 %v14109_v13, %v2958_v37  ;;  %v3311_v27 = vsel %vm2252_vm2, %v14120_v3, -inf  ;;  %v10165_v20 = vld [vmem:[%s17076_s4 + $0x4] sm:$0xf] }
 0x45f   : > { %v2961_v39 = vpop.xlane.xlu0 %2960  ;;  %v2607_v59 = vpack.c.bf16 %v2603_v32, %v2602_v57  ;;  %v3314_v10 = vsel %vm2252_vm2, %v14125_v18, -inf  ;;  %12148 = vmatprep.subr.msk.bf16.mxu1 %vm2703_vm3, %v10165_v20  ;;  %v14379_v37 = vsel %vm2703_vm3, %v10165_v20, 0  ;;  %v14385_v57 = vld [vmem:[%s17076_s4] sm:$0xf] }
 0x460   : > { %12362 = vpow2.f32 %v2981_v9  ;;  %v2983_v38 = vmul.f32 1.442695, %v2970_v56  ;;  %v2971_v30 = vsub.f32 %v14103_v42, %v2961_v39  ;;  %11341 = vmatpush3.bf16.msra.mxu1 %v14379_v37 }
 0x461   : > { %11337 = vmatmul.mubr.msk.bf16.gmra.mrb[128].mxu1 %vm2252_vm2, %v2607_v59  ;;  %v2964_v48 = vpop.xlane.xlu1 %2963  ;;  %12149 = vmatprep.subr.msk.bf16.mxu1 %vm2703_vm3, %v14385_v57 }
 0x462   : > { %v14325_v11 = vpop.eup %12354  ;;  %12364 = vpow2.f32 %v2983_v38  ;;  %v2985_v25 = vmul.f32 1.442695, %v2971_v30  ;;  %v2972_v17 = vsub.f32 %v14107_v47, %v2964_v48 }
 0x463   : > { %v2989_v51 = vsel %vm2252_vm2, %v14325_v11, 0.0 }
 0x464   : > { %v14330_v8 = vpop.eup %12356  ;;  %12366 = vpow2.f32 %v2985_v25  ;;  %v2987_v13 = vmul.f32 1.442695, %v2972_v17  ;;  %2990 = vadd.xlane.f32.xlu0 %v2989_v51 }
 0x465   : > { %v2992_v42 = vsel %vm2252_vm2, %v14330_v8, 0.0 }
 0x466   : > { %v14334_v33 = vpop.eup %12358  ;;  %12368 = vpow2.f32 %v2987_v13  ;;  %2993 = vadd.xlane.f32.xlu1 %v2992_v42 }
 0x467   : > { %v2995_v24 = vsel %vm2252_vm2, %v14334_v33, 0.0 }
 0x468   : > { %v14338_v29 = vpop.eup %12360  ;;  %2996 = vadd.xlane.f32.xlu0 %v2995_v24 }
 0x469   : > { %v2998_v47 = vsel %vm2252_vm2, %v14338_v29, 0.0 }
 0x46a   : > { %v14342_v23 = vpop.eup %12362  ;;  %2999 = vadd.xlane.f32.xlu1 %v2998_v47 }
 0x46b   : > { %v3001_v1 = vsel %vm2252_vm2, %v14342_v23, 0.0 }
 0x46c   : > { %v14346_v31 = vpop.eup %12364  ;;  %3002 = vadd.xlane.f32.xlu0 %v3001_v1 }
 0x46d   : > { %v3004_v4 = vsel %vm2252_vm2, %v14346_v31, 0.0 }
 0x46e   : > { %v14350_v5 = vpop.eup %12366  ;;  %3005 = vadd.xlane.f32.xlu1 %v3004_v4 }
 0x46f   : > { %v3007_v54 = vsel %vm2252_vm2, %v14350_v5, 0.0 }
 0x470   : > { %v14354_v50 = vpop.eup %12368  ;;  %3008 = vadd.xlane.f32.xlu0 %v3007_v54 }
 0x471   : > { %v3010_v35 = vsel %vm2252_vm2, %v14354_v50, 0.0 }
 0x472   : > { %3011 = vadd.xlane.f32.xlu1 %v3010_v35 }
 0x474   : > { %3294 = vmax.xlane.f32.xlu0 %v3293_v60 }
 0x476   : > { %3297 = vmax.xlane.f32.xlu1 %v3296_v34 }
 0x478   : > { %3300 = vmax.xlane.f32.xlu0 %v3299_v58 }
 0x47a   : > { %3303 = vmax.xlane.f32.xlu1 %v3302_v15 }
 0x47c   : > { %3306 = vmax.xlane.f32.xlu0 %v3305_v52 }
 0x47e   : > { %3309 = vmax.xlane.f32.xlu1 %v3308_v36 }
 0x480   : > { %3312 = vmax.xlane.f32.xlu0 %v3311_v27 }
 0x482   : > { %3315 = vmax.xlane.f32.xlu1 %v3314_v10 }
 0x4f1   : > { %v14389_v32 = vpop.xlane.xlu0 %2990 }
 0x4f3   : > { %v14391_v9 = vpop.xlane.xlu1 %2993 }
 0x4f5   : > { %v14393_v56 = vpop.xlane.xlu0 %2996 }
 0x4f7   : > { %v14395_v39 = vpop.xlane.xlu1 %2999 }
 0x4f9   : > { %v14397_v59 = vpop.xlane.xlu0 %3002 }
 0x4fb   : > { %v14399_v38 = vpop.xlane.xlu1 %3005 }
 0x4fd   : > { %v14401_v30 = vpop.xlane.xlu0 %3008 }
 0x4ff   : > { %v14403_v48 = vpop.xlane.xlu1 %3011 }
 0x501   : > { %v3295_v25 = vpop.xlane.xlu0 %3294 }
 0x502   : > { %v3317_v17 = vsub.f32 %v14113_v46, %v3295_v25 }
 0x503   : > { %v3298_v51 = vpop.xlane.xlu1 %3297 }
 0x504   : > { %v3325_v13 = vmul.f32 1.442695, %v3317_v17  ;;  %v3318_v42 = vsub.f32 %v14117_v7, %v3298_v51  ;;  %v14489_v7 = vsel %vm2703_vm3, %v14385_v57, 0 }
 0x505   : > { %v3301_v24 = vpop.xlane.xlu0 %3300 }
 0x506   : > { %12370 = vpow2.f32 %v3325_v13  ;;  %v3327_v47 = vmul.f32 1.442695, %v3318_v42  ;;  %v3319_v1 = vsub.f32 %v14111_v14, %v3301_v24  ;;  %v14408_v4 = vpop.f32.mrb[116].mxu1 }
 0x507   : > { %v3304_v54 = vpop.xlane.xlu1 %3303  ;;  %v14410_v60 = vpop.f32.mrb[117].mxu1 }
 0x508   : > { %12372 = vpow2.f32 %v3327_v47  ;;  %v3329_v35 = vmul.f32 1.442695, %v3319_v1  ;;  %v3320_v34 = vsub.f32 %v14115_v53, %v3304_v54  ;;  %v14413_v58 = vpop.f32.mrb[118].mxu1 }
 0x509   : > { %v3307_v46 = vpop.xlane.xlu0 %3306  ;;  %v14418_v14 = vpop.f32.mrb[119].mxu1 }
 0x50a   : > { %12374 = vpow2.f32 %v3329_v35  ;;  %v3331_v15 = vmul.f32 1.442695, %v3320_v34  ;;  %v3321_v52 = vsub.f32 %v14123_v43, %v3307_v46  ;;  %v2423_v36 = vpack.c.bf16 %v14418_v14, %v14410_v60 }
 0x50b   : > { %v3310_v27 = vpop.xlane.xlu1 %3309  ;;  %v17330_v60 = vpack.c.bf16 %v14413_v58, %v14408_v4 }
 0x50c   : > { %12376 = vpow2.f32 %v3331_v15  ;;  %v3333_v10 = vmul.f32 1.442695, %v3321_v52  ;;  %v3322_v53 = vsub.f32 %v14127_v45, %v3310_v27 }
 0x50d   : > { %v3313_v20 = vpop.xlane.xlu0 %3312 }
 0x50e   : > { %12378 = vpow2.f32 %v3333_v10  ;;  %v3335_v25 = vmul.f32 1.442695, %v3322_v53  ;;  %v3323_v17 = vsub.f32 %v14120_v3, %v3313_v20  ;;  %v14424_v51 = vpop.f32.mrb[120].mxu1 }
 0x50f   : > { %v3316_v13 = vpop.xlane.xlu1 %3315  ;;  %v14428_v24 = vpop.f32.mrb[121].mxu1 }
 0x510   : > { %v14426_v42 = vpop.eup %12370  ;;  %12380 = vpow2.f32 %v3335_v25  ;;  %v3337_v43 = vmul.f32 1.442695, %v3323_v17  ;;  %v3324_v47 = vsub.f32 %v14125_v18, %v3316_v13  ;;  %v14431_v1 = vpop.f32.mrb[122].mxu1 }
 0x511   : > { %v3341_v45 = vsel %vm2252_vm2, %v14426_v42, 0.0  ;;  %v14439_v34 = vpop.f32.mrb[123].mxu1 }
 0x512   : > { %v14435_v54 = vpop.eup %12372  ;;  %12382 = vpow2.f32 %v3337_v43  ;;  %v3339_v3 = vmul.f32 1.442695, %v3324_v47  ;;  %3342 = vadd.xlane.f32.xlu0 %v3341_v45  ;;  %v17331_v14 = vpack.c.bf16 %v14439_v34, %v14428_v24  ;;  %v17334_v34 = vpack.c.bf16 %v14431_v1, %v14424_v51 }
 0x513   : > { %v3344_v18 = vsel %vm2252_vm2, %v14435_v54, 0.0 }
 0x514   : > { %v14445_v15 = vpop.eup %12374  ;;  %12384 = vpow2.f32 %v3339_v3  ;;  %3345 = vadd.xlane.f32.xlu1 %v3344_v18  ;;  %v3657_v3 = vsel %vm2252_vm2, %v14159_v55, -inf  ;;  %v3660_v18 = vsel %vm2252_vm2, %v14165_v2, -inf }
 0x515   : > { %v3347_v52 = vsel %vm2252_vm2, %v14445_v15, 0.0  ;;  %12386 = vrcp.f32 %v14391_v9  ;;  %v3937_v9 = vsel %vm2252_vm2, %v14217_v61, -inf }
 0x516   : > { %v14449_v27 = vpop.eup %12376  ;;  %3348 = vadd.xlane.f32.xlu0 %v3347_v52  ;;  %v3663_v52 = vsel %vm2252_vm2, %v14151_v49, -inf  ;;  %12388 = vrcp.f32 %v14389_v32 }
 0x517   : > { %v3350_v10 = vsel %vm2252_vm2, %v14449_v27, 0.0  ;;  %12390 = vrcp.f32 %v14395_v39 }
 0x518   : > { %v14453_v53 = vpop.eup %12378  ;;  %3351 = vadd.xlane.f32.xlu1 %v3350_v10  ;;  %v3666_v10 = vsel %vm2252_vm2, %v14161_v12, -inf  ;;  %12392 = vrcp.f32 %v14399_v38  ;;  %v17333_v38 = vld [vmem:[#allocation35_spill] sm:$0xff] }
 0x519   : > { %v3353_v20 = vsel %vm2252_vm2, %v14453_v53, 0.0  ;;  %12394 = vrcp.f32 %v14393_v56 }
 0x51a   : > { %v14457_v25 = vpop.eup %12380  ;;  %3354 = vadd.xlane.f32.xlu0 %v3353_v20  ;;  %v3669_v20 = vsel %vm2252_vm2, %v14177_v44, -inf  ;;  %12396 = vrcp.f32 %v14397_v59 }
 0x51b   : > { %v3356_v17 = vsel %vm2252_vm2, %v14457_v25, 0.0  ;;  %12398 = vrcp.f32 %v14403_v48  ;;  %v17335_v48 = vld [vmem:[#allocation34_spill] sm:$0xff] }
 0x51c   : > { %v14461_v13 = vpop.eup %12382  ;;  %3357 = vadd.xlane.f32.xlu1 %v3356_v17  ;;  %v3672_v17 = vsel %vm2252_vm2, %v14181_v21, -inf  ;;  %12400 = vrcp.f32 %v14401_v30  ;;  %v10182_v30 = vld [vmem:[%s17076_s4 + $0x8] sm:$0xf] }
 0x51d   : > { %v3359_v43 = vsel %vm2252_vm2, %v14461_v13, 0.0 }
 0x51e   : > { %v14465_v47 = vpop.eup %12384  ;;  %3360 = vadd.xlane.f32.xlu0 %v3359_v43 }
 0x51f   : > { %v3362_v45 = vsel %vm2252_vm2, %v14465_v47, 0.0  ;;  %v12387_v32 = vpop.eup %12386 }
 0x520   : > { %3363 = vadd.xlane.f32.xlu1 %v3362_v45  ;;  %v12389_v39 = vpop.eup %12388  ;;  %v3022_v56 = vmul.f32 %v12387_v32, %v14330_v8 }
 0x521   : > { %v3021_v59 = vmul.f32 %v12389_v39, %v14325_v11  ;;  %v12391_v4 = vpop.eup %12390 }
 0x522   : > { %3658 = vmax.xlane.f32.xlu0 %v3657_v3  ;;  %v3675_v3 = vsel %vm2252_vm2, %v14173_v22, -inf  ;;  %v12393_v24 = vpop.eup %12392  ;;  %v3024_v11 = vmul.f32 %v12391_v4, %v14338_v29 }
 0x523   : > { %v3029_v58 = vpack.c.bf16 %v3022_v56, %v3021_v59 }
 0x524   : > { %3661 = vmax.xlane.f32.xlu1 %v3660_v18 }
 0x526   : > { %3664 = vmax.xlane.f32.xlu0 %v3663_v52 }
 0x528   : > { %3667 = vmax.xlane.f32.xlu1 %v3666_v10  ;;  %v3678_v10 = vsel %vm2252_vm2, %v14179_v40, -inf }
 0x52a   : > { %3670 = vmax.xlane.f32.xlu0 %v3669_v20  ;;  %v3919_v20 = vsel %vm2252_vm2, %v14199_v6, -inf }
 0x52c   : > { %v11334_v43 = vpop.f32.mrb[124].mxu1  ;;  %3673 = vmax.xlane.f32.xlu1 %v3672_v17  ;;  %v3922_v17 = vsel %vm2252_vm2, %v14207_v28, -inf }
 0x52d   : > { %v2654_v45 = vpop.f32.mrb[125].mxu1 }
 0x52e   : > { %3676 = vmax.xlane.f32.xlu0 %v3675_v3  ;;  %v11335_v18 = vpop.f32.mrb[126].mxu1  ;;  %v3925_v3 = vsel %vm2252_vm2, %v14193_v63, -inf }
 0x52f   : > { %v2688_v52 = vpack.c.bf16 %v11335_v18, %v11334_v43  ;;  %v2657_v35 = vpop.f32.mrb[127].mxu1 }
 0x530   : > { %v2687_v46 = vpack.c.bf16 %v2657_v35, %v2654_v45  ;;  %3679 = vmax.xlane.f32.xlu1 %v3678_v10  ;;  %v17329_v35 = vld [vmem:[#allocation33_spill] sm:$0xff] }
 0x532   : > { %3920 = vmax.xlane.f32.xlu0 %v3919_v20  ;;  %11342 = vmatprep.mubr.msk.bf16.mxu1 %vm2162_vm1, %v2687_v46  ;;  %v3928_v46 = vsel %vm2252_vm2, %v14201_v26, -inf  ;;  %v3931_v20 = vsel %vm2252_vm2, %v14223_v0, -inf }
 0x533   : > { %11343 = vmatmul.mubr.msk.bf16.vlgmr.msra.gmra.mrb[132].mxu1 %vm2162_vm1, %v2688_v52 }
 0x534   : > { %11351 = vmatpush3.bf16.msra.mxu1 %v14489_v7  ;;  %v11338_v43 = vpop.f32.mrb[128].mxu1  ;;  %3923 = vmax.xlane.f32.xlu1 %v3922_v17  ;;  %v3934_v17 = vsel %vm2252_vm2, %v14231_v16, -inf }
 0x535   : > { %11376 = vmatprep.subr.bf16.mxu1 %v17329_v35  ;;  %v2670_v45 = vpop.f32.mrb[129].mxu1 }
 0x536   : > { %3926 = vmax.xlane.f32.xlu0 %v3925_v3  ;;  %v11339_v57 = vpop.f32.mrb[130].mxu1 }
 0x537   : > { %v2690_v18 = vpack.c.bf16 %v11339_v57, %v11338_v43  ;;  %v2673_v10 = vpop.f32.mrb[131].mxu1  ;;  %v3940_v43 = vsel %vm2252_vm2, %v14225_v41, -inf  ;;  %v14554_v57 = vsel %vm2703_vm3, %v10182_v30, 0 }
 0x538   : > { %v2689_v52 = vpack.c.bf16 %v2673_v10, %v2670_v45  ;;  %3929 = vmax.xlane.f32.xlu1 %v3928_v46  ;;  %v3026_v45 = vmul.f32 %v12393_v24, %v14346_v31  ;;  %17336 = vst [vmem:[#allocation23_spill] sm:$0xff] %v14554_v57 }
 0x53a   : > { %3932 = vmax.xlane.f32.xlu0 %v3931_v20  ;;  %11346 = vmatprep.mubr.msk.bf16.mxu1 %vm2162_vm1, %v2689_v52 }
 0x53b   : > { %11347 = vmatmul.mubr.msk.bf16.gmra.mrb[136].mxu1 %vm2162_vm1, %v2690_v18 }
 0x53c   : > { %11352 = vmatprep.mubr.msk.bf16.mxu1 %vm2162_vm1, %v2423_v36  ;;  %3935 = vmax.xlane.f32.xlu1 %v3934_v17  ;;  %v17332_v36 = vld [vmem:[#allocation32_spill] sm:$0xff] }
 0x53e   : > { %3938 = vmax.xlane.f32.xlu0 %v3937_v9 }
 0x540   : > { %3941 = vmax.xlane.f32.xlu1 %v3940_v43 }
 0x543   : > { %11353 = vmatmul.mubr.msk.bf16.vlgmr.msra.gmra.mrb[132].mxu1 %vm2162_vm1, %v17330_v60 }
 0x544   : > { %11377 = vmatpush3.bf16.msra.mxu1 %v17329_v35  ;;  %11356 = vmatprep.mubr.msk.bf16.mxu1 %vm2162_vm1, %v17331_v14  ;;  %v12395_v35 = vpop.eup %12394 }
 0x545   : > { %11378 = vmatprep.subr.bf16.mxu1 %v17332_v36  ;;  %v12397_v8 = vpop.eup %12396  ;;  %v3023_v51 = vmul.f32 %v12395_v35, %v14334_v33 }
 0x546   : > { %v3025_v1 = vmul.f32 %v12397_v8, %v14342_v23  ;;  %v12399_v29 = vpop.eup %12398 }
 0x547   : > { %v3030_v3 = vpack.c.bf16 %v3024_v11, %v3023_v51  ;;  %v12401_v10 = vpop.eup %12400  ;;  %v3028_v33 = vmul.f32 %v12399_v29, %v14354_v50 }
 0x548   : > { %11379 = vmatpush3.bf16.msra.mxu1 %v17332_v36  ;;  %v3031_v18 = vpack.c.bf16 %v3026_v45, %v3025_v1  ;;  %v3027_v23 = vmul.f32 %v12401_v10, %v14350_v5 }
 0x549   : > { %11380 = vmatprep.subr.bf16.mxu1 %v17333_v38 }
 0x54a   : > { %v3032_v31 = vpack.c.bf16 %v3028_v33, %v3027_v23 }
 0x54b   : > { %11357 = vmatmul.mubr.msk.bf16.gmra.mrb[136].mxu1 %vm2162_vm1, %v17334_v34 }
 0x54c   : > { %11381 = vmatpush3.bf16.msra.mxu1 %v17333_v38  ;;  %11384 = vmatprep.mubr.msk.bf16.mxu1 %vm2252_vm2, %v3029_v58 }
 0x54d   : > { %11382 = vmatprep.subr.bf16.mxu1 %v17335_v48 }
 0x550   : > { %11383 = vmatpush3.bf16.msra.mxu1 %v17335_v48 }
 0x551   : > { %12154 = vmatprep.subr.msk.bf16.mxu1 %vm2703_vm3, %v10182_v30 }
 0x553   : > { %11385 = vmatmul.mubr.msk.bf16.vlgmr.msra.gmra.mrb[140].mxu1 %vm2252_vm2, %v3030_v3 }
 0x554   : > { %11393 = vmatpush3.bf16.msra.mxu1 %v14554_v57  ;;  %11388 = vmatprep.mubr.msk.bf16.mxu1 %vm2252_vm2, %v3031_v18  ;;  %v17362_v57 = vld [vmem:[#allocation21_spill] sm:$0xff] }
 0x555   : > { %11418 = vmatprep.subr.bf16.mxu1 %v13864_v62 }
 0x55b   : > { %11389 = vmatmul.mubr.msk.bf16.gmra.mrb[144].mxu1 %vm2252_vm2, %v3032_v31 }
 0x59f   : > { %v14563_v46 = vpop.xlane.xlu0 %3342 }
 0x5a1   : > { %v14565_v52 = vpop.xlane.xlu1 %3345 }
 0x5a3   : > { %v14567_v20 = vpop.xlane.xlu0 %3348 }
 0x5a5   : > { %v14569_v17 = vpop.xlane.xlu1 %3351 }
 0x5a7   : > { %v14571_v9 = vpop.xlane.xlu0 %3354 }
 0x5a9   : > { %v14573_v43 = vpop.xlane.xlu1 %3357 }
 0x5ab   : > { %v14575_v32 = vpop.xlane.xlu0 %3360 }
 0x5ad   : > { %v14577_v50 = vpop.xlane.xlu1 %3363 }
 0x5af   : > { %v3659_v5 = vpop.xlane.xlu0 %3658 }
 0x5b0   : > { %v3681_v60 = vsub.f32 %v14159_v55, %v3659_v5 }
 0x5b1   : > { %v3662_v14 = vpop.xlane.xlu1 %3661 }
 0x5b2   : > { %v3689_v39 = vmul.f32 1.442695, %v3681_v60  ;;  %v3682_v36 = vsub.f32 %v14165_v2, %v3662_v14 }
 0x5b3   : > { %v3665_v56 = vpop.xlane.xlu0 %3664 }
 0x5b4   : > { %12402 = vpow2.f32 %v3689_v39  ;;  %v3691_v59 = vmul.f32 1.442695, %v3682_v36  ;;  %v3683_v38 = vsub.f32 %v14151_v49, %v3665_v56 }
 0x5b5   : > { %v3668_v4 = vpop.xlane.xlu1 %3667 }
 0x5b6   : > { %12404 = vpow2.f32 %v3691_v59  ;;  %v3693_v58 = vmul.f32 1.442695, %v3683_v38  ;;  %v3684_v24 = vsub.f32 %v14161_v12, %v3668_v4 }
 0x5b7   : > { %v3671_v34 = vpop.xlane.xlu0 %3670 }
 0x5b8   : > { %12406 = vpow2.f32 %v3693_v58  ;;  %v3695_v35 = vmul.f32 1.442695, %v3684_v24  ;;  %v3685_v8 = vsub.f32 %v14177_v44, %v3671_v34 }
 0x5b9   : > { %v3674_v55 = vpop.xlane.xlu1 %3673 }
 0x5ba   : > { %12408 = vpow2.f32 %v3695_v35  ;;  %v3697_v11 = vmul.f32 1.442695, %v3685_v8  ;;  %v3686_v2 = vsub.f32 %v14181_v21, %v3674_v55 }
 0x5bb   : > { %v3677_v48 = vpop.xlane.xlu0 %3676 }
 0x5bc   : > { %12410 = vpow2.f32 %v3697_v11  ;;  %v3699_v30 = vmul.f32 1.442695, %v3686_v2  ;;  %v3687_v49 = vsub.f32 %v14173_v22, %v3677_v48 }
 0x5bd   : > { %v3680_v45 = vpop.xlane.xlu1 %3679 }
 0x5be   : > { %v14586_v51 = vpop.eup %12402  ;;  %12412 = vpow2.f32 %v3699_v30  ;;  %v3701_v12 = vmul.f32 1.442695, %v3687_v49  ;;  %v3688_v1 = vsub.f32 %v14179_v40, %v3680_v45 }
 0x5bf   : > { %v3921_v3 = vpop.xlane.xlu0 %3920  ;;  %v3705_v44 = vsel %vm2252_vm2, %v14586_v51, 0.0 }
 0x5c0   : > { %v14591_v29 = vpop.eup %12404  ;;  %12414 = vpow2.f32 %v3701_v12  ;;  %v3703_v21 = vmul.f32 1.442695, %v3688_v1  ;;  %v3943_v18 = vsub.f32 %v14199_v6, %v3921_v3  ;;  %3706 = vadd.xlane.f32.xlu0 %v3705_v44 }
 0x5c1   : > { %v3924_v10 = vpop.xlane.xlu1 %3923  ;;  %v3708_v22 = vsel %vm2252_vm2, %v14591_v29, 0.0 }
 0x5c2   : > { %v14596_v33 = vpop.eup %12406  ;;  %12416 = vpow2.f32 %v3703_v21  ;;  %v3951_v23 = vmul.f32 1.442695, %v3943_v18  ;;  %v3944_v40 = vsub.f32 %v14207_v28, %v3924_v10  ;;  %3709 = vadd.xlane.f32.xlu1 %v3708_v22 }
 0x5c3   : > { %v3927_v31 = vpop.xlane.xlu0 %3926  ;;  %v3711_v5 = vsel %vm2252_vm2, %v14596_v33, 0.0 }
 0x5c4   : > { %v14601_v60 = vpop.eup %12408  ;;  %12418 = vpow2.f32 %v3951_v23  ;;  %v3953_v6 = vmul.f32 1.442695, %v3944_v40  ;;  %v3945_v14 = vsub.f32 %v14193_v63, %v3927_v31  ;;  %3712 = vadd.xlane.f32.xlu0 %v3711_v5 }
 0x5c5   : > { %v3930_v39 = vpop.xlane.xlu1 %3929  ;;  %v3714_v36 = vsel %vm2252_vm2, %v14601_v60, 0.0 }
 0x5c6   : > { %v14606_v56 = vpop.eup %12410  ;;  %12420 = vpow2.f32 %v3953_v6  ;;  %v3955_v28 = vmul.f32 1.442695, %v3945_v14  ;;  %v3946_v59 = vsub.f32 %v14201_v26, %v3930_v39  ;;  %3715 = vadd.xlane.f32.xlu1 %v3714_v36 }
 0x5c7   : > { %v3933_v38 = vpop.xlane.xlu0 %3932  ;;  %v3717_v4 = vsel %vm2252_vm2, %v14606_v56, 0.0 }
 0x5c8   : > { %v14611_v58 = vpop.eup %12412  ;;  %12422 = vpow2.f32 %v3955_v28  ;;  %v3957_v63 = vmul.f32 1.442695, %v3946_v59  ;;  %v3947_v24 = vsub.f32 %v14223_v0, %v3933_v38  ;;  %3718 = vadd.xlane.f32.xlu0 %v3717_v4  ;;  %v4335_v28 = vsel %vm2252_vm2, %v14257_v19, -inf  ;;  %v17337_v59 = vld [vmem:[#allocation43_spill] sm:$0xff] }
 0x5c9   : > { %v3936_v34 = vpop.xlane.xlu1 %3935  ;;  %v3720_v35 = vsel %vm2252_vm2, %v14611_v58, 0.0  ;;  %v4338_v38 = vsel %vm2252_vm2, %v17337_v59, -inf  ;;  %v17338_v4 = vld [vmem:[#allocation31_spill] sm:$0xff] }
 0x5ca   : > { %v14616_v8 = vpop.eup %12414  ;;  %12424 = vpow2.f32 %v3957_v63  ;;  %v3959_v26 = vmul.f32 1.442695, %v3947_v24  ;;  %v3948_v55 = vsub.f32 %v14231_v16, %v3936_v34  ;;  %3721 = vadd.xlane.f32.xlu1 %v3720_v35  ;;  %v4341_v63 = vsel %vm2252_vm2, %v17338_v4, -inf  ;;  %v17339_v24 = vld [vmem:[#allocation30_spill] sm:$0xff] }
 0x5cb   : > { %v3939_v11 = vpop.xlane.xlu0 %3938  ;;  %v3723_v2 = vsel %vm2252_vm2, %v14616_v8, 0.0  ;;  %v4344_v34 = vsel %vm2252_vm2, %v17339_v24, -inf  ;;  %v17340_v35 = vld [vmem:[#allocation42_spill] sm:$0xff] }
 0x5cc   : > { %v14621_v48 = vpop.eup %12416  ;;  %12426 = vpow2.f32 %v3959_v26  ;;  %v3961_v0 = vmul.f32 1.442695, %v3948_v55  ;;  %v3949_v30 = vsub.f32 %v14217_v61, %v3939_v11  ;;  %3724 = vadd.xlane.f32.xlu0 %v3723_v2  ;;  %v4347_v26 = vsel %vm2252_vm2, %v17340_v35, -inf  ;;  %v17341_v55 = vld [vmem:[#allocation47_spill] sm:$0xff]  ;;  %v17342_v2 = vld [vmem:[#allocation41_spill] sm:$0xff] }
 0x5cd   : > { %v3942_v49 = vpop.xlane.xlu1 %3941  ;;  %v3726_v45 = vsel %vm2252_vm2, %v14621_v48, 0.0  ;;  %v4350_v11 = vsel %vm2252_vm2, %v17341_v55, -inf }
 0x5ce   : > { %v14626_v12 = vpop.eup %12418  ;;  %12428 = vpow2.f32 %v3961_v0  ;;  %v3963_v16 = vmul.f32 1.442695, %v3949_v30  ;;  %v3950_v1 = vsub.f32 %v14225_v41, %v3942_v49  ;;  %3727 = vadd.xlane.f32.xlu1 %v3726_v45  ;;  %v4353_v0 = vsel %vm2252_vm2, %v17342_v2, -inf  ;;  %v17343_v30 = vld [vmem:[#allocation40_spill] sm:$0xff] }
 0x5cf   : > { %v3967_v3 = vsel %vm2252_vm2, %v14626_v12, 0.0  ;;  %v4356_v49 = vsel %vm2252_vm2, %v17343_v30, -inf }
 0x5d0   : > { %v14631_v44 = vpop.eup %12420  ;;  %12430 = vpow2.f32 %v3963_v16  ;;  %v3965_v21 = vmul.f32 1.442695, %v3950_v1  ;;  %3968 = vadd.xlane.f32.xlu0 %v3967_v3 }
 0x5d1   : > { %v3970_v61 = vsel %vm2252_vm2, %v14631_v44, 0.0 }
 0x5d2   : > { %v14635_v18 = vpop.eup %12422  ;;  %12432 = vpow2.f32 %v3965_v21  ;;  %3971 = vadd.xlane.f32.xlu1 %v3970_v61 }
 0x5d3   : > { %v3973_v10 = vsel %vm2252_vm2, %v14635_v18, 0.0  ;;  %12434 = vrcp.f32 %v14565_v52 }
 0x5d4   : > { %v14639_v41 = vpop.eup %12424  ;;  %3974 = vadd.xlane.f32.xlu0 %v3973_v10  ;;  %12436 = vrcp.f32 %v14563_v46 }
 0x5d5   : > { %v3976_v22 = vsel %vm2252_vm2, %v14639_v41, 0.0  ;;  %12438 = vrcp.f32 %v14569_v17 }
 0x5d6   : > { %v14643_v23 = vpop.eup %12426  ;;  %3977 = vadd.xlane.f32.xlu1 %v3976_v22  ;;  %12440 = vrcp.f32 %v14573_v43  ;;  %v17344_v22 = vld [vmem:[#allocation48_spill] sm:$0xff] }
 0x5d7   : > { %v3979_v40 = vsel %vm2252_vm2, %v14643_v23, 0.0  ;;  %12442 = vrcp.f32 %v14567_v20 }
 0x5d8   : > { %v14647_v31 = vpop.eup %12428  ;;  %3980 = vadd.xlane.f32.xlu0 %v3979_v40  ;;  %12444 = vrcp.f32 %v14571_v9 }
 0x5d9   : > { %v3982_v5 = vsel %vm2252_vm2, %v14647_v31, 0.0  ;;  %12446 = vrcp.f32 %v14577_v50 }
 0x5da   : > { %v14651_v6 = vpop.eup %12430  ;;  %3983 = vadd.xlane.f32.xlu1 %v3982_v5  ;;  %12448 = vrcp.f32 %v14575_v32  ;;  %v10195_v32 = vld [vmem:[%s17076_s4 + $0xc] sm:$0xf] }
 0x5db   : > { %v3985_v14 = vsel %vm2252_vm2, %v14651_v6, 0.0 }
 0x5dc   : > { %v14655_v39 = vpop.eup %12432  ;;  %3986 = vadd.xlane.f32.xlu0 %v3985_v14 }
 0x5dd   : > { %v3988_v36 = vsel %vm2252_vm2, %v14655_v39, 0.0  ;;  %v12435_v10 = vpop.eup %12434 }
 0x5de   : > { %3989 = vadd.xlane.f32.xlu1 %v3988_v36  ;;  %v12437_v52 = vpop.eup %12436  ;;  %v3374_v5 = vmul.f32 %v12435_v10, %v14435_v54  ;;  %v17345_v36 = vld [vmem:[#allocation50_spill] sm:$0xff] }
 0x5df   : > { %v3373_v9 = vmul.f32 %v12437_v52, %v14426_v42  ;;  %v17346_v42 = vld [vmem:[#allocation49_spill] sm:$0xff] }
 0x5e0   : > { %4336 = vmax.xlane.f32.xlu0 %v4335_v28 }
 0x5e1   : > { %v3381_v28 = vpack.c.bf16 %v3374_v5, %v3373_v9 }
 0x5e2   : > { %4339 = vmax.xlane.f32.xlu1 %v4338_v38 }
 0x5e4   : > { %4342 = vmax.xlane.f32.xlu0 %v4341_v63 }
 0x5e6   : > { %4345 = vmax.xlane.f32.xlu1 %v4344_v34 }
 0x5e8   : > { %4348 = vmax.xlane.f32.xlu0 %v4347_v26 }
 0x5ea   : > { %4351 = vmax.xlane.f32.xlu1 %v4350_v11 }
 0x5ec   : > { %4354 = vmax.xlane.f32.xlu0 %v4353_v0 }
 0x5ee   : > { %4357 = vmax.xlane.f32.xlu1 %v4356_v49  ;;  %v14706_v49 = vsel %vm2703_vm3, %v10195_v32, 0 }
 0x5ef   : > { %17347 = vst [vmem:[#allocation22_spill] sm:$0xff] %v14706_v49 }
 0x626   : > { %v11386_v45 = vpop.f32.mrb[140].mxu1 }
 0x627   : > { %v3079_v16 = vpop.f32.mrb[141].mxu1 }
 0x628   : > { %v11387_v1 = vpop.f32.mrb[142].mxu1 }
 0x629   : > { %v3113_v3 = vpack.c.bf16 %v11387_v1, %v11386_v45  ;;  %v3082_v21 = vpop.f32.mrb[143].mxu1 }
 0x62a   : > { %v3112_v61 = vpack.c.bf16 %v3082_v21, %v3079_v16 }
 0x62c   : > { %11394 = vmatprep.mubr.msk.bf16.mxu1 %vm2162_vm1, %v3112_v61 }
 0x62d   : > { %11395 = vmatmul.mubr.msk.bf16.vlgmr.msra.gmra.mrb[132].mxu1 %vm2162_vm1, %v3113_v3 }
 0x62e   : > { %11419 = vmatpush3.bf16.msra.mxu1 %v13864_v62  ;;  %v11390_v46 = vpop.f32.mrb[144].mxu1  ;;  %v12439_v62 = vpop.eup %12438 }
 0x62f   : > { %11420 = vmatprep.subr.bf16.mxu1 %v17344_v22  ;;  %v3095_v40 = vpop.f32.mrb[145].mxu1  ;;  %v12441_v38 = vpop.eup %12440  ;;  %v3376_v63 = vmul.f32 %v12439_v62, %v14449_v27 }
 0x630   : > { %v11391_v17 = vpop.f32.mrb[146].mxu1  ;;  %v12443_v54 = vpop.eup %12442  ;;  %v3378_v34 = vmul.f32 %v12441_v38, %v14457_v25 }
 0x631   : > { %v3115_v43 = vpack.c.bf16 %v11391_v17, %v11390_v46  ;;  %v3098_v14 = vpop.f32.mrb[147].mxu1  ;;  %v12445_v50 = vpop.eup %12444  ;;  %v3375_v26 = vmul.f32 %v12443_v54, %v14445_v15  ;;  %v17348_v15 = vld [vmem:[#allocation19_spill] sm:$0xff] }
 0x632   : > { %v3114_v20 = vpack.c.bf16 %v3098_v14, %v3095_v40  ;;  %11421 = vmatpush3.bf16.msra.mxu1 %v17344_v22  ;;  %v3377_v11 = vmul.f32 %v12445_v50, %v14453_v53  ;;  %v12447_v27 = vpop.eup %12446 }
 0x633   : > { %11422 = vmatprep.subr.bf16.mxu1 %v17345_v36  ;;  %v3382_v0 = vpack.c.bf16 %v3376_v63, %v3375_v26  ;;  %v12449_v16 = vpop.eup %12448  ;;  %v3380_v25 = vmul.f32 %v12447_v27, %v14465_v47 }
 0x634   : > { %11398 = vmatprep.mubr.msk.bf16.mxu1 %vm2162_vm1, %v3114_v20  ;;  %v3383_v45 = vpack.c.bf16 %v3378_v34, %v3377_v11  ;;  %v3379_v53 = vmul.f32 %v12449_v16, %v14461_v13 }
 0x635   : > { %11399 = vmatmul.mubr.msk.bf16.gmra.mrb[136].mxu1 %vm2162_vm1, %v3115_v43 }
 0x636   : > { %11423 = vmatpush3.bf16.msra.mxu1 %v17345_v36  ;;  %11426 = vmatprep.mubr.msk.bf16.mxu1 %vm2252_vm2, %v3381_v28  ;;  %v3384_v1 = vpack.c.bf16 %v3380_v25, %v3379_v53 }
 0x637   : > { %11424 = vmatprep.subr.bf16.mxu1 %v17346_v42 }
 0x63a   : > { %11425 = vmatpush3.bf16.msra.mxu1 %v17346_v42 }
 0x63b   : > { %12159 = vmatprep.subr.msk.bf16.mxu1 %vm2703_vm3, %v10195_v32 }
 0x63d   : > { %11427 = vmatmul.mubr.msk.bf16.vlgmr.msra.gmra.mrb[148].mxu1 %vm2252_vm2, %v3382_v0 }
 0x63e   : > { %11435 = vmatpush3.bf16.msra.mxu1 %v14706_v49  ;;  %11430 = vmatprep.mubr.msk.bf16.mxu1 %vm2252_vm2, %v3383_v45 }
 0x63f   : > { %11460 = vmatprep.subr.bf16.mxu1 %v17348_v15 }
 0x645   : > { %11431 = vmatmul.mubr.msk.bf16.gmra.mrb[152].mxu1 %vm2252_vm2, %v3384_v1 }
 0x64d   : > { %v14715_v3 = vpop.xlane.xlu0 %3706 }
 0x64f   : > { %v14717_v21 = vpop.xlane.xlu1 %3709 }
 0x651   : > { %v14719_v61 = vpop.xlane.xlu0 %3712 }
 0x653   : > { %v14721_v10 = vpop.xlane.xlu1 %3715 }
 0x655   : > { %v14723_v46 = vpop.xlane.xlu0 %3718 }
 0x657   : > { %v14725_v52 = vpop.xlane.xlu1 %3721 }
 0x659   : > { %v14727_v22 = vpop.xlane.xlu0 %3724 }
 0x65b   : > { %v14729_v47 = vpop.xlane.xlu1 %3727 }
 0x65d   : > { %v14731_v13 = vpop.xlane.xlu0 %3968 }
 0x65f   : > { %v14733_v40 = vpop.xlane.xlu1 %3971 }
 0x661   : > { %v14735_v17 = vpop.xlane.xlu0 %3974 }
 0x663   : > { %v14737_v5 = vpop.xlane.xlu1 %3977 }
 0x665   : > { %v14739_v43 = vpop.xlane.xlu0 %3980 }
 0x667   : > { %v14741_v14 = vpop.xlane.xlu1 %3983 }
 0x669   : > { %v14743_v20 = vpop.xlane.xlu0 %3986 }
 0x66b   : > { %v14745_v9 = vpop.xlane.xlu1 %3989 }
 0x66d   : > { %v4337_v36 = vpop.xlane.xlu0 %4336 }
 0x66e   : > { %v4359_v62 = vsub.f32 %v14257_v19, %v4337_v36 }
 0x66f   : > { %v4340_v28 = vpop.xlane.xlu1 %4339 }
 0x670   : > { %v4367_v38 = vmul.f32 1.442695, %v4359_v62  ;;  %v4360_v54 = vsub.f32 %v17337_v59, %v4340_v28 }
 0x671   : > { %v4343_v50 = vpop.xlane.xlu0 %4342 }
 0x672   : > { %12450 = vpow2.f32 %v4367_v38  ;;  %v4369_v63 = vmul.f32 1.442695, %v4360_v54  ;;  %v4361_v42 = vsub.f32 %v17338_v4, %v4343_v50 }
 0x673   : > { %v4346_v32 = vpop.xlane.xlu1 %4345 }
 0x674   : > { %12452 = vpow2.f32 %v4369_v63  ;;  %v4371_v34 = vmul.f32 1.442695, %v4361_v42  ;;  %v4362_v26 = vsub.f32 %v17339_v24, %v4346_v32 }
 0x675   : > { %v4349_v11 = vpop.xlane.xlu0 %4348 }
 0x676   : > { %12454 = vpow2.f32 %v4371_v34  ;;  %v4373_v0 = vmul.f32 1.442695, %v4362_v26  ;;  %v4363_v27 = vsub.f32 %v17340_v35, %v4349_v11 }
 0x677   : > { %v4352_v19 = vpop.xlane.xlu1 %4351 }
 0x678   : > { %12456 = vpow2.f32 %v4373_v0  ;;  %v4375_v45 = vmul.f32 1.442695, %v4363_v27  ;;  %v4364_v59 = vsub.f32 %v17341_v55, %v4352_v19  ;;  %v17353_v27 = vld [vmem:[#allocation46_spill] sm:$0xff] }
 0x679   : > { %v4355_v16 = vpop.xlane.xlu0 %4354  ;;  %v4682_v19 = vsel %vm2252_vm2, %v17353_v27, -inf }
 0x67a   : > { %12458 = vpow2.f32 %v4375_v45  ;;  %v4377_v25 = vmul.f32 1.442695, %v4364_v59  ;;  %v4365_v4 = vsub.f32 %v17342_v2, %v4355_v16  ;;  %v17354_v45 = vld [vmem:[#allocation55_spill] sm:$0xff]  ;;  %v17355_v16 = vld [vmem:[#allocation45_spill] sm:$0xff] }
 0x67b   : > { %v4358_v53 = vpop.xlane.xlu1 %4357  ;;  %v4685_v59 = vsel %vm2252_vm2, %v17354_v45, -inf }
 0x67c   : > { %v14754_v1 = vpop.eup %12450  ;;  %12460 = vpow2.f32 %v4377_v25  ;;  %v4379_v24 = vmul.f32 1.442695, %v4365_v4  ;;  %v4366_v36 = vsub.f32 %v17343_v30, %v4358_v53  ;;  %v4688_v25 = vsel %vm2252_vm2, %v17355_v16, -inf  ;;  %v17356_v4 = vld [vmem:[#allocation44_spill] sm:$0xff] }
 0x67d   : > { %v4383_v35 = vsel %vm2252_vm2, %v14754_v1, 0.0  ;;  %v4691_v53 = vsel %vm2252_vm2, %v17356_v4, -inf }
 0x67e   : > { %v14759_v62 = vpop.eup %12452  ;;  %12462 = vpow2.f32 %v4379_v24  ;;  %v4381_v28 = vmul.f32 1.442695, %v4366_v36  ;;  %4384 = vadd.xlane.f32.xlu0 %v4383_v35  ;;  %v17357_v24 = vld [vmem:[#allocation57_spill] sm:$0xff]  ;;  %v17358_v35 = vld [vmem:[#allocation59_spill] sm:$0xff] }
 0x67f   : > { %v4386_v55 = vsel %vm2252_vm2, %v14759_v62, 0.0  ;;  %v4694_v36 = vsel %vm2252_vm2, %v17357_v24, -inf }
 0x680   : > { %v14763_v38 = vpop.eup %12454  ;;  %12464 = vpow2.f32 %v4381_v28  ;;  %4387 = vadd.xlane.f32.xlu1 %v4386_v55  ;;  %v4697_v28 = vsel %vm2252_vm2, %v17358_v35, -inf  ;;  %v17359_v55 = vld [vmem:[#allocation56_spill] sm:$0xff] }
 0x681   : > { %17349 = vst [vmem:[#allocation25_spill] sm:$0xff] %v14763_v38  ;;  %v4389_v2 = vsel %vm2252_vm2, %v14763_v38, 0.0  ;;  %12466 = vrcp.f32 %v14717_v21 }
 0x682   : > { %v14767_v54 = vpop.eup %12456  ;;  %4390 = vadd.xlane.f32.xlu0 %v4389_v2  ;;  %v4700_v2 = vsel %vm2252_vm2, %v17359_v55, -inf  ;;  %12468 = vrcp.f32 %v14715_v3 }
 0x683   : > { %v4392_v30 = vsel %vm2252_vm2, %v14767_v54, 0.0  ;;  %12470 = vrcp.f32 %v14721_v10 }
 0x684   : > { %v14771_v50 = vpop.eup %12458  ;;  %4393 = vadd.xlane.f32.xlu1 %v4392_v30  ;;  %v17360_v30 = vld [vmem:[#allocation58_spill] sm:$0xff]  ;;  %12472 = vrcp.f32 %v14725_v52 }
 0x685   : > { %17350 = vst [vmem:[#allocation24_spill] sm:$0xff] %v14771_v50  ;;  %v4395_v63 = vsel %vm2252_vm2, %v14771_v50, 0.0  ;;  %12474 = vrcp.f32 %v14719_v61 }
 0x686   : > { %v14775_v42 = vpop.eup %12460  ;;  %4396 = vadd.xlane.f32.xlu0 %v4395_v63  ;;  %v4703_v63 = vsel %vm2252_vm2, %v17360_v30, -inf  ;;  %12476 = vrcp.f32 %v14723_v46 }
 0x687   : > { %v4398_v32 = vsel %vm2252_vm2, %v14775_v42, 0.0  ;;  %12478 = vrcp.f32 %v14729_v47 }
 0x688   : > { %v14779_v34 = vpop.eup %12462  ;;  %4399 = vadd.xlane.f32.xlu1 %v4398_v32  ;;  %12480 = vrcp.f32 %v14727_v22 }
 0x689   : > { %17351 = vst [vmem:[#allocation33_spill] sm:$0xff] %v14779_v34  ;;  %v4401_v26 = vsel %vm2252_vm2, %v14779_v34, 0.0  ;;  %12482 = vrcp.f32 %v14733_v40 }
 0x68a   : > { %v14783_v11 = vpop.eup %12464  ;;  %4402 = vadd.xlane.f32.xlu0 %v4401_v26  ;;  %12484 = vrcp.f32 %v14731_v13 }
 0x68b   : > { %17352 = vst [vmem:[#allocation32_spill] sm:$0xff] %v14783_v11  ;;  %v4404_v0 = vsel %vm2252_vm2, %v14783_v11, 0.0  ;;  %v12467_v3 = vpop.eup %12466 }
 0x68c   : > { %4405 = vadd.xlane.f32.xlu1 %v4404_v0  ;;  %v12469_v10 = vpop.eup %12468  ;;  %v3738_v61 = vmul.f32 %v12467_v3, %v14591_v29 }
 0x68d   : > { %v12471_v38 = vpop.eup %12470 }
 0x68e   : > { %4683 = vmax.xlane.f32.xlu0 %v4682_v19 }
 0x690   : > { %4686 = vmax.xlane.f32.xlu1 %v4685_v59 }
 0x692   : > { %4689 = vmax.xlane.f32.xlu0 %v4688_v25 }
 0x694   : > { %4692 = vmax.xlane.f32.xlu1 %v4691_v53 }
 0x696   : > { %4695 = vmax.xlane.f32.xlu0 %v4694_v36 }
 0x698   : > { %4698 = vmax.xlane.f32.xlu1 %v4697_v28 }
 0x69a   : > { %4701 = vmax.xlane.f32.xlu0 %v4700_v2 }
 0x69c   : > { %4704 = vmax.xlane.f32.xlu1 %v4703_v63 }
 0x70b   : > { %v14803_v32 = vpop.xlane.xlu0 %4384 }
 0x70d   : > { %v14806_v26 = vpop.xlane.xlu1 %4387 }
 0x70f   : > { %v14809_v0 = vpop.xlane.xlu0 %4390 }
 0x710   : > { %v11428_v19 = vpop.f32.mrb[148].mxu1 }
 0x711   : > { %v3431_v59 = vpop.f32.mrb[149].mxu1  ;;  %v14811_v25 = vpop.xlane.xlu1 %4393 }
 0x712   : > { %v11429_v53 = vpop.f32.mrb[150].mxu1 }
 0x713   : > { %v3465_v36 = vpack.c.bf16 %v11429_v53, %v11428_v19  ;;  %v14813_v28 = vpop.xlane.xlu0 %4396  ;;  %v3434_v2 = vpop.f32.mrb[151].mxu1 }
 0x714   : > { %v3464_v63 = vpack.c.bf16 %v3434_v2, %v3431_v59  ;;  %v17361_v59 = vld [vmem:[#allocation18_spill] sm:$0xff] }
 0x715   : > { %v14817_v21 = vpop.xlane.xlu1 %4399 }
 0x716   : > { %11436 = vmatprep.mubr.msk.bf16.mxu1 %vm2162_vm1, %v3464_v63 }
 0x717   : > { %v14822_v49 = vpop.xlane.xlu0 %4402  ;;  %11437 = vmatmul.mubr.msk.bf16.vlgmr.msra.gmra.mrb[132].mxu1 %vm2162_vm1, %v3465_v36 }
 0x718   : > { %11461 = vmatpush3.bf16.msra.mxu1 %v17348_v15  ;;  %v11432_v19 = vpop.f32.mrb[152].mxu1  ;;  %v3737_v15 = vmul.f32 %v12469_v10, %v14586_v51 }
 0x719   : > { %11462 = vmatprep.subr.bf16.mxu1 %v17361_v59  ;;  %v3447_v52 = vpop.f32.mrb[153].mxu1  ;;  %v14827_v53 = vpop.xlane.xlu1 %4405 }
 0x71a   : > { %v11433_v2 = vpop.f32.mrb[154].mxu1  ;;  %v3745_v47 = vpack.c.bf16 %v3738_v61, %v3737_v15  ;;  %v17365_v15 = vld [vmem:[#allocation26_spill] sm:$0xff] }
 0x71b   : > { %v3467_v63 = vpack.c.bf16 %v11433_v2, %v11432_v19  ;;  %v4684_v34 = vpop.xlane.xlu0 %4683  ;;  %v3450_v11 = vpop.f32.mrb[155].mxu1  ;;  %v17364_v2 = vld [vmem:[#allocation27_spill] sm:$0xff] }
 0x71c   : > { %v4706_v46 = vsub.f32 %v17353_v27, %v4684_v34  ;;  %v3466_v36 = vpack.c.bf16 %v3450_v11, %v3447_v52  ;;  %11463 = vmatpush3.bf16.msra.mxu1 %v17361_v59  ;;  %v12473_v34 = vpop.eup %12472 }
 0x71d   : > { %11464 = vmatprep.subr.bf16.mxu1 %v17362_v57  ;;  %v4687_v50 = vpop.xlane.xlu1 %4686  ;;  %v12475_v51 = vpop.eup %12474  ;;  %v3742_v59 = vmul.f32 %v12473_v34, %v14611_v58 }
 0x71e   : > { %v4714_v29 = vmul.f32 1.442695, %v4706_v46  ;;  %v4707_v3 = vsub.f32 %v17354_v45, %v4687_v50  ;;  %11440 = vmatprep.mubr.msk.bf16.mxu1 %vm2162_vm1, %v3466_v36  ;;  %v12477_v40 = vpop.eup %12476  ;;  %v3740_v50 = vmul.f32 %v12471_v38, %v14601_v60  ;;  %v17363_v45 = vld [vmem:[#allocation20_spill] sm:$0xff] }
 0x71f   : > { %v4690_v11 = vpop.xlane.xlu0 %4689  ;;  %11441 = vmatmul.mubr.msk.bf16.gmra.mrb[136].mxu1 %vm2162_vm1, %v3467_v63  ;;  %v12479_v58 = vpop.eup %12478 }
 0x720   : > { %12486 = vpow2.f32 %v4714_v29  ;;  %v4716_v22 = vmul.f32 1.442695, %v4707_v3  ;;  %v4708_v27 = vsub.f32 %v17355_v16, %v4690_v11  ;;  %11465 = vmatpush3.bf16.msra.mxu1 %v17362_v57  ;;  %11468 = vmatprep.mubr.msk.bf16.mxu1 %vm2252_vm2, %v3745_v47  ;;  %v3739_v16 = vmul.f32 %v12475_v51, %v14596_v33  ;;  %v12481_v63 = vpop.eup %12480 }
 0x721   : > { %12488 = vrcp.f32 %v14735_v17  ;;  %11466 = vmatprep.subr.bf16.mxu1 %v17363_v45  ;;  %v4693_v13 = vpop.xlane.xlu1 %4692  ;;  %v3741_v17 = vmul.f32 %v12477_v40, %v14606_v56  ;;  %v12483_v46 = vpop.eup %12482  ;;  %v3744_v29 = vmul.f32 %v12479_v58, %v14621_v48  ;;  %v3743_v11 = vmul.f32 %v12481_v63, %v14616_v8 }
 0x722   : > { %12490 = vpow2.f32 %v4716_v22  ;;  %v4718_v19 = vmul.f32 1.442695, %v4708_v27  ;;  %v4709_v10 = vsub.f32 %v17356_v4, %v4693_v13  ;;  %v3746_v38 = vpack.c.bf16 %v3740_v50, %v3739_v16  ;;  %v12485_v36 = vpop.eup %12484 }
 0x723   : > { %12492 = vrcp.f32 %v14737_v5  ;;  %v4696_v57 = vpop.xlane.xlu0 %4695  ;;  %v3747_v61 = vpack.c.bf16 %v3742_v59, %v3741_v17  ;;  %v4000_v51 = vmul.f32 %v12483_v46, %v14631_v44  ;;  %v3748_v40 = vpack.c.bf16 %v3744_v29, %v3743_v11  ;;  %v17368_v29 = vld [vmem:[#allocation6_spill] sm:$0xff] }
 0x724   : > { %12494 = vpow2.f32 %v4718_v19  ;;  %v4720_v52 = vmul.f32 1.442695, %v4709_v10  ;;  %v4710_v60 = vsub.f32 %v17357_v24, %v4696_v57  ;;  %11467 = vmatpush3.bf16.msra.mxu1 %v17363_v45  ;;  %v3999_v8 = vmul.f32 %v12485_v36, %v14626_v12  ;;  %v17367_v12 = vld [vmem:[#allocation28_spill] sm:$0xff] }
 0x725   : > { %12496 = vrcp.f32 %v14741_v14  ;;  %11492 = vmatprep.subr.bf16.mxu1 %v17364_v2  ;;  %v4699_v4 = vpop.xlane.xlu1 %4698 }
 0x726   : > { %12498 = vpow2.f32 %v4720_v52  ;;  %v4722_v33 = vmul.f32 1.442695, %v4710_v60  ;;  %v4711_v5 = vsub.f32 %v17358_v35, %v4699_v4  ;;  %v4007_v13 = vpack.c.bf16 %v4000_v51, %v3999_v8  ;;  %v17370_v51 = vld [vmem:[#allocation8_spill] sm:$0xff] }
 0x727   : > { %12500 = vrcp.f32 %v14739_v43  ;;  %v4702_v24 = vpop.xlane.xlu0 %4701  ;;  %11469 = vmatmul.mubr.msk.bf16.vlgmr.msra.gmra.mrb[156].mxu1 %vm2252_vm2, %v3746_v38 }
 0x728   : > { %12502 = vpow2.f32 %v4722_v33  ;;  %v4724_v56 = vmul.f32 1.442695, %v4711_v5  ;;  %v4712_v14 = vsub.f32 %v17359_v55, %v4702_v24  ;;  %11493 = vmatpush3.bf16.msra.mxu1 %v17364_v2  ;;  %11472 = vmatprep.mubr.msk.bf16.mxu1 %vm2252_vm2, %v3747_v61  ;;  %v12867_v24 = vld [vmem:[%s17076_s4] sm:$0xf] }
 0x729   : > { %11494 = vmatprep.subr.bf16.mxu1 %v17365_v15  ;;  %v4705_v35 = vpop.xlane.xlu1 %4704 }
 0x72a   : > { %v14864_v3 = vpop.eup %12486  ;;  %12504 = vpow2.f32 %v4724_v56  ;;  %v4726_v43 = vmul.f32 1.442695, %v4712_v14  ;;  %v4713_v47 = vsub.f32 %v17360_v30, %v4705_v35  ;;  %v17366_v30 = vld [vmem:[#allocation29_spill] sm:$0xff]  ;;  %v14930_v14 = vld [vmem:[%s17078_s6] ss:$0 sm:$0xff] }
 0x72b   : > { %v12489_v34 = vpop.eup %12488  ;;  %12506 = vrcp.f32 %v14745_v9  ;;  %v4730_v55 = vsel %vm2252_vm2, %v14864_v3, 0.0 }
 0x72c   : > { %v14872_v22 = vpop.eup %12490  ;;  %12508 = vpow2.f32 %v4726_v43  ;;  %v4728_v48 = vmul.f32 1.442695, %v4713_v47  ;;  %11495 = vmatpush3.bf16.msra.mxu1 %v17365_v15  ;;  %4731 = vadd.xlane.f32.xlu0 %v4730_v55  ;;  %v4001_v52 = vmul.f32 %v12489_v34, %v14635_v18  ;;  %v17369_v34 = vld [vmem:[#allocation2_spill] sm:$0xff] }
 0x72d   : > { %v12493_v27 = vpop.eup %12492  ;;  %12510 = vrcp.f32 %v14743_v20  ;;  %11496 = vmatprep.subr.bf16.mxu1 %v17366_v30  ;;  %v4733_v9 = vsel %vm2252_vm2, %v14872_v22, 0.0 }
 0x72e   : > { %v14880_v50 = vpop.eup %12494  ;;  %12512 = vpow2.f32 %v4728_v48  ;;  %4734 = vadd.xlane.f32.xlu1 %v4733_v9  ;;  %v4002_v10 = vmul.f32 %v12493_v27, %v14639_v41 }
 0x72f   : > { %v12497_v44 = vpop.eup %12496  ;;  %11473 = vmatmul.mubr.msk.bf16.gmra.mrb[160].mxu1 %vm2252_vm2, %v3748_v40  ;;  %v4736_v45 = vsel %vm2252_vm2, %v14880_v50, 0.0  ;;  %12514 = vrcp.f32 %v14806_v26 }
 0x730   : > { %v14885_v20 = vpop.eup %12498  ;;  %11497 = vmatpush3.bf16.msra.mxu1 %v17366_v30  ;;  %4737 = vadd.xlane.f32.xlu0 %v4736_v45  ;;  %v4004_v57 = vmul.f32 %v12497_v44, %v14647_v31  ;;  %v4008_v2 = vpack.c.bf16 %v4002_v10, %v4001_v52  ;;  %v12866_v31 = vld [vmem:[%s17076_s4 + $0x4] sm:$0xf]  ;;  %v17371_v30 = vld [vmem:[#allocation4_spill] sm:$0xff]  ;;  %12516 = vrcp.f32 %v14803_v32 }
 0x731   : > { %v12501_v19 = vpop.eup %12500  ;;  %11498 = vmatprep.subr.bf16.mxu1 %v17367_v12  ;;  %11500 = vmatprep.mubr.msk.bf16.mxu1 %vm2252_vm2, %v4007_v13  ;;  %v4739_v59 = vsel %vm2252_vm2, %v14885_v20, 0.0  ;;  %12518 = vrcp.f32 %v14811_v25 }
 0x732   : > { %v14893_v16 = vpop.eup %12502  ;;  %4740 = vadd.xlane.f32.xlu1 %v4739_v59  ;;  %v4003_v41 = vmul.f32 %v12501_v19, %v14643_v23  ;;  %v17372_v59 = vld [vmem:[#allocation14_spill] sm:$0xff]  ;;  %12520 = vrcp.f32 %v14817_v21 }
 0x733   : > { %v4742_v60 = vsel %vm2252_vm2, %v14893_v16, 0.0  ;;  %12522 = vrcp.f32 %v14809_v0 }
 0x734   : > { %v14899_v17 = vpop.eup %12504  ;;  %11499 = vmatpush3.bf16.msra.mxu1 %v17367_v12  ;;  %4743 = vadd.xlane.f32.xlu0 %v4742_v60  ;;  %v4009_v58 = vpack.c.bf16 %v4004_v57, %v4003_v41  ;;  %12524 = vrcp.f32 %v14813_v28 }
 0x735   : > { %v12507_v38 = vpop.eup %12506  ;;  %v4745_v4 = vsel %vm2252_vm2, %v14899_v17, 0.0  ;;  %12168 = vmatprep.subr.msk.bf16.mxu1 %vm2703_vm3, %v12866_v31  ;;  %12526 = vrcp.f32 %v14827_v53 }
 0x736   : > { %v14909_v18 = vpop.eup %12508  ;;  %4746 = vadd.xlane.f32.xlu1 %v4745_v4  ;;  %v4006_v63 = vmul.f32 %v12507_v38, %v14655_v39  ;;  %12528 = vrcp.f32 %v14822_v49  ;;  %v17381_v49 = vld [vmem:[#allocation24_spill] sm:$0xff] }
 0x737   : > { %v12511_v33 = vpop.eup %12510  ;;  %11501 = vmatmul.mubr.msk.bf16.vlgmr.msra.gmra.mrb[164].mxu1 %vm2252_vm2, %v4008_v2  ;;  %v4748_v23 = vsel %vm2252_vm2, %v14909_v18, 0.0  ;;  %v17373_v2 = vld [vmem:[#allocation10_spill] sm:$0xff] }
 0x738   : > { %v14914_v5 = vpop.eup %12512  ;;  %4749 = vadd.xlane.f32.xlu0 %v4748_v23  ;;  %11504 = vmatprep.mubr.msk.bf16.mxu1 %vm2252_vm2, %v4009_v58  ;;  %v4005_v46 = vmul.f32 %v12511_v33, %v14651_v6  ;;  %v17374_v58 = vld [vmem:[#allocation16_spill] sm:$0xff] }
 0x739   : > { %v4751_v61 = vsel %vm2252_vm2, %v14914_v5, 0.0  ;;  %11509 = vmatpush3.bf16.msra.mxu1 %v14379_v37  ;;  %v12515_v26 = vpop.eup %12514 }
 0x73a   : > { %4752 = vadd.xlane.f32.xlu1 %v4751_v61  ;;  %12169 = vmatprep.subr.msk.bf16.mxu1 %vm2703_vm3, %v12867_v24  ;;  %v4010_v56 = vpack.c.bf16 %v4006_v63, %v4005_v46  ;;  %v17375_v63 = vld [vmem:[#allocation12_spill] sm:$0xff]  ;;  %v12517_v25 = vpop.eup %12516  ;;  %v4416_v21 = vmul.f32 %v12515_v26, %v14759_v62 }
 0x73b   : > { %v4415_v0 = vmul.f32 %v12517_v25, %v14754_v1  ;;  %v12519_v28 = vpop.eup %12518 }
 0x73c   : > { %v4418_v53 = vmul.f32 %v12519_v28, %v14767_v54 }
 0x73f   : > { %11505 = vmatmul.mubr.msk.bf16.gmra.mrb[168].mxu1 %vm2252_vm2, %v4010_v56 }
 0x7ea   : > { %v11438_v39 = vpop.f32.mrb[132].mxu1 }
 0x7eb   : > { %v3562_v37 = vadd.f32 %v11438_v39, %v14930_v14  ;;  %v3517_v36 = vpop.f32.mrb[133].mxu1 }
 0x7ec   : > { %v3560_v15 = vadd.f32 %v14930_v14, %v3517_v36  ;;  %v11439_v35 = vpop.f32.mrb[134].mxu1 }
 0x7ed   : > { %v14935_v43 = vadd.f32 %v3562_v37, %v17368_v29  ;;  %v3563_v6 = vadd.f32 %v11439_v35, %v14930_v14  ;;  %v3520_v47 = vpop.f32.mrb[135].mxu1 }
 0x7ee   : > { %v14939_v55 = vadd.f32 %v3560_v15, %v17369_v34  ;;  %v3561_v11 = vadd.f32 %v14930_v14, %v3520_v47 }
 0x7ef   : > { %v14943_v48 = vadd.f32 %v3563_v6, %v17370_v51  ;;  %v4972_v27 = vsel %vm633_vm0, %v14935_v43, 0.0  ;;  %v5033_v19 = vmul.f32 %v14935_v43, %v14935_v43 }
 0x7f0   : > { %v14948_v9 = vadd.f32 %v3561_v11, %v17371_v30  ;;  %4973 = vadd.xlane.f32.xlu0 %v4972_v27  ;;  %v4966_v13 = vsel %vm633_vm0, %v14939_v55, 0.0  ;;  %v5031_v61 = vmul.f32 %v14939_v55, %v14939_v55 }
 0x7f1   : > { %v4975_v40 = vsel %vm633_vm0, %v14943_v48, 0.0  ;;  %v5034_v38 = vmul.f32 %v14943_v48, %v14943_v48  ;;  %v5053_v23 = vsel %vm633_vm0, %v5033_v19, 0.0 }
 0x7f2   : > { %v11442_v8 = vpop.f32.mrb[136].mxu1  ;;  %4976 = vadd.xlane.f32.xlu1 %v4975_v40  ;;  %v4969_v41 = vsel %vm633_vm0, %v14948_v9, 0.0  ;;  %v5032_v56 = vmul.f32 %v14948_v9, %v14948_v9  ;;  %v5047_v36 = vsel %vm633_vm0, %v5031_v61, 0.0 }
 0x7f3   : > { %v3566_v44 = vadd.f32 %v11442_v8, %v14930_v14  ;;  %v3533_v45 = vpop.f32.mrb[137].mxu1  ;;  %v5056_v46 = vsel %vm633_vm0, %v5034_v38, 0.0 }
 0x7f4   : > { %v3564_v10 = vadd.f32 %v14930_v14, %v3533_v45  ;;  %4967 = vadd.xlane.f32.xlu0 %v4966_v13  ;;  %v11443_v12 = vpop.f32.mrb[138].mxu1  ;;  %v5050_v6 = vsel %vm633_vm0, %v5032_v56, 0.0  ;;  %v17376_v56 = vld [vmem:[#allocation37_spill] sm:$0xff] }
 0x7f5   : > { %v14959_v57 = vadd.f32 %v3566_v44, %v17372_v59  ;;  %v3567_v52 = vadd.f32 %v11443_v12, %v14930_v14  ;;  %v3536_v60 = vpop.f32.mrb[139].mxu1 }
 0x7f6   : > { %v14967_v4 = vadd.f32 %v3564_v10, %v17373_v2  ;;  %v3565_v31 = vadd.f32 %v14930_v14, %v3536_v60  ;;  %4970 = vadd.xlane.f32.xlu1 %v4969_v41 }
 0x7f7   : > { %v14971_v33 = vadd.f32 %v3567_v52, %v17374_v58  ;;  %v4984_v34 = vsel %vm633_vm0, %v14959_v57, 0.0  ;;  %v5037_v40 = vmul.f32 %v14959_v57, %v14959_v57 }
 0x7f8   : > { %v14977_v24 = vadd.f32 %v3565_v31, %v17375_v63  ;;  %5054 = vadd.xlane.f32.xlu0 %v5053_v23  ;;  %v4978_v30 = vsel %vm633_vm0, %v14967_v4, 0.0  ;;  %v5035_v59 = vmul.f32 %v14967_v4, %v14967_v4 }
 0x7f9   : > { %v4987_v11 = vsel %vm633_vm0, %v14971_v33, 0.0  ;;  %v5038_v19 = vmul.f32 %v14971_v33, %v14971_v33  ;;  %v5065_v12 = vsel %vm633_vm0, %v5037_v40, 0.0 }
 0x7fa   : > { %v14982_v39 = vpop.f32.mrb[156].mxu1  ;;  %5057 = vadd.xlane.f32.xlu1 %v5056_v46  ;;  %v4981_v13 = vsel %vm633_vm0, %v14977_v24, 0.0  ;;  %v5036_v60 = vmul.f32 %v14977_v24, %v14977_v24  ;;  %v5059_v2 = vsel %vm633_vm0, %v5035_v59, 0.0  ;;  %v17385_v59 = vld [vmem:[#allocation33_spill] sm:$0xff] }
 0x7fb   : > { %v3795_v37 = vpop.f32.mrb[157].mxu1  ;;  %v5068_v52 = vsel %vm633_vm0, %v5038_v19, 0.0  ;;  %v17383_v19 = vld [vmem:[#allocation52_spill] sm:$0xff] }
 0x7fc   : > { %5048 = vadd.xlane.f32.xlu0 %v5047_v36  ;;  %v14985_v15 = vpop.f32.mrb[158].mxu1  ;;  %v5062_v61 = vsel %vm633_vm0, %v5036_v60, 0.0 }
 0x7fd   : > { %v3827_v35 = vpack.c.bf16 %v14985_v15, %v14982_v39  ;;  %v3798_v29 = vpop.f32.mrb[159].mxu1 }
 0x7fe   : > { %v3826_v47 = vpack.c.bf16 %v3798_v29, %v3795_v37  ;;  %5051 = vadd.xlane.f32.xlu1 %v5050_v6  ;;  %v17377_v6 = vld [vmem:[#allocation36_spill] sm:$0xff] }
 0x800   : > { %4985 = vadd.xlane.f32.xlu0 %v4984_v34  ;;  %v12521_v34 = vpop.eup %12520 }
 0x801   : > { %v4420_v1 = vmul.f32 %v12521_v34, %v14775_v42 }
 0x802   : > { %v14994_v51 = vpop.f32.mrb[160].mxu1  ;;  %4988 = vadd.xlane.f32.xlu1 %v4987_v11  ;;  %v12523_v11 = vpop.eup %12522 }
 0x803   : > { %v3811_v27 = vpop.f32.mrb[161].mxu1  ;;  %v12525_v62 = vpop.eup %12524 }
 0x804   : > { %4979 = vadd.xlane.f32.xlu0 %v4978_v30  ;;  %v15000_v8 = vpop.f32.mrb[162].mxu1  ;;  %v4419_v40 = vmul.f32 %v12525_v62, %v17381_v49  ;;  %v12527_v54 = vpop.eup %12526 }
 0x805   : > { %v3829_v44 = vpack.c.bf16 %v15000_v8, %v14994_v51  ;;  %v3814_v45 = vpop.f32.mrb[163].mxu1  ;;  %v17379_v51 = vld [vmem:[#allocation38_spill] sm:$0xff] }
 0x806   : > { %v3828_v10 = vpack.c.bf16 %v3814_v45, %v3811_v27  ;;  %4982 = vadd.xlane.f32.xlu1 %v4981_v13  ;;  %v17380_v27 = vld [vmem:[#allocation25_spill] sm:$0xff]  ;;  %v4425_v42 = vpack.c.bf16 %v4420_v1, %v4419_v40  ;;  %v12529_v45 = vpop.eup %12528  ;;  %v17382_v13 = vld [vmem:[#allocation23_spill] sm:$0xff] }
 0x807   : > { %v4417_v30 = vmul.f32 %v12523_v11, %v17380_v27 }
 0x808   : > { %5066 = vadd.xlane.f32.xlu0 %v5065_v12 }
 0x809   : > { %v4424_v8 = vpack.c.bf16 %v4418_v53, %v4417_v30 }
 0x80a   : > { %v11502_v41 = vpop.f32.mrb[164].mxu1  ;;  %5069 = vadd.xlane.f32.xlu1 %v5068_v52  ;;  %v4421_v52 = vmul.f32 %v12529_v45, %v17385_v59 }
 0x80b   : > { %v4057_v38 = vpop.f32.mrb[165].mxu1 }
 0x80c   : > { %5060 = vadd.xlane.f32.xlu0 %v5059_v2  ;;  %v11503_v31 = vpop.f32.mrb[166].mxu1 }
 0x80d   : > { %v4089_v58 = vpack.c.bf16 %v11503_v31, %v11502_v41  ;;  %v4060_v23 = vpop.f32.mrb[167].mxu1  ;;  %v15077_v41 = vpop.xlane.xlu0 %4731 }
 0x80e   : > { %v4088_v63 = vpack.c.bf16 %v4060_v23, %v4057_v38  ;;  %5063 = vadd.xlane.f32.xlu1 %v5062_v61  ;;  %v15079_v38 = vpop.xlane.xlu1 %4734 }
 0x810   : > { %11510 = vmatprep.mubr.msk.bf16.mxu1 %vm2162_vm1, %v4088_v63 }
 0x811   : > { %11511 = vmatmul.mubr.msk.bf16.vlgmr.msra.gmra.mrb[172].mxu1 %vm2162_vm1, %v4089_v58  ;;  %v15081_v2 = vpop.xlane.xlu0 %4737 }
 0x812   : > { %11519 = vmatpush3.bf16.msra.mxu1 %v14489_v7  ;;  %v11506_v46 = vpop.f32.mrb[168].mxu1  ;;  %v5255_v7 = vld [vmem:[%s15032_s19] sm:$0xf]  ;;  %v15083_v31 = vpop.xlane.xlu1 %4740 }
 0x813   : > { %11544 = vmatprep.subr.bf16.mxu1 %v17376_v56  ;;  %v4073_v39 = vpop.f32.mrb[169].mxu1  ;;  %12180 = vmatprep.subr.msk.bf16.mxu0 %vm633_vm0, %v5255_v7  ;;  %v5270_v32 = vsel %vm633_vm0, %v5255_v7, 0 }
 0x814   : > { %v11507_v37 = vpop.f32.mrb[170].mxu1  ;;  %11613 = vmatpush3.bf16.xpose.msra.mxu0 %v5270_v32 }
 0x815   : > { %v4091_v36 = vpack.c.bf16 %v11507_v37, %v11506_v46  ;;  %v4076_v15 = vpop.f32.mrb[171].mxu1  ;;  %v15085_v58 = vpop.xlane.xlu0 %4743 }
 0x816   : > { %v4090_v29 = vpack.c.bf16 %v4076_v15, %v4073_v39  ;;  %v15087_v23 = vpop.xlane.xlu1 %4746 }
 0x818   : > { %11514 = vmatprep.mubr.msk.bf16.mxu1 %vm2162_vm1, %v4090_v29 }
 0x819   : > { %11515 = vmatmul.mubr.msk.bf16.gmra.mrb[176].mxu1 %vm2162_vm1, %v4091_v36  ;;  %v15089_v61 = vpop.xlane.xlu0 %4749 }
 0x81a   : > { %11520 = vmatprep.mubr.msk.bf16.mxu1 %vm2162_vm1, %v3826_v47  ;;  %v17378_v47 = vld [vmem:[#allocation39_spill] sm:$0xff]  ;;  %v15091_v63 = vpop.xlane.xlu1 %4752 }
 0x821   : > { %11521 = vmatmul.mubr.msk.bf16.vlgmr.msra.gmra.mrb[172].mxu1 %vm2162_vm1, %v3827_v35  ;;  %v4423_v35 = vpack.c.bf16 %v4416_v21, %v4415_v0 }
 0x822   : > { %11545 = vmatpush3.bf16.msra.mxu1 %v17376_v56  ;;  %11524 = vmatprep.mubr.msk.bf16.mxu1 %vm2162_vm1, %v3828_v10  ;;  %v17384_v10 = vld [vmem:[#allocation32_spill] sm:$0xff] }
 0x823   : > { %11546 = vmatprep.subr.bf16.mxu1 %v17377_v6  ;;  %v4422_v12 = vmul.f32 %v12527_v54, %v17384_v10 }
 0x825   : > { %v4426_v60 = vpack.c.bf16 %v4422_v12, %v4421_v52 }
 0x826   : > { %11547 = vmatpush3.bf16.msra.mxu1 %v17377_v6 }
 0x827   : > { %11548 = vmatprep.subr.bf16.mxu1 %v17378_v47 }
 0x829   : > { %11525 = vmatmul.mubr.msk.bf16.gmra.mrb[176].mxu1 %vm2162_vm1, %v3829_v44  ;;  %v12868_v44 = vld [vmem:[%s17076_s4 + $0x8] sm:$0xf] }
 0x82a   : > { %11549 = vmatpush3.bf16.msra.mxu1 %v17378_v47  ;;  %11552 = vmatprep.mubr.msk.bf16.mxu1 %vm2252_vm2, %v4423_v35 }
 0x82b   : > { %11550 = vmatprep.subr.bf16.mxu1 %v17379_v51 }
 0x82e   : > { %11551 = vmatpush3.bf16.msra.mxu1 %v17379_v51 }
 0x82f   : > { %12174 = vmatprep.subr.msk.bf16.mxu1 %vm2703_vm3, %v12868_v44 }
 0x831   : > { %11553 = vmatmul.mubr.msk.bf16.vlgmr.msra.gmra.mrb[180].mxu1 %vm2252_vm2, %v4424_v8 }
 0x832   : > { %11561 = vmatpush3.bf16.msra.mxu1 %v17382_v13  ;;  %11556 = vmatprep.mubr.msk.bf16.mxu1 %vm2252_vm2, %v4425_v42 }
 0x833   : > { %11586 = vmatprep.subr.bf16.mxu1 %v17383_v19 }
 0x839   : > { %11557 = vmatmul.mubr.msk.bf16.gmra.mrb[184].mxu1 %vm2252_vm2, %v4426_v60 }
 0x87d   : > { %v4974_v46 = vpop.xlane.xlu0 %4973 }
 0x87e   : > { %v5017_v37 = vmul.f32 0.03125, %v4974_v46 }
 0x87f   : > { %v4977_v56 = vpop.xlane.xlu1 %4976 }
 0x880   : > { %v5018_v15 = vmul.f32 0.03125, %v4977_v56  ;;  %v5113_v7 = vmul.f32 %v5017_v37, %v5017_v37 }
 0x881   : > { %v4968_v39 = vpop.xlane.xlu0 %4967 }
 0x882   : > { %v5015_v32 = vmul.f32 0.03125, %v4968_v39  ;;  %v5114_v6 = vmul.f32 %v5018_v15, %v5018_v15  ;;  %v5146_v56 = vsub.f32 %v14943_v48, %v5018_v15  ;;  %v15104_v15 = vld [vmem:[%s17078_s6 + $0x1] ss:$0 sm:$0xff] }
 0x883   : > { %v4971_v36 = vpop.xlane.xlu1 %4970 }
 0x884   : > { %v5016_v21 = vmul.f32 0.03125, %v4971_v36  ;;  %v5111_v35 = vmul.f32 %v5015_v32, %v5015_v32 }
 0x885   : > { %v5055_v29 = vpop.xlane.xlu0 %5054 }
 0x886   : > { %v5097_v26 = vmul.f32 0.03125, %v5055_v29  ;;  %v5112_v51 = vmul.f32 %v5016_v21, %v5016_v21  ;;  %v5144_v48 = vsub.f32 %v14948_v9, %v5016_v21 }
 0x887   : > { %v5058_v25 = vpop.xlane.xlu1 %5057 }
 0x888   : > { %v5129_v0 = vsub.f32 %v5097_v26, %v5113_v7  ;;  %v5098_v47 = vmul.f32 0.03125, %v5058_v25  ;;  %v5145_v7 = vsub.f32 %v14935_v43, %v5017_v37 }
 0x889   : > { %v5049_v28 = vpop.xlane.xlu0 %5048 }
 0x88a   : > { %v5161_v34 = vadd.f32 1e-05, %v5129_v0  ;;  %v5130_v11 = vsub.f32 %v5098_v47, %v5114_v6  ;;  %v5095_v62 = vmul.f32 0.03125, %v5049_v28  ;;  %v5143_v0 = vsub.f32 %v14939_v55, %v5015_v32 }
 0x88b   : > { %v5052_v53 = vpop.xlane.xlu1 %5051 }
 0x88c   : > { %v5162_v1 = vadd.f32 1e-05, %v5130_v11  ;;  %v5127_v27 = vsub.f32 %v5095_v62, %v5111_v35  ;;  %v5096_v30 = vmul.f32 0.03125, %v5052_v53  ;;  %12530 = vrsqrt.f32 %v5161_v34 }
 0x88d   : > { %v4986_v49 = vpop.xlane.xlu0 %4985 }
 0x88e   : > { %12532 = vrsqrt.f32 %v5162_v1  ;;  %v5159_v40 = vadd.f32 1e-05, %v5127_v27  ;;  %v5128_v8 = vsub.f32 %v5096_v30, %v5112_v51  ;;  %v15093_v45 = vmul.f32 0.03125, %v4986_v49 }
 0x88f   : > { %v4989_v44 = vpop.xlane.xlu1 %4988 }
 0x890   : > { %12534 = vrsqrt.f32 %v5159_v40  ;;  %v5160_v54 = vadd.f32 1e-05, %v5128_v8  ;;  %v5022_v10 = vmul.f32 0.03125, %v4989_v44  ;;  %v5117_v52 = vmul.f32 %v15093_v45, %v15093_v45 }
 0x891   : > { %v4980_v42 = vpop.xlane.xlu0 %4979 }
 0x892   : > { %12536 = vrsqrt.f32 %v5160_v54  ;;  %v5019_v12 = vmul.f32 0.03125, %v4980_v42  ;;  %v5118_v26 = vmul.f32 %v5022_v10, %v5022_v10  ;;  %v15113_v42 = vld [vmem:[%s17078_s6 + $0x2] ss:$0 sm:$0xff] }
 0x893   : > { %v4983_v13 = vpop.xlane.xlu1 %4982 }
 0x894   : > { %v5020_v39 = vmul.f32 0.03125, %v4983_v13  ;;  %v5115_v28 = vmul.f32 %v5019_v12, %v5019_v12 }
 0x895   : > { %v5067_v59 = vpop.xlane.xlu0 %5066 }
 0x896   : > { %v5101_v60 = vmul.f32 0.03125, %v5067_v59  ;;  %v12531_v46 = vpop.eup %12530  ;;  %v5116_v37 = vmul.f32 %v5020_v39, %v5020_v39 }
 0x897   : > { %v5070_v36 = vpop.xlane.xlu1 %5069  ;;  %v5193_v11 = vmul.f32 %v12531_v46, %v5145_v7  ;;  %v5150_v7 = vsub.f32 %v14971_v33, %v5022_v10 }
 0x898   : > { %v12533_v29 = vpop.eup %12532  ;;  %v5133_v25 = vsub.f32 %v5101_v60, %v5117_v52  ;;  %v5102_v6 = vmul.f32 0.03125, %v5070_v36 }
 0x899   : > { %v5194_v47 = vmul.f32 %v12533_v29, %v5146_v56  ;;  %v5061_v35 = vpop.xlane.xlu0 %5060  ;;  %v5213_v9 = vmul.f32 %v15104_v15, %v5193_v11 }
 0x89a   : > { %v12535_v34 = vpop.eup %12534  ;;  %v5165_v62 = vadd.f32 1e-05, %v5133_v25  ;;  %v5134_v53 = vsub.f32 %v5102_v6, %v5118_v26  ;;  %v5099_v51 = vmul.f32 0.03125, %v5061_v35  ;;  %v5149_v25 = vsub.f32 %v14959_v57, %v15093_v45 }
 0x89b   : > { %v5191_v43 = vmul.f32 %v12535_v34, %v5143_v0  ;;  %v5064_v1 = vpop.xlane.xlu1 %5063  ;;  %v5214_v55 = vmul.f32 %v15104_v15, %v5194_v47  ;;  %v15125_v46 = vadd.f32 %v15113_v42, %v5213_v9  ;;  %v5147_v6 = vsub.f32 %v14967_v4, %v5019_v12  ;;  %v17399_v9 = vld [vmem:[#allocation54_spill] sm:$0xff] }
 0x89c   : > { %v12537_v27 = vpop.eup %12536  ;;  %v5166_v32 = vadd.f32 1e-05, %v5134_v53  ;;  %v5131_v30 = vsub.f32 %v5099_v51, %v5115_v28  ;;  %v5100_v49 = vmul.f32 0.03125, %v5064_v1  ;;  %12538 = vrsqrt.f32 %v5165_v62 }
 0x89d   : > { %v5211_v40 = vmul.f32 %v15104_v15, %v5191_v43  ;;  %v5192_v8 = vmul.f32 %v12537_v27, %v5144_v48  ;;  %v15116_v59 = vadd.f32 %v15113_v42, %v5214_v55  ;;  %17389 = vst [vmem:[#allocation31_spill] sm:$0xff] %v15125_v46  ;;  %v5148_v35 = vsub.f32 %v14977_v24, %v5020_v39 }
 0x89e   : > { %12540 = vrsqrt.f32 %v5166_v32  ;;  %v5163_v21 = vadd.f32 1e-05, %v5131_v30  ;;  %v5132_v44 = vsub.f32 %v5100_v49, %v5116_v37  ;;  %v17398_v30 = vld [vmem:[#allocation51_spill] sm:$0xff] }
 0x89f   : > { %v5212_v54 = vmul.f32 %v15104_v15, %v5192_v8  ;;  %17386 = vst [vmem:[#allocation35_spill] sm:$0xff] %v15116_v59  ;;  %v15119_v52 = vadd.f32 %v15113_v42, %v5211_v40  ;;  %v15133_v36 = vpack.c.bf16 %v15116_v59, %v15125_v46 }
 0x8a0   : > { %12542 = vrsqrt.f32 %v5163_v21  ;;  %v5164_v13 = vadd.f32 1e-05, %v5132_v44 }
 0x8a1   : > { %17387 = vst [vmem:[#allocation34_spill] sm:$0xff] %v15119_v52  ;;  %v15122_v60 = vadd.f32 %v15113_v42, %v5212_v54  ;;  %17391 = vst [vmem:[#allocation42_spill] sm:$0xff] %v15133_v36 }
 0x8a2   : > { %12544 = vrsqrt.f32 %v5164_v13 }
 0x8a3   : > { %17388 = vst [vmem:[#allocation43_spill] sm:$0xff] %v15122_v60  ;;  %v15129_v56 = vpack.c.bf16 %v15122_v60, %v15119_v52  ;;  %12546 = vrcp.f32 %v15079_v38 }
 0x8a4   : > { %12548 = vrcp.f32 %v15077_v41 }
 0x8a5   : > { %17390 = vst [vmem:[#allocation30_spill] sm:$0xff] %v15129_v56  ;;  %11614 = vmatprep.mubr.msk.bf16.mxu0 %vm633_vm0, %v15129_v56  ;;  %12550 = vrcp.f32 %v15083_v31 }
 0x8a6   : > { %11615 = vmatmul.mubr.msk.bf16.vlgmr.msra.gmra.mrb[172].mxu0 %vm633_vm0, %v15133_v36  ;;  %v12539_v29 = vpop.eup %12538  ;;  %12552 = vrcp.f32 %v15087_v23 }
 0x8a7   : > { %v5197_v28 = vmul.f32 %v12539_v29, %v5149_v25  ;;  %12554 = vrcp.f32 %v15081_v2 }
 0x8a8   : > { %v12541_v26 = vpop.eup %12540  ;;  %12556 = vrcp.f32 %v15085_v58 }
 0x8a9   : > { %v5198_v0 = vmul.f32 %v12541_v26, %v5150_v7  ;;  %v5217_v33 = vmul.f32 %v15104_v15, %v5197_v28  ;;  %12558 = vrcp.f32 %v15091_v63  ;;  %v12869_v26 = vld [vmem:[%s17076_s4 + $0xc] sm:$0xf] }
 0x8aa   : > { %v12543_v47 = vpop.eup %12542  ;;  %12560 = vrcp.f32 %v15089_v61 }
 0x8ab   : > { %v5195_v34 = vmul.f32 %v12543_v47, %v5147_v6  ;;  %v5218_v62 = vmul.f32 %v15104_v15, %v5198_v0  ;;  %v15158_v24 = vadd.f32 %v15113_v42, %v5217_v33 }
 0x8ac   : > { %v12545_v11 = vpop.eup %12544 }
 0x8ad   : > { %v5215_v53 = vmul.f32 %v15104_v15, %v5195_v34  ;;  %v5196_v51 = vmul.f32 %v12545_v11, %v5148_v35  ;;  %v15149_v57 = vadd.f32 %v15113_v42, %v5218_v62  ;;  %17395 = vst [vmem:[#allocation48_spill] sm:$0xff] %v15158_v24  ;;  %v12547_v32 = vpop.eup %12546  ;;  %v12254_v11 = vld [vmem:[%s17075_s3 + $0xc0] sm:$0xff]  }
 0x8ae   : > { %v12549_v38 = vpop.eup %12548  ;;  %v4763_v40 = vmul.f32 %v12547_v32, %v14872_v22 }
 0x8af   : > { %v5216_v10 = vmul.f32 %v15104_v15, %v5196_v51  ;;  %17392 = vst [vmem:[#allocation47_spill] sm:$0xff] %v15149_v57  ;;  %v15152_v4 = vadd.f32 %v15113_v42, %v5215_v53  ;;  %v15166_v39 = vpack.c.bf16 %v15149_v57, %v15158_v24  ;;  %v4762_v58 = vmul.f32 %v12549_v38, %v14864_v3  ;;  %v17400_v3 = vld [vmem:[#allocation53_spill] sm:$0xff] }
 0x8b1   : > { %17393 = vst [vmem:[#allocation41_spill] sm:$0xff] %v15152_v4  ;;  %v15155_v45 = vadd.f32 %v15113_v42, %v5216_v10  ;;  %17397 = vst [vmem:[#allocation49_spill] sm:$0xff] %v15166_v39  ;;  %v4770_v21 = vpack.c.bf16 %v4763_v40, %v4762_v58 }
 0x8b3   : > { %17394 = vst [vmem:[#allocation40_spill] sm:$0xff] %v15155_v45  ;;  %v15162_v12 = vpack.c.bf16 %v15155_v45, %v15152_v4 }
 0x8b5   : > { %17396 = vst [vmem:[#allocation50_spill] sm:$0xff] %v15162_v12  ;;  %11618 = vmatprep.mubr.msk.bf16.mxu0 %vm633_vm0, %v15162_v12 }
 0x8b6   : > { %11619 = vmatmul.mubr.msk.bf16.gmra.mrb[176].mxu0 %vm633_vm0, %v15166_v39 }
 0x904   : > { %v11554_v48 = vpop.f32.mrb[180].mxu1 }
 0x905   : > { %v4473_v43 = vpop.f32.mrb[181].mxu1 }
 0x906   : > { %v11555_v37 = vpop.f32.mrb[182].mxu1 }
 0x907   : > { %v4505_v1 = vpack.c.bf16 %v11555_v37, %v11554_v48  ;;  %v4476_v27 = vpop.f32.mrb[183].mxu1 }
 0x908   : > { %v4504_v55 = vpack.c.bf16 %v4476_v27, %v4473_v43 }
 0x90a   : > { %11562 = vmatprep.mubr.msk.bf16.mxu1 %vm2162_vm1, %v4504_v55 }
 0x90b   : > { %11563 = vmatmul.mubr.msk.bf16.vlgmr.msra.gmra.mrb[172].mxu1 %vm2162_vm1, %v4505_v1  ;;  %v12255_v1 = vld [vmem:[%s17075_s3 + $0xc8] sm:$0xff]  }
 0x90c   : > { %11587 = vmatpush3.bf16.msra.mxu1 %v17383_v19  ;;  %v11558_v41 = vpop.f32.mrb[184].mxu1  ;;  %v12551_v19 = vpop.eup %12550 }
 0x90d   : > { %11588 = vmatprep.subr.bf16.mxu1 %v17398_v30  ;;  %v4489_v49 = vpop.f32.mrb[185].mxu1  ;;  %v12553_v44 = vpop.eup %12552  ;;  %v4765_v54 = vmul.f32 %v12551_v19, %v14885_v20 }
 0x90e   : > { %v11559_v31 = vpop.f32.mrb[186].mxu1  ;;  %v12555_v22 = vpop.eup %12554  ;;  %v4767_v13 = vmul.f32 %v12553_v44, %v14899_v17  ;;  %v17401_v17 = vld [vmem:[#allocation22_spill] sm:$0xff] }
 0x90f   : > { %v4507_v23 = vpack.c.bf16 %v11559_v31, %v11558_v41  ;;  %v4492_v8 = vpop.f32.mrb[187].mxu1  ;;  %v12557_v63 = vpop.eup %12556  ;;  %v4764_v61 = vmul.f32 %v12555_v22, %v14880_v50 }
 0x910   : > { %v4506_v2 = vpack.c.bf16 %v4492_v8, %v4489_v49  ;;  %11589 = vmatpush3.bf16.msra.mxu1 %v17398_v30  ;;  %v4766_v29 = vmul.f32 %v12557_v63, %v14893_v16  ;;  %v12559_v25 = vpop.eup %12558  ;;  %v17404_v63 = vld [vmem:[#allocation9_spill] sm:$0xff] }
 0x911   : > { %11590 = vmatprep.subr.bf16.mxu1 %v17399_v9  ;;  %v4771_v7 = vpack.c.bf16 %v4765_v54, %v4764_v61  ;;  %v12561_v20 = vpop.eup %12560  ;;  %v4769_v50 = vmul.f32 %v12559_v25, %v14914_v5 }
 0x912   : > { %11566 = vmatprep.mubr.msk.bf16.mxu1 %vm2162_vm1, %v4506_v2  ;;  %v4772_v6 = vpack.c.bf16 %v4767_v13, %v4766_v29  ;;  %v4768_v16 = vmul.f32 %v12561_v20, %v14909_v18  ;;  %v17402_v2 = vld [vmem:[#allocation7_spill] sm:$0xff]  ;;  %v17405_v13 = vld [vmem:[#allocation5_spill] sm:$0xff] }
 0x913   : > { %11567 = vmatmul.mubr.msk.bf16.gmra.mrb[176].mxu1 %vm2162_vm1, %v4507_v23 }
 0x914   : > { %11591 = vmatpush3.bf16.msra.mxu1 %v17399_v9  ;;  %11594 = vmatprep.mubr.msk.bf16.mxu1 %vm2252_vm2, %v4770_v21  ;;  %v4773_v0 = vpack.c.bf16 %v4769_v50, %v4768_v16  ;;  %v17403_v21 = vld [vmem:[#allocation3_spill] sm:$0xff] }
 0x915   : > { %11592 = vmatprep.subr.bf16.mxu1 %v17400_v3  ;;  %v17406_v16 = vld [vmem:[#allocation15_spill] sm:$0xff] }
 0x918   : > { %11593 = vmatpush3.bf16.msra.mxu1 %v17400_v3 }
 0x919   : > { %12179 = vmatprep.subr.msk.bf16.mxu1 %vm2703_vm3, %v12869_v26 }
 0x91b   : > { %11595 = vmatmul.mubr.msk.bf16.vlgmr.msra.gmra.mrb[188].mxu1 %vm2252_vm2, %v4771_v7 }
 0x91c   : > { %11598 = vmatprep.mubr.msk.bf16.mxu1 %vm2252_vm2, %v4772_v6  ;;  %11603 = vmatpush3.bf16.msra.mxu1 %v17401_v17 }
 0x91d   : > { %11632 = vmatprep.subr.bf16.mxu1 %v12254_v11 }
 0x923   : > { %11599 = vmatmul.mubr.msk.bf16.gmra.mrb[192].mxu1 %vm2252_vm2, %v4773_v0 }
 0x979   : > { %v15208_v47 = vpop.f32.mrb[172].mxu0 }
 0x97a   : > { %v15210_v28 = vpop.f32.mrb[173].mxu0 }
 0x97b   : > { %v15212_v35 = vpop.f32.mrb[174].mxu0 }
 0x97c   : > { %v15214_v34 = vpop.f32.mrb[175].mxu0 }
 0x989   : > { %v15219_v62 = vpop.f32.mrb[176].mxu0 }
 0x98a   : > { %v15221_v5 = vpop.f32.mrb[177].mxu0 }
 0x98b   : > { %v15223_v18 = vpop.f32.mrb[178].mxu0 }
 0x98c   : > { %v15225_v53 = vpop.f32.mrb[179].mxu0 }
 0x9ee   : > { %v11596_v51 = vpop.f32.mrb[188].mxu1 }
 0x9ef   : > { %v4820_v33 = vpop.f32.mrb[189].mxu1 }
 0x9f0   : > { %v11597_v10 = vpop.f32.mrb[190].mxu1 }
 0x9f1   : > { %v4852_v48 = vpack.c.bf16 %v11597_v10, %v11596_v51  ;;  %v4823_v43 = vpop.f32.mrb[191].mxu1 }
 0x9f2   : > { %v4851_v37 = vpack.c.bf16 %v4823_v43, %v4820_v33 }
 0x9f4   : > { %11604 = vmatprep.mubr.msk.bf16.mxu1 %vm2162_vm1, %v4851_v37 }
 0x9f5   : > { %11605 = vmatmul.mubr.msk.bf16.vlgmr.msra.gmra.mrb[172].mxu1 %vm2162_vm1, %v4852_v48  ;;  %v17407_v48 = vld [vmem:[#allocation11_spill] sm:$0xff] }
 0x9f6   : > { %v11600_v27 = vpop.f32.mrb[192].mxu1  ;;  %11633 = vmatpush3.bf16.msra.mxu1 %v12254_v11 }
 0x9f7   : > { %v4836_v55 = vpop.f32.mrb[193].mxu1  ;;  %11634 = vmatprep.subr.bf16.mxu1 %v12255_v1 }
 0x9f8   : > { %v11601_v32 = vpop.f32.mrb[194].mxu1 }
 0x9f9   : > { %v4854_v41 = vpack.c.bf16 %v11601_v32, %v11600_v27  ;;  %v4839_v38 = vpop.f32.mrb[195].mxu1 }
 0x9fa   : > { %v4853_v30 = vpack.c.bf16 %v4839_v38, %v4836_v55  ;;  %11635 = vmatpush3.bf16.msra.mxu1 %v12255_v1  ;;  %v17408_v1 = vld [vmem:[#allocation17_spill] sm:$0xff] }
 0x9fc   : > { %11608 = vmatprep.mubr.msk.bf16.mxu1 %vm2162_vm1, %v4853_v30 }
 0x9fd   : > { %11609 = vmatmul.mubr.msk.bf16.gmra.mrb[176].mxu1 %vm2162_vm1, %v4854_v41  ;;  %v17409_v41 = vld [vmem:[#allocation13_spill] sm:$0xff] }
 0x9fe   : > { %11636 = vmatprep.mubr.msk.bf16.mxu1 %vm633_vm0, %v15129_v56 }
 0xa05   : > { %11637 = vmatmul.mubr.msk.bf16.vlgmr.msra.gmra.mrb[196].mxu1 %vm633_vm0, %v15133_v36 }
 0xa06   : > { %11640 = vmatprep.mubr.msk.bf16.mxu1 %vm633_vm0, %v15162_v12 }
 0xa0d   : > { %11641 = vmatmul.mubr.msk.bf16.gmra.mrb[200].mxu1 %vm633_vm0, %v15166_v39 }
 0xac8   : > { %v11606_v49 = vpop.f32.mrb[172].mxu1 }
 0xac9   : > { %v4942_v31 = vadd.f32 %v11606_v49, %v14930_v14  ;;  %v4901_v40 = vpop.f32.mrb[173].mxu1 }
 0xaca   : > { %v4940_v23 = vadd.f32 %v14930_v14, %v4901_v40  ;;  %v11607_v8 = vpop.f32.mrb[174].mxu1 }
 0xacb   : > { %v15245_v58 = vadd.f32 %v4942_v31, %v17402_v2  ;;  %v4943_v9 = vadd.f32 %v11607_v8, %v14930_v14  ;;  %v4904_v19 = vpop.f32.mrb[175].mxu1  ;;  %v15295_v31 = vld [vmem:[%s17077_s5 + $0xc] ss:$0 sm:$0xff] }
 0xacc   : > { %v15249_v44 = vadd.f32 %v4940_v23, %v17403_v21  ;;  %v4941_v22 = vadd.f32 %v14930_v14, %v4904_v19 }
 0xacd   : > { %v15253_v54 = vadd.f32 %v4943_v9, %v17404_v63  ;;  %v4996_v3 = vsel %vm633_vm0, %v15245_v58, 0.0  ;;  %v5041_v20 = vmul.f32 %v15245_v58, %v15245_v58 }
 0xace   : > { %v15258_v61 = vadd.f32 %v4941_v22, %v17405_v13  ;;  %4997 = vadd.xlane.f32.xlu0 %v4996_v3  ;;  %v4990_v6 = vsel %vm633_vm0, %v15249_v44, 0.0  ;;  %v5039_v32 = vmul.f32 %v15249_v44, %v15249_v44 }
 0xacf   : > { %v4999_v29 = vsel %vm633_vm0, %v15253_v54, 0.0  ;;  %v5042_v10 = vmul.f32 %v15253_v54, %v15253_v54  ;;  %v5077_v55 = vsel %vm633_vm0, %v5041_v20, 0.0 }
 0xad0   : > { %5000 = vadd.xlane.f32.xlu1 %v4999_v29  ;;  %v11610_v7 = vpop.f32.mrb[176].mxu1  ;;  %v4993_v33 = vsel %vm633_vm0, %v15258_v61, 0.0  ;;  %v5040_v49 = vmul.f32 %v15258_v61, %v15258_v61  ;;  %v5071_v23 = vsel %vm633_vm0, %v5039_v32, 0.0 }
 0xad1   : > { %v4946_v26 = vadd.f32 %v11610_v7, %v14930_v14  ;;  %v4917_v25 = vpop.f32.mrb[177].mxu1  ;;  %v5080_v30 = vsel %vm633_vm0, %v5042_v10, 0.0 }
 0xad2   : > { %v4944_v17 = vadd.f32 %v14930_v14, %v4917_v25  ;;  %4991 = vadd.xlane.f32.xlu0 %v4990_v6  ;;  %v11611_v50 = vpop.f32.mrb[178].mxu1  ;;  %v5074_v21 = vsel %vm633_vm0, %v5040_v49, 0.0 }
 0xad3   : > { %v15269_v0 = vadd.f32 %v4946_v26, %v17406_v16  ;;  %v4947_v11 = vadd.f32 %v11611_v50, %v14930_v14  ;;  %v4920_v51 = vpop.f32.mrb[179].mxu1 }
 0xad4   : > { %v15277_v43 = vadd.f32 %v4944_v17, %v17407_v48  ;;  %v4945_v37 = vadd.f32 %v14930_v14, %v4920_v51  ;;  %4994 = vadd.xlane.f32.xlu1 %v4993_v33 }
 0xad5   : > { %v15281_v27 = vadd.f32 %v4947_v11, %v17408_v1  ;;  %v5008_v13 = vsel %vm633_vm0, %v15269_v0, 0.0 }
 0xad6   : > { %v15287_v38 = vadd.f32 %v4945_v37, %v17409_v41  ;;  %5078 = vadd.xlane.f32.xlu0 %v5077_v55  ;;  %v5002_v6 = vsel %vm633_vm0, %v15277_v43, 0.0  ;;  %v5043_v20 = vmul.f32 %v15277_v43, %v15277_v43  ;;  %v5045_v55 = vmul.f32 %v15269_v0, %v15269_v0 }
 0xad7   : > { %v5011_v7 = vsel %vm633_vm0, %v15281_v27, 0.0 }
 0xad8   : > { %5081 = vadd.xlane.f32.xlu1 %v5080_v30  ;;  %v11638_v14 = vpop.f32.mrb[196].mxu1  ;;  %v5005_v51 = vsel %vm633_vm0, %v15287_v38, 0.0  ;;  %v5044_v33 = vmul.f32 %v15287_v38, %v15287_v38  ;;  %v5083_v1 = vsel %vm633_vm0, %v5043_v20, 0.0  ;;  %v5046_v30 = vmul.f32 %v15281_v27, %v15281_v27 }
 0xad9   : > { %v5478_v40 = vpop.f32.mrb[197].mxu1  ;;  %v15299_v2 = vadd.f32 %v11638_v14, %v15295_v31  ;;  %v5089_v49 = vsel %vm633_vm0, %v5045_v55, 0.0 }
 0xada   : > { %5072 = vadd.xlane.f32.xlu0 %v5071_v23  ;;  %v11639_v8 = vpop.f32.mrb[198].mxu1  ;;  %v15306_v22 = vadd.f32 %v15295_v31, %v5478_v40  ;;  %v5086_v41 = vsel %vm633_vm0, %v5044_v33, 0.0  ;;  %v5092_v14 = vsel %vm633_vm0, %v5046_v30, 0.0  ;;  %v5256_v40 = vld [vmem:[%s15032_s19 + $0x4] sm:$0xf] }
 0xadb   : > { %v15302_v9 = vadd.f32 %v11639_v8, %v15295_v31  ;;  %v5481_v19 = vpop.f32.mrb[199].mxu1  ;;  %12181 = vmatprep.subr.msk.bf16.mxu0 %vm633_vm0, %v5256_v40  ;;  %v5350_v23 = vsel %vm633_vm0, %v5256_v40, 0  ;;  %v12257_v8 = vld [vmem:[%s17075_s3 + $0x110] sm:$0xff]  }
 0xadc   : > { %v15309_v63 = vadd.f32 %v15295_v31, %v5481_v19  ;;  %5075 = vadd.xlane.f32.xlu1 %v5074_v21  ;;  %11623 = vmatpush3.bf16.xpose.msra.mxu0 %v5350_v23  ;;  %v17156_v19 = vmov 0.0   ;;  %v12259_v21 = vld [vmem:[%s17075_s3 + $0x118] sm:$0xff]  }
 0xadd   : > { %11652 = vmatprep.subr.bf16.mxu0 %v17156_v19  ;;  %11688 = vmatprep.subr.bf16.mxu1 %v17156_v19 }
 0xade   : > { %5009 = vadd.xlane.f32.xlu0 %v5008_v13  ;;  %11689 = vmatpush3.bf16.msra.mxu1 %v12257_v8 }
 0xadf   : > { %11690 = vmatprep.subr.bf16.mxu1 %v17156_v19 }
 0xae0   : > { %5012 = vadd.xlane.f32.xlu1 %v5011_v7  ;;  %v11642_v26 = vpop.f32.mrb[200].mxu1 }
 0xae1   : > { %v5494_v25 = vpop.f32.mrb[201].mxu1  ;;  %v15324_v50 = vadd.f32 %v11642_v26, %v15295_v31 }
 0xae2   : > { %5003 = vadd.xlane.f32.xlu0 %v5002_v6  ;;  %v11643_v17 = vpop.f32.mrb[202].mxu1  ;;  %v15334_v10 = vadd.f32 %v15295_v31, %v5494_v25  ;;  %11691 = vmatpush3.bf16.msra.mxu1 %v12259_v21 }
 0xae3   : > { %v15327_v16 = vadd.f32 %v11643_v17, %v15295_v31  ;;  %v5497_v11 = vpop.f32.mrb[203].mxu1  ;;  %11696 = vmatprep.subr.bf16.mxu1 %v17156_v19 }
 0xae4   : > { %v15337_v48 = vadd.f32 %v15295_v31, %v5497_v11  ;;  %5006 = vadd.xlane.f32.xlu1 %v5005_v51 }
 0xae6   : > { %5084 = vadd.xlane.f32.xlu0 %v5083_v1 }
 0xae8   : > { %5087 = vadd.xlane.f32.xlu1 %v5086_v41 }
 0xaea   : > { %5090 = vadd.xlane.f32.xlu0 %v5089_v49 }
 0xaec   : > { %5093 = vadd.xlane.f32.xlu1 %v5092_v14 }
 0xb5b   : > { %v4998_v13 = vpop.xlane.xlu0 %4997 }
 0xb5c   : > { %v5025_v25 = vmul.f32 0.03125, %v4998_v13 }
 0xb5d   : > { %v5001_v7 = vpop.xlane.xlu1 %5000 }
 0xb5e   : > { %v5026_v20 = vmul.f32 0.03125, %v5001_v7  ;;  %v5121_v11 = vmul.f32 %v5025_v25, %v5025_v25 }
 0xb5f   : > { %v4992_v26 = vpop.xlane.xlu0 %4991 }
 0xb60   : > { %v5023_v51 = vmul.f32 0.03125, %v4992_v26  ;;  %v5122_v55 = vmul.f32 %v5026_v20, %v5026_v20 }
 0xb61   : > { %v4995_v6 = vpop.xlane.xlu1 %4994 }
 0xb62   : > { %v5024_v41 = vmul.f32 0.03125, %v4995_v6  ;;  %v5119_v40 = vmul.f32 %v5023_v51, %v5023_v51 }
 0xb63   : > { %v5079_v17 = vpop.xlane.xlu0 %5078 }
 0xb64   : > { %v5105_v33 = vmul.f32 0.03125, %v5079_v17  ;;  %v5120_v32 = vmul.f32 %v5024_v41, %v5024_v41  ;;  %v5152_v57 = vsub.f32 %v15258_v61, %v5024_v41 }
 0xb65   : > { %v5082_v1 = vpop.xlane.xlu1 %5081 }
 0xb66   : > { %v5137_v30 = vsub.f32 %v5105_v33, %v5121_v11  ;;  %v5106_v49 = vmul.f32 0.03125, %v5082_v1 }
 0xb67   : > { %v5073_v14 = vpop.xlane.xlu0 %5072 }
 0xb68   : > { %v5169_v23 = vadd.f32 1e-05, %v5137_v30  ;;  %v5138_v8 = vsub.f32 %v5106_v49, %v5122_v55  ;;  %v5103_v21 = vmul.f32 0.03125, %v5073_v14 }
 0xb69   : > { %v5076_v37 = vpop.xlane.xlu1 %5075 }
 0xb6a   : > { %v5170_v3 = vadd.f32 1e-05, %v5138_v8  ;;  %v5135_v13 = vsub.f32 %v5103_v21, %v5119_v40  ;;  %v5104_v29 = vmul.f32 0.03125, %v5076_v37  ;;  %12562 = vrsqrt.f32 %v5169_v23 }
 0xb6b   : > { %v5010_v7 = vpop.xlane.xlu0 %5009  ;;  %v5154_v23 = vsub.f32 %v15253_v54, %v5026_v20  ;;  %v5153_v8 = vsub.f32 %v15245_v58, %v5025_v25 }
 0xb6c   : > { %12564 = vrsqrt.f32 %v5170_v3  ;;  %v5167_v26 = vadd.f32 1e-05, %v5135_v13  ;;  %v5136_v17 = vsub.f32 %v5104_v29, %v5120_v32  ;;  %v15366_v55 = vmul.f32 0.03125, %v5010_v7 }
 0xb6d   : > { %v5013_v19 = vpop.xlane.xlu1 %5012  ;;  %v5151_v7 = vsub.f32 %v15249_v44, %v5023_v51 }
 0xb6e   : > { %12566 = vrsqrt.f32 %v5167_v26  ;;  %v5168_v6 = vadd.f32 1e-05, %v5136_v17  ;;  %v15369_v3 = vmul.f32 0.03125, %v5013_v19 }
 0xb6f   : > { %v5004_v11 = vpop.xlane.xlu0 %5003 }
 0xb70   : > { %12568 = vrsqrt.f32 %v5168_v6  ;;  %v5027_v33 = vmul.f32 0.03125, %v5004_v11  ;;  %v5125_v6 = vmul.f32 %v15366_v55, %v15366_v55 }
 0xb71   : > { %v5007_v1 = vpop.xlane.xlu1 %5006 }
 0xb72   : > { %v15364_v30 = vmul.f32 0.03125, %v5007_v1  ;;  %v5123_v14 = vmul.f32 %v5027_v33, %v5027_v33 }
 0xb73   : > { %v5085_v49 = vpop.xlane.xlu0 %5084 }
 0xb74   : > { %v5107_v40 = vmul.f32 0.03125, %v5085_v49  ;;  %v12563_v37 = vpop.eup %12562  ;;  %v5124_v21 = vmul.f32 %v15364_v30, %v15364_v30 }
 0xb75   : > { %v5088_v29 = vpop.xlane.xlu1 %5087  ;;  %v5201_v54 = vmul.f32 %v12563_v37, %v5153_v8 }
 0xb76   : > { %v12565_v32 = vpop.eup %12564  ;;  %v5139_v13 = vsub.f32 %v5107_v40, %v5123_v14  ;;  %v5108_v26 = vmul.f32 0.03125, %v5088_v29  ;;  %v5126_v14 = vmul.f32 %v15369_v3, %v15369_v3 }
 0xb77   : > { %v5202_v17 = vmul.f32 %v12565_v32, %v5154_v23  ;;  %v5091_v11 = vpop.xlane.xlu0 %5090  ;;  %v5221_v8 = vmul.f32 %v15104_v15, %v5201_v54  ;;  %v5155_v54 = vsub.f32 %v15277_v43, %v5027_v33  ;;  %v12258_v43 = vld [vmem:[%s17075_s3 + $0x108] sm:$0xff]  }
 0xb78   : > { %v12567_v1 = vpop.eup %12566  ;;  %v5171_v19 = vadd.f32 1e-05, %v5139_v13  ;;  %v5140_v20 = vsub.f32 %v5108_v26, %v5124_v21  ;;  %v5109_v49 = vmul.f32 0.03125, %v5091_v11  ;;  %v12256_v11 = vld [vmem:[%s17075_s3 + $0x100] sm:$0xff]  }
 0xb79   : > { %v5222_v58 = vmul.f32 %v15104_v15, %v5202_v17  ;;  %v5199_v25 = vmul.f32 %v12567_v1, %v5151_v7  ;;  %v5094_v40 = vpop.xlane.xlu1 %5093 }
 0xb7a   : > { %v12569_v44 = vpop.eup %12568  ;;  %12570 = vrsqrt.f32 %v5171_v19  ;;  %v5172_v51 = vadd.f32 1e-05, %v5140_v20  ;;  %v5141_v23 = vsub.f32 %v5109_v49, %v5125_v6  ;;  %v5110_v29 = vmul.f32 0.03125, %v5094_v40 }
 0xb7b   : > { %v5219_v32 = vmul.f32 %v15104_v15, %v5199_v25  ;;  %v5200_v37 = vmul.f32 %v12569_v44, %v5152_v57  ;;  %v15385_v26 = vadd.f32 %v15113_v42, %v5222_v58  ;;  %v15394_v57 = vadd.f32 %v15113_v42, %v5221_v8 }
 0xb7c   : > { %12572 = vrsqrt.f32 %v5172_v51  ;;  %v5173_v21 = vadd.f32 1e-05, %v5141_v23  ;;  %v5142_v61 = vsub.f32 %v5110_v29, %v5126_v14  ;;  %v5156_v20 = vsub.f32 %v15287_v38, %v15364_v30 }
 0xb7d   : > { %v5220_v41 = vmul.f32 %v15104_v15, %v5200_v37  ;;  %17410 = vst [vmem:[#allocation19_spill] sm:$0xff] %v15385_v26  ;;  %v15388_v7 = vadd.f32 %v15113_v42, %v5219_v32  ;;  %17413 = vst [vmem:[#allocation45_spill] sm:$0xff] %v15394_v57  ;;  %v15405_v1 = vpack.c.bf16 %v15385_v26, %v15394_v57  ;;  %v17416_v58 = vmov 0.0  }
 0xb7e   : > { %12574 = vrsqrt.f32 %v5173_v21  ;;  %v5174_v13 = vadd.f32 1e-05, %v5142_v61  ;;  %v5157_v25 = vsub.f32 %v15269_v0, %v15366_v55  ;;  %v5158_v51 = vsub.f32 %v15281_v27, %v15369_v3  ;;  %v12261_v61 = vld [vmem:[%s17075_s3 + $0x150] sm:$0xff]  }
 0xb7f   : > { %17411 = vst [vmem:[#allocation46_spill] sm:$0xff] %v15388_v7  ;;  %v15391_v17 = vadd.f32 %v15113_v42, %v5220_v41  ;;  %17415 = vst [vmem:[#allocation57_spill] sm:$0xff] %v15405_v1  ;;  %v12262_v41 = vld [vmem:[%s17075_s3 + $0x148] sm:$0xff]  }
 0xb80   : > { %12576 = vrsqrt.f32 %v5174_v13  ;;  %v12263_v13 = vld [vmem:[%s17075_s3 + $0x158] sm:$0xff]  }
 0xb81   : > { %17412 = vst [vmem:[#allocation55_spill] sm:$0xff] %v15391_v17  ;;  %v15398_v6 = vpack.c.bf16 %v15391_v17, %v15388_v7 }
 0xb83   : > { %17414 = vst [vmem:[#allocation44_spill] sm:$0xff] %v15398_v6  ;;  %11624 = vmatprep.mubr.msk.bf16.mxu0 %vm633_vm0, %v15398_v6  ;;  %11644 = vmatprep.mubr.msk.bf16.mxu1 %vm633_vm0, %v15398_v6 }
 0xb84   : > { %v12571_v19 = vpop.eup %12570  ;;  %11625 = vmatmul.mubr.msk.bf16.vlgmr.msra.gmra.mrb[180].mxu0 %vm633_vm0, %v15405_v1  ;;  %11645 = vmatmul.mubr.msk.bf16.gmra.mrb[204].mxu1 %vm633_vm0, %v15405_v1 }
 0xb85   : > { %v5203_v49 = vmul.f32 %v12571_v19, %v5155_v54  ;;  %11653 = vmatpush3.bf16.msra.mxu0 %v12256_v11  ;;  %v12264_v11 = vld [vmem:[%s17075_s3 + $0xd0] sm:$0xff]   ;;  %v12265_v54 = vld [vmem:[%s17075_s3 + $0xe0] sm:$0xff]   ;;  %v12266_v19 = vld [vmem:[%s17075_s3 + $0xd8] sm:$0xff]  }
 0xb86   : > { %v12573_v33 = vpop.eup %12572  ;;  %11654 = vmatprep.subr.bf16.mxu0 %v17416_v58 }
 0xb87   : > { %v5223_v14 = vmul.f32 %v15104_v15, %v5203_v49  ;;  %v5204_v40 = vmul.f32 %v12573_v33, %v5156_v20  ;;  %v12267_v20 = vld [vmem:[%s17075_s3 + $0xe8] sm:$0xff]   ;;  %v12268_v49 = vld [vmem:[%s17075_s3 + $0x120] sm:$0xff]  }
 0xb88   : > { %v12575_v44 = vpop.eup %12574  ;;  %v12270_v33 = vld [vmem:[%s17075_s3 + $0x128] sm:$0xff]  }
 0xb89   : > { %v5224_v38 = vmul.f32 %v15104_v15, %v5204_v40  ;;  %v5205_v30 = vmul.f32 %v12575_v44, %v5157_v25  ;;  %11655 = vmatpush3.bf16.msra.mxu0 %v12258_v43  ;;  %v15431_v0 = vadd.f32 %v15113_v42, %v5223_v14  ;;  %v12269_v43 = vld [vmem:[%s17075_s3 + $0x130] sm:$0xff]   ;;  %v12271_v25 = vld [vmem:[%s17075_s3 + $0x138] sm:$0xff]   ;;  %v12272_v14 = vld [vmem:[%s17075_s3 + $0x160] sm:$0xff]  }
 0xb8a   : > { %v12577_v23 = vpop.eup %12576  ;;  %11660 = vmatprep.subr.bf16.mxu0 %v17416_v58  ;;  %v12273_v40 = vld [vmem:[%s17075_s3 + $0x170] sm:$0xff]   ;;  %v12274_v44 = vld [vmem:[%s17075_s3 + $0x168] sm:$0xff]  }
 0xb8b   : > { %v5225_v29 = vmul.f32 %v15104_v15, %v5205_v30  ;;  %v5206_v32 = vmul.f32 %v12577_v23, %v5158_v51  ;;  %17417 = vst [vmem:[#allocation59_spill] sm:$0xff] %v15431_v0  ;;  %v15434_v55 = vadd.f32 %v15113_v42, %v5224_v38  ;;  %v12275_v51 = vld [vmem:[%s17075_s3 + $0x178] sm:$0xff]   ;;  %v12276_v38 = vld [vmem:[%s17075_s3 + $0xf0] sm:$0xff]   ;;  %v17423_v23 = vpack.c.bf16 %v15309_v63, %v15306_v22 }
 0xb8c   : > { %v12277_v30 = vld [vmem:[%s17075_s3 + $0xf8] sm:$0xff]  }
 0xb8d   : > { %17418 = vst [vmem:[#allocation56_spill] sm:$0xff] %v15434_v55  ;;  %v5226_v37 = vmul.f32 %v15104_v15, %v5206_v32  ;;  %v15439_v27 = vpack.c.bf16 %v15434_v55, %v15431_v0  ;;  %v15446_v3 = vadd.f32 %v15113_v42, %v5225_v29  ;;  %v15464_v15 = vld [vmem:[%s15068_s24] sm:$0xff]  }
 0xb8f   : > { %17419 = vst [vmem:[#allocation58_spill] sm:$0xff] %v15439_v27  ;;  %11628 = vmatprep.mubr.msk.bf16.mxu0 %vm633_vm0, %v15439_v27  ;;  %11648 = vmatprep.mubr.msk.bf16.mxu1 %vm633_vm0, %v15439_v27  ;;  %17420 = vst [vmem:[#allocation18_spill] sm:$0xff] %v15446_v3  ;;  %v15449_v8 = vadd.f32 %v15113_v42, %v5226_v37  ;;  %v12260_v42 = vld [vmem:[%s17075_s3 + $0x140] sm:$0xff]  }
 0xb91   : > { %17421 = vst [vmem:[#allocation21_spill] sm:$0xff] %v15449_v8  ;;  %v15453_v21 = vpack.c.bf16 %v15449_v8, %v15446_v3  ;;  %v10291_v8 = vld [vmem:[%s17077_s5 + $0x14] ss:$0 sm:$0xff] }
 0xb93   : > { %17422 = vst [vmem:[#allocation20_spill] sm:$0xff] %v15453_v21  ;;  %11629 = vmatmul.mubr.msk.bf16.gmra.mrb[184].mxu0 %vm633_vm0, %v15453_v21  ;;  %11649 = vmatmul.mubr.msk.bf16.gmra.mrb[208].mxu1 %vm633_vm0, %v15453_v21 }
 0xb94   : > { %11656 = vmatprep.mubr.msk.bf16.mxu0 %vm12890_vm4, %v17416_v58  ;;  %11692 = vmatprep.mubr.msk.bf16.mxu1 %vm12890_vm4, %v17416_v58 }
 0xb9b   : > { %11657 = vmatmul.mubr.msk.bf16.vlgmr.msra.gmra.mrb[188].mxu0 %vm633_vm0, %v15464_v15  ;;  %11693 = vmatmul.mubr.msk.bf16.vlgmr.msra.gmra.mrb[212].mxu1 %vm633_vm0, %v15464_v15 }
 0xb9c   : > { %11661 = vmatpush3.bf16.msra.mxu0 %v12260_v42  ;;  %11697 = vmatpush3.bf16.msra.mxu1 %v12261_v61 }
 0xb9d   : > { %11662 = vmatprep.subr.bf16.mxu0 %v17416_v58  ;;  %11698 = vmatprep.subr.bf16.mxu1 %v17416_v58 }
 0xb9e   : > { %11664 = vmatprep.mubr.msk.bf16.mxu0 %vm12890_vm4, %v17416_v58  ;;  %11700 = vmatprep.mubr.msk.bf16.mxu1 %vm12890_vm4, %v17416_v58 }
 0xba0   : > { %11663 = vmatpush3.bf16.msra.mxu0 %v12262_v41  ;;  %11699 = vmatpush3.bf16.msra.mxu1 %v12263_v13 }
 0xba1   : > { %11668 = vmatprep.subr.bf16.mxu0 %v12264_v11  ;;  %11704 = vmatprep.subr.bf16.mxu1 %v12265_v54 }
 0xba3   : > { %11665 = vmatmul.mubr.msk.bf16.vlgmr.msra.gmra.mrb[192].mxu0 %vm633_vm0, %v15464_v15  ;;  %11701 = vmatmul.mubr.msk.bf16.vlgmr.msra.gmra.mrb[216].mxu1 %vm633_vm0, %v15464_v15 }
 0xba4   : > { %11669 = vmatpush3.bf16.msra.mxu0 %v12264_v11  ;;  %11672 = vmatprep.mubr.msk.bf16.mxu0 %vm633_vm0, %v15129_v56 }
 0xba5   : > { %11705 = vmatpush3.bf16.msra.mxu1 %v12265_v54  ;;  %11708 = vmatprep.mubr.msk.bf16.mxu1 %vm633_vm0, %v15129_v56 }
 0xba6   : > { %11670 = vmatprep.subr.bf16.mxu0 %v12266_v19  ;;  %11706 = vmatprep.subr.bf16.mxu1 %v12267_v20 }
 0xba8   : > { %11671 = vmatpush3.bf16.msra.mxu0 %v12266_v19 }
 0xba9   : > { %11707 = vmatpush3.bf16.msra.mxu1 %v12267_v20  ;;  %11724 = vmatprep.subr.bf16.mxu0 %v17416_v58 }
 0xbaa   : > { %11760 = vmatprep.subr.bf16.mxu1 %v17416_v58 }
 0xbab   : > { %11673 = vmatmul.mubr.msk.bf16.vlgmr.msra.gmra.mrb[196].mxu0 %vm633_vm0, %v15133_v36 }
 0xbac   : > { %11709 = vmatmul.mubr.msk.bf16.vlgmr.msra.gmra.mrb[220].mxu1 %vm633_vm0, %v15133_v36  ;;  %11676 = vmatprep.mubr.msk.bf16.mxu0 %vm633_vm0, %v15162_v12 }
 0xbad   : > { %11712 = vmatprep.mubr.msk.bf16.mxu1 %vm633_vm0, %v15162_v12  ;;  %11725 = vmatpush3.bf16.msra.mxu0 %v12268_v49 }
 0xbae   : > { %11761 = vmatpush3.bf16.msra.mxu1 %v12269_v43  ;;  %11726 = vmatprep.subr.bf16.mxu0 %v17416_v58 }
 0xbaf   : > { %11762 = vmatprep.subr.bf16.mxu1 %v17416_v58 }
 0xbb1   : > { %11727 = vmatpush3.bf16.msra.mxu0 %v12270_v33 }
 0xbb2   : > { %11763 = vmatpush3.bf16.msra.mxu1 %v12271_v25  ;;  %11732 = vmatprep.subr.bf16.mxu0 %v17416_v58 }
 0xbb3   : > { %11677 = vmatmul.mubr.msk.bf16.gmra.mrb[200].mxu0 %vm633_vm0, %v15166_v39  ;;  %11768 = vmatprep.subr.bf16.mxu1 %v17416_v58 }
 0xbb4   : > { %11713 = vmatmul.mubr.msk.bf16.gmra.mrb[224].mxu1 %vm633_vm0, %v15166_v39  ;;  %11680 = vmatprep.mubr.msk.bf16.mxu0 %vm633_vm0, %v15398_v6 }
 0xbb5   : > { %11716 = vmatprep.mubr.msk.bf16.mxu1 %vm633_vm0, %v15398_v6 }
 0xbbb   : > { %11681 = vmatmul.mubr.msk.bf16.gmra.mrb[204].mxu0 %vm633_vm0, %v15405_v1 }
 0xbbc   : > { %11717 = vmatmul.mubr.msk.bf16.gmra.mrb[228].mxu1 %vm633_vm0, %v15405_v1  ;;  %11684 = vmatprep.mubr.msk.bf16.mxu0 %vm633_vm0, %v15439_v27 }
 0xbbd   : > { %11720 = vmatprep.mubr.msk.bf16.mxu1 %vm633_vm0, %v15439_v27 }
 0xbc3   : > { %11685 = vmatmul.mubr.msk.bf16.gmra.mrb[208].mxu0 %vm633_vm0, %v15453_v21 }
 0xbc4   : > { %11721 = vmatmul.mubr.msk.bf16.gmra.mrb[232].mxu1 %vm633_vm0, %v15453_v21  ;;  %11728 = vmatprep.mubr.msk.bf16.mxu0 %vm12890_vm4, %v17416_v58 }
 0xbc5   : > { %11764 = vmatprep.mubr.msk.bf16.mxu1 %vm12890_vm4, %v17416_v58 }
 0xbcb   : > { %11729 = vmatmul.mubr.msk.bf16.vlgmr.msra.gmra.mrb[212].mxu0 %vm633_vm0, %v15464_v15 }
 0xbcc   : > { %11765 = vmatmul.mubr.msk.bf16.vlgmr.msra.gmra.mrb[236].mxu1 %vm633_vm0, %v15464_v15  ;;  %11733 = vmatpush3.bf16.msra.mxu0 %v12272_v14 }
 0xbcd   : > { %11769 = vmatpush3.bf16.msra.mxu1 %v12273_v40  ;;  %11734 = vmatprep.subr.bf16.mxu0 %v17416_v58 }
 0xbce   : > { %11770 = vmatprep.subr.bf16.mxu1 %v17416_v58  ;;  %11736 = vmatprep.mubr.msk.bf16.mxu0 %vm12890_vm4, %v17416_v58 }
 0xbcf   : > { %11772 = vmatprep.mubr.msk.bf16.mxu1 %vm12890_vm4, %v17416_v58 }
 0xbd0   : > { %11735 = vmatpush3.bf16.msra.mxu0 %v12274_v44 }
 0xbd1   : > { %11771 = vmatpush3.bf16.msra.mxu1 %v12275_v51  ;;  %11740 = vmatprep.subr.bf16.mxu0 %v12276_v38 }
 0xbd3   : > { %11737 = vmatmul.mubr.msk.bf16.vlgmr.msra.gmra.mrb[216].mxu0 %vm633_vm0, %v15464_v15 }
 0xbd4   : > { %11773 = vmatmul.mubr.msk.bf16.vlgmr.msra.gmra.mrb[240].mxu1 %vm633_vm0, %v15464_v15  ;;  %11741 = vmatpush3.bf16.msra.mxu0 %v12276_v38 }
 0xbd5   : > { %11744 = vmatprep.mubr.msk.bf16.mxu0 %vm633_vm0, %v15129_v56  ;;  %11778 = vmatprep.mubr.msk.bf16.mxu1 %vm2162_vm1, %v17423_v23 }
 0xbd6   : > { %11742 = vmatprep.subr.bf16.mxu0 %v12277_v30 }
 0xbd8   : > { %11743 = vmatpush3.bf16.msra.mxu0 %v12277_v30 }
 0xbdb   : > { %11745 = vmatmul.mubr.msk.bf16.vlgmr.msra.gmra.mrb[220].mxu0 %vm633_vm0, %v15133_v36 }
 0xbdc   : > { %11748 = vmatprep.mubr.msk.bf16.mxu0 %vm633_vm0, %v15162_v12 }
 0xbe3   : > { %11749 = vmatmul.mubr.msk.bf16.gmra.mrb[224].mxu0 %vm633_vm0, %v15166_v39 }
 0xbe4   : > { %11752 = vmatprep.mubr.msk.bf16.mxu0 %vm633_vm0, %v15398_v6 }
 0xbeb   : > { %11753 = vmatmul.mubr.msk.bf16.gmra.mrb[228].mxu0 %vm633_vm0, %v15405_v1 }
 0xbec   : > { %11756 = vmatprep.mubr.msk.bf16.mxu0 %vm633_vm0, %v15439_v27 }
 0xbf3   : > { %11757 = vmatmul.mubr.msk.bf16.gmra.mrb[232].mxu0 %vm633_vm0, %v15453_v21 }
 0xc57   : > { %v15610_v22 = vpop.f32.mrb[180].mxu0  ;;  %v11646_v63 = vpop.f32.mrb[204].mxu1 }
 0xc58   : > { %17424 = vst [vmem:[#allocation27_spill] sm:$0xff] %v15610_v22  ;;  %v15612_v29 = vpop.f32.mrb[181].mxu0  ;;  %v5510_v32 = vpop.f32.mrb[205].mxu1  ;;  %v15617_v42 = vadd.f32 %v11646_v63, %v15295_v31 }
 0xc59   : > { %17425 = vst [vmem:[#allocation26_spill] sm:$0xff] %v15612_v29  ;;  %v15614_v37 = vpop.f32.mrb[182].mxu0  ;;  %v11647_v15 = vpop.f32.mrb[206].mxu1  ;;  %v15625_v11 = vadd.f32 %v15295_v31, %v5510_v32 }
 0xc5a   : > { %17426 = vst [vmem:[#allocation29_spill] sm:$0xff] %v15614_v37  ;;  %17427 = vst [vmem:[#allocation28_spill] sm:$0xff] %v15617_v42  ;;  %v15620_v61 = vadd.f32 %v11647_v15, %v15295_v31  ;;  %v15622_v41 = vpop.f32.mrb[183].mxu0  ;;  %v5513_v13 = vpop.f32.mrb[207].mxu1 }
 0xc5b   : > { %17429 = vst [vmem:[#allocation2_spill] sm:$0xff] %v15622_v41  ;;  %v15628_v54 = vadd.f32 %v15295_v31, %v5513_v13  ;;  %v10316_v13 = vld [vmem:[%s17077_s5 + $0x11] ss:$0 sm:$0xff] }
 0xc5c   : > { %17428 = vst [vmem:[#allocation6_spill] sm:$0xff] %v15620_v61 }
 0xc66   : > { %v15634_v49 = vpop.f32.mrb[184].mxu0  ;;  %v11650_v43 = vpop.f32.mrb[208].mxu1 }
 0xc67   : > { %17430 = vst [vmem:[#allocation8_spill] sm:$0xff] %v15634_v49  ;;  %v15636_v33 = vpop.f32.mrb[185].mxu0  ;;  %v5526_v25 = vpop.f32.mrb[209].mxu1  ;;  %v15641_v44 = vadd.f32 %v11650_v43, %v15295_v31  ;;  %v10281_v43 = vld [vmem:[%s17077_s5 + $0x10] ss:$0 sm:$0xff] }
 0xc68   : > { %17431 = vst [vmem:[#allocation4_spill] sm:$0xff] %v15636_v33  ;;  %v15638_v14 = vpop.f32.mrb[186].mxu0  ;;  %v11651_v40 = vpop.f32.mrb[210].mxu1  ;;  %v15649_v23 = vadd.f32 %v15295_v31, %v5526_v25 }
 0xc69   : > { %17432 = vst [vmem:[#allocation14_spill] sm:$0xff] %v15638_v14  ;;  %17433 = vst [vmem:[#allocation10_spill] sm:$0xff] %v15641_v44  ;;  %v15644_v51 = vadd.f32 %v11651_v40, %v15295_v31  ;;  %v15646_v38 = vpop.f32.mrb[187].mxu0  ;;  %v5529_v30 = vpop.f32.mrb[211].mxu1 }
 0xc6a   : > { %17435 = vst [vmem:[#allocation12_spill] sm:$0xff] %v15646_v38  ;;  %17436 = vst [vmem:[#allocation37_spill] sm:$0xff] %v15649_v23  ;;  %v15652_v63 = vadd.f32 %v15295_v31, %v5529_v30 }
 0xc6b   : > { %17434 = vst [vmem:[#allocation16_spill] sm:$0xff] %v15644_v51 }
 0xc6c   : > { %17437 = vst [vmem:[#allocation36_spill] sm:$0xff] %v15652_v63 }
 0xc6e   : > { %v5614_v40 = vpop.f32.mrb[188].mxu0  ;;  %v5870_v25 = vpop.f32.mrb[212].mxu1 }
 0xc6f   : > { %v11658_v19 = vpop.f32.mrb[189].mxu0  ;;  %v5871_v20 = vadd.f32 %v10316_v13, %v5870_v25  ;;  %v11694_v31 = vpop.f32.mrb[213].mxu1  ;;  %v5615_v27 = vadd.f32 %v10281_v43, %v5614_v40 }
 0xc70   : > { %v5617_v30 = vpop.f32.mrb[190].mxu0  ;;  %v5873_v21 = vpop.f32.mrb[214].mxu1  ;;  %v10325_v19 = vld [vmem:[%s17077_s5 + $0x15] ss:$0 sm:$0xff] }
 0xc71   : > { %v5618_v32 = vadd.f32 %v10281_v43, %v5617_v30  ;;  %v11659_v1 = vpop.f32.mrb[191].mxu0  ;;  %v5874_v6 = vadd.f32 %v10316_v13, %v5873_v21  ;;  %v11695_v15 = vpop.f32.mrb[215].mxu1 }
 0xc73   : > { %v15664_v55 = vpack.c.bf16 %v5618_v32, %v5615_v27  ;;  %v15666_v0 = vpack.c.bf16 %v5874_v6, %v5871_v20 }
 0xc75   : > { %17438 = vst [vmem:[#allocation39_spill] sm:$0xff] %v15666_v0  ;;  %12182 = vmatprep.subr.msk.bf16.mxu1 %vm2162_vm1, %v15664_v55  ;;  %v6465_v1 = vsel %vm2162_vm1, %v15664_v55, 0 }
 0xc76   : > { %11777 = vmatpush3.bf16.xpose.msra.mxu1 %v6465_v1  ;;  %v5679_v21 = vpop.f32.mrb[192].mxu0  ;;  %v5934_v27 = vpop.f32.mrb[216].mxu1  ;;  %v6723_v1 = vsel %vm2162_vm1, %v15666_v0, 0 }
 0xc77   : > { %v5680_v32 = vadd.f32 %v10291_v8, %v5679_v21  ;;  %v5935_v6 = vadd.f32 %v10325_v19, %v5934_v27  ;;  %v11666_v20 = vpop.f32.mrb[193].mxu0  ;;  %v11702_v15 = vpop.f32.mrb[217].mxu1  ;;  %12184 = vmatprep.subr.msk.bf16.mxu1 %vm2162_vm1, %v15666_v0  ;;  %v17439_v21 = vpack.c.bf16 %v15302_v9, %v15299_v2  ;;  %v15697_v27 = vld [vmem:[%s17077_s5 + $0xd] ss:$0 sm:$0xff]  ;;  %v15706_v9 = vld [vmem:[%s17077_s5 + $0xe] ss:$0 sm:$0xff] }
 0xc78   : > { %v5682_v13 = vpop.f32.mrb[194].mxu0  ;;  %v5937_v43 = vpop.f32.mrb[218].mxu1 }
 0xc79   : > { %v5683_v40 = vadd.f32 %v10291_v8, %v5682_v13  ;;  %v5938_v25 = vadd.f32 %v10325_v19, %v5937_v43  ;;  %v11667_v31 = vpop.f32.mrb[195].mxu0  ;;  %v11703_v30 = vpop.f32.mrb[219].mxu1 }
 0xc7b   : > { %v15680_v3 = vpack.c.bf16 %v5683_v40, %v5680_v32  ;;  %v15682_v17 = vpack.c.bf16 %v5938_v25, %v5935_v6  ;;  %v17440_v32 = vpack.c.bf16 %v15337_v48, %v15334_v10 }
 0xc7d   : > { %11779 = vmatmul.mubr.msk.bf16.vlgmr.msra.gmra.mrb[244].mxu1 %vm2162_vm1, %v17439_v21  ;;  %12183 = vmatprep.subr.msk.bf16.mxu0 %vm2703_vm3, %v15680_v3  ;;  %v6637_v8 = vsel %vm2703_vm3, %v15680_v3, 0 }
 0xc7e   : > { %v11674_v19 = vpop.f32.mrb[196].mxu0  ;;  %11782 = vmatprep.mubr.msk.bf16.mxu1 %vm2162_vm1, %v17440_v32  ;;  %11797 = vmatpush3.bf16.xpose.msra.mxu1 %v6723_v1 }
 0xc7f   : > { %v11710_v2 = vpop.f32.mrb[220].mxu1  ;;  %v5743_v6 = vpop.f32.mrb[197].mxu0  ;;  %11787 = vmatpush3.bf16.msra.mxu0 %v6637_v8  ;;  %v5752_v13 = vadd.f32 %v11674_v19, %v15697_v27 }
 0xc80   : > { %v5998_v20 = vpop.f32.mrb[221].mxu1  ;;  %v11675_v15 = vpop.f32.mrb[198].mxu0  ;;  %12185 = vmatprep.subr.msk.bf16.mxu0 %vm2703_vm3, %v15682_v17  ;;  %v15713_v40 = vadd.f32 %v11710_v2, %v15706_v9  ;;  %v5744_v25 = vadd.f32 %v15697_v27, %v5743_v6 }
 0xc81   : > { %v5755_v10 = vadd.f32 %v11675_v15, %v15697_v27  ;;  %v11711_v48 = vpop.f32.mrb[222].mxu1  ;;  %v5746_v43 = vpop.f32.mrb[199].mxu0  ;;  %v15721_v21 = vadd.f32 %v15706_v9, %v5998_v20  ;;  %v17441_v15 = vpack.c.bf16 %v15327_v16, %v15324_v50 }
 0xc82   : > { %v15717_v31 = vadd.f32 %v11711_v48, %v15706_v9  ;;  %v5747_v30 = vadd.f32 %v15697_v27, %v5746_v43  ;;  %v6001_v1 = vpop.f32.mrb[223].mxu1 }
 0xc83   : > { %v5807_v8 = vpack.c.bf16 %v5755_v10, %v5752_v13  ;;  %v15724_v19 = vadd.f32 %v15706_v9, %v6001_v1 }
 0xc84   : > { %v5806_v2 = vpack.c.bf16 %v5747_v30, %v5744_v25 }
 0xc85   : > { %11783 = vmatmul.mubr.msk.bf16.gmra.mrb[248].mxu1 %vm2162_vm1, %v17441_v15 }
 0xc86   : > { %v11678_v48 = vpop.f32.mrb[200].mxu0  ;;  %11798 = vmatprep.mubr.msk.bf16.mxu1 %vm2162_vm1, %v5806_v2 }
 0xc87   : > { %v11714_v20 = vpop.f32.mrb[224].mxu1  ;;  %v5759_v13 = vpop.f32.mrb[201].mxu0  ;;  %v5768_v1 = vadd.f32 %v11678_v48, %v15697_v27 }
 0xc88   : > { %v6014_v10 = vpop.f32.mrb[225].mxu1  ;;  %v11679_v43 = vpop.f32.mrb[202].mxu0  ;;  %v15738_v6 = vadd.f32 %v11714_v20, %v15706_v9  ;;  %v5760_v50 = vadd.f32 %v15697_v27, %v5759_v13 }
 0xc89   : > { %v5771_v32 = vadd.f32 %v11679_v43, %v15697_v27  ;;  %v11715_v25 = vpop.f32.mrb[226].mxu1  ;;  %v5762_v30 = vpop.f32.mrb[203].mxu0  ;;  %v15746_v26 = vadd.f32 %v15706_v9, %v6014_v10 }
 0xc8a   : > { %v15742_v16 = vadd.f32 %v11715_v25, %v15706_v9  ;;  %v5763_v2 = vadd.f32 %v15697_v27, %v5762_v30  ;;  %v6017_v15 = vpop.f32.mrb[227].mxu1 }
 0xc8b   : > { %v5809_v7 = vpack.c.bf16 %v5771_v32, %v5768_v1  ;;  %v15749_v48 = vadd.f32 %v15706_v9, %v6017_v15 }
 0xc8c   : > { %v5808_v20 = vpack.c.bf16 %v5763_v2, %v5760_v50 }
 0xc8d   : > { %11799 = vmatmul.mubr.msk.bf16.vlgmr.msra.gmra.mrb[252].mxu1 %vm2162_vm1, %v5807_v8 }
 0xc8e   : > { %v11682_v25 = vpop.f32.mrb[204].mxu0  ;;  %11802 = vmatprep.mubr.msk.bf16.mxu1 %vm2162_vm1, %v5808_v20 }
 0xc8f   : > { %v15758_v30 = vadd.f32 %v11682_v25, %v15697_v27  ;;  %v11718_v10 = vpop.f32.mrb[228].mxu1  ;;  %v5775_v32 = vpop.f32.mrb[205].mxu0 }
 0xc90   : > { %v15761_v1 = vadd.f32 %v11718_v10, %v15706_v9  ;;  %v15764_v15 = vadd.f32 %v15697_v27, %v5775_v32  ;;  %v6030_v50 = vpop.f32.mrb[229].mxu1  ;;  %v11683_v2 = vpop.f32.mrb[206].mxu0 }
 0xc91   : > { %17442 = vst [vmem:[#allocation38_spill] sm:$0xff] %v15758_v30  ;;  %v15767_v43 = vadd.f32 %v15706_v9, %v6030_v50  ;;  %v15770_v8 = vadd.f32 %v11683_v2, %v15697_v27  ;;  %v11719_v20 = vpop.f32.mrb[230].mxu1  ;;  %v5778_v13 = vpop.f32.mrb[207].mxu0 }
 0xc92   : > { %17443 = vst [vmem:[#allocation25_spill] sm:$0xff] %v15761_v1  ;;  %17444 = vst [vmem:[#allocation24_spill] sm:$0xff] %v15764_v15  ;;  %v15773_v25 = vadd.f32 %v11719_v20, %v15706_v9  ;;  %v15776_v57 = vadd.f32 %v15697_v27, %v5778_v13  ;;  %v6033_v10 = vpop.f32.mrb[231].mxu1 }
 0xc93   : > { %17445 = vst [vmem:[#allocation23_spill] sm:$0xff] %v15767_v43  ;;  %17446 = vst [vmem:[#allocation52_spill] sm:$0xff] %v15770_v8  ;;  %v15781_v39 = vadd.f32 %v15706_v9, %v6033_v10 }
 0xc94   : > { %17447 = vst [vmem:[#allocation32_spill] sm:$0xff] %v15773_v25  ;;  %17448 = vst [vmem:[#allocation33_spill] sm:$0xff] %v15776_v57 }
 0xc95   : > { %17449 = vst [vmem:[#allocation51_spill] sm:$0xff] %v15781_v39  ;;  %11803 = vmatmul.mubr.msk.bf16.gmra.mrb[0].mxu1 %vm2162_vm1, %v5809_v7  ;;  %v10368_v39 = vld [vmem:[%s17077_s5 + $0xf] ss:$0 sm:$0xff] }
 0xc96   : > { %v11686_v13 = vpop.f32.mrb[208].mxu0 }
 0xc97   : > { %v15791_v12 = vadd.f32 %v11686_v13, %v15697_v27  ;;  %v11722_v36 = vpop.f32.mrb[232].mxu1  ;;  %v5791_v32 = vpop.f32.mrb[209].mxu0 }
 0xc98   : > { %v15794_v10 = vadd.f32 %v11722_v36, %v15706_v9  ;;  %v15797_v56 = vadd.f32 %v15697_v27, %v5791_v32  ;;  %v6046_v50 = vpop.f32.mrb[233].mxu1  ;;  %v11687_v58 = vpop.f32.mrb[210].mxu0 }
 0xc99   : > { %17450 = vst [vmem:[#allocation54_spill] sm:$0xff] %v15791_v12  ;;  %v15800_v2 = vadd.f32 %v15706_v9, %v6046_v50  ;;  %v15803_v20 = vadd.f32 %v11687_v58, %v15697_v27  ;;  %v11723_v7 = vpop.f32.mrb[234].mxu1  ;;  %v5794_v24 = vpop.f32.mrb[211].mxu0 }
 0xc9a   : > { %17451 = vst [vmem:[#allocation53_spill] sm:$0xff] %v15794_v10  ;;  %17452 = vst [vmem:[#allocation22_spill] sm:$0xff] %v15797_v56  ;;  %v15806_v13 = vadd.f32 %v11723_v7, %v15706_v9  ;;  %v15809_v45 = vadd.f32 %v15697_v27, %v5794_v24  ;;  %v6049_v36 = vpop.f32.mrb[235].mxu1  ;;  %v10350_v7 = vld [vmem:[%s17077_s5 + $0x12] ss:$0 sm:$0xff] }
 0xc9b   : > { %17453 = vst [vmem:[#allocation7_spill] sm:$0xff] %v15800_v2  ;;  %17454 = vst [vmem:[#allocation3_spill] sm:$0xff] %v15803_v20  ;;  %v15814_v4 = vadd.f32 %v15706_v9, %v6049_v36  ;;  %v10384_v27 = vld [vmem:[%s17077_s5 + $0x13] ss:$0 sm:$0xff]  ;;  %v10359_v24 = vld [vmem:[%s17077_s5 + $0x16] ss:$0 sm:$0xff] }
 0xc9c   : > { %17455 = vst [vmem:[#allocation9_spill] sm:$0xff] %v15806_v13  ;;  %17456 = vst [vmem:[#allocation5_spill] sm:$0xff] %v15809_v45 }
 0xc9d   : > { %17457 = vst [vmem:[#allocation15_spill] sm:$0xff] %v15814_v4 }
 0xc9e   : > { %v6125_v32 = vpop.f32.mrb[212].mxu0 }
 0xc9f   : > { %v6126_v9 = vadd.f32 %v10350_v7, %v6125_v32  ;;  %v11730_v36 = vpop.f32.mrb[213].mxu0  ;;  %v6380_v59 = vpop.f32.mrb[236].mxu1  ;;  %v10393_v32 = vld [vmem:[%s17077_s5 + $0x17] ss:$0 sm:$0xff] }
 0xca0   : > { %v6128_v46 = vpop.f32.mrb[214].mxu0  ;;  %v6381_v50 = vadd.f32 %v10384_v27, %v6380_v59  ;;  %v11766_v60 = vpop.f32.mrb[237].mxu1 }
 0xca1   : > { %v6129_v52 = vadd.f32 %v10350_v7, %v6128_v46  ;;  %v11731_v58 = vpop.f32.mrb[215].mxu0  ;;  %v6383_v10 = vpop.f32.mrb[238].mxu1 }
 0xca2   : > { %v6384_v13 = vadd.f32 %v10384_v27, %v6383_v10  ;;  %v11767_v1 = vpop.f32.mrb[239].mxu1 }
 0xca3   : > { %v15828_v25 = vpack.c.bf16 %v6129_v52, %v6126_v9 }
 0xca4   : > { %v15833_v2 = vpack.c.bf16 %v6384_v13, %v6381_v50 }
 0xca6   : > { %v6189_v36 = vpop.f32.mrb[216].mxu0 }
 0xca7   : > { %v6190_v59 = vadd.f32 %v10359_v24, %v6189_v36  ;;  %v11738_v60 = vpop.f32.mrb[217].mxu0  ;;  %v6444_v46 = vpop.f32.mrb[240].mxu1 }
 0xca8   : > { %v6192_v58 = vpop.f32.mrb[218].mxu0  ;;  %v6445_v7 = vadd.f32 %v10393_v32, %v6444_v46  ;;  %v11774_v10 = vpop.f32.mrb[241].mxu1 }
 0xca9   : > { %v6193_v1 = vadd.f32 %v10359_v24, %v6192_v58  ;;  %v11739_v52 = vpop.f32.mrb[219].mxu0  ;;  %v6447_v27 = vpop.f32.mrb[242].mxu1 }
 0xcaa   : > { %v6448_v9 = vadd.f32 %v10393_v32, %v6447_v27  ;;  %v11775_v4 = vpop.f32.mrb[243].mxu1 }
 0xcab   : > { %v15838_v43 = vpack.c.bf16 %v6193_v1, %v6190_v59 }
 0xcac   : > { %v15840_v13 = vpack.c.bf16 %v6448_v9, %v6445_v7 }
 0xcae   : > { %v11746_v50 = vpop.f32.mrb[220].mxu0 }
 0xcaf   : > { %v6253_v36 = vpop.f32.mrb[221].mxu0  ;;  %v15845_v12 = vadd.f32 %v11746_v50, %v10368_v39 }
 0xcb0   : > { %v11747_v60 = vpop.f32.mrb[222].mxu0  ;;  %v15849_v58 = vadd.f32 %v10368_v39, %v6253_v36 }
 0xcb1   : > { %v15847_v46 = vadd.f32 %v11747_v60, %v10368_v39  ;;  %v6256_v24 = vpop.f32.mrb[223].mxu0 }
 0xcb2   : > { %v15851_v32 = vadd.f32 %v10368_v39, %v6256_v24 }
 0xcb6   : > { %v11750_v7 = vpop.f32.mrb[224].mxu0 }
 0xcb7   : > { %v6269_v10 = vpop.f32.mrb[225].mxu0  ;;  %v15857_v52 = vadd.f32 %v11750_v7, %v10368_v39 }
 0xcb8   : > { %v11751_v1 = vpop.f32.mrb[226].mxu0  ;;  %v15861_v50 = vadd.f32 %v10368_v39, %v6269_v10 }
 0xcb9   : > { %v15859_v27 = vadd.f32 %v11751_v1, %v10368_v39  ;;  %v6272_v9 = vpop.f32.mrb[227].mxu0 }
 0xcba   : > { %v15863_v36 = vadd.f32 %v10368_v39, %v6272_v9 }
 0xcbe   : > { %v11754_v4 = vpop.f32.mrb[228].mxu0 }
 0xcbf   : > { %v15869_v59 = vadd.f32 %v11754_v4, %v10368_v39  ;;  %v6285_v20 = vpop.f32.mrb[229].mxu0 }
 0xcc0   : > { %v15871_v56 = vadd.f32 %v10368_v39, %v6285_v20  ;;  %v11755_v7 = vpop.f32.mrb[230].mxu0 }
 0xcc1   : > { %17458 = vst [vmem:[#allocation11_spill] sm:$0xff] %v15869_v59  ;;  %v15873_v1 = vadd.f32 %v11755_v7, %v10368_v39  ;;  %v6288_v45 = vpop.f32.mrb[231].mxu0 }
 0xcc2   : > { %17459 = vst [vmem:[#allocation17_spill] sm:$0xff] %v15871_v56  ;;  %v15875_v10 = vadd.f32 %v10368_v39, %v6288_v45 }
 0xcc3   : > { %17460 = vst [vmem:[#allocation13_spill] sm:$0xff] %v15873_v1 }
 0xcc4   : > { %17461 = vst [vmem:[#allocation60_spill] sm:$0xff] %v15875_v10 }
 0xcc6   : > { %v11758_v30 = vpop.f32.mrb[232].mxu0 }
 0xcc7   : > { %v15881_v24 = vadd.f32 %v11758_v30, %v10368_v39  ;;  %v6301_v4 = vpop.f32.mrb[233].mxu0 }
 0xcc8   : > { %v15883_v8 = vadd.f32 %v10368_v39, %v6301_v4  ;;  %v11759_v20 = vpop.f32.mrb[234].mxu0 }
 0xcc9   : > { %17462 = vst [vmem:[#allocation61_spill] sm:$0xff] %v15881_v24  ;;  %v15885_v15 = vadd.f32 %v11759_v20, %v10368_v39  ;;  %v6304_v7 = vpop.f32.mrb[235].mxu0 }
 0xcca   : > { %17463 = vst [vmem:[#allocation62_spill] sm:$0xff] %v15883_v8  ;;  %v15887_v57 = vadd.f32 %v10368_v39, %v6304_v7 }
 0xccb   : > { %17464 = vst [vmem:[#allocation63_spill] sm:$0xff] %v15885_v15 }
 0xccc   : > { %17465 = vst [vmem:[#allocation64_spill] sm:$0xff] %v15887_v57 }
 0xd50   : > { %v11780_v59 = vpop.f32.mrb[244].mxu1 }
 0xd51   : > { %v15894_v60 = vadd.f32 %v11780_v59, %v15208_v47  ;;  %v6501_v30 = vpop.f32.mrb[245].mxu1 }
 0xd52   : > { %v15897_v4 = vadd.f32 %v6501_v30, %v15210_v28  ;;  %v11781_v1 = vpop.f32.mrb[246].mxu1 }
 0xd53   : > { %v15900_v20 = vadd.f32 %v11781_v1, %v15212_v35  ;;  %v6504_v39 = vpop.f32.mrb[247].mxu1  ;;  %v6538_v30 = vsel %vm2162_vm1, %v15894_v60, -inf }
 0xd54   : > { %v15903_v7 = vadd.f32 %v6504_v39, %v15214_v34  ;;  %v6532_v45 = vsel %vm2162_vm1, %v15897_v4, -inf }
 0xd55   : > { %6533 = vmax.xlane.f32.xlu0 %v6532_v45  ;;  %v6541_v45 = vsel %vm2162_vm1, %v15900_v20, -inf }
 0xd56   : > { %v6535_v59 = vsel %vm2162_vm1, %v15903_v7, -inf }
 0xd57   : > { %6536 = vmax.xlane.f32.xlu1 %v6535_v59 }
 0xd58   : > { %v11784_v9 = vpop.f32.mrb[248].mxu1 }
 0xd59   : > { %v15912_v24 = vadd.f32 %v11784_v9, %v15219_v62  ;;  %v6517_v1 = vpop.f32.mrb[249].mxu1  ;;  %6539 = vmax.xlane.f32.xlu0 %v6538_v30 }
 0xd5a   : > { %v15915_v39 = vadd.f32 %v6517_v1, %v15221_v5  ;;  %v11785_v15 = vpop.f32.mrb[250].mxu1 }
 0xd5b   : > { %v15920_v8 = vadd.f32 %v11785_v15, %v15223_v18  ;;  %v6520_v59 = vpop.f32.mrb[251].mxu1  ;;  %6542 = vmax.xlane.f32.xlu1 %v6541_v45  ;;  %v6550_v56 = vsel %vm2162_vm1, %v15912_v24, -inf }
 0xd5c   : > { %v15923_v57 = vadd.f32 %v6520_v59, %v15225_v53  ;;  %v6544_v9 = vsel %vm2162_vm1, %v15915_v39, -inf }
 0xd5d   : > { %6545 = vmax.xlane.f32.xlu0 %v6544_v9  ;;  %v6553_v9 = vsel %vm2162_vm1, %v15920_v8, -inf }
 0xd5e   : > { %v6547_v30 = vsel %vm2162_vm1, %v15923_v57, -inf }
 0xd5f   : > { %6548 = vmax.xlane.f32.xlu1 %v6547_v30 }
 0xd60   : > { %v11800_v1 = vpop.f32.mrb[252].mxu1 }
 0xd61   : > { %v15932_v15 = vadd.f32 %v11800_v1, %v15208_v47  ;;  %6551 = vmax.xlane.f32.xlu0 %v6550_v56  ;;  %v6759_v45 = vpop.f32.mrb[253].mxu1 }
 0xd62   : > { %v15935_v59 = vadd.f32 %v6759_v45, %v15210_v28  ;;  %v11801_v10 = vpop.f32.mrb[254].mxu1 }
 0xd63   : > { %v15940_v0 = vadd.f32 %v11801_v10, %v15212_v35  ;;  %6554 = vmax.xlane.f32.xlu1 %v6553_v9  ;;  %v6762_v30 = vpop.f32.mrb[255].mxu1  ;;  %v6796_v14 = vsel %vm2162_vm1, %v15932_v15, -inf }
 0xd64   : > { %v15943_v38 = vadd.f32 %v6762_v30, %v15214_v34  ;;  %v6790_v1 = vsel %vm2162_vm1, %v15935_v59, -inf }
 0xd65   : > { %6791 = vmax.xlane.f32.xlu0 %v6790_v1  ;;  %v6799_v1 = vsel %vm2162_vm1, %v15940_v0, -inf }
 0xd66   : > { %v6793_v56 = vsel %vm2162_vm1, %v15943_v38, -inf }
 0xd67   : > { %6794 = vmax.xlane.f32.xlu1 %v6793_v56 }
 0xd68   : > { %v11804_v45 = vpop.f32.mrb[0].mxu1 }
 0xd69   : > { %v15952_v10 = vadd.f32 %v11804_v45, %v15219_v62  ;;  %v6775_v9 = vpop.f32.mrb[1].mxu1  ;;  %6797 = vmax.xlane.f32.xlu0 %v6796_v14 }
 0xd6a   : > { %v15955_v30 = vadd.f32 %v6775_v9, %v15221_v5  ;;  %v11805_v33 = vpop.f32.mrb[2].mxu1 }
 0xd6b   : > { %v15960_v49 = vadd.f32 %v11805_v33, %v15223_v18  ;;  %v6778_v56 = vpop.f32.mrb[3].mxu1  ;;  %6800 = vmax.xlane.f32.xlu1 %v6799_v1  ;;  %v6808_v9 = vsel %vm2162_vm1, %v15952_v10, -inf }
 0xd6c   : > { %v15963_v41 = vadd.f32 %v6778_v56, %v15225_v53  ;;  %v6802_v45 = vsel %vm2162_vm1, %v15955_v30, -inf }
 0xd6d   : > { %6803 = vmax.xlane.f32.xlu0 %v6802_v45  ;;  %v6811_v33 = vsel %vm2162_vm1, %v15960_v49, -inf }
 0xd6e   : > { %v6805_v14 = vsel %vm2162_vm1, %v15963_v41, -inf }
 0xd6f   : > { %6806 = vmax.xlane.f32.xlu1 %v6805_v14 }
 0xd71   : > { %6809 = vmax.xlane.f32.xlu0 %v6808_v9 }
 0xd73   : > { %6812 = vmax.xlane.f32.xlu1 %v6811_v33 }
 0xde2   : > { %v6534_v1 = vpop.xlane.xlu0 %6533 }
 0xde3   : > { %v6556_v56 = vsub.f32 %v15897_v4, %v6534_v1 }
 0xde4   : > { %v6537_v37 = vpop.xlane.xlu1 %6536 }
 0xde5   : > { %v6564_v29 = vmul.f32 1.442695, %v6556_v56  ;;  %v6557_v22 = vsub.f32 %v15903_v7, %v6537_v37 }
 0xde6   : > { %v6540_v45 = vpop.xlane.xlu0 %6539 }
 0xde7   : > { %12578 = vpow2.f32 %v6564_v29  ;;  %v6566_v44 = vmul.f32 1.442695, %v6557_v22  ;;  %v6558_v14 = vsub.f32 %v15894_v60, %v6540_v45 }
 0xde8   : > { %v6543_v51 = vpop.xlane.xlu1 %6542 }
 0xde9   : > { %12580 = vpow2.f32 %v6566_v44  ;;  %v6568_v23 = vmul.f32 1.442695, %v6558_v14  ;;  %v6559_v9 = vsub.f32 %v15900_v20, %v6543_v51 }
 0xdea   : > { %v6546_v63 = vpop.xlane.xlu0 %6545 }
 0xdeb   : > { %12582 = vpow2.f32 %v6568_v23  ;;  %v6570_v33 = vmul.f32 1.442695, %v6559_v9  ;;  %v6560_v42 = vsub.f32 %v15915_v39, %v6546_v63 }
 0xdec   : > { %v6549_v4 = vpop.xlane.xlu1 %6548 }
 0xded   : > { %12584 = vpow2.f32 %v6570_v33  ;;  %v6572_v1 = vmul.f32 1.442695, %v6560_v42  ;;  %v6561_v37 = vsub.f32 %v15923_v57, %v6549_v4 }
 0xdee   : > { %v6552_v7 = vpop.xlane.xlu0 %6551 }
 0xdef   : > { %12586 = vpow2.f32 %v6572_v1  ;;  %v6574_v22 = vmul.f32 1.442695, %v6561_v37  ;;  %v6562_v29 = vsub.f32 %v15912_v24, %v6552_v7 }
 0xdf0   : > { %v6555_v60 = vpop.xlane.xlu1 %6554 }
 0xdf1   : > { %v15980_v44 = vpop.eup %12578  ;;  %12588 = vpow2.f32 %v6574_v22  ;;  %v6576_v51 = vmul.f32 1.442695, %v6562_v29  ;;  %v6563_v23 = vsub.f32 %v15920_v8, %v6555_v60 }
 0xdf2   : > { %v6792_v20 = vpop.xlane.xlu0 %6791  ;;  %v6580_v63 = vsel %vm2162_vm1, %v15980_v44, 0.0 }
 0xdf3   : > { %v15985_v39 = vpop.eup %12580  ;;  %12590 = vpow2.f32 %v6576_v51  ;;  %v6578_v57 = vmul.f32 1.442695, %v6563_v23  ;;  %v6814_v42 = vsub.f32 %v15935_v59, %v6792_v20  ;;  %6581 = vadd.xlane.f32.xlu0 %v6580_v63 }
 0xdf4   : > { %v6795_v56 = vpop.xlane.xlu1 %6794  ;;  %v6583_v24 = vsel %vm2162_vm1, %v15985_v39, 0.0 }
 0xdf5   : > { %v15990_v45 = vpop.eup %12582  ;;  %12592 = vpow2.f32 %v6578_v57  ;;  %v6822_v14 = vmul.f32 1.442695, %v6814_v42  ;;  %v6815_v8 = vsub.f32 %v15943_v38, %v6795_v56  ;;  %6584 = vadd.xlane.f32.xlu1 %v6583_v24 }
 0xdf6   : > { %v6798_v9 = vpop.xlane.xlu0 %6797  ;;  %v6586_v33 = vsel %vm2162_vm1, %v15990_v45, 0.0 }
 0xdf7   : > { %v15995_v4 = vpop.eup %12584  ;;  %12594 = vpow2.f32 %v6822_v14  ;;  %v6824_v59 = vmul.f32 1.442695, %v6815_v8  ;;  %v6816_v1 = vsub.f32 %v15932_v15, %v6798_v9  ;;  %6587 = vadd.xlane.f32.xlu0 %v6586_v33 }
 0xdf8   : > { %v6801_v37 = vpop.xlane.xlu1 %6800  ;;  %v6589_v7 = vsel %vm2162_vm1, %v15995_v4, 0.0 }
 0xdf9   : > { %v16000_v22 = vpop.eup %12586  ;;  %12596 = vpow2.f32 %v6824_v59  ;;  %v6826_v38 = vmul.f32 1.442695, %v6816_v1  ;;  %v6817_v29 = vsub.f32 %v15940_v0, %v6801_v37  ;;  %6590 = vadd.xlane.f32.xlu1 %v6589_v7 }
 0xdfa   : > { %v6804_v60 = vpop.xlane.xlu0 %6803  ;;  %v6592_v51 = vsel %vm2162_vm1, %v16000_v22, 0.0 }
 0xdfb   : > { %v16005_v23 = vpop.eup %12588  ;;  %12598 = vpow2.f32 %v6826_v38  ;;  %v6828_v15 = vmul.f32 1.442695, %v6817_v29  ;;  %v6818_v20 = vsub.f32 %v15955_v30, %v6804_v60  ;;  %6593 = vadd.xlane.f32.xlu0 %v6592_v51 }
 0xdfc   : > { %v6807_v63 = vpop.xlane.xlu1 %6806  ;;  %v6595_v57 = vsel %vm2162_vm1, %v16005_v23, 0.0 }
 0xdfd   : > { %v16010_v42 = vpop.eup %12590  ;;  %12600 = vpow2.f32 %v6828_v15  ;;  %v6830_v0 = vmul.f32 1.442695, %v6818_v20  ;;  %v6819_v56 = vsub.f32 %v15963_v41, %v6807_v63  ;;  %6596 = vadd.xlane.f32.xlu1 %v6595_v57 }
 0xdfe   : > { %v6810_v24 = vpop.xlane.xlu0 %6809  ;;  %v6598_v14 = vsel %vm2162_vm1, %v16010_v42, 0.0 }
 0xdff   : > { %v16015_v8 = vpop.eup %12592  ;;  %12602 = vpow2.f32 %v6830_v0  ;;  %v6832_v30 = vmul.f32 1.442695, %v6819_v56  ;;  %v6820_v9 = vsub.f32 %v15952_v10, %v6810_v24  ;;  %6599 = vadd.xlane.f32.xlu0 %v6598_v14 }
 0xe00   : > { %v6813_v33 = vpop.xlane.xlu1 %6812  ;;  %v6601_v59 = vsel %vm2162_vm1, %v16015_v8, 0.0 }
 0xe01   : > { %v16020_v1 = vpop.eup %12594  ;;  %12604 = vpow2.f32 %v6832_v30  ;;  %v6834_v41 = vmul.f32 1.442695, %v6820_v9  ;;  %v6821_v37 = vsub.f32 %v15960_v49, %v6813_v33  ;;  %6602 = vadd.xlane.f32.xlu1 %v6601_v59 }
 0xe02   : > { %v6838_v7 = vsel %vm2162_vm1, %v16020_v1, 0.0 }
 0xe03   : > { %v16025_v38 = vpop.eup %12596  ;;  %12606 = vpow2.f32 %v6834_v41  ;;  %v6836_v29 = vmul.f32 1.442695, %v6821_v37  ;;  %6839 = vadd.xlane.f32.xlu0 %v6838_v7 }
 0xe04   : > { %v6841_v10 = vsel %vm2162_vm1, %v16025_v38, 0.0 }
 0xe05   : > { %v16029_v60 = vpop.eup %12598  ;;  %12608 = vpow2.f32 %v6836_v29  ;;  %6842 = vadd.xlane.f32.xlu1 %v6841_v10 }
 0xe06   : > { %v6844_v51 = vsel %vm2162_vm1, %v16029_v60, 0.0 }
 0xe07   : > { %v16033_v49 = vpop.eup %12600  ;;  %6845 = vadd.xlane.f32.xlu0 %v6844_v51 }
 0xe08   : > { %v6847_v15 = vsel %vm2162_vm1, %v16033_v49, 0.0 }
 0xe09   : > { %v16037_v20 = vpop.eup %12602  ;;  %6848 = vadd.xlane.f32.xlu1 %v6847_v15 }
 0xe0a   : > { %v6850_v63 = vsel %vm2162_vm1, %v16037_v20, 0.0 }
 0xe0b   : > { %v16041_v57 = vpop.eup %12604  ;;  %6851 = vadd.xlane.f32.xlu0 %v6850_v63 }
 0xe0c   : > { %v6853_v0 = vsel %vm2162_vm1, %v16041_v57, 0.0 }
 0xe0d   : > { %v16045_v56 = vpop.eup %12606  ;;  %6854 = vadd.xlane.f32.xlu1 %v6853_v0 }
 0xe0e   : > { %v6856_v24 = vsel %vm2162_vm1, %v16045_v56, 0.0 }
 0xe0f   : > { %v16049_v14 = vpop.eup %12608  ;;  %6857 = vadd.xlane.f32.xlu0 %v6856_v24 }
 0xe10   : > { %v6859_v30 = vsel %vm2162_vm1, %v16049_v14, 0.0 }
 0xe11   : > { %6860 = vadd.xlane.f32.xlu1 %v6859_v30 }
 0xe80   : > { %v6582_v9 = vpop.xlane.xlu0 %6581 }
 0xe81   : > { %12610 = vrcp.f32 %v6582_v9 }
 0xe82   : > { %v6585_v33 = vpop.xlane.xlu1 %6584 }
 0xe83   : > { %12612 = vrcp.f32 %v6585_v33 }
 0xe84   : > { %v6588_v59 = vpop.xlane.xlu0 %6587 }
 0xe85   : > { %12614 = vrcp.f32 %v6588_v59 }
 0xe86   : > { %v6591_v41 = vpop.xlane.xlu1 %6590 }
 0xe87   : > { %12616 = vrcp.f32 %v6591_v41 }
 0xe88   : > { %v6594_v37 = vpop.xlane.xlu0 %6593 }
 0xe89   : > { %12618 = vrcp.f32 %v6594_v37 }
 0xe8a   : > { %v6597_v7 = vpop.xlane.xlu1 %6596 }
 0xe8b   : > { %v12611_v29 = vpop.eup %12610  ;;  %12620 = vrcp.f32 %v6597_v7 }
 0xe8c   : > { %v6600_v10 = vpop.xlane.xlu0 %6599  ;;  %v6612_v63 = vmul.f32 %v12611_v29, %v15980_v44  ;;  %v6895_v29 = vsel %vm2703_vm3, %v15682_v17, 0 }
 0xe8d   : > { %v12613_v51 = vpop.eup %12612  ;;  %12622 = vrcp.f32 %v6600_v10 }
 0xe8e   : > { %v6603_v15 = vpop.xlane.xlu1 %6602  ;;  %v6613_v0 = vmul.f32 %v12613_v51, %v15985_v39 }
 0xe8f   : > { %v12615_v24 = vpop.eup %12614  ;;  %12624 = vrcp.f32 %v6603_v15 }
 0xe90   : > { %v6840_v30 = vpop.xlane.xlu0 %6839  ;;  %v6620_v9 = vpack.c.bf16 %v6613_v0, %v6612_v63  ;;  %v6614_v59 = vmul.f32 %v12615_v24, %v15990_v45 }
 0xe91   : > { %v12617_v33 = vpop.eup %12616  ;;  %12626 = vrcp.f32 %v6840_v30 }
 0xe92   : > { %v6615_v41 = vmul.f32 %v12617_v33, %v15995_v4  ;;  %v6843_v37 = vpop.xlane.xlu1 %6842  ;;  %11788 = vmatprep.mubr.msk.bf16.mxu0 %vm2162_vm1, %v6620_v9 }
 0xe93   : > { %v12619_v7 = vpop.eup %12618  ;;  %12628 = vrcp.f32 %v6843_v37 }
 0xe94   : > { %v6621_v10 = vpack.c.bf16 %v6615_v41, %v6614_v59  ;;  %v6846_v61 = vpop.xlane.xlu0 %6845  ;;  %v6616_v51 = vmul.f32 %v12619_v7, %v16000_v22 }
 0xe95   : > { %v12621_v44 = vpop.eup %12620  ;;  %12630 = vrcp.f32 %v6846_v61 }
 0xe96   : > { %v6849_v39 = vpop.xlane.xlu1 %6848  ;;  %11789 = vmatmul.mubr.msk.bf16.vlgmr.msra.gmra.mrb[236].mxu0 %vm2162_vm1, %v6621_v10  ;;  %v6617_v45 = vmul.f32 %v12621_v44, %v16005_v23 }
 0xe97   : > { %v12623_v4 = vpop.eup %12622  ;;  %12632 = vrcp.f32 %v6849_v39  ;;  %11807 = vmatpush3.bf16.msra.mxu0 %v6895_v29 }
 0xe98   : > { %v6852_v15 = vpop.xlane.xlu0 %6851  ;;  %v6622_v63 = vpack.c.bf16 %v6617_v45, %v6616_v51  ;;  %12188 = vmatprep.subr.msk.bf16.mxu0 %vm2162_vm1, %v15828_v25  ;;  %v6618_v24 = vmul.f32 %v12623_v4, %v16010_v42  ;;  %v7141_v51 = vsel %vm2162_vm1, %v15828_v25, 0 }
 0xe99   : > { %v12625_v0 = vpop.eup %12624  ;;  %12634 = vrcp.f32 %v6852_v15 }
 0xe9a   : > { %v6855_v61 = vpop.xlane.xlu1 %6854  ;;  %11792 = vmatprep.mubr.msk.bf16.mxu0 %vm2162_vm1, %v6622_v63  ;;  %v6619_v30 = vmul.f32 %v12625_v0, %v16015_v8 }
 0xe9b   : > { %v12627_v22 = vpop.eup %12626  ;;  %12636 = vrcp.f32 %v6855_v61  ;;  %v17467_v61 = vpack.c.bf16 %v15717_v31, %v15713_v40  ;;  %v16108_v40 = vld [vmem:[%s17076_s4 + $0x14] sm:$0xf]  ;;  %v16120_v31 = vld [vmem:[%s17076_s4 + $0x10] sm:$0xf] }
 0xe9c   : > { %v6858_v23 = vpop.xlane.xlu0 %6857  ;;  %v6623_v9 = vpack.c.bf16 %v6619_v30, %v6618_v24  ;;  %v6870_v41 = vmul.f32 %v12627_v22, %v16020_v1  ;;  %12186 = vmatprep.subr.msk.bf16.mxu1 %vm2703_vm3, %v16108_v40 }
 0xe9d   : > { %v12629_v33 = vpop.eup %12628  ;;  %12638 = vrcp.f32 %v6858_v23 }
 0xe9e   : > { %v6861_v59 = vpop.xlane.xlu1 %6860  ;;  %11793 = vmatmul.mubr.msk.bf16.gmra.mrb[240].mxu0 %vm2162_vm1, %v6623_v9  ;;  %v6871_v37 = vmul.f32 %v12629_v33, %v16025_v38 }
 0xe9f   : > { %v12631_v7 = vpop.eup %12630  ;;  %12640 = vrcp.f32 %v6861_v59 }
 0xea0   : > { %v6878_v10 = vpack.c.bf16 %v6871_v37, %v6870_v41  ;;  %v6872_v42 = vmul.f32 %v12631_v7, %v16029_v60 }
 0xea1   : > { %v12633_v44 = vpop.eup %12632 }
 0xea2   : > { %v6873_v8 = vmul.f32 %v12633_v44, %v16033_v49  ;;  %11808 = vmatprep.mubr.msk.bf16.mxu0 %vm2162_vm1, %v6878_v10 }
 0xea3   : > { %v12635_v39 = vpop.eup %12634 }
 0xea4   : > { %v6879_v29 = vpack.c.bf16 %v6873_v8, %v6872_v42  ;;  %v6874_v1 = vmul.f32 %v12635_v39, %v16037_v20  ;;  %v17466_v20 = vpack.c.bf16 %v15724_v19, %v15721_v21  ;;  %v17469_v21 = vpack.c.bf16 %v15742_v16, %v15738_v6  ;;  %v10431_v39 = vld [vmem:[%s17076_s4 + $0x18] sm:$0xf] }
 0xea5   : > { %v12637_v45 = vpop.eup %12636  ;;  %v16126_v8 = vsel %vm2703_vm3, %v16120_v31, 0 }
 0xea6   : > { %11809 = vmatmul.mubr.msk.bf16.vlgmr.msra.gmra.mrb[244].mxu0 %vm2162_vm1, %v6879_v29  ;;  %v6875_v38 = vmul.f32 %v12637_v45, %v16041_v57  ;;  %v7313_v57 = vsel %vm2703_vm3, %v15838_v43, 0 }
 0xea7   : > { %v12639_v4 = vpop.eup %12638  ;;  %11837 = vmatpush3.bf16.xpose.msra.mxu0 %v7141_v51 }
 0xea8   : > { %v6880_v15 = vpack.c.bf16 %v6875_v38, %v6874_v1  ;;  %12189 = vmatprep.subr.msk.bf16.mxu0 %vm2703_vm3, %v15838_v43  ;;  %v6876_v49 = vmul.f32 %v12639_v4, %v16045_v56  ;;  %v17468_v56 = vpack.c.bf16 %v15749_v48, %v15746_v26  ;;  %v16114_v26 = vsel %vm2703_vm3, %v16108_v40, 0 }
 0xea9   : > { %v12641_v60 = vpop.eup %12640  ;;  %11817 = vmatpush3.bf16.msra.mxu1 %v16114_v26 }
 0xeaa   : > { %11812 = vmatprep.mubr.msk.bf16.mxu0 %vm2162_vm1, %v6880_v15  ;;  %v6877_v63 = vmul.f32 %v12641_v60, %v16049_v14  ;;  %12187 = vmatprep.subr.msk.bf16.mxu1 %vm2703_vm3, %v16120_v31 }
 0xeac   : > { %v6881_v0 = vpack.c.bf16 %v6877_v63, %v6876_v49 }
 0xeae   : > { %11813 = vmatmul.mubr.msk.bf16.gmra.mrb[248].mxu0 %vm2162_vm1, %v6881_v0 }
 0xeaf   : > { %11838 = vmatprep.mubr.msk.bf16.mxu0 %vm2162_vm1, %v17466_v20 }
 0xeb6   : > { %11839 = vmatmul.mubr.msk.bf16.vlgmr.msra.gmra.mrb[252].mxu0 %vm2162_vm1, %v17467_v61 }
 0xeb7   : > { %11847 = vmatpush3.bf16.msra.mxu0 %v7313_v57  ;;  %11842 = vmatprep.mubr.msk.bf16.mxu0 %vm2162_vm1, %v17468_v56 }
 0xeb8   : > { %12191 = vmatprep.subr.msk.bf16.mxu0 %vm2162_vm1, %v15833_v2 }
 0xebe   : > { %11843 = vmatmul.mubr.msk.bf16.gmra.mrb[0].mxu0 %vm2162_vm1, %v17469_v21  ;;  %v16144_v21 = vsel %vm2703_vm3, %v10431_v39, 0 }
 0xf69   : > { %v11790_v19 = vpop.f32.mrb[236].mxu0 }
 0xf6a   : > { %v6673_v6 = vpop.f32.mrb[237].mxu0 }
 0xf6b   : > { %v11791_v16 = vpop.f32.mrb[238].mxu0 }
 0xf6c   : > { %v6707_v48 = vpack.c.bf16 %v11791_v16, %v11790_v19  ;;  %v6676_v14 = vpop.f32.mrb[239].mxu0 }
 0xf6d   : > { %v6706_v24 = vpack.c.bf16 %v6676_v14, %v6673_v6 }
 0xf71   : > { %v11794_v30 = vpop.f32.mrb[240].mxu0 }
 0xf72   : > { %v6689_v22 = vpop.f32.mrb[241].mxu0 }
 0xf73   : > { %v11795_v23 = vpop.f32.mrb[242].mxu0 }
 0xf74   : > { %v6709_v9 = vpack.c.bf16 %v11795_v23, %v11794_v30  ;;  %v6692_v33 = vpop.f32.mrb[243].mxu0 }
 0xf75   : > { %v6708_v59 = vpack.c.bf16 %v6692_v33, %v6689_v22 }
 0xf79   : > { %v11810_v41 = vpop.f32.mrb[244].mxu0 }
 0xf7a   : > { %v6931_v37 = vpop.f32.mrb[245].mxu0 }
 0xf7b   : > { %v11811_v7 = vpop.f32.mrb[246].mxu0 }
 0xf7c   : > { %v6965_v10 = vpack.c.bf16 %v11811_v7, %v11810_v41  ;;  %v6934_v44 = vpop.f32.mrb[247].mxu0 }
 0xf7d   : > { %v6964_v42 = vpack.c.bf16 %v6934_v44, %v6931_v37 }
 0xf7f   : > { %11818 = vmatprep.mubr.msk.bf16.mxu1 %vm2162_vm1, %v6964_v42 }
 0xf80   : > { %11819 = vmatmul.mubr.msk.bf16.vlgmr.msra.gmra.mrb[4].mxu1 %vm2162_vm1, %v6965_v10 }
 0xf81   : > { %v11814_v29 = vpop.f32.mrb[248].mxu0  ;;  %11827 = vmatpush3.bf16.msra.mxu1 %v16126_v8 }
 0xf82   : > { %v6947_v51 = vpop.f32.mrb[249].mxu0  ;;  %12190 = vmatprep.subr.msk.bf16.mxu1 %vm2703_vm3, %v10431_v39 }
 0xf83   : > { %v11815_v45 = vpop.f32.mrb[250].mxu0 }
 0xf84   : > { %v6967_v1 = vpack.c.bf16 %v11815_v45, %v11814_v29  ;;  %v6950_v38 = vpop.f32.mrb[251].mxu0 }
 0xf85   : > { %v6966_v4 = vpack.c.bf16 %v6950_v38, %v6947_v51 }
 0xf87   : > { %11822 = vmatprep.mubr.msk.bf16.mxu1 %vm2162_vm1, %v6966_v4 }
 0xf88   : > { %11823 = vmatmul.mubr.msk.bf16.gmra.mrb[8].mxu1 %vm2162_vm1, %v6967_v1 }
 0xf89   : > { %11828 = vmatprep.mubr.msk.bf16.mxu1 %vm2162_vm1, %v6706_v24  ;;  %v11840_v15 = vpop.f32.mrb[252].mxu0 }
 0xf8a   : > { %v7186_v60 = vadd.f32 %v11840_v15, %v15208_v47  ;;  %v7177_v49 = vpop.f32.mrb[253].mxu0 }
 0xf8b   : > { %v7178_v63 = vadd.f32 %v7177_v49, %v15210_v28  ;;  %v11841_v0 = vpop.f32.mrb[254].mxu0 }
 0xf8c   : > { %v7189_v20 = vadd.f32 %v11841_v0, %v15212_v35  ;;  %v7180_v57 = vpop.f32.mrb[255].mxu0  ;;  %v7214_v16 = vsel %vm2162_vm1, %v7186_v60, -inf }
 0xf8d   : > { %v7181_v61 = vadd.f32 %v7180_v57, %v15214_v34  ;;  %v7208_v56 = vsel %vm2162_vm1, %v7178_v63, -inf }
 0xf8e   : > { %7209 = vmax.xlane.f32.xlu0 %v7208_v56  ;;  %v7217_v23 = vsel %vm2162_vm1, %v7189_v20, -inf }
 0xf8f   : > { %v7211_v19 = vsel %vm2162_vm1, %v7181_v61, -inf }
 0xf90   : > { %7212 = vmax.xlane.f32.xlu1 %v7211_v19  ;;  %11829 = vmatmul.mubr.msk.bf16.vlgmr.msra.gmra.mrb[4].mxu1 %vm2162_vm1, %v6707_v48 }
 0xf91   : > { %11857 = vmatpush3.bf16.msra.mxu1 %v16144_v21  ;;  %11832 = vmatprep.mubr.msk.bf16.mxu1 %vm2162_vm1, %v6708_v59  ;;  %v11844_v6 = vpop.f32.mrb[0].mxu0 }
 0xf92   : > { %v7202_v14 = vadd.f32 %v11844_v6, %v15219_v62  ;;  %12192 = vmatprep.subr.msk.bf16.mxu1 %vm2703_vm3, %v15840_v13  ;;  %v7193_v24 = vpop.f32.mrb[1].mxu0  ;;  %7215 = vmax.xlane.f32.xlu0 %v7214_v16 }
 0xf93   : > { %v7194_v30 = vadd.f32 %v7193_v24, %v15221_v5  ;;  %v11845_v22 = vpop.f32.mrb[2].mxu0 }
 0xf94   : > { %v7205_v48 = vadd.f32 %v11845_v22, %v15223_v18  ;;  %v7196_v33 = vpop.f32.mrb[3].mxu0  ;;  %7218 = vmax.xlane.f32.xlu1 %v7217_v23  ;;  %v7226_v7 = vsel %vm2162_vm1, %v7202_v14, -inf }
 0xf95   : > { %v7197_v59 = vadd.f32 %v7196_v33, %v15225_v53  ;;  %v7220_v41 = vsel %vm2162_vm1, %v7194_v30, -inf }
 0xf96   : > { %7221 = vmax.xlane.f32.xlu0 %v7220_v41  ;;  %v7229_v10 = vsel %vm2162_vm1, %v7205_v48, -inf }
 0xf97   : > { %v7223_v37 = vsel %vm2162_vm1, %v7197_v59, -inf }
 0xf98   : > { %7224 = vmax.xlane.f32.xlu1 %v7223_v37  ;;  %11833 = vmatmul.mubr.msk.bf16.gmra.mrb[8].mxu1 %vm2162_vm1, %v6709_v9 }
 0xf9a   : > { %7227 = vmax.xlane.f32.xlu0 %v7226_v7 }
 0xf9c   : > { %7230 = vmax.xlane.f32.xlu1 %v7229_v10 }
0x101b   : > { %v7210_v44 = vpop.xlane.xlu0 %7209 }
0x101c   : > { %v7232_v42 = vsub.f32 %v7178_v63, %v7210_v44 }
0x101d   : > { %v7213_v39 = vpop.xlane.xlu1 %7212 }
0x101e   : > { %v7240_v29 = vmul.f32 1.442695, %v7232_v42  ;;  %v7233_v51 = vsub.f32 %v7181_v61, %v7213_v39 }
0x101f   : > { %v7216_v45 = vpop.xlane.xlu0 %7215 }
0x1020   : > { %12642 = vpow2.f32 %v7240_v29  ;;  %v7242_v1 = vmul.f32 1.442695, %v7233_v51  ;;  %v7234_v38 = vsub.f32 %v7186_v60, %v7216_v45 }
0x1021   : > { %v7219_v4 = vpop.xlane.xlu1 %7218 }
0x1022   : > { %12644 = vpow2.f32 %v7242_v1  ;;  %v7244_v15 = vmul.f32 1.442695, %v7234_v38  ;;  %v7235_v49 = vsub.f32 %v7189_v20, %v7219_v4 }
0x1023   : > { %v7222_v9 = vpop.xlane.xlu0 %7221 }
0x1024   : > { %12646 = vpow2.f32 %v7244_v15  ;;  %v7246_v0 = vmul.f32 1.442695, %v7235_v49  ;;  %v7236_v57 = vsub.f32 %v7194_v30, %v7222_v9 }
0x1025   : > { %v7225_v56 = vpop.xlane.xlu1 %7224 }
0x1026   : > { %12648 = vpow2.f32 %v7246_v0  ;;  %v7248_v19 = vmul.f32 1.442695, %v7236_v57  ;;  %v7237_v6 = vsub.f32 %v7197_v59, %v7225_v56 }
0x1027   : > { %v7228_v63 = vpop.xlane.xlu0 %7227 }
0x1028   : > { %12650 = vpow2.f32 %v7248_v19  ;;  %v7250_v16 = vmul.f32 1.442695, %v7237_v6  ;;  %v7238_v61 = vsub.f32 %v7202_v14, %v7228_v63 }
0x1029   : > { %v7231_v24 = vpop.xlane.xlu1 %7230 }
0x102a   : > { %v12643_v22 = vpop.eup %12642  ;;  %12652 = vpow2.f32 %v7250_v16  ;;  %v7252_v60 = vmul.f32 1.442695, %v7238_v61  ;;  %v7239_v23 = vsub.f32 %v7205_v48, %v7231_v24 }
0x102b   : > { %v7256_v33 = vsel %vm2162_vm1, %v12643_v22, 0.0 }
0x102c   : > { %v12645_v20 = vpop.eup %12644  ;;  %12654 = vpow2.f32 %v7252_v60  ;;  %v7254_v41 = vmul.f32 1.442695, %v7239_v23  ;;  %7257 = vadd.xlane.f32.xlu0 %v7256_v33 }
0x102d   : > { %v7259_v30 = vsel %vm2162_vm1, %v12645_v20, 0.0 }
0x102e   : > { %v12647_v37 = vpop.eup %12646  ;;  %12656 = vpow2.f32 %v7254_v41  ;;  %7260 = vadd.xlane.f32.xlu1 %v7259_v30 }
0x102f   : > { %v7262_v59 = vsel %vm2162_vm1, %v12647_v37, 0.0 }
0x1030   : > { %v12649_v7 = vpop.eup %12648  ;;  %7263 = vadd.xlane.f32.xlu0 %v7262_v59  ;;  %v7833_v59 = vrot.slane %v15664_v55, 4  ;;  %v17470_v55 = vpack.c.bf16 %v15851_v32, %v15849_v58  ;;  %v17473_v58 = vpack.c.bf16 %v15859_v27, %v15857_v52  ;;  %v17476_v32 = vld [vmem:[#allocation28_spill] sm:$0xff] }
0x1031   : > { %v7265_v14 = vsel %vm2162_vm1, %v12649_v7, 0.0 }
0x1032   : > { %v12651_v10 = vpop.eup %12650  ;;  %7266 = vadd.xlane.f32.xlu1 %v7265_v14  ;;  %v7487_v14 = vsel %vm2162_vm1, %v15833_v2, 0 }
0x1033   : > { %v7268_v48 = vsel %vm2162_vm1, %v12651_v10, 0.0 }
0x1034   : > { %v12653_v44 = vpop.eup %12652  ;;  %7269 = vadd.xlane.f32.xlu0 %v7268_v48 }
0x1035   : > { %v7271_v42 = vsel %vm2162_vm1, %v12653_v44, 0.0 }
0x1036   : > { %v12655_v39 = vpop.eup %12654  ;;  %7272 = vadd.xlane.f32.xlu1 %v7271_v42 }
0x1037   : > { %v7274_v29 = vsel %vm2162_vm1, %v12655_v39, 0.0 }
0x1038   : > { %v12657_v51 = vpop.eup %12656  ;;  %7275 = vadd.xlane.f32.xlu0 %v7274_v29 }
0x1039   : > { %v7277_v45 = vsel %vm2162_vm1, %v12657_v51, 0.0 }
0x103a   : > { %7278 = vadd.xlane.f32.xlu1 %v7277_v45 }
0x10b9   : > { %v7258_v1 = vpop.xlane.xlu0 %7257 }
0x10ba   : > { %12658 = vrcp.f32 %v7258_v1 }
0x10bb   : > { %v7261_v38 = vpop.xlane.xlu1 %7260 }
0x10bc   : > { %12660 = vrcp.f32 %v7261_v38  ;;  %v17479_v38 = vld [vmem:[#allocation37_spill] sm:$0xff] }
0x10bd   : > { %v7264_v4 = vpop.xlane.xlu0 %7263 }
0x10be   : > { %12662 = vrcp.f32 %v7264_v4 }
0x10bf   : > { %v7267_v15 = vpop.xlane.xlu1 %7266 }
0x10c0   : > { %12664 = vrcp.f32 %v7267_v15 }
0x10c1   : > { %v7270_v49 = vpop.xlane.xlu0 %7269 }
0x10c2   : > { %12666 = vrcp.f32 %v7270_v49 }
0x10c3   : > { %v7273_v9 = vpop.xlane.xlu1 %7272 }
0x10c4   : > { %v12659_v0 = vpop.eup %12658  ;;  %12668 = vrcp.f32 %v7273_v9 }
0x10c5   : > { %v7276_v57 = vpop.xlane.xlu0 %7275  ;;  %v7288_v6 = vmul.f32 %v12659_v0, %v12643_v22 }
0x10c6   : > { %v12661_v56 = vpop.eup %12660  ;;  %12670 = vrcp.f32 %v7276_v57 }
0x10c7   : > { %v7279_v19 = vpop.xlane.xlu1 %7278  ;;  %v7289_v63 = vmul.f32 %v12661_v56, %v12645_v20  ;;  %v7659_v56 = vsel %vm2703_vm3, %v15840_v13, 0 }
0x10c8   : > { %v12663_v16 = vpop.eup %12662  ;;  %12672 = vrcp.f32 %v7279_v19 }
0x10c9   : > { %v7296_v61 = vpack.c.bf16 %v7289_v63, %v7288_v6  ;;  %v7290_v60 = vmul.f32 %v12663_v16, %v12647_v37 }
0x10ca   : > { %v12665_v24 = vpop.eup %12664 }
0x10cb   : > { %v7291_v23 = vmul.f32 %v12665_v24, %v12649_v7  ;;  %11848 = vmatprep.mubr.msk.bf16.mxu0 %vm2162_vm1, %v7296_v61 }
0x10cc   : > { %v12667_v33 = vpop.eup %12666 }
0x10cd   : > { %v7297_v41 = vpack.c.bf16 %v7291_v23, %v7290_v60  ;;  %v7292_v22 = vmul.f32 %v12667_v33, %v12651_v10  ;;  %v8007_v10 = vrot.slane %v15680_v3, 4  ;;  %v8267_v3 = vrot.slane %v15682_v17, 4 }
0x10ce   : > { %v12669_v30 = vpop.eup %12668 }
0x10cf   : > { %11849 = vmatmul.mubr.msk.bf16.vlgmr.msra.gmra.mrb[4].mxu0 %vm2162_vm1, %v7297_v41  ;;  %v7293_v20 = vmul.f32 %v12669_v30, %v12653_v44  ;;  %v17471_v44 = vpack.c.bf16 %v15847_v46, %v15845_v12  ;;  %v17474_v12 = vpack.c.bf16 %v15628_v54, %v15625_v11  ;;  %v17475_v46 = vld [vmem:[#allocation6_spill] sm:$0xff]  ;;  %v17481_v11 = vld [vmem:[#allocation16_spill] sm:$0xff] }
0x10d0   : > { %v12671_v48 = vpop.eup %12670  ;;  %11867 = vmatpush3.bf16.xpose.msra.mxu0 %v7487_v14  ;;  %v17477_v1 = vpack.c.bf16 %v17475_v46, %v17476_v32  ;;  %v17482_v54 = vld [vmem:[#allocation10_spill] sm:$0xff]  ;;  %v17486_v32 = vld [vmem:[#allocation29_spill] sm:$0xff] }
0x10d1   : > { %12194 = vmatprep.subr.msk.bf16.mxu0 %vm2162_vm1, %v7833_v59  ;;  %v7298_v37 = vpack.c.bf16 %v7293_v20, %v7292_v22  ;;  %v7294_v42 = vmul.f32 %v12671_v48, %v12655_v39  ;;  %v7847_v39 = vsel %vm2162_vm1, %v7833_v59, 0  ;;  %v17483_v27 = vpack.c.bf16 %v17481_v11, %v17482_v54  ;;  %v17488_v11 = vld [vmem:[#allocation8_spill] sm:$0xff] }
0x10d2   : > { %v12673_v7 = vpop.eup %12672 }
0x10d3   : > { %v7295_v29 = vmul.f32 %v12673_v7, %v12657_v51  ;;  %11852 = vmatprep.mubr.msk.bf16.mxu0 %vm2162_vm1, %v7298_v37  ;;  %v17472_v51 = vpack.c.bf16 %v15863_v36, %v15861_v50  ;;  %v8021_v50 = vsel %vm2703_vm3, %v8007_v10, 0  ;;  %v17478_v36 = vld [vmem:[#allocation36_spill] sm:$0xff] }
0x10d4   : > { %v17480_v52 = vpack.c.bf16 %v17478_v36, %v17479_v38  ;;  %v17487_v36 = vld [vmem:[#allocation2_spill] sm:$0xff] }
0x10d5   : > { %v7299_v45 = vpack.c.bf16 %v7295_v29, %v7294_v42 }
0x10d7   : > { %11853 = vmatmul.mubr.msk.bf16.gmra.mrb[8].mxu0 %vm2162_vm1, %v7299_v45 }
0x10d8   : > { %11868 = vmatprep.mubr.msk.bf16.mxu0 %vm2162_vm1, %v17470_v55 }
0x10df   : > { %11869 = vmatmul.mubr.msk.bf16.vlgmr.msra.gmra.mrb[12].mxu0 %vm2162_vm1, %v17471_v44 }
0x10e0   : > { %11897 = vmatpush3.bf16.xpose.msra.mxu0 %v7847_v39  ;;  %11872 = vmatprep.mubr.msk.bf16.mxu0 %vm2162_vm1, %v17472_v51  ;;  %v17484_v51 = vld [vmem:[#allocation27_spill] sm:$0xff] }
0x10e1   : > { %12195 = vmatprep.subr.msk.bf16.mxu0 %vm2703_vm3, %v8007_v10 }
0x10e7   : > { %11873 = vmatmul.mubr.msk.bf16.gmra.mrb[16].mxu0 %vm2162_vm1, %v17473_v58 }
0x10e8   : > { %11898 = vmatprep.mubr.msk.bf16.mxu0 %vm2162_vm1, %v17474_v12  ;;  %v17485_v12 = vld [vmem:[#allocation26_spill] sm:$0xff] }
0x10ef   : > { %11899 = vmatmul.mubr.msk.bf16.vlgmr.msra.gmra.mrb[20].mxu0 %vm2162_vm1, %v17477_v1 }
0x10f0   : > { %11907 = vmatpush3.bf16.msra.mxu0 %v8021_v50  ;;  %11902 = vmatprep.mubr.msk.bf16.mxu0 %vm2162_vm1, %v17480_v52 }
0x10f1   : > { %12197 = vmatprep.subr.msk.bf16.mxu0 %vm2703_vm3, %v8267_v3 }
0x10f7   : > { %11903 = vmatmul.mubr.msk.bf16.gmra.mrb[24].mxu0 %vm2162_vm1, %v17483_v27 }
0x11a2   : > { %v11850_v4 = vpop.f32.mrb[4].mxu0 }
0x11a3   : > { %v7349_v15 = vpop.f32.mrb[5].mxu0 }
0x11a4   : > { %v11851_v49 = vpop.f32.mrb[6].mxu0 }
0x11a5   : > { %v7383_v9 = vpack.c.bf16 %v11851_v49, %v11850_v4  ;;  %v7352_v0 = vpop.f32.mrb[7].mxu0  ;;  %v17489_v4 = vld [vmem:[#allocation4_spill] sm:$0xff] }
0x11a6   : > { %v7382_v57 = vpack.c.bf16 %v7352_v0, %v7349_v15 }
0x11a8   : > { %11858 = vmatprep.mubr.msk.bf16.mxu1 %vm2162_vm1, %v7382_v57 }
0x11a9   : > { %11859 = vmatmul.mubr.msk.bf16.vlgmr.msra.gmra.mrb[4].mxu1 %vm2162_vm1, %v7383_v9  ;;  %v17490_v9 = vld [vmem:[#allocation14_spill] sm:$0xff] }
0x11aa   : > { %11877 = vmatpush3.bf16.msra.mxu1 %v7659_v56  ;;  %v11854_v19 = vpop.f32.mrb[8].mxu0  ;;  %v17491_v56 = vld [vmem:[#allocation12_spill] sm:$0xff] }
0x11ab   : > { %v7365_v6 = vpop.f32.mrb[9].mxu0 }
0x11ac   : > { %v11855_v63 = vpop.f32.mrb[10].mxu0 }
0x11ad   : > { %v7385_v16 = vpack.c.bf16 %v11855_v63, %v11854_v19  ;;  %v7368_v61 = vpop.f32.mrb[11].mxu0 }
0x11ae   : > { %v7384_v24 = vpack.c.bf16 %v7368_v61, %v7365_v6 }
0x11b0   : > { %11862 = vmatprep.mubr.msk.bf16.mxu1 %vm2162_vm1, %v7384_v24 }
0x11b1   : > { %11863 = vmatmul.mubr.msk.bf16.gmra.mrb[8].mxu1 %vm2162_vm1, %v7385_v16 }
0x11b2   : > { %v11870_v60 = vpop.f32.mrb[12].mxu0 }
0x11b3   : > { %v7532_v23 = vadd.f32 %v11870_v60, %v15208_v47  ;;  %v7523_v33 = vpop.f32.mrb[13].mxu0 }
0x11b4   : > { %v7524_v41 = vadd.f32 %v7523_v33, %v15210_v28  ;;  %v11871_v30 = vpop.f32.mrb[14].mxu0 }
0x11b5   : > { %v7535_v59 = vadd.f32 %v11871_v30, %v15212_v35  ;;  %v7526_v14 = vpop.f32.mrb[15].mxu0  ;;  %v7560_v7 = vsel %vm2162_vm1, %v7532_v23, -inf }
0x11b6   : > { %v7527_v22 = vadd.f32 %v7526_v14, %v15214_v34  ;;  %v7554_v20 = vsel %vm2162_vm1, %v7524_v41, -inf }
0x11b7   : > { %7555 = vmax.xlane.f32.xlu0 %v7554_v20  ;;  %v7563_v35 = vsel %vm2162_vm1, %v7535_v59, -inf }
0x11b8   : > { %v7557_v48 = vsel %vm2162_vm1, %v7527_v22, -inf }
0x11b9   : > { %7558 = vmax.xlane.f32.xlu1 %v7557_v48 }
0x11ba   : > { %v11874_v37 = vpop.f32.mrb[16].mxu0 }
0x11bb   : > { %v7548_v47 = vadd.f32 %v11874_v37, %v15219_v62  ;;  %v7539_v42 = vpop.f32.mrb[17].mxu0  ;;  %7561 = vmax.xlane.f32.xlu0 %v7560_v7 }
0x11bc   : > { %v7540_v28 = vadd.f32 %v7539_v42, %v15221_v5  ;;  %v11875_v29 = vpop.f32.mrb[18].mxu0 }
0x11bd   : > { %v7551_v34 = vadd.f32 %v11875_v29, %v15223_v18  ;;  %v7542_v45 = vpop.f32.mrb[19].mxu0  ;;  %7564 = vmax.xlane.f32.xlu1 %v7563_v35  ;;  %v7572_v39 = vsel %vm2162_vm1, %v7548_v47, -inf }
0x11be   : > { %v7543_v55 = vadd.f32 %v7542_v45, %v15225_v53  ;;  %v7566_v10 = vsel %vm2162_vm1, %v7540_v28, -inf }
0x11bf   : > { %7567 = vmax.xlane.f32.xlu0 %v7566_v10  ;;  %v7575_v53 = vsel %vm2162_vm1, %v7551_v34, -inf }
0x11c0   : > { %v7569_v44 = vsel %vm2162_vm1, %v7543_v55, -inf }
0x11c1   : > { %7570 = vmax.xlane.f32.xlu1 %v7569_v44 }
0x11c2   : > { %v11900_v62 = vpop.f32.mrb[20].mxu0 }
0x11c3   : > { %v16241_v5 = vadd.f32 %v11900_v62, %v17484_v51  ;;  %v7883_v58 = vpop.f32.mrb[21].mxu0  ;;  %7573 = vmax.xlane.f32.xlu0 %v7572_v39 }
0x11c4   : > { %v16244_v18 = vadd.f32 %v7883_v58, %v17485_v12  ;;  %v11901_v46 = vpop.f32.mrb[22].mxu0 }
0x11c5   : > { %v16248_v1 = vadd.f32 %v11901_v46, %v17486_v32  ;;  %v7886_v50 = vpop.f32.mrb[23].mxu0  ;;  %7576 = vmax.xlane.f32.xlu1 %v7575_v53 }
0x11c6   : > { %v16251_v38 = vadd.f32 %v7886_v50, %v17487_v36 }
0x11ca   : > { %v11904_v52 = vpop.f32.mrb[24].mxu0 }
0x11cb   : > { %v16254_v54 = vadd.f32 %v11904_v52, %v17488_v11  ;;  %v7899_v27 = vpop.f32.mrb[25].mxu0 }
0x11cc   : > { %v16257_v15 = vadd.f32 %v7899_v27, %v17489_v4  ;;  %v11905_v49 = vpop.f32.mrb[26].mxu0 }
0x11cd   : > { %v16260_v0 = vadd.f32 %v11905_v49, %v17490_v9  ;;  %v7902_v57 = vpop.f32.mrb[27].mxu0 }
0x11ce   : > { %v16263_v19 = vadd.f32 %v7902_v57, %v17491_v56 }
0x1244   : > { %v7556_v6 = vpop.xlane.xlu0 %7555 }
0x1245   : > { %v7578_v63 = vsub.f32 %v7524_v41, %v7556_v6 }
0x1246   : > { %v7559_v16 = vpop.xlane.xlu1 %7558 }
0x1247   : > { %v7586_v61 = vmul.f32 1.442695, %v7578_v63  ;;  %v7579_v24 = vsub.f32 %v7527_v22, %v7559_v16 }
0x1248   : > { %v7562_v60 = vpop.xlane.xlu0 %7561 }
0x1249   : > { %12674 = vpow2.f32 %v7586_v61  ;;  %v7588_v33 = vmul.f32 1.442695, %v7579_v24  ;;  %v7580_v30 = vsub.f32 %v7532_v23, %v7562_v60  ;;  %v7914_v61 = vsel %vm2162_vm1, %v16244_v18, -inf }
0x124a   : > { %v7565_v14 = vpop.xlane.xlu1 %7564  ;;  %v7917_v24 = vsel %vm2162_vm1, %v16251_v38, -inf  ;;  %v7920_v60 = vsel %vm2162_vm1, %v16241_v5, -inf }
0x124b   : > { %12676 = vpow2.f32 %v7588_v33  ;;  %v7590_v20 = vmul.f32 1.442695, %v7580_v30  ;;  %v7581_v48 = vsub.f32 %v7535_v59, %v7565_v14  ;;  %v7923_v33 = vsel %vm2162_vm1, %v16248_v1, -inf }
0x124c   : > { %v7568_v37 = vpop.xlane.xlu0 %7567  ;;  %v7926_v30 = vsel %vm2162_vm1, %v16257_v15, -inf  ;;  %v7929_v14 = vsel %vm2162_vm1, %v16263_v19, -inf }
0x124d   : > { %12678 = vpow2.f32 %v7590_v20  ;;  %v7592_v7 = vmul.f32 1.442695, %v7581_v48  ;;  %v7582_v42 = vsub.f32 %v7540_v28, %v7568_v37  ;;  %v7932_v20 = vsel %vm2162_vm1, %v16254_v54, -inf  ;;  %v16301_v37 = vld [vmem:[%s17076_s4 + $0x1c] sm:$0xf] }
0x124e   : > { %v7571_v29 = vpop.xlane.xlu1 %7570  ;;  %v7935_v48 = vsel %vm2162_vm1, %v16260_v0, -inf  ;;  %12193 = vmatprep.subr.msk.bf16.mxu1 %vm2703_vm3, %v16301_v37 }
0x124f   : > { %12680 = vpow2.f32 %v7592_v7  ;;  %v7594_v35 = vmul.f32 1.442695, %v7582_v42  ;;  %v7583_v45 = vsub.f32 %v7543_v55, %v7571_v29 }
0x1250   : > { %v7574_v41 = vpop.xlane.xlu0 %7573 }
0x1251   : > { %12682 = vpow2.f32 %v7594_v35  ;;  %v7596_v10 = vmul.f32 1.442695, %v7583_v45  ;;  %v7584_v22 = vsub.f32 %v7548_v47, %v7574_v41 }
0x1252   : > { %v7577_v44 = vpop.xlane.xlu1 %7576 }
0x1253   : > { %v16265_v62 = vpop.eup %12674  ;;  %12684 = vpow2.f32 %v7596_v10  ;;  %v7598_v23 = vmul.f32 1.442695, %v7584_v22  ;;  %v7585_v39 = vsub.f32 %v7551_v34, %v7577_v44 }
0x1254   : > { %v7602_v59 = vsel %vm2162_vm1, %v16265_v62, 0.0 }
0x1255   : > { %v12677_v58 = vpop.eup %12676  ;;  %12686 = vpow2.f32 %v7598_v23  ;;  %v7600_v28 = vmul.f32 1.442695, %v7585_v39  ;;  %7603 = vadd.xlane.f32.xlu0 %v7602_v59 }
0x1256   : > { %v7605_v46 = vsel %vm2162_vm1, %v12677_v58, 0.0 }
0x1257   : > { %v12679_v55 = vpop.eup %12678  ;;  %12688 = vpow2.f32 %v7600_v28  ;;  %7606 = vadd.xlane.f32.xlu1 %v7605_v46 }
0x1258   : > { %v7608_v47 = vsel %vm2162_vm1, %v12679_v55, 0.0 }
0x1259   : > { %v12681_v53 = vpop.eup %12680  ;;  %7609 = vadd.xlane.f32.xlu0 %v7608_v47 }
0x125a   : > { %v7611_v50 = vsel %vm2162_vm1, %v12681_v53, 0.0 }
0x125b   : > { %v16272_v52 = vpop.eup %12682  ;;  %7612 = vadd.xlane.f32.xlu1 %v7611_v50 }
0x125c   : > { %v7614_v34 = vsel %vm2162_vm1, %v16272_v52, 0.0 }
0x125d   : > { %v12685_v27 = vpop.eup %12684  ;;  %7615 = vadd.xlane.f32.xlu0 %v7614_v34 }
0x125e   : > { %v7617_v49 = vsel %vm2162_vm1, %v12685_v27, 0.0 }
0x125f   : > { %v16277_v57 = vpop.eup %12686  ;;  %7618 = vadd.xlane.f32.xlu1 %v7617_v49 }
0x1260   : > { %v7620_v6 = vsel %vm2162_vm1, %v16277_v57, 0.0 }
0x1261   : > { %v12689_v63 = vpop.eup %12688  ;;  %7621 = vadd.xlane.f32.xlu0 %v7620_v6 }
0x1262   : > { %v7623_v16 = vsel %vm2162_vm1, %v12689_v63, 0.0 }
0x1263   : > { %7624 = vadd.xlane.f32.xlu1 %v7623_v16  ;;  %v16309_v16 = vsel %vm2703_vm3, %v16301_v37, 0 }
0x1265   : > { %7915 = vmax.xlane.f32.xlu0 %v7914_v61 }
0x1267   : > { %7918 = vmax.xlane.f32.xlu1 %v7917_v24  ;;  %v17492_v24 = vld [vmem:[#allocation39_spill] sm:$0xff] }
0x1269   : > { %7921 = vmax.xlane.f32.xlu0 %v7920_v60  ;;  %v8093_v60 = vrot.slane %v17492_v24, 4 }
0x126b   : > { %7924 = vmax.xlane.f32.xlu1 %v7923_v33 }
0x126d   : > { %7927 = vmax.xlane.f32.xlu0 %v7926_v30 }
0x126f   : > { %7930 = vmax.xlane.f32.xlu1 %v7929_v14 }
0x1271   : > { %7933 = vmax.xlane.f32.xlu0 %v7932_v20 }
0x1273   : > { %7936 = vmax.xlane.f32.xlu1 %v7935_v48 }
0x12e2   : > { %v7604_v7 = vpop.xlane.xlu0 %7603 }
0x12e3   : > { %12690 = vrcp.f32 %v7604_v7 }
0x12e4   : > { %v7607_v42 = vpop.xlane.xlu1 %7606 }
0x12e5   : > { %12692 = vrcp.f32 %v7607_v42 }
0x12e6   : > { %v7610_v29 = vpop.xlane.xlu0 %7609 }
0x12e7   : > { %12694 = vrcp.f32 %v7610_v29 }
0x12e8   : > { %v7613_v35 = vpop.xlane.xlu1 %7612 }
0x12e9   : > { %12696 = vrcp.f32 %v7613_v35  ;;  %v8107_v35 = vsel %vm2162_vm1, %v8093_v60, 0 }
0x12ea   : > { %v7616_v45 = vpop.xlane.xlu0 %7615 }
0x12eb   : > { %12698 = vrcp.f32 %v7616_v45 }
0x12ec   : > { %v7619_v41 = vpop.xlane.xlu1 %7618 }
0x12ed   : > { %v12691_v10 = vpop.eup %12690  ;;  %12700 = vrcp.f32 %v7619_v41 }
0x12ee   : > { %v7622_v22 = vpop.xlane.xlu0 %7621  ;;  %v7634_v39 = vmul.f32 %v12691_v10, %v16265_v62 }
0x12ef   : > { %v12693_v44 = vpop.eup %12692  ;;  %12702 = vrcp.f32 %v7622_v22 }
0x12f0   : > { %v7625_v23 = vpop.xlane.xlu1 %7624  ;;  %v7635_v59 = vmul.f32 %v12693_v44, %v12677_v58  ;;  %v17493_v44 = vld [vmem:[#allocation33_spill] sm:$0xff] }
0x12f1   : > { %v12695_v28 = vpop.eup %12694  ;;  %12704 = vrcp.f32 %v7625_v23  ;;  %v17494_v23 = vld [vmem:[#allocation24_spill] sm:$0xff] }
0x12f2   : > { %v7642_v46 = vpack.c.bf16 %v7635_v59, %v7634_v39  ;;  %v7636_v50 = vmul.f32 %v12695_v28, %v12679_v55  ;;  %v17495_v39 = vpack.c.bf16 %v17493_v44, %v17494_v23  ;;  %v17496_v59 = vld [vmem:[#allocation52_spill] sm:$0xff]  ;;  %v17497_v28 = vld [vmem:[#allocation38_spill] sm:$0xff] }
0x12f3   : > { %v12697_v47 = vpop.eup %12696 }
0x12f4   : > { %v7637_v34 = vmul.f32 %v12697_v47, %v12681_v53  ;;  %11878 = vmatprep.mubr.msk.bf16.mxu1 %vm2162_vm1, %v7642_v46  ;;  %v17498_v46 = vpack.c.bf16 %v17496_v59, %v17497_v28  ;;  %v17499_v47 = vld [vmem:[#allocation5_spill] sm:$0xff] }
0x12f5   : > { %v12699_v49 = vpop.eup %12698 }
0x12f6   : > { %v7643_v6 = vpack.c.bf16 %v7637_v34, %v7636_v50  ;;  %v7638_v62 = vmul.f32 %v12699_v49, %v16272_v52  ;;  %v17502_v34 = vld [vmem:[#allocation3_spill] sm:$0xff]  ;;  %v17503_v49 = vld [vmem:[#allocation54_spill] sm:$0xff] }
0x12f7   : > { %v12701_v61 = vpop.eup %12700 }
0x12f8   : > { %11879 = vmatmul.mubr.msk.bf16.vlgmr.msra.gmra.mrb[12].mxu1 %vm2162_vm1, %v7643_v6  ;;  %v7639_v58 = vmul.f32 %v12701_v61, %v12685_v27  ;;  %v17504_v6 = vpack.c.bf16 %v17502_v34, %v17503_v49 }
0x12f9   : > { %v12703_v33 = vpop.eup %12702  ;;  %11887 = vmatpush3.bf16.msra.mxu1 %v16309_v16 }
0x12fa   : > { %12196 = vmatprep.subr.msk.bf16.mxu1 %vm2162_vm1, %v8093_v60  ;;  %v7644_v55 = vpack.c.bf16 %v7639_v58, %v7638_v62  ;;  %v7640_v30 = vmul.f32 %v12703_v33, %v16277_v57  ;;  %v7916_v58 = vpop.xlane.xlu0 %7915  ;;  %v7919_v33 = vpop.xlane.xlu1 %7918 }
0x12fb   : > { %v12705_v53 = vpop.eup %12704 }
0x12fc   : > { %v7641_v14 = vmul.f32 %v12705_v53, %v12689_v63  ;;  %11882 = vmatprep.mubr.msk.bf16.mxu1 %vm2162_vm1, %v7644_v55 }
0x12fe   : > { %v7645_v20 = vpack.c.bf16 %v7641_v14, %v7640_v30  ;;  %v7922_v30 = vpop.xlane.xlu0 %7921  ;;  %v7925_v14 = vpop.xlane.xlu1 %7924 }
0x12ff   : > { %v7941_v44 = vsub.f32 %v16248_v1, %v7925_v14 }
0x1300   : > { %11883 = vmatmul.mubr.msk.bf16.gmra.mrb[16].mxu1 %vm2162_vm1, %v7645_v20  ;;  %v7938_v20 = vsub.f32 %v16244_v18, %v7916_v58 }
0x1302   : > { %v7931_v18 = vpop.xlane.xlu1 %7930 }
0x1306   : > { %v7937_v34 = vpop.xlane.xlu1 %7936 }
0x13cb   : > { %v11880_v48 = vpop.f32.mrb[12].mxu1 }
0x13cc   : > { %v7695_v7 = vpop.f32.mrb[13].mxu1 }
0x13cd   : > { %v11881_v42 = vpop.f32.mrb[14].mxu1 }
0x13ce   : > { %v7729_v52 = vpack.c.bf16 %v11881_v42, %v11880_v48  ;;  %v7698_v27 = vpop.f32.mrb[15].mxu1 }
0x13cf   : > { %v7728_v29 = vpack.c.bf16 %v7698_v27, %v7695_v7  ;;  %v7939_v7 = vsub.f32 %v16251_v38, %v7919_v33  ;;  %v7928_v27 = vpop.xlane.xlu0 %7927 }
0x13d1   : > { %11888 = vmatprep.mubr.msk.bf16.mxu1 %vm2162_vm1, %v7728_v29 }
0x13d2   : > { %11889 = vmatmul.mubr.msk.bf16.vlgmr.msra.gmra.mrb[4].mxu1 %vm2162_vm1, %v7729_v52 }
0x13d3   : > { %11917 = vmatpush3.bf16.xpose.msra.mxu1 %v8107_v35  ;;  %v11884_v57 = vpop.f32.mrb[16].mxu1  ;;  %v7934_v59 = vpop.xlane.xlu0 %7933 }
0x13d4   : > { %v7711_v63 = vpop.f32.mrb[17].mxu1  ;;  %12198 = vmatprep.subr.msk.bf16.mxu1 %vm2703_vm3, %v16108_v40  ;;  %v17500_v40 = vld [vmem:[#allocation22_spill] sm:$0xff]  ;;  %v7944_v33 = vsub.f32 %v16254_v54, %v7934_v59 }
0x13d5   : > { %v11885_v45 = vpop.f32.mrb[18].mxu1  ;;  %v17501_v50 = vpack.c.bf16 %v17499_v47, %v17500_v40  ;;  %v7952_v47 = vmul.f32 1.442695, %v7941_v44  ;;  %v7943_v40 = vsub.f32 %v16263_v19, %v7931_v18 }
0x13d6   : > { %v7731_v41 = vpack.c.bf16 %v11885_v45, %v11884_v57  ;;  %v7714_v10 = vpop.f32.mrb[19].mxu1  ;;  %v7946_v57 = vmul.f32 1.442695, %v7938_v20  ;;  %v7958_v54 = vmul.f32 1.442695, %v7944_v33 }
0x13d7   : > { %v7730_v22 = vpack.c.bf16 %v7714_v10, %v7711_v63  ;;  %v7940_v63 = vsub.f32 %v16241_v5, %v7922_v30 }
0x13d8   : > { %12706 = vpow2.f32 %v7946_v57 }
0x13d9   : > { %11892 = vmatprep.mubr.msk.bf16.mxu1 %vm2162_vm1, %v7730_v22  ;;  %v7948_v22 = vmul.f32 1.442695, %v7939_v7  ;;  %v7950_v5 = vmul.f32 1.442695, %v7940_v63  ;;  %v7945_v7 = vsub.f32 %v16260_v0, %v7937_v34 }
0x13da   : > { %11893 = vmatmul.mubr.msk.bf16.gmra.mrb[8].mxu1 %vm2162_vm1, %v7731_v41 }
0x13db   : > { %11918 = vmatprep.mubr.msk.bf16.mxu1 %vm2162_vm1, %v17495_v39  ;;  %v7942_v39 = vsub.f32 %v16257_v15, %v7928_v27  ;;  %12708 = vpow2.f32 %v7948_v22  ;;  %v7960_v57 = vmul.f32 1.442695, %v7945_v7 }
0x13dc   : > { %12710 = vpow2.f32 %v7950_v5 }
0x13dd   : > { %v7954_v58 = vmul.f32 1.442695, %v7942_v39  ;;  %12712 = vpow2.f32 %v7952_v47 }
0x13df   : > { %12714 = vpow2.f32 %v7954_v58 }
0x13e2   : > { %11919 = vmatmul.mubr.msk.bf16.vlgmr.msra.gmra.mrb[20].mxu1 %vm2162_vm1, %v17498_v46 }
0x13e3   : > { %11922 = vmatprep.mubr.msk.bf16.mxu1 %vm2162_vm1, %v17501_v50  ;;  %11937 = vmatpush3.bf16.msra.mxu1 %v16114_v26 }
0x13e4   : > { %12199 = vmatprep.subr.msk.bf16.mxu1 %vm2703_vm3, %v16120_v31 }
0x13ea   : > { %11923 = vmatmul.mubr.msk.bf16.gmra.mrb[24].mxu1 %vm2162_vm1, %v17504_v6 }
0x14a5   : > { %v16345_v61 = vpop.f32.mrb[4].mxu1 }
0x14a6   : > { %v16347_v24 = vpop.f32.mrb[5].mxu1 }
0x14a7   : > { %v16349_v60 = vpop.f32.mrb[6].mxu1 }
0x14a8   : > { %v16351_v62 = vpop.f32.mrb[7].mxu1 }
0x14ad   : > { %v16353_v55 = vpop.f32.mrb[8].mxu1 }
0x14ae   : > { %v16355_v26 = vpop.f32.mrb[9].mxu1 }
0x14af   : > { %v16357_v31 = vpop.f32.mrb[10].mxu1 }
0x14b0   : > { %v16359_v53 = vpop.f32.mrb[11].mxu1 }
0x14b5   : > { %v11920_v48 = vpop.f32.mrb[20].mxu1 }
0x14b6   : > { %v16364_v42 = vadd.f32 %v11920_v48, %v17484_v51  ;;  %v8143_v52 = vpop.f32.mrb[21].mxu1  ;;  %v7956_v48 = vmul.f32 1.442695, %v7943_v40 }
0x14b7   : > { %v16367_v29 = vadd.f32 %v8143_v52, %v17485_v12  ;;  %v11921_v35 = vpop.f32.mrb[22].mxu1 }
0x14b8   : > { %v16371_v45 = vadd.f32 %v11921_v35, %v17486_v32  ;;  %v8146_v41 = vpop.f32.mrb[23].mxu1  ;;  %v8180_v46 = vsel %vm2162_vm1, %v16364_v42, -inf  ;;  %v16407_v35 = vpop.eup %12706  ;;  %12716 = vpow2.f32 %v7956_v48 }
0x14b9   : > { %v16374_v10 = vadd.f32 %v8146_v41, %v17487_v36  ;;  %v8174_v38 = vsel %vm2162_vm1, %v16367_v29, -inf  ;;  %v16411_v41 = vpop.eup %12708  ;;  %12718 = vpow2.f32 %v7958_v54  ;;  %v7962_v0 = vsel %vm2162_vm1, %v16407_v35, 0.0 }
0x14ba   : > { %8175 = vmax.xlane.f32.xlu0 %v8174_v38  ;;  %v8183_v6 = vsel %vm2162_vm1, %v16371_v45, -inf  ;;  %v16415_v18 = vpop.eup %12710  ;;  %12720 = vpow2.f32 %v7960_v57  ;;  %v7965_v38 = vsel %vm2162_vm1, %v16411_v41, 0.0 }
0x14bb   : > { %v8177_v23 = vsel %vm2162_vm1, %v16374_v10, -inf  ;;  %v16419_v22 = vpop.eup %12712  ;;  %v7968_v44 = vsel %vm2162_vm1, %v16415_v18, 0.0 }
0x14bc   : > { %8178 = vmax.xlane.f32.xlu1 %v8177_v23  ;;  %v16423_v23 = vpop.eup %12714  ;;  %v7971_v5 = vsel %vm2162_vm1, %v16419_v22, 0.0 }
0x14bd   : > { %v11924_v28 = vpop.f32.mrb[24].mxu1  ;;  %v7974_v59 = vsel %vm2162_vm1, %v16423_v23, 0.0 }
0x14be   : > { %v16386_v1 = vadd.f32 %v11924_v28, %v17488_v11  ;;  %v8159_v50 = vpop.f32.mrb[25].mxu1  ;;  %8181 = vmax.xlane.f32.xlu0 %v8180_v46 }
0x14bf   : > { %v16389_v49 = vadd.f32 %v8159_v50, %v17489_v4  ;;  %v11925_v15 = vpop.f32.mrb[26].mxu1 }
0x14c0   : > { %v16395_v30 = vadd.f32 %v11925_v15, %v17490_v9  ;;  %v8162_v19 = vpop.f32.mrb[27].mxu1  ;;  %8184 = vmax.xlane.f32.xlu1 %v8183_v6  ;;  %v8192_v27 = vsel %vm2162_vm1, %v16386_v1, -inf }
0x14c1   : > { %v16398_v14 = vadd.f32 %v8162_v19, %v17491_v56  ;;  %v8186_v20 = vsel %vm2162_vm1, %v16389_v49, -inf }
0x14c2   : > { %8187 = vmax.xlane.f32.xlu0 %v8186_v20  ;;  %v8195_v63 = vsel %vm2162_vm1, %v16395_v30, -inf  ;;  %v16427_v39 = vpop.eup %12716 }
0x14c3   : > { %v8189_v52 = vsel %vm2162_vm1, %v16398_v14, -inf  ;;  %v16431_v28 = vpop.eup %12718  ;;  %v7977_v46 = vsel %vm2162_vm1, %v16427_v39, 0.0 }
0x14c4   : > { %8190 = vmax.xlane.f32.xlu1 %v8189_v52  ;;  %v16435_v47 = vpop.eup %12720  ;;  %v7980_v40 = vsel %vm2162_vm1, %v16431_v28, 0.0 }
0x14c5   : > { %v7983_v50 = vsel %vm2162_vm1, %v16435_v47, 0.0 }
0x14c6   : > { %8193 = vmax.xlane.f32.xlu0 %v8192_v27 }
0x14c8   : > { %8196 = vmax.xlane.f32.xlu1 %v8195_v63 }
0x14ca   : > { %7963 = vadd.xlane.f32.xlu0 %v7962_v0 }
0x14cc   : > { %7966 = vadd.xlane.f32.xlu1 %v7965_v38 }
0x14ce   : > { %7969 = vadd.xlane.f32.xlu0 %v7968_v44 }
0x14d0   : > { %7972 = vadd.xlane.f32.xlu1 %v7971_v5 }
0x14d2   : > { %7975 = vadd.xlane.f32.xlu0 %v7974_v59 }
0x14d4   : > { %7978 = vadd.xlane.f32.xlu1 %v7977_v46 }
0x14d6   : > { %7981 = vadd.xlane.f32.xlu0 %v7980_v40 }
0x14d8   : > { %7984 = vadd.xlane.f32.xlu1 %v7983_v50 }
0x1547   : > { %v8176_v34 = vpop.xlane.xlu0 %8175 }
0x1548   : > { %v8198_v15 = vsub.f32 %v16367_v29, %v8176_v34 }
0x1549   : > { %v8179_v6 = vpop.xlane.xlu1 %8178 }
0x154a   : > { %v8206_v58 = vmul.f32 1.442695, %v8198_v15  ;;  %v8199_v33 = vsub.f32 %v16374_v10, %v8179_v6 }
0x154b   : > { %v8182_v19 = vpop.xlane.xlu0 %8181 }
0x154c   : > { %12722 = vpow2.f32 %v8206_v58  ;;  %v8208_v20 = vmul.f32 1.442695, %v8199_v33  ;;  %v8200_v48 = vsub.f32 %v16364_v42, %v8182_v19 }
0x154d   : > { %v8185_v7 = vpop.xlane.xlu1 %8184 }
0x154e   : > { %12724 = vpow2.f32 %v8208_v20  ;;  %v8210_v52 = vmul.f32 1.442695, %v8200_v48  ;;  %v8201_v54 = vsub.f32 %v16371_v45, %v8185_v7 }
0x154f   : > { %v8188_v27 = vpop.xlane.xlu0 %8187 }
0x1550   : > { %12726 = vpow2.f32 %v8210_v52  ;;  %v8212_v57 = vmul.f32 1.442695, %v8201_v54  ;;  %v8202_v63 = vsub.f32 %v16389_v49, %v8188_v27 }
0x1551   : > { %v8191_v29 = vpop.xlane.xlu1 %8190 }
0x1552   : > { %12728 = vpow2.f32 %v8212_v57  ;;  %v8214_v0 = vmul.f32 1.442695, %v8202_v63  ;;  %v8203_v10 = vsub.f32 %v16398_v14, %v8191_v29 }
0x1553   : > { %v8194_v38 = vpop.xlane.xlu0 %8193 }
0x1554   : > { %12730 = vpow2.f32 %v8214_v0  ;;  %v8216_v44 = vmul.f32 1.442695, %v8203_v10  ;;  %v8204_v42 = vsub.f32 %v16386_v1, %v8194_v38 }
0x1555   : > { %v8197_v5 = vpop.xlane.xlu1 %8196 }
0x1556   : > { %v16448_v59 = vpop.eup %12722  ;;  %12732 = vpow2.f32 %v8216_v44  ;;  %v8218_v45 = vmul.f32 1.442695, %v8204_v42  ;;  %v8205_v46 = vsub.f32 %v16395_v30, %v8197_v5 }
0x1557   : > { %v7964_v40 = vpop.xlane.xlu0 %7963  ;;  %v8222_v49 = vsel %vm2162_vm1, %v16448_v59, 0.0 }
0x1558   : > { %v16453_v50 = vpop.eup %12724  ;;  %12734 = vpow2.f32 %v8218_v45  ;;  %v8220_v14 = vmul.f32 1.442695, %v8205_v46  ;;  %8223 = vadd.xlane.f32.xlu0 %v8222_v49 }
0x1559   : > { %12736 = vrcp.f32 %v7964_v40  ;;  %v7967_v34 = vpop.xlane.xlu1 %7966  ;;  %v8225_v1 = vsel %vm2162_vm1, %v16453_v50, 0.0 }
0x155a   : > { %v16457_v15 = vpop.eup %12726  ;;  %12738 = vpow2.f32 %v8220_v14  ;;  %8226 = vadd.xlane.f32.xlu1 %v8225_v1 }
0x155b   : > { %12740 = vrcp.f32 %v7967_v34  ;;  %v7970_v30 = vpop.xlane.xlu0 %7969  ;;  %v8228_v6 = vsel %vm2162_vm1, %v16457_v15, 0.0 }
0x155c   : > { %v16461_v58 = vpop.eup %12728  ;;  %12742 = vrcp.f32 %v7970_v30  ;;  %8229 = vadd.xlane.f32.xlu0 %v8228_v6 }
0x155d   : > { %v7973_v33 = vpop.xlane.xlu1 %7972  ;;  %v8231_v19 = vsel %vm2162_vm1, %v16461_v58, 0.0 }
0x155e   : > { %v16465_v20 = vpop.eup %12730  ;;  %12744 = vrcp.f32 %v7973_v33  ;;  %8232 = vadd.xlane.f32.xlu1 %v8231_v19  ;;  %v8507_v33 = vrot.slane %v15828_v25, 4 }
0x155f   : > { %v7976_v48 = vpop.xlane.xlu0 %7975  ;;  %v8234_v7 = vsel %vm2162_vm1, %v16465_v20, 0.0 }
0x1560   : > { %v16469_v52 = vpop.eup %12732  ;;  %12746 = vrcp.f32 %v7976_v48  ;;  %8235 = vadd.xlane.f32.xlu0 %v8234_v7 }
0x1561   : > { %v7979_v54 = vpop.xlane.xlu1 %7978  ;;  %v8237_v27 = vsel %vm2162_vm1, %v16469_v52, 0.0 }
0x1562   : > { %v16473_v57 = vpop.eup %12734  ;;  %12748 = vrcp.f32 %v7979_v54  ;;  %8238 = vadd.xlane.f32.xlu1 %v8237_v27 }
0x1563   : > { %v12737_v63 = vpop.eup %12736  ;;  %v7982_v29 = vpop.xlane.xlu0 %7981  ;;  %v8240_v0 = vsel %vm2162_vm1, %v16473_v57, 0.0 }
0x1564   : > { %v16477_v10 = vpop.eup %12738  ;;  %12750 = vrcp.f32 %v7982_v29  ;;  %8241 = vadd.xlane.f32.xlu0 %v8240_v0  ;;  %v7994_v45 = vmul.f32 %v12737_v63, %v16407_v35  ;;  %v8281_v35 = vsel %vm2703_vm3, %v8267_v3, 0 }
0x1565   : > { %v12741_v38 = vpop.eup %12740  ;;  %v7985_v44 = vpop.xlane.xlu1 %7984  ;;  %v8243_v42 = vsel %vm2162_vm1, %v16477_v10, 0.0 }
0x1566   : > { %v12743_v5 = vpop.eup %12742  ;;  %12752 = vrcp.f32 %v7985_v44  ;;  %8244 = vadd.xlane.f32.xlu1 %v8243_v42  ;;  %v7995_v46 = vmul.f32 %v12741_v38, %v16411_v41 }
0x1567   : > { %v7996_v14 = vmul.f32 %v12743_v5, %v16415_v18 }
0x1568   : > { %v12745_v40 = vpop.eup %12744  ;;  %v8002_v49 = vpack.c.bf16 %v7995_v46, %v7994_v45 }
0x1569   : > { %v7997_v34 = vmul.f32 %v12745_v40, %v16419_v22 }
0x156a   : > { %v12747_v1 = vpop.eup %12746  ;;  %11908 = vmatprep.mubr.msk.bf16.mxu0 %vm2162_vm1, %v8002_v49 }
0x156b   : > { %v8003_v30 = vpack.c.bf16 %v7997_v34, %v7996_v14  ;;  %v7998_v41 = vmul.f32 %v12747_v1, %v16423_v23  ;;  %v8681_v1 = vrot.slane %v15838_v43, 4 }
0x156c   : > { %v12749_v6 = vpop.eup %12748 }
0x156d   : > { %11909 = vmatmul.mubr.msk.bf16.vlgmr.msra.gmra.mrb[28].mxu0 %vm2162_vm1, %v8003_v30  ;;  %v7999_v19 = vmul.f32 %v12749_v6, %v16427_v39 }
0x156e   : > { %v12751_v18 = vpop.eup %12750  ;;  %11927 = vmatpush3.bf16.msra.mxu0 %v8281_v35 }
0x156f   : > { %12200 = vmatprep.subr.msk.bf16.mxu0 %vm2162_vm1, %v8507_v33  ;;  %v8004_v22 = vpack.c.bf16 %v7999_v19, %v7998_v41  ;;  %v8000_v7 = vmul.f32 %v12751_v18, %v16431_v28  ;;  %v17506_v19 = vld [vmem:[#allocation23_spill] sm:$0xff]  ;;  %v17508_v18 = vld [vmem:[#allocation32_spill] sm:$0xff] }
0x1570   : > { %v12753_v48 = vpop.eup %12752 }
0x1571   : > { %v8001_v25 = vmul.f32 %v12753_v48, %v16435_v47  ;;  %11912 = vmatprep.mubr.msk.bf16.mxu0 %vm2162_vm1, %v8004_v22  ;;  %v17509_v22 = vld [vmem:[#allocation25_spill] sm:$0xff] }
0x1572   : > { %v17510_v48 = vpack.c.bf16 %v17508_v18, %v17509_v22 }
0x1573   : > { %v8005_v54 = vpack.c.bf16 %v8001_v25, %v8000_v7  ;;  %v17512_v7 = vld [vmem:[#allocation7_spill] sm:$0xff] }
0x1575   : > { %11913 = vmatmul.mubr.msk.bf16.gmra.mrb[32].mxu0 %vm2162_vm1, %v8005_v54  ;;  %v17514_v54 = vld [vmem:[#allocation9_spill] sm:$0xff] }
0x15e5   : > { %v8224_v17 = vpop.xlane.xlu0 %8223 }
0x15e6   : > { %12754 = vrcp.f32 %v8224_v17  ;;  %v17515_v17 = vld [vmem:[#allocation53_spill] sm:$0xff] }
0x15e7   : > { %v8227_v3 = vpop.xlane.xlu1 %8226 }
0x15e8   : > { %12756 = vrcp.f32 %v8227_v3  ;;  %v17516_v3 = vpack.c.bf16 %v17514_v54, %v17515_v17 }
0x15e9   : > { %v8230_v23 = vpop.xlane.xlu0 %8229 }
0x15ea   : > { %12758 = vrcp.f32 %v8230_v23 }
0x15eb   : > { %v8233_v39 = vpop.xlane.xlu1 %8232 }
0x15ec   : > { %12760 = vrcp.f32 %v8233_v39 }
0x15ed   : > { %v8236_v27 = vpop.xlane.xlu0 %8235 }
0x15ee   : > { %12762 = vrcp.f32 %v8236_v27 }
0x15ef   : > { %v8239_v63 = vpop.xlane.xlu1 %8238 }
0x15f0   : > { %v12755_v29 = vpop.eup %12754  ;;  %12764 = vrcp.f32 %v8239_v63 }
0x15f1   : > { %v8242_v28 = vpop.xlane.xlu0 %8241  ;;  %v8254_v38 = vmul.f32 %v12755_v29, %v16448_v59  ;;  %v8521_v59 = vsel %vm2162_vm1, %v8507_v33, 0  ;;  %v17505_v33 = vld [vmem:[#allocation51_spill] sm:$0xff] }
0x15f2   : > { %v12757_v47 = vpop.eup %12756  ;;  %12766 = vrcp.f32 %v8242_v28 }
0x15f3   : > { %v8245_v0 = vpop.xlane.xlu1 %8244  ;;  %v8255_v44 = vmul.f32 %v12757_v47, %v16453_v50 }
0x15f4   : > { %v12759_v42 = vpop.eup %12758  ;;  %12768 = vrcp.f32 %v8245_v0 }
0x15f5   : > { %v8262_v5 = vpack.c.bf16 %v8255_v44, %v8254_v38  ;;  %v8256_v46 = vmul.f32 %v12759_v42, %v16457_v15 }
0x15f6   : > { %v12761_v45 = vpop.eup %12760 }
0x15f7   : > { %v8257_v40 = vmul.f32 %v12761_v45, %v16461_v58  ;;  %11928 = vmatprep.mubr.msk.bf16.mxu0 %vm2162_vm1, %v8262_v5 }
0x15f8   : > { %v12763_v49 = vpop.eup %12762 }
0x15f9   : > { %v8263_v14 = vpack.c.bf16 %v8257_v40, %v8256_v46  ;;  %v8258_v50 = vmul.f32 %v12763_v49, %v16465_v20  ;;  %v17507_v20 = vpack.c.bf16 %v17505_v33, %v17506_v19 }
0x15fa   : > { %v12765_v34 = vpop.eup %12764 }
0x15fb   : > { %11929 = vmatmul.mubr.msk.bf16.vlgmr.msra.gmra.mrb[36].mxu0 %vm2162_vm1, %v8263_v14  ;;  %v8259_v30 = vmul.f32 %v12765_v34, %v16469_v52  ;;  %v8852_v52 = vrot.slane %v15833_v2, 4  ;;  %v17520_v2 = vld [vmem:[#allocation13_spill] sm:$0xff] }
0x15fc   : > { %v12767_v6 = vpop.eup %12766  ;;  %11957 = vmatpush3.bf16.xpose.msra.mxu0 %v8521_v59 }
0x15fd   : > { %12201 = vmatprep.subr.msk.bf16.mxu0 %vm2703_vm3, %v8681_v1  ;;  %v8264_v15 = vpack.c.bf16 %v8259_v30, %v8258_v50  ;;  %v8260_v35 = vmul.f32 %v12767_v6, %v16473_v57  ;;  %v8695_v57 = vsel %vm2703_vm3, %v8681_v1, 0  ;;  %v12870_v50 = vld [vmem:[%s17076_s4 + $0x18] sm:$0xf] }
0x15fe   : > { %v12769_v58 = vpop.eup %12768 }
0x15ff   : > { %v8261_v41 = vmul.f32 %v12769_v58, %v16477_v10  ;;  %11932 = vmatprep.mubr.msk.bf16.mxu0 %vm2162_vm1, %v8264_v15  ;;  %v17511_v10 = vld [vmem:[#allocation15_spill] sm:$0xff] }
0x1600   : > { %v17513_v25 = vpack.c.bf16 %v17511_v10, %v17512_v7 }
0x1601   : > { %v8265_v43 = vpack.c.bf16 %v8261_v41, %v8260_v35 }
0x1603   : > { %11933 = vmatmul.mubr.msk.bf16.gmra.mrb[40].mxu0 %vm2162_vm1, %v8265_v43 }
0x1604   : > { %11958 = vmatprep.mubr.msk.bf16.mxu0 %vm2162_vm1, %v17507_v20 }
0x160b   : > { %11959 = vmatmul.mubr.msk.bf16.vlgmr.msra.gmra.mrb[44].mxu0 %vm2162_vm1, %v17510_v48 }
0x160c   : > { %11967 = vmatpush3.bf16.msra.mxu0 %v8695_v57  ;;  %11962 = vmatprep.mubr.msk.bf16.mxu0 %vm2162_vm1, %v17513_v25  ;;  %v9026_v57 = vrot.slane %v15840_v13, 4 }
0x160d   : > { %12203 = vmatprep.subr.msk.bf16.mxu0 %vm2162_vm1, %v8852_v52 }
0x1613   : > { %11963 = vmatmul.mubr.msk.bf16.gmra.mrb[48].mxu0 %vm2162_vm1, %v17516_v3 }
0x1640   : > { %v11910_v23 = vpop.f32.mrb[28].mxu0 }
0x1641   : > { %v8057_v39 = vpop.f32.mrb[29].mxu0 }
0x1642   : > { %v11911_v27 = vpop.f32.mrb[30].mxu0 }
0x1643   : > { %v8089_v63 = vpack.c.bf16 %v11911_v27, %v11910_v23  ;;  %v8060_v29 = vpop.f32.mrb[31].mxu0 }
0x1644   : > { %v8088_v28 = vpack.c.bf16 %v8060_v29, %v8057_v39 }
0x1648   : > { %v11914_v47 = vpop.f32.mrb[32].mxu0 }
0x1649   : > { %v8073_v0 = vpop.f32.mrb[33].mxu0 }
0x164a   : > { %v11915_v38 = vpop.f32.mrb[34].mxu0 }
0x164b   : > { %v8091_v44 = vpack.c.bf16 %v11915_v38, %v11914_v47  ;;  %v8076_v42 = vpop.f32.mrb[35].mxu0 }
0x164c   : > { %v8090_v5 = vpack.c.bf16 %v8076_v42, %v8073_v0 }
0x16ce   : > { %v11930_v45 = vpop.f32.mrb[36].mxu0 }
0x16cf   : > { %v8317_v46 = vpop.f32.mrb[37].mxu0 }
0x16d0   : > { %v11931_v40 = vpop.f32.mrb[38].mxu0 }
0x16d1   : > { %v8349_v49 = vpack.c.bf16 %v11931_v40, %v11930_v45  ;;  %v8320_v14 = vpop.f32.mrb[39].mxu0 }
0x16d2   : > { %v8348_v34 = vpack.c.bf16 %v8320_v14, %v8317_v46 }
0x16d4   : > { %11938 = vmatprep.mubr.msk.bf16.mxu1 %vm2162_vm1, %v8348_v34 }
0x16d5   : > { %11939 = vmatmul.mubr.msk.bf16.vlgmr.msra.gmra.mrb[28].mxu1 %vm2162_vm1, %v8349_v49 }
0x16d6   : > { %v11934_v1 = vpop.f32.mrb[40].mxu0  ;;  %11947 = vmatpush3.bf16.msra.mxu1 %v16126_v8 }
0x16d7   : > { %v8333_v59 = vpop.f32.mrb[41].mxu0  ;;  %12202 = vmatprep.subr.msk.bf16.mxu1 %vm2703_vm3, %v12870_v50 }
0x16d8   : > { %v11935_v30 = vpop.f32.mrb[42].mxu0 }
0x16d9   : > { %v8351_v6 = vpack.c.bf16 %v11935_v30, %v11934_v1  ;;  %v8336_v15 = vpop.f32.mrb[43].mxu0 }
0x16da   : > { %v8350_v58 = vpack.c.bf16 %v8336_v15, %v8333_v59 }
0x16dc   : > { %11942 = vmatprep.mubr.msk.bf16.mxu1 %vm2162_vm1, %v8350_v58 }
0x16dd   : > { %11943 = vmatmul.mubr.msk.bf16.gmra.mrb[32].mxu1 %vm2162_vm1, %v8351_v6 }
0x16de   : > { %11948 = vmatprep.mubr.msk.bf16.mxu1 %vm2162_vm1, %v8088_v28  ;;  %v11960_v35 = vpop.f32.mrb[44].mxu0 }
0x16df   : > { %v8566_v8 = vadd.f32 %v11960_v35, %v17484_v51  ;;  %v8557_v41 = vpop.f32.mrb[45].mxu0 }
0x16e0   : > { %v8558_v43 = vadd.f32 %v8557_v41, %v17485_v12  ;;  %v11961_v33 = vpop.f32.mrb[46].mxu0 }
0x16e1   : > { %v8569_v19 = vadd.f32 %v11961_v33, %v17486_v32  ;;  %v8560_v20 = vpop.f32.mrb[47].mxu0  ;;  %v8594_v7 = vsel %vm2162_vm1, %v8566_v8, -inf }
0x16e2   : > { %v8561_v18 = vadd.f32 %v8560_v20, %v17487_v36  ;;  %v8588_v22 = vsel %vm2162_vm1, %v8558_v43, -inf }
0x16e3   : > { %8589 = vmax.xlane.f32.xlu0 %v8588_v22  ;;  %v8597_v23 = vsel %vm2162_vm1, %v8569_v19, -inf }
0x16e4   : > { %v8591_v48 = vsel %vm2162_vm1, %v8561_v18, -inf }
0x16e5   : > { %8592 = vmax.xlane.f32.xlu1 %v8591_v48  ;;  %11949 = vmatmul.mubr.msk.bf16.vlgmr.msra.gmra.mrb[28].mxu1 %vm2162_vm1, %v8089_v63 }
0x16e6   : > { %11977 = vmatpush3.bf16.msra.mxu1 %v16144_v21  ;;  %11952 = vmatprep.mubr.msk.bf16.mxu1 %vm2162_vm1, %v8090_v5  ;;  %v11964_v10 = vpop.f32.mrb[48].mxu0 }
0x16e7   : > { %v8582_v25 = vadd.f32 %v11964_v10, %v17488_v11  ;;  %12204 = vmatprep.subr.msk.bf16.mxu1 %vm2703_vm3, %v9026_v57  ;;  %v8573_v54 = vpop.f32.mrb[49].mxu0  ;;  %8595 = vmax.xlane.f32.xlu0 %v8594_v7 }
0x16e8   : > { %v8574_v17 = vadd.f32 %v8573_v54, %v17489_v4  ;;  %v11965_v3 = vpop.f32.mrb[50].mxu0 }
0x16e9   : > { %v8585_v21 = vadd.f32 %v11965_v3, %v17490_v9  ;;  %v8576_v39 = vpop.f32.mrb[51].mxu0  ;;  %8598 = vmax.xlane.f32.xlu1 %v8597_v23  ;;  %v8606_v28 = vsel %vm2162_vm1, %v8582_v25, -inf }
0x16ea   : > { %v8577_v27 = vadd.f32 %v8576_v39, %v17491_v56  ;;  %v8600_v63 = vsel %vm2162_vm1, %v8574_v17, -inf }
0x16eb   : > { %8601 = vmax.xlane.f32.xlu0 %v8600_v63  ;;  %v8609_v47 = vsel %vm2162_vm1, %v8585_v21, -inf }
0x16ec   : > { %v8603_v29 = vsel %vm2162_vm1, %v8577_v27, -inf }
0x16ed   : > { %8604 = vmax.xlane.f32.xlu1 %v8603_v29  ;;  %11953 = vmatmul.mubr.msk.bf16.gmra.mrb[32].mxu1 %vm2162_vm1, %v8091_v44 }
0x16ef   : > { %8607 = vmax.xlane.f32.xlu0 %v8606_v28 }
0x16f1   : > { %8610 = vmax.xlane.f32.xlu1 %v8609_v47 }
0x1770   : > { %v8590_v0 = vpop.xlane.xlu0 %8589 }
0x1771   : > { %v8612_v38 = vsub.f32 %v8558_v43, %v8590_v0 }
0x1772   : > { %v8593_v42 = vpop.xlane.xlu1 %8592 }
0x1773   : > { %v8620_v5 = vmul.f32 1.442695, %v8612_v38  ;;  %v8613_v45 = vsub.f32 %v8561_v18, %v8593_v42 }
0x1774   : > { %v8596_v46 = vpop.xlane.xlu0 %8595 }
0x1775   : > { %12770 = vpow2.f32 %v8620_v5  ;;  %v8622_v40 = vmul.f32 1.442695, %v8613_v45  ;;  %v8614_v49 = vsub.f32 %v8566_v8, %v8596_v46 }
0x1776   : > { %v8599_v14 = vpop.xlane.xlu1 %8598 }
0x1777   : > { %12772 = vpow2.f32 %v8622_v40  ;;  %v8624_v34 = vmul.f32 1.442695, %v8614_v49  ;;  %v8615_v1 = vsub.f32 %v8569_v19, %v8599_v14 }
0x1778   : > { %v8602_v44 = vpop.xlane.xlu0 %8601 }
0x1779   : > { %12774 = vpow2.f32 %v8624_v34  ;;  %v8626_v59 = vmul.f32 1.442695, %v8615_v1  ;;  %v8616_v50 = vsub.f32 %v8574_v17, %v8602_v44 }
0x177a   : > { %v8605_v30 = vpop.xlane.xlu1 %8604 }
0x177b   : > { %12776 = vpow2.f32 %v8626_v59  ;;  %v8628_v6 = vmul.f32 1.442695, %v8616_v50  ;;  %v8617_v15 = vsub.f32 %v8577_v27, %v8605_v30 }
0x177c   : > { %v8608_v58 = vpop.xlane.xlu0 %8607 }
0x177d   : > { %12778 = vpow2.f32 %v8628_v6  ;;  %v8630_v35 = vmul.f32 1.442695, %v8617_v15  ;;  %v8618_v41 = vsub.f32 %v8582_v25, %v8608_v58 }
0x177e   : > { %v8611_v43 = vpop.xlane.xlu1 %8610 }
0x177f   : > { %v12771_v33 = vpop.eup %12770  ;;  %12780 = vpow2.f32 %v8630_v35  ;;  %v8632_v8 = vmul.f32 1.442695, %v8618_v41  ;;  %v8619_v20 = vsub.f32 %v8585_v21, %v8611_v43  ;;  %v8866_v35 = vsel %vm2162_vm1, %v8852_v52, 0  ;;  %v17521_v52 = vld [vmem:[#allocation11_spill] sm:$0xff] }
0x1780   : > { %v8636_v18 = vsel %vm2162_vm1, %v12771_v33, 0.0 }
0x1781   : > { %v12773_v19 = vpop.eup %12772  ;;  %12782 = vpow2.f32 %v8632_v8  ;;  %v8634_v22 = vmul.f32 1.442695, %v8619_v20  ;;  %8637 = vadd.xlane.f32.xlu0 %v8636_v18 }
0x1782   : > { %v8639_v48 = vsel %vm2162_vm1, %v12773_v19, 0.0 }
0x1783   : > { %v12775_v10 = vpop.eup %12774  ;;  %12784 = vpow2.f32 %v8634_v22  ;;  %8640 = vadd.xlane.f32.xlu1 %v8639_v48  ;;  %v17517_v48 = vld [vmem:[#allocation60_spill] sm:$0xff] }
0x1784   : > { %v8642_v7 = vsel %vm2162_vm1, %v12775_v10, 0.0 }
0x1785   : > { %v12777_v54 = vpop.eup %12776  ;;  %8643 = vadd.xlane.f32.xlu0 %v8642_v7 }
0x1786   : > { %v8645_v25 = vsel %vm2162_vm1, %v12777_v54, 0.0 }
0x1787   : > { %v12779_v17 = vpop.eup %12778  ;;  %8646 = vadd.xlane.f32.xlu1 %v8645_v25  ;;  %v17523_v25 = vld [vmem:[#allocation64_spill] sm:$0xff] }
0x1788   : > { %v8648_v3 = vsel %vm2162_vm1, %v12779_v17, 0.0 }
0x1789   : > { %v12781_v23 = vpop.eup %12780  ;;  %8649 = vadd.xlane.f32.xlu0 %v8648_v3 }
0x178a   : > { %v8651_v21 = vsel %vm2162_vm1, %v12781_v23, 0.0 }
0x178b   : > { %v12783_v39 = vpop.eup %12782  ;;  %8652 = vadd.xlane.f32.xlu1 %v8651_v21  ;;  %v17527_v21 = vld [vmem:[#allocation61_spill] sm:$0xff] }
0x178c   : > { %v8654_v27 = vsel %vm2162_vm1, %v12783_v39, 0.0 }
0x178d   : > { %v12785_v63 = vpop.eup %12784  ;;  %8655 = vadd.xlane.f32.xlu0 %v8654_v27 }
0x178e   : > { %v8657_v29 = vsel %vm2162_vm1, %v12785_v63, 0.0 }
0x178f   : > { %8658 = vadd.xlane.f32.xlu1 %v8657_v29 }
0x180e   : > { %v8638_v28 = vpop.xlane.xlu0 %8637 }
0x180f   : > { %12786 = vrcp.f32 %v8638_v28 }
0x1810   : > { %v8641_v47 = vpop.xlane.xlu1 %8640 }
0x1811   : > { %12788 = vrcp.f32 %v8641_v47 }
0x1812   : > { %v8644_v0 = vpop.xlane.xlu0 %8643 }
0x1813   : > { %12790 = vrcp.f32 %v8644_v0 }
0x1814   : > { %v8647_v38 = vpop.xlane.xlu1 %8646 }
0x1815   : > { %12792 = vrcp.f32 %v8647_v38  ;;  %v9040_v38 = vsel %vm2703_vm3, %v9026_v57, 0 }
0x1816   : > { %v8650_v42 = vpop.xlane.xlu0 %8649 }
0x1817   : > { %12794 = vrcp.f32 %v8650_v42 }
0x1818   : > { %v8653_v5 = vpop.xlane.xlu1 %8652 }
0x1819   : > { %v12787_v45 = vpop.eup %12786  ;;  %12796 = vrcp.f32 %v8653_v5 }
0x181a   : > { %v8656_v46 = vpop.xlane.xlu0 %8655  ;;  %v8668_v14 = vmul.f32 %v12787_v45, %v12771_v33 }
0x181b   : > { %v12789_v40 = vpop.eup %12788  ;;  %12798 = vrcp.f32 %v8656_v46 }
0x181c   : > { %v8659_v49 = vpop.xlane.xlu1 %8658  ;;  %v8669_v34 = vmul.f32 %v12789_v40, %v12773_v19 }
0x181d   : > { %v12791_v1 = vpop.eup %12790  ;;  %12800 = vrcp.f32 %v8659_v49 }
0x181e   : > { %v8676_v44 = vpack.c.bf16 %v8669_v34, %v8668_v14  ;;  %v8670_v50 = vmul.f32 %v12791_v1, %v12775_v10  ;;  %v17518_v10 = vld [vmem:[#allocation17_spill] sm:$0xff] }
0x181f   : > { %v12793_v59 = vpop.eup %12792  ;;  %v17519_v7 = vpack.c.bf16 %v17517_v48, %v17518_v10 }
0x1820   : > { %v8671_v30 = vmul.f32 %v12793_v59, %v12777_v54  ;;  %11968 = vmatprep.mubr.msk.bf16.mxu0 %vm2162_vm1, %v8676_v44  ;;  %v17522_v54 = vpack.c.bf16 %v17520_v2, %v17521_v52 }
0x1821   : > { %v12795_v6 = vpop.eup %12794 }
0x1822   : > { %v8677_v15 = vpack.c.bf16 %v8671_v30, %v8670_v50  ;;  %v8672_v41 = vmul.f32 %v12795_v6, %v12779_v17  ;;  %v17524_v17 = vld [vmem:[#allocation62_spill] sm:$0xff] }
0x1823   : > { %v12797_v58 = vpop.eup %12796  ;;  %v17525_v3 = vpack.c.bf16 %v17523_v25, %v17524_v17 }
0x1824   : > { %11969 = vmatmul.mubr.msk.bf16.vlgmr.msra.gmra.mrb[52].mxu0 %vm2162_vm1, %v8677_v15  ;;  %v8673_v43 = vmul.f32 %v12797_v58, %v12781_v23  ;;  %v17526_v23 = vld [vmem:[#allocation63_spill] sm:$0xff] }
0x1825   : > { %v12799_v33 = vpop.eup %12798  ;;  %11987 = vmatpush3.bf16.xpose.msra.mxu0 %v8866_v35 }
0x1826   : > { %v8678_v8 = vpack.c.bf16 %v8673_v43, %v8672_v41  ;;  %v8674_v18 = vmul.f32 %v12799_v33, %v12783_v39  ;;  %v17528_v39 = vpack.c.bf16 %v17526_v23, %v17527_v21 }
0x1827   : > { %v12801_v20 = vpop.eup %12800 }
0x1828   : > { %v8675_v19 = vmul.f32 %v12801_v20, %v12785_v63  ;;  %11972 = vmatprep.mubr.msk.bf16.mxu0 %vm2162_vm1, %v8678_v8 }
0x182a   : > { %v8679_v22 = vpack.c.bf16 %v8675_v19, %v8674_v18 }
0x182c   : > { %11973 = vmatmul.mubr.msk.bf16.gmra.mrb[56].mxu0 %vm2162_vm1, %v8679_v22 }
0x182d   : > { %11988 = vmatprep.mubr.msk.bf16.mxu0 %vm2162_vm1, %v17519_v7 }
0x1834   : > { %11989 = vmatmul.mubr.msk.bf16.vlgmr.msra.gmra.mrb[60].mxu0 %vm2162_vm1, %v17522_v54 }
0x1835   : > { %11992 = vmatprep.mubr.msk.bf16.mxu0 %vm2162_vm1, %v17525_v3 }
0x183c   : > { %11993 = vmatmul.mubr.msk.bf16.gmra.mrb[64].mxu0 %vm2162_vm1, %v17528_v39 }
0x18f7   : > { %v11970_v27 = vpop.f32.mrb[52].mxu0 }
0x18f8   : > { %v8731_v63 = vpop.f32.mrb[53].mxu0 }
0x18f9   : > { %v11971_v29 = vpop.f32.mrb[54].mxu0 }
0x18fa   : > { %v8763_v28 = vpack.c.bf16 %v11971_v29, %v11970_v27  ;;  %v8734_v47 = vpop.f32.mrb[55].mxu0 }
0x18fb   : > { %v8762_v0 = vpack.c.bf16 %v8734_v47, %v8731_v63 }
0x18fd   : > { %11978 = vmatprep.mubr.msk.bf16.mxu1 %vm2162_vm1, %v8762_v0 }
0x18fe   : > { %11979 = vmatmul.mubr.msk.bf16.vlgmr.msra.gmra.mrb[28].mxu1 %vm2162_vm1, %v8763_v28 }
0x18ff   : > { %11997 = vmatpush3.bf16.msra.mxu1 %v9040_v38  ;;  %v11974_v42 = vpop.f32.mrb[56].mxu0 }
0x1900   : > { %v8747_v5 = vpop.f32.mrb[57].mxu0  ;;  %12205 = vmatprep.subr.msk.bf16.mxu1 %vm2703_vm3, %v16301_v37 }
0x1901   : > { %v11975_v45 = vpop.f32.mrb[58].mxu0 }
0x1902   : > { %v8765_v46 = vpack.c.bf16 %v11975_v45, %v11974_v42  ;;  %v8750_v40 = vpop.f32.mrb[59].mxu0 }
0x1903   : > { %v8764_v49 = vpack.c.bf16 %v8750_v40, %v8747_v5 }
0x1905   : > { %11982 = vmatprep.mubr.msk.bf16.mxu1 %vm2162_vm1, %v8764_v49 }
0x1906   : > { %11983 = vmatmul.mubr.msk.bf16.gmra.mrb[32].mxu1 %vm2162_vm1, %v8765_v46 }
0x1907   : > { %v11990_v14 = vpop.f32.mrb[60].mxu0 }
0x1908   : > { %v8911_v34 = vadd.f32 %v11990_v14, %v17484_v51  ;;  %v8902_v13 = vpop.f32.mrb[61].mxu0  ;;  %v16641_v14 = vld [vmem:[%s17078_s6 + $0x4] ss:$0 sm:$0xff] }
0x1909   : > { %v8903_v57 = vadd.f32 %v8902_v13, %v17485_v12  ;;  %v11991_v1 = vpop.f32.mrb[62].mxu0 }
0x190a   : > { %v8914_v44 = vadd.f32 %v11991_v1, %v17486_v32  ;;  %v8905_v59 = vpop.f32.mrb[63].mxu0  ;;  %v8939_v15 = vsel %vm2162_vm1, %v8911_v34, -inf }
0x190b   : > { %v8906_v37 = vadd.f32 %v8905_v59, %v17487_v36  ;;  %v8933_v50 = vsel %vm2162_vm1, %v8903_v57, -inf  ;;  %v7825_v59 = vadd.f32 %v16641_v14, %v16351_v62  ;;  %v7827_v62 = vadd.f32 %v16349_v60, %v16641_v14 }
0x190c   : > { %8934 = vmax.xlane.f32.xlu0 %v8933_v50  ;;  %v8942_v32 = vsel %vm2162_vm1, %v8914_v44, -inf }
0x190d   : > { %v8936_v30 = vsel %vm2162_vm1, %v8906_v37, -inf }
0x190e   : > { %8937 = vmax.xlane.f32.xlu1 %v8936_v30  ;;  %v7826_v30 = vadd.f32 %v16345_v61, %v16641_v14  ;;  %v17531_v61 = vld [vmem:[#allocation31_spill] sm:$0xff] }
0x190f   : > { %v11994_v6 = vpop.f32.mrb[64].mxu0 }
0x1910   : > { %v8927_v51 = vadd.f32 %v11994_v6, %v17488_v11  ;;  %v8918_v58 = vpop.f32.mrb[65].mxu0  ;;  %8940 = vmax.xlane.f32.xlu0 %v8939_v15  ;;  %v17529_v6 = vld [vmem:[#allocation34_spill] sm:$0xff] }
0x1911   : > { %v8919_v12 = vadd.f32 %v8918_v58, %v17489_v4  ;;  %v11995_v35 = vpop.f32.mrb[66].mxu0  ;;  %v17530_v58 = vld [vmem:[#allocation43_spill] sm:$0xff] }
0x1912   : > { %v8930_v36 = vadd.f32 %v11995_v35, %v17490_v9  ;;  %v8921_v41 = vpop.f32.mrb[67].mxu0  ;;  %8943 = vmax.xlane.f32.xlu1 %v8942_v32  ;;  %v8951_v11 = vsel %vm2162_vm1, %v8927_v51, -inf  ;;  %v16676_v32 = vadd.f32 %v7826_v30, %v17531_v61 }
0x1913   : > { %v8922_v43 = vadd.f32 %v8921_v41, %v17491_v56  ;;  %v8945_v33 = vsel %vm2162_vm1, %v8919_v12, -inf  ;;  %v17532_v41 = vld [vmem:[#allocation35_spill] sm:$0xff] }
0x1914   : > { %8946 = vmax.xlane.f32.xlu0 %v8945_v33  ;;  %v8954_v4 = vsel %vm2162_vm1, %v8930_v36, -inf  ;;  %v7828_v33 = vadd.f32 %v16641_v14, %v16355_v26 }
0x1915   : > { %v8948_v8 = vsel %vm2162_vm1, %v8922_v43, -inf }
0x1916   : > { %8949 = vmax.xlane.f32.xlu1 %v8948_v8  ;;  %v9228_v8 = vsel %vm633_vm0, %v16676_v32, 0.0 }
0x1918   : > { %8952 = vmax.xlane.f32.xlu0 %v8951_v11 }
0x191a   : > { %8955 = vmax.xlane.f32.xlu1 %v8954_v4  ;;  %v7829_v4 = vadd.f32 %v16641_v14, %v16359_v53  ;;  %v7830_v53 = vadd.f32 %v16353_v55, %v16641_v14 }
0x1999   : > { %v8935_v20 = vpop.xlane.xlu0 %8934 }
0x199a   : > { %v8957_v18 = vsub.f32 %v8903_v57, %v8935_v20  ;;  %v7824_v57 = vadd.f32 %v16641_v14, %v16347_v24 }
0x199b   : > { %v8938_v19 = vpop.xlane.xlu1 %8937 }
0x199c   : > { %v8965_v9 = vmul.f32 1.442695, %v8957_v18  ;;  %v8958_v22 = vsub.f32 %v8906_v37, %v8938_v19  ;;  %v16662_v24 = vadd.f32 %v7824_v57, %v17529_v6  ;;  %v17533_v19 = vld [vmem:[#allocation41_spill] sm:$0xff] }
0x199d   : > { %v8941_v48 = vpop.xlane.xlu0 %8940 }
0x199e   : > { %12802 = vpow2.f32 %v8965_v9  ;;  %v8967_v56 = vmul.f32 1.442695, %v8958_v22  ;;  %v8959_v10 = vsub.f32 %v8911_v34, %v8941_v48  ;;  %v9286_v11 = vmul.f32 %v16662_v24, %v16662_v24  ;;  %v17534_v22 = vld [vmem:[#allocation40_spill] sm:$0xff] }
0x199f   : > { %v8944_v7 = vpop.xlane.xlu1 %8943  ;;  %v16698_v9 = vadd.f32 %v7828_v33, %v17533_v19  ;;  %v16702_v48 = vadd.f32 %v7829_v4, %v17534_v22  ;;  %v17537_v19 = vmov 0.0  }
0x19a0   : > { %12804 = vpow2.f32 %v8967_v56  ;;  %v8969_v2 = vmul.f32 1.442695, %v8959_v10  ;;  %v8960_v52 = vsub.f32 %v8914_v44, %v8944_v7  ;;  %v9302_v26 = vsel %vm633_vm0, %v9286_v11, 0.0 }
0x19a1   : > { %v8947_v54 = vpop.xlane.xlu0 %8946  ;;  %v9234_v10 = vsel %vm633_vm0, %v16698_v9, 0.0  ;;  %v9288_v7 = vmul.f32 %v16676_v32, %v16676_v32 }
0x19a2   : > { %12806 = vpow2.f32 %v8969_v2  ;;  %v8971_v25 = vmul.f32 1.442695, %v8960_v52  ;;  %v8961_v17 = vsub.f32 %v8919_v12, %v8947_v54  ;;  %v16671_v12 = vadd.f32 %v7825_v59, %v17530_v58 }
0x19a3   : > { %v8950_v3 = vpop.xlane.xlu1 %8949  ;;  %v7831_v2 = vadd.f32 %v16357_v31, %v16641_v14  ;;  %v9237_v52 = vsel %vm633_vm0, %v16702_v48, 0.0  ;;  %v9308_v55 = vsel %vm633_vm0, %v9288_v7, 0.0 }
0x19a4   : > { %12808 = vpow2.f32 %v8971_v25  ;;  %v8973_v23 = vmul.f32 1.442695, %v8961_v17  ;;  %v8962_v21 = vsub.f32 %v8922_v43, %v8950_v3  ;;  %v16681_v43 = vadd.f32 %v7827_v62, %v17532_v41  ;;  %v17535_v25 = vld [vmem:[#allocation48_spill] sm:$0xff]  ;;  %v17536_v3 = vld [vmem:[#allocation47_spill] sm:$0xff] }
0x19a5   : > { %v8953_v39 = vpop.xlane.xlu0 %8952  ;;  %v9225_v60 = vsel %vm633_vm0, %v16671_v12, 0.0  ;;  %v9287_v18 = vmul.f32 %v16671_v12, %v16671_v12  ;;  %v16718_v17 = vadd.f32 %v7830_v53, %v17535_v25 }
0x19a6   : > { %12810 = vpow2.f32 %v8973_v23  ;;  %v8975_v27 = vmul.f32 1.442695, %v8962_v21  ;;  %v8963_v63 = vsub.f32 %v8927_v51, %v8953_v39  ;;  %v9231_v20 = vsel %vm633_vm0, %v16681_v43, 0.0 }
0x19a7   : > { %v8956_v29 = vpop.xlane.xlu1 %8955  ;;  %v9305_v56 = vsel %vm633_vm0, %v9287_v18, 0.0  ;;  %v9289_v54 = vmul.f32 %v16681_v43, %v16681_v43  ;;  %v16722_v23 = vadd.f32 %v7831_v2, %v17536_v3  ;;  %v9240_v31 = vsel %vm633_vm0, %v16718_v17, 0.0  ;;  %v17539_v3 = vld [vmem:[#allocation42_spill] sm:$0xff] }
0x19a8   : > { %v16624_v28 = vpop.eup %12802  ;;  %12812 = vpow2.f32 %v8975_v27  ;;  %v8977_v47 = vmul.f32 1.442695, %v8963_v63  ;;  %v8964_v0 = vsub.f32 %v8930_v36, %v8956_v29  ;;  %v9222_v36 = vsel %vm633_vm0, %v16662_v24, 0.0 }
0x19a9   : > { %v8981_v38 = vsel %vm2162_vm1, %v16624_v28, 0.0  ;;  %v9311_v21 = vsel %vm633_vm0, %v9289_v54, 0.0  ;;  %v9290_v39 = vmul.f32 %v16698_v9, %v16698_v9  ;;  %v9243_v27 = vsel %vm633_vm0, %v16722_v23, 0.0 }
0x19aa   : > { %v16628_v42 = vpop.eup %12804  ;;  %12814 = vpow2.f32 %v8977_v47  ;;  %v8979_v5 = vmul.f32 1.442695, %v8964_v0  ;;  %8982 = vadd.xlane.f32.xlu0 %v8981_v38  ;;  %v9291_v63 = vmul.f32 %v16702_v48, %v16702_v48  ;;  %v9292_v47 = vmul.f32 %v16718_v17, %v16718_v17 }
0x19ab   : > { %v8984_v45 = vsel %vm2162_vm1, %v16628_v42, 0.0  ;;  %v9314_v29 = vsel %vm633_vm0, %v9290_v39, 0.0  ;;  %v9293_v38 = vmul.f32 %v16722_v23, %v16722_v23 }
0x19ac   : > { %v16632_v46 = vpop.eup %12806  ;;  %12816 = vpow2.f32 %v8979_v5  ;;  %8985 = vadd.xlane.f32.xlu1 %v8984_v45  ;;  %v9317_v0 = vsel %vm633_vm0, %v9291_v63, 0.0  ;;  %v9320_v5 = vsel %vm633_vm0, %v9292_v47, 0.0 }
0x19ad   : > { %v8987_v40 = vsel %vm2162_vm1, %v16632_v46, 0.0  ;;  %v9323_v45 = vsel %vm633_vm0, %v9293_v38, 0.0 }
0x19ae   : > { %v16636_v49 = vpop.eup %12808  ;;  %8988 = vadd.xlane.f32.xlu0 %v8987_v40 }
0x19af   : > { %v8990_v34 = vsel %vm2162_vm1, %v16636_v49, 0.0 }
0x19b0   : > { %v16645_v13 = vpop.eup %12810  ;;  %8991 = vadd.xlane.f32.xlu1 %v8990_v34 }
0x19b1   : > { %v8993_v1 = vsel %vm2162_vm1, %v16645_v13, 0.0 }
0x19b2   : > { %v16651_v44 = vpop.eup %12812  ;;  %8994 = vadd.xlane.f32.xlu0 %v8993_v1 }
0x19b3   : > { %v8996_v37 = vsel %vm2162_vm1, %v16651_v44, 0.0 }
0x19b4   : > { %v16657_v50 = vpop.eup %12814  ;;  %8997 = vadd.xlane.f32.xlu1 %v8996_v37 }
0x19b5   : > { %v8999_v15 = vsel %vm2162_vm1, %v16657_v50, 0.0 }
0x19b6   : > { %v16666_v51 = vpop.eup %12816  ;;  %9000 = vadd.xlane.f32.xlu0 %v8999_v15 }
0x19b7   : > { %v9002_v35 = vsel %vm2162_vm1, %v16666_v51, 0.0 }
0x19b8   : > { %9003 = vadd.xlane.f32.xlu1 %v9002_v35 }
0x19ba   : > { %9223 = vadd.xlane.f32.xlu0 %v9222_v36 }
0x19bc   : > { %9226 = vadd.xlane.f32.xlu1 %v9225_v60 }
0x19be   : > { %9229 = vadd.xlane.f32.xlu0 %v9228_v8 }
0x19c0   : > { %9232 = vadd.xlane.f32.xlu1 %v9231_v20 }
0x19c2   : > { %9303 = vadd.xlane.f32.xlu0 %v9302_v26 }
0x19c4   : > { %9306 = vadd.xlane.f32.xlu1 %v9305_v56 }
0x19c6   : > { %9235 = vadd.xlane.f32.xlu0 %v9234_v10 }
0x19c8   : > { %9238 = vadd.xlane.f32.xlu1 %v9237_v52 }
0x19ca   : > { %9309 = vadd.xlane.f32.xlu0 %v9308_v55 }
0x19cc   : > { %9312 = vadd.xlane.f32.xlu1 %v9311_v21  ;;  %v5261_v21 = vsel %vm633_vm0, %v17539_v3, 0 }
0x19ce   : > { %9241 = vadd.xlane.f32.xlu0 %v9240_v31  ;;  %v17540_v31 = vld [vmem:[#allocation50_spill] sm:$0xff] }
0x19cf   : > { %v5264_v39 = vsel %vm633_vm0, %v17540_v31, 0  ;;  %v17549_v31 = vld [vmem:[#allocation56_spill] sm:$0xff] }
0x19d0   : > { %9244 = vadd.xlane.f32.xlu1 %v9243_v27  ;;  %v17541_v27 = vld [vmem:[#allocation49_spill] sm:$0xff] }
0x19d1   : > { %v5267_v63 = vsel %vm633_vm0, %v17541_v27, 0 }
0x19d2   : > { %9315 = vadd.xlane.f32.xlu0 %v9314_v29  ;;  %v12871_v29 = vld [vmem:[%s15032_s19] sm:$0xf] }
0x19d4   : > { %9318 = vadd.xlane.f32.xlu1 %v9317_v0 }
0x19d6   : > { %9321 = vadd.xlane.f32.xlu0 %v9320_v5 }
0x19d8   : > { %9324 = vadd.xlane.f32.xlu1 %v9323_v45 }
0x1a37   : > { %v8983_v40 = vpop.xlane.xlu0 %8982 }
0x1a38   : > { %12818 = vrcp.f32 %v8983_v40  ;;  %v17542_v40 = vld [vmem:[#allocation45_spill] sm:$0xff] }
0x1a39   : > { %v8986_v34 = vpop.xlane.xlu1 %8985 }
0x1a3a   : > { %12820 = vrcp.f32 %v8986_v34 }
0x1a3b   : > { %v8989_v57 = vpop.xlane.xlu0 %8988 }
0x1a3c   : > { %12822 = vrcp.f32 %v8989_v57 }
0x1a3d   : > { %v8992_v1 = vpop.xlane.xlu1 %8991 }
0x1a3e   : > { %12824 = vrcp.f32 %v8992_v1 }
0x1a3f   : > { %v8995_v59 = vpop.xlane.xlu0 %8994 }
0x1a40   : > { %12826 = vrcp.f32 %v8995_v59 }
0x1a41   : > { %v8998_v37 = vpop.xlane.xlu1 %8997 }
0x1a42   : > { %v12819_v30 = vpop.eup %12818  ;;  %12828 = vrcp.f32 %v8998_v37  ;;  %v17543_v37 = vld [vmem:[#allocation46_spill] sm:$0xff] }
0x1a43   : > { %v9001_v6 = vpop.xlane.xlu0 %9000  ;;  %v9013_v58 = vmul.f32 %v12819_v30, %v16624_v28 }
0x1a44   : > { %v12821_v15 = vpop.eup %12820  ;;  %12830 = vrcp.f32 %v9001_v6  ;;  %v17544_v6 = vld [vmem:[#allocation19_spill] sm:$0xff] }
0x1a45   : > { %v9004_v62 = vpop.xlane.xlu1 %9003  ;;  %v9014_v35 = vmul.f32 %v12821_v15, %v16628_v42 }
0x1a46   : > { %v12823_v61 = vpop.eup %12822  ;;  %12832 = vrcp.f32 %v9004_v62 }
0x1a47   : > { %v9021_v36 = vpack.c.bf16 %v9014_v35, %v9013_v58  ;;  %v9015_v60 = vmul.f32 %v12823_v61, %v16632_v46  ;;  %v17545_v35 = vld [vmem:[#allocation55_spill] sm:$0xff] }
0x1a48   : > { %v12825_v41 = vpop.eup %12824 }
0x1a49   : > { %v9016_v33 = vmul.f32 %v12825_v41, %v16636_v49  ;;  %11998 = vmatprep.mubr.msk.bf16.mxu1 %vm2162_vm1, %v9021_v36  ;;  %v9227_v58 = vpop.xlane.xlu1 %9226 }
0x1a4a   : > { %v12827_v8 = vpop.eup %12826 }
0x1a4b   : > { %v9022_v11 = vpack.c.bf16 %v9016_v33, %v9015_v60  ;;  %v9017_v20 = vmul.f32 %v12827_v8, %v16645_v13  ;;  %v9224_v60 = vpop.xlane.xlu0 %9223 }
0x1a4c   : > { %v12829_v4 = vpop.eup %12828 }
0x1a4d   : > { %11999 = vmatmul.mubr.msk.bf16.vlgmr.msra.gmra.mrb[36].mxu1 %vm2162_vm1, %v9022_v11  ;;  %v9018_v28 = vmul.f32 %v12829_v4, %v16651_v44 }
0x1a4e   : > { %v12831_v42 = vpop.eup %12830  ;;  %12007 = vmatpush3.bf16.msra.mxu1 %v16309_v16  ;;  %v17538_v16 = vld [vmem:[#allocation30_spill] sm:$0xff] }
0x1a4f   : > { %v9023_v18 = vpack.c.bf16 %v9018_v28, %v9017_v20  ;;  %12016 = vmatprep.subr.bf16.mxu1 %v17537_v19  ;;  %v9019_v49 = vmul.f32 %v12831_v42, %v16657_v50  ;;  %v5258_v50 = vsel %vm633_vm0, %v17538_v16, 0 }
0x1a50   : > { %v12833_v46 = vpop.eup %12832 }
0x1a51   : > { %v9020_v26 = vmul.f32 %v12833_v46, %v16666_v51  ;;  %12002 = vmatprep.mubr.msk.bf16.mxu1 %vm2162_vm1, %v9023_v18  ;;  %v9233_v18 = vpop.xlane.xlu1 %9232 }
0x1a53   : > { %v9024_v22 = vpack.c.bf16 %v9020_v26, %v9019_v49 }
0x1a55   : > { %12003 = vmatmul.mubr.msk.bf16.gmra.mrb[40].mxu1 %vm2162_vm1, %v9024_v22  ;;  %v9230_v22 = vpop.xlane.xlu0 %9229 }
0x1b20   : > { %v12000_v56 = vpop.f32.mrb[36].mxu1 }
0x1b21   : > { %v9076_v13 = vpop.f32.mrb[37].mxu1 }
0x1b22   : > { %v12001_v53 = vpop.f32.mrb[38].mxu1 }
0x1b23   : > { %v9108_v44 = vpack.c.bf16 %v12001_v53, %v12000_v56  ;;  %v9079_v10 = vpop.f32.mrb[39].mxu1 }
0x1b24   : > { %v9107_v7 = vpack.c.bf16 %v9079_v10, %v9076_v13 }
0x1b26   : > { %12008 = vmatprep.mubr.msk.bf16.mxu1 %vm2162_vm1, %v9107_v7 }
0x1b27   : > { %12009 = vmatmul.mubr.msk.bf16.vlgmr.msra.gmra.mrb[28].mxu1 %vm2162_vm1, %v9108_v44  ;;  %v17546_v44 = vld [vmem:[#allocation18_spill] sm:$0xff] }
0x1b28   : > { %12017 = vmatpush3.bf16.xpose.msra.mxu1 %v5258_v50  ;;  %v12004_v51 = vpop.f32.mrb[40].mxu1  ;;  %v9307_v50 = vpop.xlane.xlu1 %9306 }
0x1b29   : > { %v9092_v2 = vpop.f32.mrb[41].mxu1  ;;  %12018 = vmatprep.subr.bf16.mxu1 %v17537_v19 }
0x1b2a   : > { %v12005_v52 = vpop.f32.mrb[42].mxu1 }
0x1b2b   : > { %v9110_v54 = vpack.c.bf16 %v12005_v52, %v12004_v51  ;;  %v9095_v25 = vpop.f32.mrb[43].mxu1  ;;  %v17547_v51 = vld [vmem:[#allocation21_spill] sm:$0xff] }
0x1b2c   : > { %v9109_v55 = vpack.c.bf16 %v9095_v25, %v9092_v2  ;;  %v9304_v25 = vpop.xlane.xlu0 %9303 }
0x1b2e   : > { %12012 = vmatprep.mubr.msk.bf16.mxu1 %vm2162_vm1, %v9109_v55  ;;  %v17548_v55 = vld [vmem:[#allocation59_spill] sm:$0xff] }
0x1b2f   : > { %12013 = vmatmul.mubr.msk.bf16.gmra.mrb[32].mxu1 %vm2162_vm1, %v9110_v54 }
0x1b30   : > { %12019 = vmatpush3.bf16.xpose.msra.mxu1 %v5261_v21  ;;  %12024 = vmatprep.mubr.msk.bf16.mxu1 %vm12890_vm4, %v17537_v19 }
0x1b31   : > { %12020 = vmatprep.subr.bf16.mxu1 %v17537_v19 }
0x1b38   : > { %12021 = vmatpush3.bf16.xpose.msra.mxu1 %v5264_v39 }
0x1b39   : > { %12022 = vmatprep.subr.bf16.mxu1 %v17537_v19 }
0x1b40   : > { %12023 = vmatpush3.bf16.xpose.msra.mxu1 %v5267_v63  ;;  %v9239_v63 = vpop.xlane.xlu1 %9238 }
0x1b47   : > { %12025 = vmatmul.mubr.msk.bf16.vlgmr.msra.gmra.mrb[44].mxu1 %vm633_vm0, %v12871_v29 }
0x1bfa   : > { %v12010_v47 = vpop.f32.mrb[28].mxu1 }
0x1bfb   : > { %v9198_v0 = vadd.f32 %v12010_v47, %v16641_v14  ;;  %v9157_v38 = vpop.f32.mrb[29].mxu1  ;;  %v9236_v47 = vpop.xlane.xlu0 %9235 }
0x1bfc   : > { %v9196_v5 = vadd.f32 %v16641_v14, %v9157_v38  ;;  %v12011_v45 = vpop.f32.mrb[30].mxu1 }
0x1bfd   : > { %v16777_v34 = vadd.f32 %v9198_v0, %v17542_v40  ;;  %v9199_v57 = vadd.f32 %v12011_v45, %v16641_v14  ;;  %v9160_v1 = vpop.f32.mrb[31].mxu1  ;;  %v9313_v40 = vpop.xlane.xlu1 %9312 }
0x1bfe   : > { %v9197_v59 = vadd.f32 %v16641_v14, %v9160_v1  ;;  %v16782_v30 = vadd.f32 %v9196_v5, %v17543_v37 }
0x1bff   : > { %v16785_v15 = vadd.f32 %v9199_v57, %v17544_v6  ;;  %v9252_v62 = vsel %vm633_vm0, %v16777_v34, 0.0  ;;  %v9296_v11 = vmul.f32 %v16777_v34, %v16777_v34 }
0x1c00   : > { %9253 = vadd.xlane.f32.xlu0 %v9252_v62  ;;  %v16790_v61 = vadd.f32 %v9197_v59, %v17545_v35  ;;  %v9246_v8 = vsel %vm633_vm0, %v16782_v30, 0.0  ;;  %v9294_v26 = vmul.f32 %v16782_v30, %v16782_v30  ;;  %v9310_v59 = vpop.xlane.xlu0 %9309  ;;  %v9271_v62 = vmul.f32 0.03125, %v9227_v58 }
0x1c01   : > { %v9255_v36 = vsel %vm633_vm0, %v16785_v15, 0.0  ;;  %v9297_v42 = vmul.f32 %v16785_v15, %v16785_v15  ;;  %v9332_v49 = vsel %vm633_vm0, %v9296_v11, 0.0  ;;  %v9245_v35 = vpop.xlane.xlu1 %9244  ;;  %v9350_v11 = vmul.f32 0.03125, %v9304_v25 }
0x1c02   : > { %v12014_v41 = vpop.f32.mrb[32].mxu1  ;;  %9256 = vadd.xlane.f32.xlu1 %v9255_v36  ;;  %v9249_v28 = vsel %vm633_vm0, %v16790_v61, 0.0  ;;  %v9295_v53 = vmul.f32 %v16790_v61, %v16790_v61  ;;  %v9326_v16 = vsel %vm633_vm0, %v9294_v26, 0.0  ;;  %v9270_v36 = vmul.f32 0.03125, %v9224_v60 }
0x1c03   : > { %v9173_v33 = vpop.f32.mrb[33].mxu1  ;;  %v9202_v46 = vadd.f32 %v12014_v41, %v16641_v14  ;;  %v9335_v13 = vsel %vm633_vm0, %v9297_v42, 0.0  ;;  %v9351_v41 = vmul.f32 0.03125, %v9307_v50  ;;  %v16848_v25 = vmul.f32 0.03125, %v9245_v35 }
0x1c04   : > { %9247 = vadd.xlane.f32.xlu0 %v9246_v8  ;;  %v12015_v4 = vpop.f32.mrb[34].mxu1  ;;  %v9200_v7 = vadd.f32 %v16641_v14, %v9173_v33  ;;  %v9329_v54 = vsel %vm633_vm0, %v9295_v53, 0.0  ;;  %v9242_v33 = vpop.xlane.xlu0 %9241  ;;  %v9367_v8 = vmul.f32 %v9271_v62, %v9271_v62  ;;  %v9275_v53 = vmul.f32 0.03125, %v9239_v63 }
0x1c05   : > { %v9176_v20 = vpop.f32.mrb[35].mxu1  ;;  %v9203_v56 = vadd.f32 %v12015_v4, %v16641_v14  ;;  %v16811_v10 = vadd.f32 %v9202_v46, %v17546_v44  ;;  %v9273_v4 = vmul.f32 0.03125, %v9233_v18  ;;  %v9319_v42 = vpop.xlane.xlu1 %9318  ;;  %v9272_v46 = vmul.f32 0.03125, %v9230_v22 }
0x1c06   : > { %9250 = vadd.xlane.f32.xlu1 %v9249_v28  ;;  %v9201_v52 = vadd.f32 %v16641_v14, %v9176_v20  ;;  %v16821_v3 = vadd.f32 %v9200_v7, %v17548_v55  ;;  %v9366_v20 = vmul.f32 %v9270_v36, %v9270_v36  ;;  %v9383_v28 = vsub.f32 %v9351_v41, %v9367_v8 }
0x1c07   : > { %v16816_v2 = vadd.f32 %v9203_v56, %v17547_v51  ;;  %v9264_v21 = vsel %vm633_vm0, %v16811_v10, 0.0  ;;  %v9300_v45 = vmul.f32 %v16811_v10, %v16811_v10  ;;  %v9352_v44 = vmul.f32 0.03125, %v9310_v59 }
0x1c08   : > { %9333 = vadd.xlane.f32.xlu0 %v9332_v49  ;;  %v16826_v39 = vadd.f32 %v9201_v52, %v17549_v31  ;;  %v9258_v14 = vsel %vm633_vm0, %v16821_v3, 0.0  ;;  %v9298_v29 = vmul.f32 %v16821_v3, %v16821_v3  ;;  %v9353_v49 = vmul.f32 0.03125, %v9313_v40  ;;  %v9316_v56 = vpop.xlane.xlu0 %9315 }
0x1c09   : > { %v9267_v27 = vsel %vm633_vm0, %v16816_v2, 0.0  ;;  %v9301_v1 = vmul.f32 %v16816_v2, %v16816_v2  ;;  %v9344_v37 = vsel %vm633_vm0, %v9300_v45, 0.0  ;;  %v9382_v26 = vsub.f32 %v9350_v11, %v9366_v20  ;;  %v9325_v52 = vpop.xlane.xlu1 %9324 }
0x1c0a   : > { %9336 = vadd.xlane.f32.xlu1 %v9335_v13  ;;  %v9261_v0 = vsel %vm633_vm0, %v16826_v39, 0.0  ;;  %v9299_v38 = vmul.f32 %v16826_v39, %v16826_v39  ;;  %v9338_v5 = vsel %vm633_vm0, %v9298_v29, 0.0  ;;  %v9369_v13 = vmul.f32 %v9273_v4, %v9273_v4 }
0x1c0b   : > { %v9347_v6 = vsel %vm633_vm0, %v9301_v1, 0.0  ;;  %v9415_v7 = vadd.f32 1e-05, %v9383_v28  ;;  %v9368_v58 = vmul.f32 %v9272_v46, %v9272_v46  ;;  %v9355_v50 = vmul.f32 0.03125, %v9319_v42  ;;  %v16864_v42 = vld [vmem:[%s17078_s6 + $0x5] ss:$0 sm:$0xff] }
0x1c0c   : > { %9327 = vadd.xlane.f32.xlu0 %v9326_v16  ;;  %v9341_v57 = vsel %vm633_vm0, %v9299_v38, 0.0  ;;  %v16846_v16 = vmul.f32 0.03125, %v9236_v47  ;;  %v9385_v60 = vsub.f32 %v9353_v49, %v9369_v13  ;;  %v9414_v51 = vadd.f32 1e-05, %v9382_v26 }
0x1c0d   : > { %v9384_v18 = vsub.f32 %v9352_v44, %v9368_v58  ;;  %v9354_v55 = vmul.f32 0.03125, %v9316_v56  ;;  %12834 = vrsqrt.f32 %v9415_v7  ;;  %v9373_v47 = vmul.f32 %v16848_v25, %v16848_v25 }
0x1c0e   : > { %9330 = vadd.xlane.f32.xlu1 %v9329_v54  ;;  %v9371_v54 = vmul.f32 %v9275_v53, %v9275_v53  ;;  %v9370_v22 = vmul.f32 %v16846_v16, %v16846_v16  ;;  %v9417_v31 = vadd.f32 1e-05, %v9385_v60  ;;  %12836 = vrsqrt.f32 %v9414_v51  ;;  %v16886_v51 = vld [vmem:[%s17079_s7 + $0x40] ss:$8 sps:$4 sm:$0xff]  }
0x1c0f   : > { %v9416_v29 = vadd.f32 1e-05, %v9384_v18  ;;  %v9401_v28 = vsub.f32 %v16681_v43, %v9273_v4  ;;  %v16873_v43 = vld [vmem:[%s17078_s6 + $0x6] ss:$0 sm:$0xff]  ;;  %v9402_v7 = vsub.f32 %v16698_v9, %v16846_v16 }
0x1c10   : > { %9265 = vadd.xlane.f32.xlu0 %v9264_v21  ;;  %v9322_v21 = vpop.xlane.xlu0 %9321  ;;  %v9387_v63 = vsub.f32 %v9355_v50, %v9371_v54  ;;  %12838 = vrsqrt.f32 %v9417_v31  ;;  %v12280_v9 = vld [vmem:[%s17079_s7 + $0x44] ss:$8 sps:$4 sm:$0xff]  }
0x1c11   : > { %v9356_v38 = vmul.f32 0.03125, %v9322_v21  ;;  %12840 = vrsqrt.f32 %v9416_v29  ;;  %9581 = vmatprep.subr.bf16.mxu0 %v12280_v9 }
0x1c12   : > { %9268 = vadd.xlane.f32.xlu1 %v9267_v27  ;;  %v16852_v27 = vmul.f32 0.03125, %v9242_v33  ;;  %v9419_v45 = vadd.f32 1e-05, %v9387_v63  ;;  %v9398_v33 = vsub.f32 %v16662_v24, %v9270_v36  ;;  %v9403_v36 = vsub.f32 %v16702_v48, %v9275_v53  ;;  %9582 = vmatpush1.bf16.msra.mxu0 %v16886_v51  ;;  %v16913_v63 = vld [vmem:[%s17079_s7 + $0x64] ss:$8 sps:$4 sm:$0xff]  }
0x1c13   : > { %v9405_v48 = vsub.f32 %v16722_v23, %v16848_v25  ;;  %v16896_v23 = vld [vmem:[%s17079_s7 + $0x54] ss:$8 sps:$4 sm:$0xff]  }
0x1c14   : > { %9259 = vadd.xlane.f32.xlu0 %v9258_v14  ;;  %v9357_v14 = vmul.f32 0.03125, %v9325_v52  ;;  %12842 = vrsqrt.f32 %v9419_v45  ;;  %v9404_v52 = vsub.f32 %v16718_v17, %v16852_v27  ;;  %v12891_v17 = vmov 0   ;;  %9583 = vmatprep.subr.bf16.mxu0 %v16896_v23  ;;  %v16929_v45 = vld [vmem:[%s17079_s7 + $0x74] ss:$8 sps:$4 sm:$0xff]  }
0x1c15   : > { %9613 = vmatprep.mubr.bf16.mxu0 %v12891_v17 }
0x1c16   : > { %9262 = vadd.xlane.f32.xlu1 %v9261_v0  ;;  %v9386_v0 = vsub.f32 %v9354_v55, %v9370_v22  ;;  %v9389_v40 = vsub.f32 %v9357_v14, %v9373_v47  ;;  %v16904_v22 = vld [vmem:[%s17079_s7 + $0x50] ss:$8 sps:$4 sm:$0xff]  }
0x1c17   : > { %9584 = vmatpush1.bf16.msra.mxu0 %v16904_v22 }
0x1c18   : > { %9339 = vadd.xlane.f32.xlu0 %v9338_v5  ;;  %v9372_v5 = vmul.f32 %v16852_v27, %v16852_v27  ;;  %v9421_v59 = vadd.f32 1e-05, %v9389_v40  ;;  %9585 = vmatprep.subr.bf16.mxu0 %v16913_v63 }
0x1c1a   : > { %9342 = vadd.xlane.f32.xlu1 %v9341_v57  ;;  %v9418_v57 = vadd.f32 1e-05, %v9386_v0  ;;  %v9388_v1 = vsub.f32 %v9356_v38, %v9372_v5  ;;  %v16921_v0 = vld [vmem:[%s17079_s7 + $0x60] ss:$8 sps:$4 sm:$0xff]  }
0x1c1b   : > { %9586 = vmatpush1.bf16.msra.mxu0 %v16921_v0 }
0x1c1c   : > { %9345 = vadd.xlane.f32.xlu0 %v9344_v37  ;;  %v12835_v37 = vpop.eup %12834  ;;  %12844 = vrsqrt.f32 %v9418_v57  ;;  %v9420_v35 = vadd.f32 1e-05, %v9388_v1  ;;  %v16936_v1 = vld [vmem:[%s17079_s7 + $0x70] ss:$8 sps:$4 sm:$0xff]   ;;  %9587 = vmatprep.subr.bf16.mxu0 %v16929_v45 }
0x1c1d   : > { %v12837_v41 = vpop.eup %12836  ;;  %12846 = vrsqrt.f32 %v9421_v59 }
0x1c1e   : > { %9348 = vadd.xlane.f32.xlu1 %v9347_v6  ;;  %v9399_v6 = vsub.f32 %v16671_v12, %v9271_v62  ;;  %v12839_v11 = vpop.eup %12838  ;;  %12848 = vrsqrt.f32 %v9420_v35  ;;  %v9446_v20 = vmul.f32 %v12837_v41, %v9398_v33  ;;  %v9400_v62 = vsub.f32 %v16676_v32, %v9272_v46 }
0x1c1f   : > { %v12841_v49 = vpop.eup %12840  ;;  %v9449_v26 = vmul.f32 %v12839_v11, %v9401_v28  ;;  %9588 = vmatpush1.bf16.msra.mxu0 %v16936_v1 }
0x1c20   : > { %v9447_v8 = vmul.f32 %v12835_v37, %v9399_v6  ;;  %v12843_v56 = vpop.eup %12842  ;;  %v9466_v24 = vmul.f32 %v16864_v42, %v9446_v20  ;;  %v9448_v4 = vmul.f32 %v12841_v49, %v9400_v62  ;;  %9672 = vmatprep.subr.bf16.mxu0 %v12280_v9 }
0x1c21   : > { %v9469_v32 = vmul.f32 %v16864_v42, %v9449_v26  ;;  %v9451_v46 = vmul.f32 %v12843_v56, %v9403_v36 }
0x1c22   : > { %v9467_v12 = vmul.f32 %v16864_v42, %v9447_v8  ;;  %v9486_v60 = vadd.f32 %v16873_v43, %v9466_v24  ;;  %v9468_v53 = vmul.f32 %v16864_v42, %v9448_v4 }
0x1c23   : > { %v9489_v18 = vadd.f32 %v16873_v43, %v9469_v32  ;;  %v9471_v25 = vmul.f32 %v16864_v42, %v9451_v46 }
0x1c24   : > { %v9487_v44 = vadd.f32 %v16873_v43, %v9467_v12  ;;  %v9488_v21 = vadd.f32 %v16873_v43, %v9468_v53 }
0x1c25   : > { %v9491_v29 = vadd.f32 %v16873_v43, %v9471_v25 }
0x1c26   : > { %v12845_v13 = vpop.eup %12844  ;;  %v9502_v54 = vpack.c.bf16 %v9487_v44, %v9486_v60  ;;  %v9503_v14 = vpack.c.bf16 %v9489_v18, %v9488_v21 }
0x1c27   : > { %v12847_v58 = vpop.eup %12846  ;;  %v9450_v50 = vmul.f32 %v12845_v13, %v9402_v7 }
0x1c28   : > { %v12849_v16 = vpop.eup %12848  ;;  %v9453_v55 = vmul.f32 %v12847_v58, %v9405_v48 }
0x1c29   : > { %v9470_v31 = vmul.f32 %v16864_v42, %v9450_v50  ;;  %v9452_v27 = vmul.f32 %v12849_v16, %v9404_v52 }
0x1c2a   : > { %v9473_v47 = vmul.f32 %v16864_v42, %v9453_v55 }
0x1c2b   : > { %v9490_v38 = vadd.f32 %v16873_v43, %v9470_v31  ;;  %v9472_v5 = vmul.f32 %v16864_v42, %v9452_v27 }
0x1c2c   : > { %v9493_v57 = vadd.f32 %v16873_v43, %v9473_v47 }
0x1c2d   : > { %v9504_v40 = vpack.c.bf16 %v9491_v29, %v9490_v38  ;;  %v9492_v59 = vadd.f32 %v16873_v43, %v9472_v5 }
0x1c2f   : > { %v9505_v37 = vpack.c.bf16 %v9493_v57, %v9492_v59 }
0x1c49   : > { %9519 = vxpose.xlu0.c.b16.start [1/4] (short) (narrow) %v9502_v54, 32 }
0x1c4d   : > { %9520 = vxpose.xlu0.c.b16.cont [2/4] (short) (narrow) %v9503_v14, 32 }
0x1c51   : > { %9521 = vxpose.xlu0.c.b16.cont [3/4] (short) (narrow) %v9504_v40, 32 }
0x1c55   : > { %9522 = vxpose.xlu0.c.b16.end [4/4] (short) (narrow) %v9505_v37, 32 }
0x1c8d   : > { %v9254_v6 = vpop.xlane.xlu0 %9253 }
0x1c8e   : > { %v16941_v33 = vmul.f32 0.03125, %v9254_v6 }
0x1c8f   : > { %v9257_v35 = vpop.xlane.xlu1 %9256 }
0x1c90   : > { %v9281_v11 = vmul.f32 0.03125, %v9257_v35  ;;  %v9376_v28 = vmul.f32 %v16941_v33, %v16941_v33  ;;  %v9408_v6 = vsub.f32 %v16777_v34, %v16941_v33 }
0x1c91   : > { %v9248_v41 = vpop.xlane.xlu0 %9247 }
0x1c92   : > { %v9278_v49 = vmul.f32 0.03125, %v9248_v41  ;;  %v9377_v26 = vmul.f32 %v9281_v11, %v9281_v11  ;;  %v9409_v35 = vsub.f32 %v16785_v15, %v9281_v11 }
0x1c93   : > { %v9251_v8 = vpop.xlane.xlu1 %9250 }
0x1c94   : > { %v9279_v56 = vmul.f32 0.03125, %v9251_v8  ;;  %v9374_v13 = vmul.f32 %v9278_v49, %v9278_v49  ;;  %v9406_v41 = vsub.f32 %v16782_v30, %v9278_v49 }
0x1c95   : > { %v9334_v20 = vpop.xlane.xlu0 %9333 }
0x1c96   : > { %v9360_v12 = vmul.f32 0.03125, %v9334_v20  ;;  %v9375_v58 = vmul.f32 %v9279_v56, %v9279_v56 }
0x1c97   : > { %v9337_v62 = vpop.xlane.xlu1 %9336 }
0x1c98   : > { %v9392_v24 = vsub.f32 %v9360_v12, %v9376_v28  ;;  %v9361_v36 = vmul.f32 0.03125, %v9337_v62 }
0x1c99   : > { %v9328_v4 = vpop.xlane.xlu0 %9327 }
0x1c9a   : > { %v9393_v44 = vsub.f32 %v9361_v36, %v9377_v26  ;;  %v9358_v7 = vmul.f32 0.03125, %v9328_v4  ;;  %v9424_v32 = vadd.f32 1e-05, %v9392_v24  ;;  %v9407_v24 = vsub.f32 %v16790_v61, %v9279_v56 }
0x1c9b   : > { %v9331_v46 = vpop.xlane.xlu1 %9330 }
0x1c9c   : > { %v9425_v60 = vadd.f32 1e-05, %v9393_v44  ;;  %v9390_v48 = vsub.f32 %v9358_v7, %v9374_v13  ;;  %v9359_v53 = vmul.f32 0.03125, %v9331_v46 }
0x1c9d   : > { %v9266_v50 = vpop.xlane.xlu0 %9265 }
0x1c9e   : > { %12850 = vrsqrt.f32 %v9425_v60  ;;  %v9422_v9 = vadd.f32 1e-05, %v9390_v48  ;;  %v9391_v16 = vsub.f32 %v9359_v53, %v9375_v58  ;;  %v16949_v27 = vmul.f32 0.03125, %v9266_v50 }
0x1c9f   : > { %12852 = vrsqrt.f32 %v9424_v32  ;;  %v9269_v52 = vpop.xlane.xlu1 %9268 }
0x1ca0   : > { %12854 = vrsqrt.f32 %v9422_v9  ;;  %v9423_v54 = vadd.f32 1e-05, %v9391_v16  ;;  %v16953_v47 = vmul.f32 0.03125, %v9269_v52  ;;  %v9380_v28 = vmul.f32 %v16949_v27, %v16949_v27 }
0x1ca1   : > { %v9260_v18 = vpop.xlane.xlu0 %9259 }
0x1ca2   : > { %12856 = vrsqrt.f32 %v9423_v54  ;;  %v16945_v25 = vmul.f32 0.03125, %v9260_v18  ;;  %v9381_v36 = vmul.f32 %v16953_v47, %v16953_v47 }
0x1ca3   : > { %v9263_v55 = vpop.xlane.xlu1 %9262 }
0x1ca4   : > { %v16947_v21 = vmul.f32 0.03125, %v9263_v55  ;;  %v9378_v14 = vmul.f32 %v16945_v25, %v16945_v25  ;;  %v9410_v52 = vsub.f32 %v16821_v3, %v16945_v25  ;;  %v9412_v3 = vsub.f32 %v16811_v10, %v16949_v27 }
0x1ca5   : > { %v9340_v31 = vpop.xlane.xlu0 %9339 }
0x1ca6   : > { %v9362_v29 = vmul.f32 0.03125, %v9340_v31  ;;  %v9379_v40 = vmul.f32 %v16947_v21, %v16947_v21 }
0x1ca7   : > { %v9343_v38 = vpop.xlane.xlu1 %9342 }
0x1ca8   : > { %v12851_v5 = vpop.eup %12850  ;;  %v9394_v57 = vsub.f32 %v9362_v29, %v9378_v14  ;;  %v9363_v59 = vmul.f32 0.03125, %v9343_v38 }
0x1ca9   : > { %v12853_v37 = vpop.eup %12852  ;;  %v9346_v8 = vpop.xlane.xlu0 %9345  ;;  %v9457_v34 = vmul.f32 %v12851_v5, %v9409_v35 }
0x1caa   : > { %v12855_v20 = vpop.eup %12854  ;;  %v9426_v12 = vadd.f32 1e-05, %v9394_v57  ;;  %v9395_v62 = vsub.f32 %v9363_v59, %v9379_v40  ;;  %v9364_v26 = vmul.f32 0.03125, %v9346_v8  ;;  %v9456_v7 = vmul.f32 %v12853_v37, %v9408_v6  ;;  %v17550_v37 = vld [vmem:[#allocation44_spill] sm:$0xff] }
0x1cab   : > { %v9349_v4 = vpop.xlane.xlu1 %9348  ;;  %v9454_v13 = vmul.f32 %v12855_v20, %v9406_v41  ;;  %v9477_v56 = vmul.f32 %v16864_v42, %v9457_v34  ;;  %v5338_v6 = vsel %vm633_vm0, %v17550_v37, 0  ;;  %v12872_v20 = vld [vmem:[%s15032_s19 + $0x4] sm:$0xf] }
0x1cac   : > { %v12857_v33 = vpop.eup %12856  ;;  %12858 = vrsqrt.f32 %v9426_v12  ;;  %v9427_v15 = vadd.f32 1e-05, %v9395_v62  ;;  %v9396_v30 = vsub.f32 %v9364_v26, %v9380_v28  ;;  %v9365_v11 = vmul.f32 0.03125, %v9349_v4  ;;  %v9768_v28 = vpop.f32.mrb[44].mxu1  ;;  %v12873_v26 = vld [vmem:[%s12961_s17] sm:$0xff] }
0x1cad   : > { %v9455_v49 = vmul.f32 %v12857_v33, %v9407_v24  ;;  %v9474_v44 = vmul.f32 %v16864_v42, %v9454_v13  ;;  %v9476_v50 = vmul.f32 %v16864_v42, %v9456_v7  ;;  %v9497_v16 = vadd.f32 %v16873_v43, %v9477_v56  ;;  %v12026_v12 = vpop.f32.mrb[45].mxu1  ;;  %9814 = vst.msk [vmem:[%s17024_s27] sm:$0xff] %vm2252_vm2, %v9768_v28  ;;  %v12874_v13 = vld [vmem:[%s12961_s17 + $0x8] sm:$0xff] }
0x1cae   : > { %12860 = vrsqrt.f32 %v9427_v15  ;;  %v9428_v32 = vadd.f32 1e-05, %v9396_v30  ;;  %v9397_v46 = vsub.f32 %v9365_v11, %v9381_v36  ;;  %v9771_v62 = vpop.f32.mrb[46].mxu1  ;;  %v12875_v15 = vld [vmem:[%s12961_s17 + $0x10] sm:$0xff]  ;;  %v12878_v56 = vld [vmem:[%s12961_s17 + $0x28] sm:$0xff] }
0x1caf   : > { %v9475_v61 = vmul.f32 %v16864_v42, %v9455_v49  ;;  %v9527_v58 = vpop.trf.xlu0  ;;  %v9494_v48 = vadd.f32 %v16873_v43, %v9474_v44  ;;  %v9496_v54 = vadd.f32 %v16873_v43, %v9476_v50  ;;  %v12027_v4 = vpop.f32.mrb[47].mxu1  ;;  %v12876_v49 = vld [vmem:[%s12961_s17 + $0x18] sm:$0xff] }
0x1cb0   : > { %12862 = vrsqrt.f32 %v9428_v32  ;;  %v9429_v60 = vadd.f32 1e-05, %v9397_v46  ;;  %10518 = vmatmul.mubr.msk.bf16.vlgmr.msra.gmra.mrb[68].mxu0 %vm2252_vm2, %v9527_v58  ;;  %v12877_v32 = vld [vmem:[%s12961_s17 + $0x20] sm:$0xff] }
0x1cb1   : > { %v9495_v53 = vadd.f32 %v16873_v43, %v9475_v61  ;;  %9673 = vmatpush1.bf16.msra.mxu0 %v16886_v51  ;;  %9623 = vmatprep.mubr.bf16.mxu0 %v12891_v17  ;;  %v9411_v51 = vsub.f32 %v16826_v39, %v16947_v21  ;;  %v9507_v31 = vpack.c.bf16 %v9497_v16, %v9496_v54  ;;  %v10521_v54 = vld [vmem:[%s12961_s17 + $0x48] sm:$0xff] }
0x1cb2   : > { %12864 = vrsqrt.f32 %v9429_v60  ;;  %9674 = vmatprep.subr.bf16.mxu0 %v16896_v23  ;;  %v9413_v39 = vsub.f32 %v16816_v2, %v16953_v47 }
0x1cb3   : > { %v9506_v9 = vpack.c.bf16 %v9495_v53, %v9494_v48  ;;  %v9528_v18 = vpop.trf.xlu0  ;;  %v12879_v48 = vld [vmem:[%s12961_s17 + $0x30] sm:$0xff] }
0x1cb5   : > { %9650 = vxpose.xlu1.c.b16.start [1/4] (short) (narrow) %v9506_v9, 32  ;;  %9675 = vmatpush1.bf16.msra.mxu0 %v16904_v22  ;;  %v12880_v9 = vld [vmem:[%s12961_s17 + $0x38] sm:$0xff] }
0x1cb6   : > { %v12859_v55 = vpop.eup %12858  ;;  %9676 = vmatprep.subr.bf16.mxu0 %v16913_v63 }
0x1cb7   : > { %v9458_v23 = vmul.f32 %v12859_v55, %v9410_v52  ;;  %v10520_v52 = vld [vmem:[%s12961_s17 + $0x40] sm:$0xff]  ;;  %v10522_v55 = vld [vmem:[%s12961_s17 + $0x50] sm:$0xff] }
0x1cb8   : > { %v12861_v14 = vpop.eup %12860  ;;  %10519 = vmatmul.mubr.msk.bf16.gmra.mrb[72].mxu0 %vm2252_vm2, %v9528_v18 }
0x1cb9   : > { %9651 = vxpose.xlu1.c.b16.cont [2/4] (short) (narrow) %v9507_v31, 32  ;;  %v9459_v25 = vmul.f32 %v12861_v14, %v9411_v51  ;;  %v9478_v29 = vmul.f32 %v16864_v42, %v9458_v23  ;;  %9677 = vmatpush1.bf16.msra.mxu0 %v16921_v0  ;;  %v10523_v23 = vld [vmem:[%s12961_s17 + $0x58] sm:$0xff] }
0x1cba   : > { %v12863_v22 = vpop.eup %12862  ;;  %9678 = vmatprep.subr.bf16.mxu0 %v16929_v45  ;;  %9704 = vmatprep.mubr.bf16.mxu0 %v12891_v17 }
0x1cbb   : > { %v9479_v63 = vmul.f32 %v16864_v42, %v9459_v25  ;;  %v9460_v21 = vmul.f32 %v12863_v22, %v9412_v3  ;;  %v9498_v10 = vadd.f32 %v16873_v43, %v9478_v29 }
0x1cbc   : > { %v12865_v38 = vpop.eup %12864 }
0x1cbd   : > { %v9499_v27 = vadd.f32 %v16873_v43, %v9479_v63  ;;  %v9461_v5 = vmul.f32 %v12865_v38, %v9413_v39  ;;  %v9480_v40 = vmul.f32 %v16864_v42, %v9460_v21  ;;  %9679 = vmatpush1.bf16.msra.mxu0 %v16936_v1  ;;  %v17551_v1 = vld [vmem:[#allocation57_spill] sm:$0xff]  ;;  %v10524_v39 = vld [vmem:[%s12961_s17 + $0x60] sm:$0xff]  ;;  %v10525_v63 = vld [vmem:[%s12961_s17 + $0x68] sm:$0xff] }
0x1cbe   : > { %12028 = vmatprep.subr.bf16.mxu0 %v17537_v19  ;;  %v5341_v35 = vsel %vm633_vm0, %v17551_v1, 0  ;;  %v10526_v38 = vld [vmem:[%s12961_s17 + $0x70] sm:$0xff] }
0x1cbf   : > { %v9508_v0 = vpack.c.bf16 %v9499_v27, %v9498_v10  ;;  %v9481_v45 = vmul.f32 %v16864_v42, %v9461_v5  ;;  %v9500_v2 = vadd.f32 %v16873_v43, %v9480_v40  ;;  %v10527_v5 = vld [vmem:[%s12961_s17 + $0x78] sm:$0xff] }
0x1cc1   : > { %9652 = vxpose.xlu1.c.b16.cont [3/4] (short) (narrow) %v9508_v0, 32  ;;  %v9501_v47 = vadd.f32 %v16873_v43, %v9481_v45  ;;  %v17552_v43 = vld [vmem:[#allocation58_spill] sm:$0xff] }
0x1cc2   : > { %v5344_v41 = vsel %vm633_vm0, %v17552_v43, 0 }
0x1cc3   : > { %v9509_v57 = vpack.c.bf16 %v9501_v47, %v9500_v2 }
0x1cc5   : > { %9653 = vxpose.xlu1.c.b16.end [4/4] (short) (narrow) %v9509_v57, 32 }
0x1d1f   : > { %v9658_v59 = vpop.trf.xlu1 }
0x1d20   : > { %10528 = vmatmul.mubr.msk.bf16.vlgmr.msra.gmra.mrb[76].mxu0 %vm2252_vm2, %v9658_v59 }
0x1d21   : > { %12029 = vmatpush3.bf16.xpose.msra.mxu0 %v5338_v6  ;;  %9714 = vmatprep.mubr.bf16.mxu0 %v12891_v17  ;;  %v17553_v17 = vld [vmem:[#allocation20_spill] sm:$0xff] }
0x1d22   : > { %12030 = vmatprep.subr.bf16.mxu0 %v17537_v19  ;;  %v5347_v8 = vsel %vm633_vm0, %v17553_v17, 0 }
0x1d23   : > { %v9659_v42 = vpop.trf.xlu1 }
0x1d28   : > { %10529 = vmatmul.mubr.msk.bf16.gmra.mrb[80].mxu0 %vm2252_vm2, %v9659_v42 }
0x1d29   : > { %12031 = vmatpush3.bf16.xpose.msra.mxu0 %v5341_v35  ;;  %12036 = vmatprep.mubr.msk.bf16.mxu0 %vm12890_vm4, %v17537_v19 }
0x1d2a   : > { %12032 = vmatprep.subr.bf16.mxu0 %v17537_v19 }
0x1d31   : > { %12033 = vmatpush3.bf16.xpose.msra.mxu0 %v5344_v41 }
0x1d32   : > { %12034 = vmatprep.subr.bf16.mxu0 %v17537_v19 }
0x1d39   : > { %12035 = vmatpush3.bf16.xpose.msra.mxu0 %v5347_v8 }
0x1d40   : > { %12037 = vmatmul.mubr.msk.bf16.vlgmr.msra.gmra.mrb[84].mxu0 %vm633_vm0, %v12872_v20 }
0x1d83   : > { %v9615_v19 = vpop.f32.mrb[68].mxu0 }
0x1d84   : > { %v9616_v24 = vadd.f32 %v12873_v26, %v9615_v19  ;;  %v9617_v36 = vpop.f32.mrb[69].mxu0 }
0x1d85   : > { %v9618_v34 = vadd.f32 %v12874_v13, %v9617_v36  ;;  %v9619_v33 = vpop.f32.mrb[70].mxu0 }
0x1d86   : > { %9634 = vst [vmem:[%s17031_s10] sm:$0xff] %v9616_v24  ;;  %v9620_v30 = vadd.f32 %v12875_v15, %v9619_v33  ;;  %v9621_v11 = vpop.f32.mrb[71].mxu0 }
0x1d87   : > { %9635 = vst [vmem:[%s17031_s10 + $0x8] sm:$0xff] %v9618_v34  ;;  %v9622_v44 = vadd.f32 %v12876_v49, %v9621_v11 }
0x1d88   : > { %9636 = vst [vmem:[%s17031_s10 + $0x10] sm:$0xff] %v9620_v30 }
0x1d89   : > { %9637 = vst [vmem:[%s17031_s10 + $0x18] sm:$0xff] %v9622_v44 }
0x1d8b   : > { %v9625_v7 = vpop.f32.mrb[72].mxu0 }
0x1d8c   : > { %v9626_v46 = vadd.f32 %v12877_v32, %v9625_v7  ;;  %v9627_v61 = vpop.f32.mrb[73].mxu0 }
0x1d8d   : > { %v9628_v58 = vadd.f32 %v12878_v56, %v9627_v61  ;;  %v9629_v60 = vpop.f32.mrb[74].mxu0 }
0x1d8e   : > { %9638 = vst [vmem:[%s17031_s10 + $0x20] sm:$0xff] %v9626_v46  ;;  %v9630_v53 = vadd.f32 %v12879_v48, %v9629_v60  ;;  %v9631_v50 = vpop.f32.mrb[75].mxu0 }
0x1d8f   : > { %9639 = vst [vmem:[%s17031_s10 + $0x28] sm:$0xff] %v9628_v58  ;;  %v9632_v16 = vadd.f32 %v12880_v9, %v9631_v50 }
0x1d90   : > { %9640 = vst [vmem:[%s17031_s10 + $0x30] sm:$0xff] %v9630_v53 }
0x1d91   : > { %9641 = vst [vmem:[%s17031_s10 + $0x38] sm:$0xff] %v9632_v16 }
0x1df3   : > { %v9706_v18 = vpop.f32.mrb[76].mxu0 }
0x1df4   : > { %v9707_v51 = vadd.f32 %v10520_v52, %v9706_v18  ;;  %v9708_v31 = vpop.f32.mrb[77].mxu0 }
0x1df5   : > { %v9709_v14 = vadd.f32 %v10521_v54, %v9708_v31  ;;  %v9710_v3 = vpop.f32.mrb[78].mxu0 }
0x1df6   : > { %10530 = vst [vmem:[%s17031_s10 + $0x40] sm:$0xff] %v9707_v51  ;;  %v9711_v25 = vadd.f32 %v10522_v55, %v9710_v3  ;;  %v9712_v29 = vpop.f32.mrb[79].mxu0 }
0x1df7   : > { %10531 = vst [vmem:[%s17031_s10 + $0x48] sm:$0xff] %v9709_v14  ;;  %v9713_v22 = vadd.f32 %v10523_v23, %v9712_v29 }
0x1df8   : > { %10532 = vst [vmem:[%s17031_s10 + $0x50] sm:$0xff] %v9711_v25 }
0x1df9   : > { %10533 = vst [vmem:[%s17031_s10 + $0x58] sm:$0xff] %v9713_v22 }
0x1dfb   : > { %v9716_v21 = vpop.f32.mrb[80].mxu0 }
0x1dfc   : > { %v9717_v10 = vadd.f32 %v10524_v39, %v9716_v21  ;;  %v9718_v27 = vpop.f32.mrb[81].mxu0 }
0x1dfd   : > { %v9719_v40 = vadd.f32 %v10525_v63, %v9718_v27  ;;  %v9720_v0 = vpop.f32.mrb[82].mxu0 }
0x1dfe   : > { %10534 = vst [vmem:[%s17031_s10 + $0x60] sm:$0xff] %v9717_v10  ;;  %v9721_v45 = vadd.f32 %v10526_v38, %v9720_v0  ;;  %v9722_v2 = vpop.f32.mrb[83].mxu0 }
0x1dff   : > { %10535 = vst [vmem:[%s17031_s10 + $0x68] sm:$0xff] %v9719_v40  ;;  %v9723_v47 = vadd.f32 %v10527_v5, %v9722_v2 }
0x1e00   : > { %10536 = vst [vmem:[%s17031_s10 + $0x70] sm:$0xff] %v9721_v45 }
0x1e01   : > { %10537 = vst [vmem:[%s17031_s10 + $0x78] sm:$0xff] %v9723_v47 }
0x1e13   : > { %v9808_v57 = vpop.f32.mrb[84].mxu0 }
0x1e14   : > { %9815 = vst.msk [vmem:[%s17024_s27 + $0x8] sm:$0xff] %vm2252_vm2, %v9808_v57  ;;  %v12038_v59 = vpop.f32.mrb[85].mxu0 }
0x1e15   : > { %v9811_v37 = vpop.f32.mrb[86].mxu0 }
0x1e16   : > { %v12039_v6 = vpop.f32.mrb[87].mxu0 }
0x1e17 PF: > { %s20_s30 = sadd.s32 1, %s12887_s30  }
0x1e18   : > { %p17_p4 = scmp.ge.s32.totalorder %s20_s30, 4  }
0x1e1a   :  { %19 = sbr.rel (!%p17_p4) target bundleno = 1 (0x1), region = 139 }

</bundles_post_ra>
